<compile_context>
chip_gen: v5e
topology: v5e:2x2
jax: 0.10.0
libtpu: 0.0.40
codegen_flags: <defaults>
</compile_context>

<pallas_src>
import functools
import math

import jax
import jax.numpy as jnp
from jax.experimental import pallas as pl
from jax.experimental.pallas import tpu as pltpu


_MAX_DOUT_TILE = 2048   # W3 columns per grid step (multiple of 128)


def _round_up(x, m):
    return ((x + m - 1) // m) * m


def _default_tile_b(batch):
    # v5-class chips have a 128x128 MXU -> cap 128; v6e/v7x are 256-wide -> 256.
    try:
        kind = jax.devices()[0].device_kind.lower()
    except Exception:  # pragma: no cover - defensive only
        kind = ""
    cap = 128 if "v5" in kind else 256
    return min(cap, _round_up(batch, 16))


def _generator_mlp_kernel(z_ref, m_ref, w1z_ref, w1m_ref, b1_ref,
                          w2_ref, b2_ref, w3_ref, b3_ref, out_ref, h2_ref):
    """Fused 3-layer MLP.

    Grid: (batch tiles, d_out tiles).  Layers 1-2 run once per batch tile
    (j == 0) into the h2 VMEM scratch; each j step then does one
    (tile_b, 1024) x (1024, tile_dout) matmul + bias + tanh.  All matmuls take
    bf16 operands and accumulate in f32 on the MXU.  Layer-1 is computed as
    z @ W1_z + mask @ W1_m  ==  concat(z, mask) @ W1.
    """
    @pl.when(pl.program_id(1) == 0)
    def _():
        h1 = jnp.dot(z_ref[...], w1z_ref[...],
                     preferred_element_type=jnp.float32)
        h1 = h1 + jnp.dot(m_ref[...], w1m_ref[...],
                          preferred_element_type=jnp.float32)
        h1 = jnp.maximum(h1 + b1_ref[...], 0.0).astype(jnp.bfloat16)   # (tb,512)
        h2 = jnp.dot(h1, w2_ref[...], preferred_element_type=jnp.float32)
        h2_ref[...] = jnp.maximum(h2 + b2_ref[...], 0.0).astype(jnp.bfloat16)

    h3 = jnp.dot(h2_ref[...], w3_ref[...], preferred_element_type=jnp.float32)
    out_ref[...] = jnp.tanh(h3 + b3_ref[...]).astype(out_ref.dtype)


def prepare_generator_params(params, latent_dim):
    """One-time weight preparation (hoisted out of the per-call forward path).

    * W1 split at row `latent_dim` into W1_z / W1_m  (== concat(z, mask) @ W1).
    * Weights cast to bf16 (MXU operands); biases kept f32, shaped (1, d).
    * W3 / b3 columns zero-padded so d_out is a multiple of 128 (lane dense)
      and of the d_out tile used by the kernel grid.
    """
    w1 = jnp.asarray(params["w1"], jnp.float32)
    w2 = jnp.asarray(params["w2"], jnp.float32)
    w3 = jnp.asarray(params["w3"], jnp.float32)
    b1 = jnp.asarray(params["b1"], jnp.float32).reshape(1, -1)
    b2 = jnp.asarray(params["b2"], jnp.float32).reshape(1, -1)
    b3 = jnp.asarray(params["b3"], jnp.float32).reshape(1, -1)

    d_out = w3.shape[1]
    tile_dout = min(_round_up(d_out, 128), _MAX_DOUT_TILE)
    d_out_pad = _round_up(d_out, tile_dout)
    if d_out_pad != d_out:
        w3 = jnp.pad(w3, ((0, 0), (0, d_out_pad - d_out)))
        b3 = jnp.pad(b3, ((0, 0), (0, d_out_pad - d_out)))

    return dict(
        w1z=w1[:latent_dim].astype(jnp.bfloat16),   # (latent, 512)
        w1m=w1[latent_dim:].astype(jnp.bfloat16),   # (Cm*H*W, 512)
        w2=w2.astype(jnp.bfloat16),                 # (512, 1024)
        w3=w3.astype(jnp.bfloat16),                 # (1024, d_out_pad)
        b1=b1, b2=b2, b3=b3,                        # f32 biases
    )


@functools.partial(jax.jit,
                   static_argnames=("output_shape", "tile_b", "out_dtype"))
def generator_forward(z, mask, prepared, *, output_shape, tile_b=None,
                      out_dtype=jnp.float32):
    """JAX wrapper mirroring Generator.forward.

    z:    (B, latent_dim)           float32
    mask: (B, mask_channels, H, W)  float32 (NCHW, as in PyTorch)
    prepared: output of prepare_generator_params (bf16 weights, split W1)
    returns (B, C, H, W) float32 where output_shape = (C, H, W)
    """
    w1z, w1m, w2, w3 = (prepared[k] for k in ("w1z", "w1m", "w2", "w3"))
    b1, b2, b3 = (prepared[k] for k in ("b1", "b2", "b3"))

    batch, latent_dim = z.shape
    d_mask = w1m.shape[0]
    d_h1 = w1z.shape[1]
    d_h2 = w2.shape[1]
    d_out_pad = w3.shape[1]
    d_out = math.prod(output_shape)
    tile_dout = min(d_out_pad, _MAX_DOUT_TILE)
    assert d_out_pad % tile_dout == 0

    # Per-call activation prep (tiny): bf16 cast + batch pad.
    z_bf = z.astype(jnp.bfloat16)
    m_bf = mask.reshape(batch, -1).astype(jnp.bfloat16)
    assert m_bf.shape[1] == d_mask, (m_bf.shape, d_mask)

    if tile_b is None:
        tile_b = _default_tile_b(batch)
    b_pad = _round_up(batch, tile_b)
    if b_pad != batch:
        pad = b_pad - batch
        z_bf = jnp.pad(z_bf, ((0, pad), (0, 0)))
        m_bf = jnp.pad(m_bf, ((0, pad), (0, 0)))

    n_btiles = b_pad // tile_b
    n_jtiles = d_out_pad // tile_dout
    grid = (n_btiles, n_jtiles)

    # Only split the batch axis across megacore TCs when there is enough work
    # to amortize the duplicated resident-weight HBM fetch per core.
    batch_sem = "parallel" if n_btiles >= 4 else "arbitrary"

    # Per-batch-tile activations (constant along j -> no re-DMA inside j loop).
    rows = lambda shape: pl.BlockSpec(shape, lambda i, j: (i, 0))
    # VMEM-resident weights/biases: constant index_map + single buffer.
    resident = lambda shape: pl.BlockSpec(shape, lambda i, j: (0, 0),
                                          pipeline_mode=pl.Buffered(1))
    # d_out-tiled operands (default double-buffering for pipelining).
    cols = lambda shape: pl.BlockSpec(shape, lambda i, j: (0, j))

    # VMEM footprint (buffer counts in parentheses):
    #   z/m tiles (x2), residents w1z/w1m/b1/w2/b2 (x1), w3/b3 tiles (x2),
    #   out tile (x2), h2 scratch (x1).  At tile_b<=256, tile_dout<=2048 this is
    #   ~15 MiB worst case -> inside the 32 MiB default scoped limit everywhere.
    flops = 2 * b_pad * (latent_dim * d_h1 + d_mask * d_h1
                         + d_h1 * d_h2 + d_h2 * d_out_pad)
    bytes_accessed = (
        z_bf.size * 2 + m_bf.size * 2
        + (w1z.size + w1m.size + w2.size + w3.size) * 2
        + (b1.size + b2.size + b3.size) * 4
        + b_pad * d_out_pad * jnp.dtype(out_dtype).itemsize)
    cost = pl.CostEstimate(flops=flops,
                           transcendentals=b_pad * d_out_pad,
                           bytes_accessed=bytes_accessed)

    out_flat = pl.pallas_call(
        _generator_mlp_kernel,
        out_shape=jax.ShapeDtypeStruct((b_pad, d_out_pad), out_dtype),
        grid=grid,
        in_specs=[
            rows((tile_b, latent_dim)),     # z tile
            rows((tile_b, d_mask)),         # mask tile
            resident((latent_dim, d_h1)),   # W1_z
            resident((d_mask, d_h1)),       # W1_m
            resident((1, d_h1)),            # b1
            resident((d_h1, d_h2)),         # W2
            resident((1, d_h2)),            # b2
            cols((d_h2, tile_dout)),        # W3 (tiled along d_out)
            cols((1, tile_dout)),           # b3
        ],
        out_specs=pl.BlockSpec((tile_b, tile_dout), lambda i, j: (i, j)),
        scratch_shapes=[pltpu.VMEM((tile_b, d_h2), jnp.bfloat16)],
        compiler_params=pltpu.CompilerParams(
            dimension_semantics=(batch_sem, "arbitrary")),
        cost_estimate=cost,
    )(z_bf, m_bf, w1z, w1m, b1, w2, b2, w3, b3)

    out = out_flat[:batch, :d_out].reshape((batch,) + tuple(output_shape))
    return out.astype(jnp.float32)   # match the module's .float()


def init_generator_params(key, latent_dim, mask_channels, output_shape):
    """Deterministic synthetic parameter init (shapes follow Generator.__init__).

    Weights stored as (in_features, out_features) so no transpose is needed.
    """
    c, h, w = output_shape
    input_dim = latent_dim + mask_channels * h * w
    output_dim = c * h * w

    keys = jax.random.split(key, 6)

    def dense(kw, kb, fan_in, fan_out):
        scale = 1.0 / jnp.sqrt(jnp.float32(fan_in))
        w_ = jax.random.uniform(kw, (fan_in, fan_out), jnp.float32,
                                -scale, scale)
        b_ = jax.random.uniform(kb, (1, fan_out), jnp.float32, -scale, scale)
        return w_, b_

    w1, b1 = dense(keys[0], keys[1], input_dim, 512)
    w2, b2 = dense(keys[2], keys[3], 512, 1024)
    w3, b3 = dense(keys[4], keys[5], 1024, output_dim)
    return dict(w1=w1, b1=b1, w2=w2, b2=b2, w3=w3, b3=b3)


if __name__ == "__main__":
    # Small shapes consistent with the module's forward pass.
    batch = 2
    latent_dim = 32
    mask_channels = 1
    output_shape = (4, 16, 16)          # (C, H, W) -> output_dim = 1024

    key = jax.random.PRNGKey(0)
    k_z, k_m, k_p = jax.random.split(key, 3)

    z = jax.random.normal(k_z, (batch, latent_dim), dtype=jnp.float32)
    mask = (jax.random.uniform(
        k_m, (batch, mask_channels, output_shape[1], output_shape[2]),
        dtype=jnp.float32) > 0.5).astype(jnp.float32)

    params = init_generator_params(k_p, latent_dim, mask_channels, output_shape)
    prepared = prepare_generator_params(params, latent_dim)   # one-time prep

    out = generator_forward(z, mask, prepared, output_shape=output_shape)
    out = jax.block_until_ready(out)

    assert out.shape == (batch,) + output_shape, out.shape
    assert out.dtype == jnp.float32

    mask_flat = mask.reshape(batch, -1)

    # Reference 1: same bf16-weight / f32-accumulate scheme as the kernel.
    zb = z.astype(jnp.bfloat16)
    mb = mask_flat.astype(jnp.bfloat16)
    w1b = params["w1"].astype(jnp.bfloat16)
    w2b = params["w2"].astype(jnp.bfloat16)
    w3b = params["w3"].astype(jnp.bfloat16)
    h1 = (jnp.dot(zb, w1b[:latent_dim], preferred_element_type=jnp.float32)
          + jnp.dot(mb, w1b[latent_dim:], preferred_element_type=jnp.float32))
    h1 = jnp.maximum(h1 + params["b1"], 0.0).astype(jnp.bfloat16)
    h2 = jnp.dot(h1, w2b, preferred_element_type=jnp.float32)
    h2 = jnp.maximum(h2 + params["b2"], 0.0).astype(jnp.bfloat16)
    ref_bf16 = jnp.tanh(
        jnp.dot(h2, w3b, preferred_element_type=jnp.float32) + params["b3"]
    ).reshape((-1,) + output_shape)
    assert jnp.allclose(out, ref_bf16, atol=2e-3, rtol=2e-3), \
        float(jnp.max(jnp.abs(out - ref_bf16)))

    # Reference 2: full f32 math (loose tolerance for bf16 weight rounding).
    zc = jnp.concatenate([z, mask_flat], axis=1)
    ref = jnp.maximum(zc @ params["w1"] + params["b1"], 0.0)
    ref = jnp.maximum(ref @ params["w2"] + params["b2"], 0.0)
    ref = jnp.tanh(ref @ params["w3"] + params["b3"])
    ref = ref.reshape((-1,) + output_shape)
    assert jnp.allclose(out, ref, atol=5e-2, rtol=5e-2), \
        float(jnp.max(jnp.abs(out - ref)))

    print("KERNEL_OK")
</pallas_src>

<mosaic_0001>
module attributes {stable_mosaic.version = 11 : i64} {
  func.func @_generator_mlp_kernel(%arg0: i32, %arg1: i32, %arg2: memref<16x32xbf16, #tpu.memory_space<vmem>>, %arg3: memref<16x256xbf16, #tpu.memory_space<vmem>>, %arg4: memref<32x512xbf16, #tpu.memory_space<vmem>>, %arg5: memref<256x512xbf16, #tpu.memory_space<vmem>>, %arg6: memref<1x512xf32, #tpu.memory_space<vmem>>, %arg7: memref<512x1024xbf16, #tpu.memory_space<vmem>>, %arg8: memref<1x1024xf32, #tpu.memory_space<vmem>>, %arg9: memref<1024x1024xbf16, #tpu.memory_space<vmem>>, %arg10: memref<1x1024xf32, #tpu.memory_space<vmem>>, %arg11: memref<16x1024xf32, #tpu.memory_space<vmem>>, %arg12: memref<16x1024xbf16, #tpu.memory_space<vmem>>) attributes {dimension_semantics = [#tpu.dimension_semantics<arbitrary>, #tpu.dimension_semantics<arbitrary>], iteration_bounds = array<i64: 1, 1>, scalar_prefetch = 0 : i64, scratch_operands = 1 : i64, tpu.core_type = #tpu.core_type<tc>, window_params = [{transform_indices = @transform_0, window_bounds = array<i64: 16, 32>}, {transform_indices = @transform_1, window_bounds = array<i64: 16, 256>}, {pipeline_mode = #tpu.pipeline_mode<synchronous>, transform_indices = @transform_2, window_bounds = array<i64: 32, 512>}, {pipeline_mode = #tpu.pipeline_mode<synchronous>, transform_indices = @transform_3, window_bounds = array<i64: 256, 512>}, {pipeline_mode = #tpu.pipeline_mode<synchronous>, transform_indices = @transform_4, window_bounds = array<i64: 1, 512>}, {pipeline_mode = #tpu.pipeline_mode<synchronous>, transform_indices = @transform_5, window_bounds = array<i64: 512, 1024>}, {pipeline_mode = #tpu.pipeline_mode<synchronous>, transform_indices = @transform_6, window_bounds = array<i64: 1, 1024>}, {transform_indices = @transform_7, window_bounds = array<i64: 1024, 1024>}, {transform_indices = @transform_8, window_bounds = array<i64: 1, 1024>}, {transform_indices = @transform_9, window_bounds = array<i64: 16, 1024>}]} {
    %c0_i32 = arith.constant 0 : i32
    %0 = arith.cmpi eq, %arg1, %c0_i32 : i32
    %1 = arith.extui %0 : i1 to i32
    %c0_i32_0 = arith.constant 0 : i32
    %2 = arith.cmpi ne, %1, %c0_i32_0 : i32
    scf.if %2 {
      %c0_8 = arith.constant 0 : index
      %c0_9 = arith.constant 0 : index
      %11 = vector.load %arg2[%c0_8, %c0_9] : memref<16x32xbf16, #tpu.memory_space<vmem>>, vector<16x32xbf16>
      %c0_10 = arith.constant 0 : index
      %c0_11 = arith.constant 0 : index
      %12 = vector.load %arg4[%c0_10, %c0_11] : memref<32x512xbf16, #tpu.memory_space<vmem>>, vector<32x512xbf16>
      %cst_12 = arith.constant dense<0.000000e+00> : vector<16x512xf32>
      %13 = tpu.matmul %11, %12, %cst_12 {dimension_numbers = #tpu.dot_dimension_numbers<[1], [0], [0], [1], [0, 0, 1, 1], [], []>} : vector<16x32xbf16>, vector<32x512xbf16>, vector<16x512xf32> -> vector<16x512xf32>
      %c0_13 = arith.constant 0 : index
      %c0_14 = arith.constant 0 : index
      %14 = vector.load %arg3[%c0_13, %c0_14] : memref<16x256xbf16, #tpu.memory_space<vmem>>, vector<16x256xbf16>
      %c0_15 = arith.constant 0 : index
      %c0_16 = arith.constant 0 : index
      %15 = vector.load %arg5[%c0_15, %c0_16] : memref<256x512xbf16, #tpu.memory_space<vmem>>, vector<256x512xbf16>
      %cst_17 = arith.constant dense<0.000000e+00> : vector<16x512xf32>
      %16 = tpu.matmul %14, %15, %cst_17 {dimension_numbers = #tpu.dot_dimension_numbers<[1], [0], [0], [1], [0, 0, 1, 1], [], []>} : vector<16x256xbf16>, vector<256x512xbf16>, vector<16x512xf32> -> vector<16x512xf32>
      %17 = arith.addf %13, %16 : vector<16x512xf32>
      %c0_18 = arith.constant 0 : index
      %c0_19 = arith.constant 0 : index
      %18 = vector.load %arg6[%c0_18, %c0_19] : memref<1x512xf32, #tpu.memory_space<vmem>>, vector<1x512xf32>
      %19 = vector.broadcast %18 : vector<1x512xf32> to vector<16x512xf32>
      %20 = arith.addf %17, %19 : vector<16x512xf32>
      %cst_20 = arith.constant 0.000000e+00 : f32
      %21 = vector.broadcast %cst_20 : f32 to vector<16x512xf32>
      %22 = arith.maximumf %20, %21 : vector<16x512xf32>
      %23 = arith.truncf %22 : vector<16x512xf32> to vector<16x512xbf16>
      %c0_21 = arith.constant 0 : index
      %c0_22 = arith.constant 0 : index
      %24 = vector.load %arg7[%c0_21, %c0_22] : memref<512x1024xbf16, #tpu.memory_space<vmem>>, vector<512x1024xbf16>
      %cst_23 = arith.constant dense<0.000000e+00> : vector<16x1024xf32>
      %25 = tpu.matmul %23, %24, %cst_23 {dimension_numbers = #tpu.dot_dimension_numbers<[1], [0], [0], [1], [0, 0, 1, 1], [], []>} : vector<16x512xbf16>, vector<512x1024xbf16>, vector<16x1024xf32> -> vector<16x1024xf32>
      %c0_24 = arith.constant 0 : index
      %c0_25 = arith.constant 0 : index
      %26 = vector.load %arg8[%c0_24, %c0_25] : memref<1x1024xf32, #tpu.memory_space<vmem>>, vector<1x1024xf32>
      %27 = vector.broadcast %26 : vector<1x1024xf32> to vector<16x1024xf32>
      %28 = arith.addf %25, %27 : vector<16x1024xf32>
      %cst_26 = arith.constant 0.000000e+00 : f32
      %29 = vector.broadcast %cst_26 : f32 to vector<16x1024xf32>
      %30 = arith.maximumf %28, %29 : vector<16x1024xf32>
      %31 = arith.truncf %30 : vector<16x1024xf32> to vector<16x1024xbf16>
      %c0_27 = arith.constant 0 : index
      %c0_28 = arith.constant 0 : index
      %32 = vector.load %arg12[%c0_27, %c0_28] : memref<16x1024xbf16, #tpu.memory_space<vmem>>, vector<16x1024xbf16>
      tpu.vector_store %arg12[%c0_27, %c0_28], %31 {strides = array<i32>} : memref<16x1024xbf16, #tpu.memory_space<vmem>>, vector<16x1024xbf16>,
    } else {
    }
    %c0 = arith.constant 0 : index
    %c0_1 = arith.constant 0 : index
    %3 = vector.load %arg12[%c0, %c0_1] : memref<16x1024xbf16, #tpu.memory_space<vmem>>, vector<16x1024xbf16>
    %c0_2 = arith.constant 0 : index
    %c0_3 = arith.constant 0 : index
    %4 = vector.load %arg9[%c0_2, %c0_3] : memref<1024x1024xbf16, #tpu.memory_space<vmem>>, vector<1024x1024xbf16>
    %cst = arith.constant dense<0.000000e+00> : vector<16x1024xf32>
    %5 = tpu.matmul %3, %4, %cst {dimension_numbers = #tpu.dot_dimension_numbers<[1], [0], [0], [1], [0, 0, 1, 1], [], []>} : vector<16x1024xbf16>, vector<1024x1024xbf16>, vector<16x1024xf32> -> vector<16x1024xf32>
    %c0_4 = arith.constant 0 : index
    %c0_5 = arith.constant 0 : index
    %6 = vector.load %arg10[%c0_4, %c0_5] : memref<1x1024xf32, #tpu.memory_space<vmem>>, vector<1x1024xf32>
    %7 = vector.broadcast %6 : vector<1x1024xf32> to vector<16x1024xf32>
    %8 = arith.addf %5, %7 : vector<16x1024xf32>
    %9 = math.tanh %8 : vector<16x1024xf32>
    %c0_6 = arith.constant 0 : index
    %c0_7 = arith.constant 0 : index
    %10 = vector.load %arg11[%c0_6, %c0_7] : memref<16x1024xf32, #tpu.memory_space<vmem>>, vector<16x1024xf32>
    tpu.vector_store %arg11[%c0_6, %c0_7], %9 {strides = array<i32>} : memref<16x1024xf32, #tpu.memory_space<vmem>>, vector<16x1024xf32>,
    return
  }
  func.func @transform_0(%arg0: i32, %arg1: i32) -> (i32, i32) {
    %c0_i32 = arith.constant 0 : i32
    %c0_i32_0 = arith.constant 0 : i32
    return %arg0, %c0_i32 : i32, i32
  }
  func.func @transform_1(%arg0: i32, %arg1: i32) -> (i32, i32) {
    %c0_i32 = arith.constant 0 : i32
    %c0_i32_0 = arith.constant 0 : i32
    return %arg0, %c0_i32 : i32, i32
  }
  func.func @transform_2(%arg0: i32, %arg1: i32) -> (i32, i32) {
    %c0_i32 = arith.constant 0 : i32
    %c0_i32_0 = arith.constant 0 : i32
    %c0_i32_1 = arith.constant 0 : i32
    return %c0_i32, %c0_i32_0 : i32, i32
  }
  func.func @transform_3(%arg0: i32, %arg1: i32) -> (i32, i32) {
    %c0_i32 = arith.constant 0 : i32
    %c0_i32_0 = arith.constant 0 : i32
    %c0_i32_1 = arith.constant 0 : i32
    return %c0_i32, %c0_i32_0 : i32, i32
  }
  func.func @transform_4(%arg0: i32, %arg1: i32) -> (i32, i32) {
    %c0_i32 = arith.constant 0 : i32
    %c0_i32_0 = arith.constant 0 : i32
    %c0_i32_1 = arith.constant 0 : i32
    return %c0_i32, %c0_i32_0 : i32, i32
  }
  func.func @transform_5(%arg0: i32, %arg1: i32) -> (i32, i32) {
    %c0_i32 = arith.constant 0 : i32
    %c0_i32_0 = arith.constant 0 : i32
    %c0_i32_1 = arith.constant 0 : i32
    return %c0_i32, %c0_i32_0 : i32, i32
  }
  func.func @transform_6(%arg0: i32, %arg1: i32) -> (i32, i32) {
    %c0_i32 = arith.constant 0 : i32
    %c0_i32_0 = arith.constant 0 : i32
    %c0_i32_1 = arith.constant 0 : i32
    return %c0_i32, %c0_i32_0 : i32, i32
  }
  func.func @transform_7(%arg0: i32, %arg1: i32) -> (i32, i32) {
    %c0_i32 = arith.constant 0 : i32
    %c0_i32_0 = arith.constant 0 : i32
    return %c0_i32, %arg1 : i32, i32
  }
  func.func @transform_8(%arg0: i32, %arg1: i32) -> (i32, i32) {
    %c0_i32 = arith.constant 0 : i32
    %c0_i32_0 = arith.constant 0 : i32
    return %c0_i32, %arg1 : i32, i32
  }
  func.func @transform_9(%arg0: i32, %arg1: i32) -> (i32, i32) {
    %c0_i32 = arith.constant 0 : i32
    return %arg0, %arg1 : i32, i32
  }
}

</mosaic_0001>

<bundles_post_ra>
// kernel: generator_forward.1
= control target key start
LH: loop header
LB: loop body
LE: loop exit
PB: predicated region body
PF: predicated region fallthrough
CT: control target
= control target key end

     0   :  { %14 = vsyncpa [#allocation4], 0  ;;  %s11817_s0 = inlined_call_operand.vmem [shape: bf16[16,32], index: 0, kind: input, shape index: {}]   ;;  %s11818_s1 = inlined_call_operand.vmem [shape: bf16[16,256], index: 1, kind: input, shape index: {}]   ;;  %s11819_s2 = inlined_call_operand.hbm [shape: bf16[32,512], index: 2, kind: input, shape index: {}]   ;;  %s11820_s3 = inlined_call_operand.hbm [shape: bf16[256,512], index: 3, kind: input, shape index: {}]   ;;  %s11821_s4 = inlined_call_operand.hbm [shape: f32[1,512], index: 4, kind: input, shape index: {}]   ;;  %s11822_s5 = inlined_call_operand.hbm [shape: bf16[512,1024], index: 5, kind: input, shape index: {}]   ;;  %s11823_s6 = inlined_call_operand.hbm [shape: f32[1,1024], index: 6, kind: input, shape index: {}]   ;;  %s11824_s7 = inlined_call_operand.hbm [shape: bf16[1024,1024], index: 7, kind: input, shape index: {}]   ;;  %s11825_s8 = inlined_call_operand.hbm [shape: f32[1,1024], index: 8, kind: input, shape index: {}]   ;;  %s11826_s9 = inlined_call_operand.vmem [shape: f32[16,1024], index: 9, kind: output, shape index: {}]  }
   0x1   :  { %15 = vsyncpa [#allocation6], 0 }
   0x2   :  { %16 = vsyncpa [#allocation9], 0 }
   0x3   :  { %17 = vsyncpa [#allocation12], 0  ;;  %s39_s11 = sshll.u32 %s11820_s3, 4  ;;  %s11382_s12 = smov [#allocation5]   ;;  %s40_s11 = int_to_ptr.hbm [resolvable:$true] %s39_s11 }
   0x4   :  { %s41_s13 = sshll.u32 %s11382_s12, 4  ;;  %s63_s16 = sshll.u32 %s11822_s5, 4  ;;  %s42_s13 = int_to_ptr.vmem [resolvable:$true] %s41_s13  ;;  %s64_s16 = int_to_ptr.hbm [resolvable:$true] %s63_s16 }
   0x5   :  { %s11383_s17 = smov 256   ;;  %s11384_s18 = smov 16  }
   0x6   :  { %47 = dma.hbm_to_vmem [thread:$0]  %s40_s11, 8192, %s42_s13, [#allocation6], %s11383_s17, %s11383_s17, %s11384_s18  }
   0x7   :  { %s11385_s19 = smov [#allocation8]   ;;  %s11386_s21 = smov 512  }
   0x8   :  { %s65_s20 = sshll.u32 %s11385_s19, 4  ;;  %s11387_s22 = smov 32   ;;  %s66_s20 = int_to_ptr.vmem [resolvable:$true] %s65_s20 }
   0x9   :  { %71 = dma.hbm_to_vmem [thread:$0]  %s64_s16, 32768, %s66_s20, [#allocation9], %s11386_s21, %s11386_s21, %s11387_s22  }
   0xa   :  { %s87_s24 = sshll.u32 %s11824_s7, 4  ;;  %s11388_s25 = smov [#allocation11]   ;;  %s88_s24 = int_to_ptr.hbm [resolvable:$true] %s87_s24 }
   0xb   :  { %s89_s26 = sshll.u32 %s11388_s25, 4  ;;  %s26_s28 = sshll.u32 %s11819_s2, 4  ;;  %s90_s26 = int_to_ptr.vmem [resolvable:$true] %s89_s26  ;;  %s27_s28 = int_to_ptr.hbm [resolvable:$true] %s26_s28 }
   0xc   :  { %95 = dma.hbm_to_vmem [thread:$0]  %s88_s24, 65536, %s90_s26, [#allocation12], %s11386_s21, %s11386_s21, %s11387_s22  }
   0xd   :  { %s11389_s29 = smov [#allocation3]   ;;  %s53_s12 = sshll.u32 %s11821_s4, 4  ;;  %s54_s12 = int_to_ptr.hbm [resolvable:$true] %s53_s12 }
   0xe   :  { %s28_s30 = sshll.u32 %s11389_s29, 4  ;;  %s77_s14 = sshll.u32 %s11823_s6, 4  ;;  %s29_s30 = int_to_ptr.vmem [resolvable:$true] %s28_s30  ;;  %s78_s14 = int_to_ptr.hbm [resolvable:$true] %s77_s14 }
   0xf   :  { %34 = dma.hbm_to_vmem [thread:$0]  %s27_s28, 1024, %s29_s30, [#allocation4], %s11383_s17, %s11383_s17, %s11384_s18  }
  0x10   :  { %s11390_s15 = smov [#allocation7]   ;;  %s11391_s2 = smov [#allocation10]  }
  0x11   :  { %s55_s16 = sshll.u32 %s11390_s15, 4  ;;  %s79_s19 = sshll.u32 %s11391_s2, 4  ;;  %s56_s16 = int_to_ptr.vmem [resolvable:$true] %s55_s16  ;;  %s80_s19 = int_to_ptr.vmem [resolvable:$true] %s79_s19 }
  0x12   :  { %58 = dma.hbm_to_vmem [thread:$0]  %s54_s12, 64, %s56_s16, [#allocation6]  }
  0x13   :  { %s101_s22 = sshll.u32 %s11825_s8, 4  ;;  %s11392_s4 = smov [#allocation13]   ;;  %s102_s22 = int_to_ptr.hbm [resolvable:$true] %s101_s22 }
  0x14   :  { %82 = dma.hbm_to_vmem [thread:$0]  %s78_s14, 128, %s80_s19, [#allocation9]  }
  0x15   :  { %s103_s17 = sshll.u32 %s11392_s4, 4  ;;  %s104_s17 = int_to_ptr.vmem [resolvable:$true] %s103_s17 }
  0x16   :  { %106 = dma.hbm_to_vmem [thread:$0]  %s102_s22, 128, %s104_s17, [#allocation12]  }
  0x17   :  { %11374 = dma.done.wait [#allocation4], 1024  }
  0x18   :  { %11375 = vsyncadd [#allocation4], 4294966272 }
  0x19   :  { %11376 = dma.done.wait [#allocation6], 8256  }
  0x1a   :  { %11377 = vsyncadd [#allocation6], 4294959040 }
  0x1b   :  { %11378 = dma.done.wait [#allocation9], 32896  }
  0x1c   :  { %11379 = vsyncadd [#allocation9], 4294934400 }
  0x1d   :  { %11380 = dma.done.wait [#allocation12], 65664  }
  0x1e   :  { %11381 = vsyncadd [#allocation12], 4294901632  ;;  %v7023_v0 = vld [vmem:[#allocation5 + $0xe0] sm:$0xf]  ;;  %v10350_v1 = vld [vmem:[#allocation5 + $0xec] sm:$0xf0] }
  0x1f   :  { %v7151_v2 = vld [vmem:[#allocation5 + $0x1e0] sm:$0xf]  ;;  %v7024_v3 = vor.u32 %v10350_v1, %v7023_v0  ;;  %v10382_v4 = vld [vmem:[#allocation5 + $0x1ec] sm:$0xf0]  ;;  %v10348_v5 = vld [vmem:[#allocation5 + $0xe4] sm:$0xf] }
  0x20   :  { %v7025_v6 = vld [vmem:[#allocation5 + $0xf0] sm:$0xf0]  ;;  %v7152_v7 = vor.u32 %v10382_v4, %v7151_v2  ;;  %v10380_v9 = vld [vmem:[#allocation5 + $0x1e4] sm:$0xf]  ;;  %v7007_v11 = vld [vmem:[#allocation5 + $0xc0] sm:$0xf] }
  0x21   :  { %v7028_v8 = vor.u32 %v10348_v5, %v7025_v6  ;;  %v7153_v10 = vld [vmem:[#allocation5 + $0x1f0] sm:$0xf0]  ;;  %546 = vmatpush.bf16.msra.mxu0 %v7024_v3  ;;  %v10346_v13 = vld [vmem:[#allocation5 + $0xcc] sm:$0xf0]  ;;  %v7135_v14 = vld [vmem:[#allocation5 + $0x1c0] sm:$0xf] }
  0x22   :  { %v7156_v12 = vor.u32 %v10380_v9, %v7153_v10  ;;  %v10378_v15 = vld [vmem:[#allocation5 + $0x1cc] sm:$0xf0]  ;;  %560 = vmatpush.bf16.msra.mxu1 %v7152_v7  ;;  %v7008_v16 = vor.u32 %v10346_v13, %v7007_v11  ;;  %v10344_v18 = vld [vmem:[#allocation5 + $0xc4] sm:$0xf]  ;;  %v7009_v19 = vld [vmem:[#allocation5 + $0xd0] sm:$0xf0] }
  0x23   :  { %574 = vmatpush.bf16.msra.mxu2 %v7028_v8  ;;  %v7136_v17 = vor.u32 %v10378_v15, %v7135_v14  ;;  %v10376_v20 = vld [vmem:[#allocation5 + $0x1c4] sm:$0xf]  ;;  %v7012_v21 = vor.u32 %v10344_v18, %v7009_v19  ;;  %v7137_v22 = vld [vmem:[#allocation5 + $0x1d0] sm:$0xf0]  ;;  %v6991_v23 = vld [vmem:[#allocation5 + $0xa0] sm:$0xf] }
  0x24   :  { %588 = vmatpush.bf16.msra.mxu3 %v7156_v12  ;;  %v10342_v24 = vld [vmem:[#allocation5 + $0xac] sm:$0xf0]  ;;  %v7140_v25 = vor.u32 %v10376_v20, %v7137_v22  ;;  %v7119_v26 = vld [vmem:[#allocation5 + $0x1a0] sm:$0xf]  ;;  %v10340_v28 = vld [vmem:[#allocation5 + $0xa4] sm:$0xf] }
  0x25   :  { %v10374_v27 = vld [vmem:[#allocation5 + $0x1ac] sm:$0xf0]  ;;  %547 = vmatpush.bf16.msra.mxu0 %v7008_v16  ;;  %v6992_v29 = vor.u32 %v10342_v24, %v6991_v23  ;;  %v6993_v30 = vld [vmem:[#allocation5 + $0xb0] sm:$0xf0]  ;;  %v10372_v31 = vld [vmem:[#allocation5 + $0x1a4] sm:$0xf] }
  0x26   :  { %v7121_v32 = vld [vmem:[#allocation5 + $0x1b0] sm:$0xf0]  ;;  %561 = vmatpush.bf16.msra.mxu1 %v7136_v17  ;;  %v7120_v33 = vor.u32 %v10374_v27, %v7119_v26  ;;  %v6996_v34 = vor.u32 %v10340_v28, %v6993_v30  ;;  %v6975_v35 = vld [vmem:[#allocation5 + $0x80] sm:$0xf]  ;;  %v10338_v36 = vld [vmem:[#allocation5 + $0x8c] sm:$0xf0] }
  0x27   :  { %575 = vmatpush.bf16.msra.mxu2 %v7012_v21  ;;  %v7103_v37 = vld [vmem:[#allocation5 + $0x180] sm:$0xf]  ;;  %v7124_v38 = vor.u32 %v10372_v31, %v7121_v32  ;;  %v10370_v39 = vld [vmem:[#allocation5 + $0x18c] sm:$0xf0]  ;;  %v10336_v40 = vld [vmem:[#allocation5 + $0x84] sm:$0xf]  ;;  %v6976_v44 = vor.u32 %v10338_v36, %v6975_v35 }
  0x28   :  { %589 = vmatpush.bf16.msra.mxu3 %v7140_v25  ;;  %v6977_v41 = vld [vmem:[#allocation5 + $0x90] sm:$0xf0]  ;;  %v10368_v42 = vld [vmem:[#allocation5 + $0x184] sm:$0xf]  ;;  %v7104_v45 = vor.u32 %v10370_v39, %v7103_v37  ;;  %v6959_v47 = vld [vmem:[#allocation5 + $0x60] sm:$0xf] }
  0x29   :  { %v7105_v43 = vld [vmem:[#allocation5 + $0x190] sm:$0xf0]  ;;  %548 = vmatpush.bf16.msra.mxu0 %v6992_v29  ;;  %v6980_v46 = vor.u32 %v10336_v40, %v6977_v41  ;;  %v10334_v48 = vld [vmem:[#allocation5 + $0x6c] sm:$0xf0]  ;;  %v7087_v49 = vld [vmem:[#allocation5 + $0x160] sm:$0xf] }
  0x2a   :  { %562 = vmatpush.bf16.msra.mxu1 %v7120_v33  ;;  %v7108_v50 = vor.u32 %v10368_v42, %v7105_v43  ;;  %v10366_v51 = vld [vmem:[#allocation5 + $0x16c] sm:$0xf0]  ;;  %v10332_v52 = vld [vmem:[#allocation5 + $0x64] sm:$0xf]  ;;  %v6961_v53 = vld [vmem:[#allocation5 + $0x70] sm:$0xf0]  ;;  %v6960_v56 = vor.u32 %v10334_v48, %v6959_v47 }
  0x2b   :  { %576 = vmatpush.bf16.msra.mxu2 %v6996_v34  ;;  %v10364_v54 = vld [vmem:[#allocation5 + $0x164] sm:$0xf]  ;;  %v7089_v55 = vld [vmem:[#allocation5 + $0x170] sm:$0xf0]  ;;  %v7088_v57 = vor.u32 %v10366_v51, %v7087_v49  ;;  %v6964_v58 = vor.u32 %v10332_v52, %v6961_v53  ;;  %v6943_v59 = vld [vmem:[#allocation5 + $0x40] sm:$0xf] }
  0x2c   :  { %590 = vmatpush.bf16.msra.mxu3 %v7124_v38  ;;  %v10330_v60 = vld [vmem:[#allocation5 + $0x4c] sm:$0xf0]  ;;  %v7071_v61 = vld [vmem:[#allocation5 + $0x140] sm:$0xf]  ;;  %v7092_v62 = vor.u32 %v10364_v54, %v7089_v55  ;;  %v10328_v0 = vld [vmem:[#allocation5 + $0x44] sm:$0xf] }
  0x2d   :  { %549 = vmatpush.bf16.msra.mxu0 %v6976_v44  ;;  %v10362_v63 = vld [vmem:[#allocation5 + $0x14c] sm:$0xf0]  ;;  %v6945_v1 = vld [vmem:[#allocation5 + $0x50] sm:$0xf0]  ;;  %v10360_v2 = vld [vmem:[#allocation5 + $0x144] sm:$0xf]  ;;  %v6944_v4 = vor.u32 %v10330_v60, %v6943_v59 }
  0x2e   :  { %563 = vmatpush.bf16.msra.mxu1 %v7104_v45  ;;  %v7073_v3 = vld [vmem:[#allocation5 + $0x150] sm:$0xf0]  ;;  %v7072_v5 = vor.u32 %v10362_v63, %v7071_v61  ;;  %v6948_v6 = vor.u32 %v10328_v0, %v6945_v1  ;;  %v6927_v7 = vld [vmem:[#allocation5 + $0x20] sm:$0xf]  ;;  %v10326_v8 = vld [vmem:[#allocation5 + $0x2c] sm:$0xf0] }
  0x2f   :  { %577 = vmatpush.bf16.msra.mxu2 %v6980_v46  ;;  %v7055_v9 = vld [vmem:[#allocation5 + $0x120] sm:$0xf]  ;;  %v7076_v10 = vor.u32 %v10360_v2, %v7073_v3  ;;  %v10358_v11 = vld [vmem:[#allocation5 + $0x12c] sm:$0xf0]  ;;  %v10324_v12 = vld [vmem:[#allocation5 + $0x24] sm:$0xf]  ;;  %v6928_v16 = vor.u32 %v10326_v8, %v6927_v7 }
  0x30   :  { %591 = vmatpush.bf16.msra.mxu3 %v7108_v50  ;;  %v6929_v13 = vld [vmem:[#allocation5 + $0x30] sm:$0xf0]  ;;  %v10356_v14 = vld [vmem:[#allocation5 + $0x124] sm:$0xf]  ;;  %v6911_v17 = vld [vmem:[#allocation5] sm:$0xf]  ;;  %v7056_v20 = vor.u32 %v10358_v11, %v7055_v9 }
  0x31   :  { %550 = vmatpush.bf16.msra.mxu0 %v6960_v56  ;;  %v7057_v15 = vld [vmem:[#allocation5 + $0x130] sm:$0xf0]  ;;  %v10322_v18 = vld [vmem:[#allocation5 + $0xc] sm:$0xf0]  ;;  %v7039_v19 = vld [vmem:[#allocation5 + $0x100] sm:$0xf]  ;;  %v6932_v21 = vor.u32 %v10324_v12, %v6929_v13 }
  0x32   :  { %564 = vmatpush.bf16.msra.mxu1 %v7088_v57  ;;  %v10354_v22 = vld [vmem:[#allocation5 + $0x10c] sm:$0xf0]  ;;  %v10320_v23 = vld [vmem:[#allocation5 + $0x4] sm:$0xf]  ;;  %v6913_v24 = vld [vmem:[#allocation5 + $0x10] sm:$0xf0]  ;;  %v7060_v25 = vor.u32 %v10356_v14, %v7057_v15  ;;  %v6912_v32 = vor.u32 %v10322_v18, %v6911_v17 }
  0x33   :  { %578 = vmatpush.bf16.msra.mxu2 %v6964_v58  ;;  %v10352_v26 = vld [vmem:[#allocation5 + $0x104] sm:$0xf]  ;;  %v7041_v27 = vld [vmem:[#allocation5 + $0x110] sm:$0xf0]  ;;  %v7031_v28 = vld [vmem:[#allocation5 + $0xe8] sm:$0xf]  ;;  %v7040_v36 = vor.u32 %v10354_v22, %v7039_v19  ;;  %v6916_v37 = vor.u32 %v10320_v23, %v6913_v24 }
  0x34   :  { %592 = vmatpush.bf16.msra.mxu3 %v7092_v62  ;;  %v10351_v29 = vld [vmem:[#allocation5 + $0xf4] sm:$0xf0]  ;;  %v7159_v30 = vld [vmem:[#allocation5 + $0x1e8] sm:$0xf]  ;;  %v10349_v33 = vld [vmem:[#allocation5 + $0xec] sm:$0xf]  ;;  %v7044_v41 = vor.u32 %v10352_v26, %v7041_v27 }
  0x35   :  { %551 = vmatpush.bf16.msra.mxu0 %v6944_v4  ;;  %v10383_v31 = vld [vmem:[#allocation5 + $0x1f4] sm:$0xf0]  ;;  %v7033_v34 = vld [vmem:[#allocation5 + $0xf8] sm:$0xf0]  ;;  %v10381_v35 = vld [vmem:[#allocation5 + $0x1ec] sm:$0xf]  ;;  %v7032_v42 = vor.u32 %v10351_v29, %v7031_v28 }
  0x36   :  { %565 = vmatpush.bf16.msra.mxu1 %v7072_v5  ;;  %v7161_v38 = vld [vmem:[#allocation5 + $0x1f8] sm:$0xf0]  ;;  %v6903_v39 = vld [vmem:[%s11818_s1] sm:$0xf]  ;;  %v10319_v40 = vld [vmem:[%s11818_s1 + $0x4] sm:$0xf0]  ;;  %v7160_v45 = vor.u32 %v10383_v31, %v7159_v30  ;;  %v7036_v46 = vor.u32 %v10349_v33, %v7033_v34 }
  0x37   :  { %579 = vmatpush.bf16.msra.mxu2 %v6948_v6  ;;  %v10318_v43 = vld [vmem:[%s11818_s1 + $0x4] sm:$0xf]  ;;  %v6905_v44 = vld [vmem:[%s11818_s1 + $0x8] sm:$0xf0]  ;;  %v7015_v47 = vld [vmem:[#allocation5 + $0xc8] sm:$0xf]  ;;  %v7164_v50 = vor.u32 %v10381_v35, %v7161_v38  ;;  %v11476_v54 = vor.u32 %v10319_v40, %v6903_v39 }
  0x38   :  { %593 = vmatpush.bf16.msra.mxu3 %v7076_v10  ;;  %v10347_v48 = vld [vmem:[#allocation5 + $0xd4] sm:$0xf0]  ;;  %v7143_v49 = vld [vmem:[#allocation5 + $0x1c8] sm:$0xf]  ;;  %v10345_v52 = vld [vmem:[#allocation5 + $0xcc] sm:$0xf]  ;;  %v11478_v57 = vor.u32 %v10318_v43, %v6905_v44 }
  0x39   :  { %552 = vmatpush.bf16.msra.mxu0 %v6928_v16  ;;  %v10379_v51 = vld [vmem:[#allocation5 + $0x1d4] sm:$0xf0]  ;;  %v7017_v53 = vld [vmem:[#allocation5 + $0xd8] sm:$0xf0]  ;;  %v10377_v55 = vld [vmem:[#allocation5 + $0x1cc] sm:$0xf]  ;;  %v7016_v58 = vor.u32 %v10347_v48, %v7015_v47 }
  0x3a   :  { %566 = vmatpush.bf16.msra.mxu1 %v7056_v20  ;;  %v7145_v56 = vld [vmem:[#allocation5 + $0x1d8] sm:$0xf0]  ;;  %v7144_v59 = vor.u32 %v10379_v51, %v7143_v49  ;;  %v7020_v60 = vor.u32 %v10345_v52, %v7017_v53  ;;  %v6999_v61 = vld [vmem:[#allocation5 + $0xa8] sm:$0xf]  ;;  %v10343_v62 = vld [vmem:[#allocation5 + $0xb4] sm:$0xf0] }
  0x3b   :  { %580 = vmatpush.bf16.msra.mxu2 %v6932_v21  ;;  %v7127_v63 = vld [vmem:[#allocation5 + $0x1a8] sm:$0xf]  ;;  %v7148_v0 = vor.u32 %v10377_v55, %v7145_v56  ;;  %v10375_v1 = vld [vmem:[#allocation5 + $0x1b4] sm:$0xf0]  ;;  %v10341_v2 = vld [vmem:[#allocation5 + $0xac] sm:$0xf]  ;;  %v7000_v6 = vor.u32 %v10343_v62, %v6999_v61 }
  0x3c   :  { %594 = vmatpush.bf16.msra.mxu3 %v7060_v25  ;;  %v7001_v3 = vld [vmem:[#allocation5 + $0xb8] sm:$0xf0]  ;;  %v10373_v4 = vld [vmem:[#allocation5 + $0x1ac] sm:$0xf]  ;;  %v7128_v7 = vor.u32 %v10375_v1, %v7127_v63  ;;  %v6983_v9 = vld [vmem:[#allocation5 + $0x88] sm:$0xf] }
  0x3d   :  { %553 = vmatpush.bf16.msra.mxu0 %v6912_v32  ;;  %v7129_v5 = vld [vmem:[#allocation5 + $0x1b8] sm:$0xf0]  ;;  %v7004_v8 = vor.u32 %v10341_v2, %v7001_v3  ;;  %v10339_v10 = vld [vmem:[#allocation5 + $0x94] sm:$0xf0]  ;;  %v7111_v11 = vld [vmem:[#allocation5 + $0x188] sm:$0xf] }
  0x3e   :  { %567 = vmatpush.bf16.msra.mxu1 %v7040_v36  ;;  %v7132_v12 = vor.u32 %v10373_v4, %v7129_v5  ;;  %v10371_v13 = vld [vmem:[#allocation5 + $0x194] sm:$0xf0]  ;;  %v10337_v14 = vld [vmem:[#allocation5 + $0x8c] sm:$0xf]  ;;  %v6985_v15 = vld [vmem:[#allocation5 + $0x98] sm:$0xf0]  ;;  %v6984_v18 = vor.u32 %v10339_v10, %v6983_v9 }
  0x3f   :  { %581 = vmatpush.bf16.msra.mxu2 %v6916_v37  ;;  %v10369_v16 = vld [vmem:[#allocation5 + $0x18c] sm:$0xf]  ;;  %v7113_v17 = vld [vmem:[#allocation5 + $0x198] sm:$0xf0]  ;;  %v7112_v19 = vor.u32 %v10371_v13, %v7111_v11  ;;  %v6988_v20 = vor.u32 %v10337_v14, %v6985_v15  ;;  %v6967_v21 = vld [vmem:[#allocation5 + $0x68] sm:$0xf] }
  0x40   :  { %595 = vmatpush.bf16.msra.mxu3 %v7044_v41  ;;  %554 = vmatmul.bf16.vlgmr.msra.gmra.mxu0 %v11476_v54  ;;  %v10335_v22 = vld [vmem:[#allocation5 + $0x74] sm:$0xf0]  ;;  %v7095_v23 = vld [vmem:[#allocation5 + $0x168] sm:$0xf]  ;;  %v7116_v24 = vor.u32 %v10369_v16, %v7113_v17  ;;  %v10333_v26 = vld [vmem:[#allocation5 + $0x6c] sm:$0xf] }
  0x41   :  { %602 = vmatpush.bf16.msrb.mxu0 %v7032_v42  ;;  %568 = vmatmul.bf16.vlgmr.msra.gmra.mxu1 %v11478_v57  ;;  %v10367_v25 = vld [vmem:[#allocation5 + $0x174] sm:$0xf0]  ;;  %v6969_v27 = vld [vmem:[#allocation5 + $0x78] sm:$0xf0]  ;;  %v10365_v28 = vld [vmem:[#allocation5 + $0x16c] sm:$0xf]  ;;  %v6968_v30 = vor.u32 %v10335_v22, %v6967_v21 }
  0x42   :  { %616 = vmatpush.bf16.msrb.mxu1 %v7160_v45  ;;  %582 = vmatmul.bf16.vlgmr.msra.gmra.mxu2 %v11476_v54  ;;  %v7097_v29 = vld [vmem:[#allocation5 + $0x178] sm:$0xf0]  ;;  %v7096_v31 = vor.u32 %v10367_v25, %v7095_v23  ;;  %v6972_v32 = vor.u32 %v10333_v26, %v6969_v27  ;;  %v6951_v33 = vld [vmem:[#allocation5 + $0x48] sm:$0xf]  ;;  %v10331_v34 = vld [vmem:[#allocation5 + $0x54] sm:$0xf0] }
  0x43   :  { %630 = vmatpush.bf16.msrb.mxu2 %v7036_v46  ;;  %596 = vmatmul.bf16.vlgmr.msra.gmra.mxu3 %v11478_v57  ;;  %v7079_v35 = vld [vmem:[#allocation5 + $0x148] sm:$0xf]  ;;  %v7100_v36 = vor.u32 %v10365_v28, %v7097_v29  ;;  %v10363_v37 = vld [vmem:[#allocation5 + $0x154] sm:$0xf0]  ;;  %v10329_v38 = vld [vmem:[#allocation5 + $0x4c] sm:$0xf]  ;;  %v6952_v42 = vor.u32 %v10331_v34, %v6951_v33 }
  0x44   :  { %644 = vmatpush.bf16.msrb.mxu3 %v7164_v50  ;;  %v6953_v39 = vld [vmem:[#allocation5 + $0x58] sm:$0xf0]  ;;  %v10361_v40 = vld [vmem:[#allocation5 + $0x14c] sm:$0xf]  ;;  %v7080_v43 = vor.u32 %v10363_v37, %v7079_v35  ;;  %v6935_v45 = vld [vmem:[#allocation5 + $0x28] sm:$0xf] }
  0x45   :  { %603 = vmatpush.bf16.msrb.mxu0 %v7016_v58  ;;  %v7081_v41 = vld [vmem:[#allocation5 + $0x158] sm:$0xf0]  ;;  %v6956_v44 = vor.u32 %v10329_v38, %v6953_v39  ;;  %v10327_v46 = vld [vmem:[#allocation5 + $0x34] sm:$0xf0]  ;;  %v7063_v47 = vld [vmem:[#allocation5 + $0x128] sm:$0xf] }
  0x46   :  { %617 = vmatpush.bf16.msrb.mxu1 %v7144_v59  ;;  %v7084_v48 = vor.u32 %v10361_v40, %v7081_v41  ;;  %v10359_v49 = vld [vmem:[#allocation5 + $0x134] sm:$0xf0]  ;;  %v10325_v50 = vld [vmem:[#allocation5 + $0x2c] sm:$0xf]  ;;  %v6937_v51 = vld [vmem:[#allocation5 + $0x38] sm:$0xf0]  ;;  %v6936_v55 = vor.u32 %v10327_v46, %v6935_v45 }
  0x47   :  { %631 = vmatpush.bf16.msrb.mxu2 %v7020_v60  ;;  %v10357_v52 = vld [vmem:[#allocation5 + $0x12c] sm:$0xf]  ;;  %v7065_v53 = vld [vmem:[#allocation5 + $0x138] sm:$0xf0]  ;;  %v6919_v56 = vld [vmem:[#allocation5 + $0x8] sm:$0xf]  ;;  %v7064_v58 = vor.u32 %v10359_v49, %v7063_v47  ;;  %v6940_v59 = vor.u32 %v10325_v50, %v6937_v51 }
  0x48   :  { %645 = vmatpush.bf16.msrb.mxu3 %v7148_v0  ;;  %v10323_v60 = vld [vmem:[#allocation5 + $0x14] sm:$0xf0]  ;;  %v7047_v61 = vld [vmem:[#allocation5 + $0x108] sm:$0xf]  ;;  %v7068_v63 = vor.u32 %v10357_v52, %v7065_v53  ;;  %v10321_v0 = vld [vmem:[#allocation5 + $0xc] sm:$0xf] }
  0x49   :  { %604 = vmatpush.bf16.msrb.mxu0 %v7000_v6  ;;  %v10355_v62 = vld [vmem:[#allocation5 + $0x114] sm:$0xf0]  ;;  %v6921_v1 = vld [vmem:[#allocation5 + $0x18] sm:$0xf0]  ;;  %v10353_v2 = vld [vmem:[#allocation5 + $0x10c] sm:$0xf]  ;;  %v6920_v6 = vor.u32 %v10323_v60, %v6919_v56 }
  0x4a   :  { %618 = vmatpush.bf16.msrb.mxu1 %v7128_v7  ;;  %v7049_v3 = vld [vmem:[#allocation5 + $0x118] sm:$0xf0]  ;;  %v7187_v4 = vld [vmem:[#allocation3 + $0x20] sm:$0xf]  ;;  %v10316_v5 = vld [vmem:[#allocation3 + $0x2c] sm:$0xf0]  ;;  %v7048_v9 = vor.u32 %v10355_v62, %v7047_v61  ;;  %v6924_v10 = vor.u32 %v10321_v0, %v6921_v1 }
  0x4b   :  { %632 = vmatpush.bf16.msrb.mxu2 %v7004_v8  ;;  %v10314_v7 = vld [vmem:[#allocation3 + $0x24] sm:$0xf]  ;;  %v7189_v8 = vld [vmem:[#allocation3 + $0x30] sm:$0xf0]  ;;  %v7195_v11 = vld [vmem:[#allocation3 + $0x28] sm:$0xf]  ;;  %v7188_v13 = vor.u32 %v10316_v5, %v7187_v4 }
  0x4c   :  { %646 = vmatpush.bf16.msrb.mxu3 %v7132_v12  ;;  %v7052_v12 = vor.u32 %v10353_v2, %v7049_v3  ;;  %v10317_v14 = vld [vmem:[#allocation3 + $0x34] sm:$0xf0]  ;;  %v10315_v15 = vld [vmem:[#allocation3 + $0x2c] sm:$0xf]  ;;  %v7197_v16 = vld [vmem:[#allocation3 + $0x38] sm:$0xf0]  ;;  %v7192_v17 = vor.u32 %v10314_v7, %v7189_v8 }
  0x4d   :  { %605 = vmatpush.bf16.msrb.mxu0 %v6984_v18  ;;  %v7171_v18 = vld [vmem:[#allocation3] sm:$0xf]  ;;  %v7173_v21 = vld [vmem:[#allocation3 + $0x10] sm:$0xf0]  ;;  %v7431_v22 = vld [vmem:[#allocation8 + $0x1c0] sm:$0xf]  ;;  %v7200_v28 = vor.u32 %v10315_v15, %v7197_v16 }
  0x4e   :  { %619 = vmatpush.bf16.msrb.mxu1 %v7112_v19  ;;  %v10312_v19 = vld [vmem:[#allocation3 + $0xc] sm:$0xf0]  ;;  %v10444_v23 = vld [vmem:[#allocation8 + $0x1dc] sm:$0xf0]  ;;  %v7179_v25 = vld [vmem:[#allocation3 + $0x8] sm:$0xf] }
  0x4f   :  { %633 = vmatpush.bf16.msrb.mxu2 %v6988_v20  ;;  %v10310_v20 = vld [vmem:[#allocation3 + $0x4] sm:$0xf]  ;;  %v7172_v29 = vor.u32 %v10312_v19, %v7171_v18  ;;  %v7432_v34 = vor.u32 %v10444_v23, %v7431_v22  ;;  %vm703_vm0 = vcmask 261120  }
  0x50   :  { %647 = vmatpush.bf16.msrb.mxu3 %v7116_v24  ;;  %v7196_v24 = vor.u32 %v10317_v14, %v7195_v11  ;;  %v7687_v26 = vld [vmem:[#allocation8 + $0x3c0] sm:$0xf]  ;;  %v7176_v33 = vor.u32 %v10310_v20, %v7173_v21 }
  0x51   :  { %606 = vmatpush.bf16.msrb.mxu0 %v6968_v30  ;;  %v10508_v27 = vld [vmem:[#allocation8 + $0x3dc] sm:$0xf0]  ;;  %v10313_v30 = vld [vmem:[#allocation3 + $0x14] sm:$0xf0] }
  0x52   :  { %620 = vmatpush.bf16.msrb.mxu1 %v7096_v31  ;;  %v10311_v31 = vld [vmem:[#allocation3 + $0xc] sm:$0xf]  ;;  %v7399_v35 = vld [vmem:[#allocation8 + $0x180] sm:$0xf]  ;;  %v7688_v38 = vor.u32 %v10508_v27, %v7687_v26 }
  0x53   :  { %634 = vmatpush.bf16.msrb.mxu2 %v6972_v32  ;;  %v7181_v32 = vld [vmem:[#allocation3 + $0x18] sm:$0xf0]  ;;  %v10572_v37 = vld [vmem:[#allocation8 + $0x5dc] sm:$0xf0] }
  0x54   :  { %648 = vmatpush.bf16.msrb.mxu3 %v7100_v36  ;;  %v7943_v36 = vld [vmem:[#allocation8 + $0x5c0] sm:$0xf]  ;;  %v7184_v45 = vor.u32 %v10311_v31, %v7181_v32 }
  0x55   :  { %607 = vmatpush.bf16.msrb.mxu0 %v6952_v42  ;;  %v10436_v39 = vld [vmem:[#allocation8 + $0x19c] sm:$0xf0]  ;;  %v7180_v42 = vor.u32 %v10313_v30, %v7179_v25  ;;  %v7944_v46 = vor.u32 %v10572_v37, %v7943_v36 }
  0x56   :  { %621 = vmatpush.bf16.msrb.mxu1 %v7080_v43  ;;  %v8199_v40 = vld [vmem:[#allocation8 + $0x7c0] sm:$0xf]  ;;  %v7400_v47 = vor.u32 %v10436_v39, %v7399_v35 }
  0x57   :  { %635 = vmatpush.bf16.msrb.mxu2 %v6956_v44  ;;  %v10636_v41 = vld [vmem:[#allocation8 + $0x7dc] sm:$0xf0] }
  0x58   :  { %649 = vmatpush.bf16.msrb.mxu3 %v7084_v48  ;;  %v7655_v43 = vld [vmem:[#allocation8 + $0x380] sm:$0xf]  ;;  %v8200_v48 = vor.u32 %v10636_v41, %v8199_v40 }
  0x59   :  { %608 = vmatpush.bf16.msrb.mxu0 %v6936_v55  ;;  %v10500_v44 = vld [vmem:[#allocation8 + $0x39c] sm:$0xf0] }
  0x5a   :  { %622 = vmatpush.bf16.msrb.mxu1 %v7064_v58  ;;  %v7367_v49 = vld [vmem:[#allocation8 + $0x140] sm:$0xf] }
  0x5b   :  { %636 = vmatpush.bf16.msrb.mxu2 %v6940_v59  ;;  %v10428_v50 = vld [vmem:[#allocation8 + $0x15c] sm:$0xf0] }
  0x5c   :  { %650 = vmatpush.bf16.msrb.mxu3 %v7068_v63  ;;  %v7623_v51 = vld [vmem:[#allocation8 + $0x340] sm:$0xf]  ;;  %v7368_v52 = vor.u32 %v10428_v50, %v7367_v49  ;;  %v10440_v50 = vld [vmem:[#allocation8 + $0x1c4] sm:$0xf] }
  0x5d   :  { %609 = vmatpush.bf16.msrb.mxu0 %v6920_v6  ;;  %v10492_v53 = vld [vmem:[#allocation8 + $0x35c] sm:$0xf0] }
  0x5e   :  { %623 = vmatpush.bf16.msrb.mxu1 %v7048_v9  ;;  %v7911_v55 = vld [vmem:[#allocation8 + $0x580] sm:$0xf]  ;;  %v7624_v58 = vor.u32 %v10492_v53, %v7623_v51  ;;  %v7433_v51 = vld [vmem:[#allocation8 + $0x1e0] sm:$0xf0] }
  0x5f   :  { %637 = vmatpush.bf16.msrb.mxu2 %v6924_v10  ;;  %v10564_v56 = vld [vmem:[#allocation8 + $0x59c] sm:$0xf0]  ;;  %v7436_v53 = vor.u32 %v10440_v50, %v7433_v51  ;;  %v10544_v50 = vld [vmem:[#allocation8 + $0x504] sm:$0xf] }
  0x60   :  { %651 = vmatpush.bf16.msrb.mxu3 %v7052_v12  ;;  %610 = vmatmul.bf16.vlgmr.msrb.gmra.mxu0 %v11476_v54  ;;  %v7912_v59 = vor.u32 %v10564_v56, %v7911_v55  ;;  %v8167_v60 = vld [vmem:[#allocation8 + $0x780] sm:$0xf]  ;;  %v10504_v55 = vld [vmem:[#allocation8 + $0x3c4] sm:$0xf] }
  0x61   :  { %713 = vmatpush.bf16.msra.mxu0 %v7188_v13  ;;  %624 = vmatmul.bf16.vlgmr.msrb.gmra.mxu1 %v11478_v57  ;;  %v10628_v61 = vld [vmem:[#allocation8 + $0x79c] sm:$0xf0]  ;;  %v7689_v56 = vld [vmem:[#allocation8 + $0x3e0] sm:$0xf0] }
  0x62   :  { %727 = vmatpush.bf16.msra.mxu1 %v7192_v17  ;;  %638 = vmatmul.bf16.vlgmr.msrb.gmra.mxu2 %v11476_v54  ;;  %v7656_v54 = vor.u32 %v10500_v44, %v7655_v43  ;;  %v7335_v62 = vld [vmem:[#allocation8 + $0x100] sm:$0xf]  ;;  %v8168_v63 = vor.u32 %v10628_v61, %v8167_v60  ;;  %v7849_v51 = vld [vmem:[#allocation8 + $0x520] sm:$0xf0] }
  0x63   :  { %652 = vmatmul.bf16.vlgmr.msrb.gmra.mxu3 %v11478_v57  ;;  %741 = vmatpush.bf16.msra.mxu2 %v7196_v24  ;;  %v10309_v57 = vld [vmem:[%s11817_s0] sm:$0xff] }
  0x64   :  { %755 = vmatpush.bf16.msra.mxu3 %v7200_v28  ;;  %v10420_v0 = vld [vmem:[#allocation8 + $0x11c] sm:$0xf0] }
  0x65   :  { %714 = vmatpush.bf16.msra.mxu0 %v7172_v29  ;;  %v7591_v1 = vld [vmem:[#allocation8 + $0x300] sm:$0xf]  ;;  %v7336_v3 = vor.u32 %v10420_v0, %v7335_v62 }
  0x66   :  { %728 = vmatpush.bf16.msra.mxu1 %v7176_v33  ;;  %v10484_v2 = vld [vmem:[#allocation8 + $0x31c] sm:$0xf0] }
  0x67   :  { %742 = vmatpush.bf16.msra.mxu2 %v7180_v42  ;;  %v7592_v4 = vor.u32 %v10484_v2, %v7591_v1  ;;  %v7879_v5 = vld [vmem:[#allocation8 + $0x540] sm:$0xf]  ;;  %v10432_v1 = vld [vmem:[#allocation8 + $0x184] sm:$0xf] }
  0x68   :  { %756 = vmatpush.bf16.msra.mxu3 %v7184_v45  ;;  %v10556_v6 = vld [vmem:[#allocation8 + $0x55c] sm:$0xf0]  ;;  %v7401_v2 = vld [vmem:[#allocation8 + $0x1a0] sm:$0xf0] }
  0x69   :  { %2347 = vmatpush.bf16.msrb.mxu0 %v7432_v34  ;;  %v8135_v7 = vld [vmem:[#allocation8 + $0x740] sm:$0xf]  ;;  %v7880_v8 = vor.u32 %v10556_v6, %v7879_v5  ;;  %v7657_v5 = vld [vmem:[#allocation8 + $0x3a0] sm:$0xf0] }
  0x6a   :  { %2361 = vmatpush.bf16.msrb.mxu1 %v7688_v38  ;;  %v10620_v9 = vld [vmem:[#allocation8 + $0x75c] sm:$0xf0] }
  0x6b   :  { %2375 = vmatpush.bf16.msrb.mxu2 %v7944_v46  ;;  %v8136_v10 = vor.u32 %v10620_v9, %v8135_v7  ;;  %v7303_v11 = vld [vmem:[#allocation8 + $0xc0] sm:$0xf] }
  0x6c   :  { %2389 = vmatpush.bf16.msrb.mxu3 %v8200_v48  ;;  %v10412_v12 = vld [vmem:[#allocation8 + $0xdc] sm:$0xf0] }
  0x6d   :  { %2348 = vmatpush.bf16.msrb.mxu0 %v7400_v47  ;;  %v7559_v13 = vld [vmem:[#allocation8 + $0x2c0] sm:$0xf]  ;;  %v7304_v14 = vor.u32 %v10412_v12, %v7303_v11  ;;  %v10568_v12 = vld [vmem:[#allocation8 + $0x5c4] sm:$0xf] }
  0x6e   :  { %2362 = vmatpush.bf16.msrb.mxu1 %v7656_v54  ;;  %v10476_v15 = vld [vmem:[#allocation8 + $0x2dc] sm:$0xf0] }
  0x6f   :  { %2376 = vmatpush.bf16.msrb.mxu2 %v7912_v59  ;;  %v7847_v16 = vld [vmem:[#allocation8 + $0x500] sm:$0xf]  ;;  %v7560_v18 = vor.u32 %v10476_v15, %v7559_v13  ;;  %v7692_v59 = vor.u32 %v10504_v55, %v7689_v56  ;;  %v10632_v15 = vld [vmem:[#allocation8 + $0x7c4] sm:$0xf]  ;;  %v7852_v56 = vor.u32 %v10544_v50, %v7849_v51 }
  0x70   :  { %7201 = vmatmul.msk.bf16.vlgmr.msra.gmra.mxu0 %vm703_vm0, %v10309_v57  ;;  %2390 = vmatpush.bf16.msrb.mxu3 %v8168_v63  ;;  %v10548_v17 = vld [vmem:[#allocation8 + $0x51c] sm:$0xf0] }
  0x71   :  { %7202 = vmatmul.msk.bf16.vlgmr.msra.gmra.mxu1 %vm703_vm0, %v10309_v57  ;;  %2349 = vmatpush.bf16.msrb.mxu0 %v7368_v52  ;;  %v7848_v19 = vor.u32 %v10548_v17, %v7847_v16  ;;  %v8103_v20 = vld [vmem:[#allocation8 + $0x700] sm:$0xf]  ;;  %v8201_v16 = vld [vmem:[#allocation8 + $0x7e0] sm:$0xf0] }
  0x72   :  { %7203 = vmatmul.msk.bf16.vlgmr.msra.gmra.mxu2 %vm703_vm0, %v10309_v57  ;;  %2363 = vmatpush.bf16.msrb.mxu1 %v7624_v58  ;;  %v10612_v21 = vld [vmem:[#allocation8 + $0x71c] sm:$0xf0] }
  0x73   :  { %7204 = vmatmul.msk.bf16.vlgmr.msra.gmra.mxu3 %vm703_vm0, %v10309_v57  ;;  %2377 = vmatpush.bf16.msrb.mxu2 %v7880_v8  ;;  %v7271_v22 = vld [vmem:[#allocation8 + $0x80] sm:$0xf]  ;;  %v8104_v23 = vor.u32 %v10612_v21, %v8103_v20  ;;  %v7369_v20 = vld [vmem:[#allocation8 + $0x160] sm:$0xf0] }
  0x74   :  { %2391 = vmatpush.bf16.msrb.mxu3 %v8136_v10  ;;  %v10404_v24 = vld [vmem:[#allocation8 + $0x9c] sm:$0xf0]  ;;  %v10488_v21 = vld [vmem:[#allocation8 + $0x344] sm:$0xf] }
  0x75   :  { %2350 = vmatpush.bf16.msrb.mxu0 %v7336_v3  ;;  %v7527_v25 = vld [vmem:[#allocation8 + $0x280] sm:$0xf]  ;;  %v7272_v27 = vor.u32 %v10404_v24, %v7271_v22  ;;  %v10496_v3 = vld [vmem:[#allocation8 + $0x384] sm:$0xf] }
  0x76   :  { %2364 = vmatpush.bf16.msrb.mxu1 %v7592_v4  ;;  %v10468_v26 = vld [vmem:[#allocation8 + $0x29c] sm:$0xf0]  ;;  %v7404_v4 = vor.u32 %v10432_v1, %v7401_v2  ;;  %v7660_v8 = vor.u32 %v10496_v3, %v7657_v5  ;;  %v7625_v24 = vld [vmem:[#allocation8 + $0x360] sm:$0xf0] }
  0x77   :  { %2378 = vmatpush.bf16.msrb.mxu2 %v7848_v19  ;;  %v7528_v28 = vor.u32 %v10468_v26, %v7527_v25  ;;  %v7815_v29 = vld [vmem:[#allocation8 + $0x4c0] sm:$0xf]  ;;  %v10424_v19 = vld [vmem:[#allocation8 + $0x144] sm:$0xf]  ;;  %v7628_v26 = vor.u32 %v10488_v21, %v7625_v24 }
  0x78   :  { %v10540_v30 = vld [vmem:[#allocation8 + $0x4dc] sm:$0xf0]  ;;  %2392 = vmatpush.bf16.msrb.mxu3 %v8104_v23  ;;  %v7372_v23 = vor.u32 %v10424_v19, %v7369_v20  ;;  %v7529_v1 = vld [vmem:[#allocation8 + $0x2a0] sm:$0xf0] }
  0x79   :  { %2351 = vmatpush.bf16.msrb.mxu0 %v7304_v14  ;;  %v8071_v31 = vld [vmem:[#allocation8 + $0x6c0] sm:$0xf]  ;;  %v7816_v32 = vor.u32 %v10540_v30, %v7815_v29  ;;  %v7945_v14 = vld [vmem:[#allocation8 + $0x5e0] sm:$0xf0] }
  0x7a   :  { %2365 = vmatpush.bf16.msrb.mxu1 %v7560_v18  ;;  %v10604_v33 = vld [vmem:[#allocation8 + $0x6dc] sm:$0xf0]  ;;  %v7948_v17 = vor.u32 %v10568_v12, %v7945_v14  ;;  %v8204_v18 = vor.u32 %v10632_v15, %v8201_v16  ;;  %v10624_v29 = vld [vmem:[#allocation8 + $0x784] sm:$0xf] }
  0x7b   :  { %v7239_v34 = vld [vmem:[#allocation8 + $0x40] sm:$0xf]  ;;  %v8072_v36 = vor.u32 %v10604_v33, %v8071_v31  ;;  %2379 = vmatpush.bf16.msrb.mxu2 %v7816_v32  ;;  %v8169_v31 = vld [vmem:[#allocation8 + $0x7a0] sm:$0xf0] }
  0x7c   :  { %v10396_v35 = vld [vmem:[#allocation8 + $0x5c] sm:$0xf0]  ;;  %v8172_v32 = vor.u32 %v10624_v29, %v8169_v31  ;;  %v10416_v33 = vld [vmem:[#allocation8 + $0x104] sm:$0xf] }
  0x7d   :  { %v7495_v37 = vld [vmem:[#allocation8 + $0x240] sm:$0xf]  ;;  %2352 = vmatpush.bf16.msrb.mxu0 %v7272_v27  ;;  %v7240_v39 = vor.u32 %v10396_v35, %v7239_v34  ;;  %2393 = vmatpush.bf16.msrb.mxu3 %v8072_v36  ;;  %v10560_v27 = vld [vmem:[#allocation8 + $0x584] sm:$0xf] }
  0x7e   :  { %v10460_v38 = vld [vmem:[#allocation8 + $0x25c] sm:$0xf0]  ;;  %2366 = vmatpush.bf16.msrb.mxu1 %v7528_v28  ;;  %v7913_v28 = vld [vmem:[#allocation8 + $0x5a0] sm:$0xf0] }
  0x7f   :  { %v7496_v40 = vor.u32 %v10460_v38, %v7495_v37  ;;  %v7783_v41 = vld [vmem:[#allocation8 + $0x480] sm:$0xf]  ;;  %v7916_v30 = vor.u32 %v10560_v27, %v7913_v28  ;;  %v7337_v34 = vld [vmem:[#allocation8 + $0x120] sm:$0xf0] }
  0x80   :  { %v10532_v42 = vld [vmem:[#allocation8 + $0x49c] sm:$0xf0]  ;;  %v10480_v35 = vld [vmem:[#allocation8 + $0x304] sm:$0xf]  ;;  %v7340_v36 = vor.u32 %v10416_v33, %v7337_v34 }
  0x81   :  { %2353 = vmatpush.bf16.msrb.mxu0 %v7240_v39  ;;  %v8039_v43 = vld [vmem:[#allocation8 + $0x680] sm:$0xf]  ;;  %v7784_v44 = vor.u32 %v10532_v42, %v7783_v41  ;;  %v7593_v37 = vld [vmem:[#allocation8 + $0x320] sm:$0xf0] }
  0x82   :  { %2367 = vmatpush.bf16.msrb.mxu1 %v7496_v40  ;;  %v10596_v45 = vld [vmem:[#allocation8 + $0x69c] sm:$0xf0]  ;;  %v7596_v38 = vor.u32 %v10480_v35, %v7593_v37  ;;  %v10552_v39 = vld [vmem:[#allocation8 + $0x544] sm:$0xf] }
  0x83   :  { %v8040_v46 = vor.u32 %v10596_v45, %v8039_v43  ;;  %v7207_v47 = vld [vmem:[#allocation8] sm:$0xf]  ;;  %2380 = vmatpush.bf16.msrb.mxu2 %v7784_v44  ;;  %v7881_v40 = vld [vmem:[#allocation8 + $0x560] sm:$0xf0] }
  0x84   :  { %v10388_v48 = vld [vmem:[#allocation8 + $0x1c] sm:$0xf0]  ;;  %v7884_v41 = vor.u32 %v10552_v39, %v7881_v40  ;;  %v10616_v42 = vld [vmem:[#allocation8 + $0x744] sm:$0xf] }
  0x85   :  { %v7463_v54 = vld [vmem:[#allocation8 + $0x200] sm:$0xf]  ;;  %v7208_v57 = vor.u32 %v10388_v48, %v7207_v47  ;;  %2394 = vmatpush.bf16.msrb.mxu3 %v8040_v46  ;;  %v8137_v43 = vld [vmem:[#allocation8 + $0x760] sm:$0xf0] }
  0x86   :  { %v10452_v49 = vld [vmem:[#allocation8 + $0x21c] sm:$0xf0]  ;;  %v8140_v44 = vor.u32 %v10616_v42, %v8137_v43  ;;  %v10408_v45 = vld [vmem:[#allocation8 + $0xc4] sm:$0xf] }
  0x87   :  { %v7464_v52 = vor.u32 %v10452_v49, %v7463_v54  ;;  %v7751_v58 = vld [vmem:[#allocation8 + $0x440] sm:$0xf]  ;;  %2354 = vmatpush.bf16.msrb.mxu0 %v7208_v57  ;;  %v7305_v46 = vld [vmem:[#allocation8 + $0xe0] sm:$0xf0] }
  0x88   :  { %v10524_v60 = vld [vmem:[#allocation8 + $0x45c] sm:$0xf0]  ;;  %v7308_v47 = vor.u32 %v10408_v45, %v7305_v46  ;;  %v10472_v48 = vld [vmem:[#allocation8 + $0x2c4] sm:$0xf] }
  0x89   :  { %v8007_v61 = vld [vmem:[#allocation8 + $0x640] sm:$0xf]  ;;  %2368 = vmatpush.bf16.msrb.mxu1 %v7464_v52  ;;  %v7752_v63 = vor.u32 %v10524_v60, %v7751_v58  ;;  %v7561_v54 = vld [vmem:[#allocation8 + $0x2e0] sm:$0xf0] }
  0x8a   :  { %v10588_v62 = vld [vmem:[#allocation8 + $0x65c] sm:$0xf0]  ;;  %v7564_v49 = vor.u32 %v10472_v48, %v7561_v54  ;;  %v10608_v52 = vld [vmem:[#allocation8 + $0x704] sm:$0xf] }
  0x8b   :  { %2403 = vmatpush.bf16.msra.mxu0 %v7436_v53  ;;  %v8008_v0 = vor.u32 %v10588_v62, %v8007_v61  ;;  %2381 = vmatpush.bf16.msrb.mxu2 %v7752_v63  ;;  %v7719_v6 = vld [vmem:[#allocation8 + $0x400] sm:$0xf]  ;;  %v8105_v58 = vld [vmem:[#allocation8 + $0x720] sm:$0xf0] }
  0x8c   :  { %v10516_v7 = vld [vmem:[#allocation8 + $0x41c] sm:$0xf0]  ;;  %v8108_v60 = vor.u32 %v10608_v52, %v8105_v58  ;;  %v10400_v61 = vld [vmem:[#allocation8 + $0x84] sm:$0xf]  ;;  %v763_v52 = vld [vmem:[#allocation7] sm:$0xf] }
  0x8d   :  { %2417 = vmatpush.bf16.msra.mxu1 %v7692_v59  ;;  %2395 = vmatpush.bf16.msrb.mxu3 %v8008_v0  ;;  %v7720_v9 = vor.u32 %v10516_v7, %v7719_v6  ;;  %v7975_v10 = vld [vmem:[#allocation8 + $0x600] sm:$0xf]  ;;  %v7273_v62 = vld [vmem:[#allocation8 + $0xa0] sm:$0xf0] }
  0x8e   :  { %v10580_v11 = vld [vmem:[#allocation8 + $0x61c] sm:$0xf0]  ;;  %v10464_v63 = vld [vmem:[#allocation8 + $0x284] sm:$0xf]  ;;  %v7276_v0 = vor.u32 %v10400_v61, %v7273_v62  ;;  %v765_v61 = vperm.slane %v763_v52, 0 }
  0x8f   :  { %2404 = vmatpush.bf16.msra.mxu0 %v7404_v4  ;;  %v7976_v13 = vor.u32 %v10580_v11, %v7975_v10  ;;  %2382 = vmatpush.bf16.msrb.mxu2 %v7720_v9  ;;  %v7532_v2 = vor.u32 %v10464_v63, %v7529_v1  ;;  %v10536_v3 = vld [vmem:[#allocation8 + $0x4c4] sm:$0xf]  ;;  %v766_v63 = vperm.slane %v763_v52, 1 }
  0x90   :  { %v7817_v4 = vld [vmem:[#allocation8 + $0x4e0] sm:$0xf0] }
  0x91   :  { %2418 = vmatpush.bf16.msra.mxu1 %v7660_v8  ;;  %2396 = vmatpush.bf16.msrb.mxu3 %v7976_v13  ;;  %v7820_v5 = vor.u32 %v10536_v3, %v7817_v4  ;;  %v10600_v6 = vld [vmem:[#allocation8 + $0x6c4] sm:$0xf] }
  0x92   :  { %v8073_v7 = vld [vmem:[#allocation8 + $0x6e0] sm:$0xf0] }
  0x93   :  { %2431 = vmatpush.bf16.msra.mxu2 %v7948_v17  ;;  %2405 = vmatpush.bf16.msra.mxu0 %v7372_v23  ;;  %v8076_v8 = vor.u32 %v10600_v6, %v8073_v7  ;;  %v10392_v9 = vld [vmem:[#allocation8 + $0x44] sm:$0xf] }
  0x94   :  { %v7241_v10 = vld [vmem:[#allocation8 + $0x60] sm:$0xf0] }
  0x95   :  { %2445 = vmatpush.bf16.msra.mxu3 %v8204_v18  ;;  %2419 = vmatpush.bf16.msra.mxu1 %v7628_v26  ;;  %v10456_v11 = vld [vmem:[#allocation8 + $0x244] sm:$0xf]  ;;  %v7244_v12 = vor.u32 %v10392_v9, %v7241_v10 }
  0x96   :  { %v7497_v13 = vld [vmem:[#allocation8 + $0x260] sm:$0xf0] }
  0x97   :  { %2432 = vmatpush.bf16.msra.mxu2 %v7916_v30  ;;  %2406 = vmatpush.bf16.msra.mxu0 %v7340_v36  ;;  %v7500_v14 = vor.u32 %v10456_v11, %v7497_v13  ;;  %v10528_v15 = vld [vmem:[#allocation8 + $0x484] sm:$0xf] }
  0x98   :  { %v7785_v16 = vld [vmem:[#allocation8 + $0x4a0] sm:$0xf0] }
  0x99   :  { %2446 = vmatpush.bf16.msra.mxu3 %v8172_v32  ;;  %2420 = vmatpush.bf16.msra.mxu1 %v7596_v38  ;;  %v10592_v17 = vld [vmem:[#allocation8 + $0x684] sm:$0xf]  ;;  %v7788_v18 = vor.u32 %v10528_v15, %v7785_v16  ;;  %v10509_v15 = vld [vmem:[#allocation8 + $0x3e4] sm:$0xf0]  ;;  %v768_v16 = vperm.slane %v763_v52, 3 }
  0x9a   :  { %v8041_v19 = vld [vmem:[#allocation8 + $0x6a0] sm:$0xf0] }
  0x9b   :  { %2433 = vmatpush.bf16.msra.mxu2 %v7884_v41  ;;  %2407 = vmatpush.bf16.msra.mxu0 %v7308_v47  ;;  %v8044_v21 = vor.u32 %v10592_v17, %v8041_v19  ;;  %v10384_v23 = vld [vmem:[#allocation8 + $0x4] sm:$0xf] }
  0x9c   :  { %v7209_v24 = vld [vmem:[#allocation8 + $0x20] sm:$0xf0] }
  0x9d   :  { %2447 = vmatpush.bf16.msra.mxu3 %v8140_v44  ;;  %2421 = vmatpush.bf16.msra.mxu1 %v7564_v49  ;;  %v10448_v26 = vld [vmem:[#allocation8 + $0x204] sm:$0xf]  ;;  %v7212_v29 = vor.u32 %v10384_v23, %v7209_v24 }
  0x9e   :  { %v7465_v30 = vld [vmem:[#allocation8 + $0x220] sm:$0xf0] }
  0x9f   :  { %2434 = vmatpush.bf16.msra.mxu2 %v7852_v56  ;;  %2408 = vmatpush.bf16.msra.mxu0 %v7276_v0  ;;  %v7468_v32 = vor.u32 %v10448_v26, %v7465_v30  ;;  %v10520_v33 = vld [vmem:[#allocation8 + $0x444] sm:$0xf] }
  0xa0   :  { %v7753_v34 = vld [vmem:[#allocation8 + $0x460] sm:$0xf0] }
  0xa1   :  { %2448 = vmatpush.bf16.msra.mxu3 %v8108_v60  ;;  %2422 = vmatpush.bf16.msra.mxu1 %v7532_v2  ;;  %v10584_v35 = vld [vmem:[#allocation8 + $0x644] sm:$0xf]  ;;  %v7756_v37 = vor.u32 %v10520_v33, %v7753_v34  ;;  %v7663_v34 = vld [vmem:[#allocation8 + $0x388] sm:$0xf] }
  0xa2   :  { %v8009_v36 = vld [vmem:[#allocation8 + $0x660] sm:$0xf0] }
  0xa3   :  { %2435 = vmatpush.bf16.msra.mxu2 %v7820_v5  ;;  %2409 = vmatpush.bf16.msra.mxu0 %v7244_v12  ;;  %v8012_v38 = vor.u32 %v10584_v35, %v8009_v36  ;;  %v10512_v39 = vld [vmem:[#allocation8 + $0x404] sm:$0xf]  ;;  %v767_v12 = vperm.slane %v763_v52, 2  ;;  %v10501_v35 = vld [vmem:[#allocation8 + $0x3a4] sm:$0xf0] }
  0xa4   :  { %v7721_v40 = vld [vmem:[#allocation8 + $0x420] sm:$0xf0] }
  0xa5   :  { %2449 = vmatpush.bf16.msra.mxu3 %v8076_v8  ;;  %2423 = vmatpush.bf16.msra.mxu1 %v7500_v14  ;;  %v7724_v41 = vor.u32 %v10512_v39, %v7721_v40  ;;  %v10576_v42 = vld [vmem:[#allocation8 + $0x604] sm:$0xf]  ;;  %v7695_v14 = vld [vmem:[#allocation8 + $0x3c8] sm:$0xf] }
  0xa6   :  { %v7977_v43 = vld [vmem:[#allocation8 + $0x620] sm:$0xf0]  ;;  %v7951_v40 = vld [vmem:[#allocation8 + $0x5c8] sm:$0xf] }
  0xa7   :  { %2436 = vmatpush.bf16.msra.mxu2 %v7788_v18  ;;  %2410 = vmatpush.bf16.msra.mxu0 %v7212_v29  ;;  %v7980_v45 = vor.u32 %v10576_v42, %v7977_v43  ;;  %v10437_v29 = vld [vmem:[#allocation8 + $0x1a4] sm:$0xf0] }
  0xa8   :  { %v8207_v42 = vld [vmem:[#allocation8 + $0x7c8] sm:$0xf] }
  0xa9   :  { %2450 = vmatpush.bf16.msra.mxu3 %v8044_v21  ;;  %2424 = vmatpush.bf16.msra.mxu1 %v7468_v32 }
  0xab   :  { %2437 = vmatpush.bf16.msra.mxu2 %v7756_v37 }
  0xad   :  { %2451 = vmatpush.bf16.msra.mxu3 %v8012_v38 }
  0xaf   :  { %2438 = vmatpush.bf16.msra.mxu2 %v7724_v41  ;;  %v10573_v41 = vld [vmem:[#allocation8 + $0x5e4] sm:$0xf0] }
  0xb1   :  { %2452 = vmatpush.bf16.msra.mxu3 %v7980_v45  ;;  %v10637_v45 = vld [vmem:[#allocation8 + $0x7e4] sm:$0xf0] }
  0xbd   :  { %v11491_v22 = vpop.f32.mrf.mxu0 }
  0xbe   :  { %v11493_v25 = vpop.f32.mrf.mxu1 }
  0xbf   :  { %v570_v56 = vadd.f32 %v11493_v25, %v11491_v22 }
  0xc5   :  { %v11495_v57 = vpop.f32.mrf.mxu2  ;;  %v11499_v55 = vpop.f32.mrf.mxu0 }
  0xc6   :  { %v11497_v53 = vpop.f32.mrf.mxu3  ;;  %v11501_v59 = vpop.f32.mrf.mxu1 }
  0xc7   :  { %v598_v58 = vadd.f32 %v11497_v53, %v11495_v57  ;;  %v572_v0 = vadd.f32 %v11501_v59, %v11499_v55  ;;  %v7439_v57 = vld [vmem:[#allocation8 + $0x1c8] sm:$0xf] }
  0xc8   :  { %v10445_v53 = vld [vmem:[#allocation8 + $0x1e4] sm:$0xf0] }
  0xc9   :  { %v7440_v21 = vor.u32 %v10445_v53, %v7439_v57  ;;  %v8143_v53 = vld [vmem:[#allocation8 + $0x748] sm:$0xf] }
  0xcd   :  { %v585_v20 = vpop.f32.mrf.mxu2 }
  0xce   :  { %v599_v27 = vpop.f32.mrf.mxu3 }
  0xcf   :  { %v600_v2 = vadd.f32 %v599_v27, %v585_v20  ;;  %v7696_v27 = vor.u32 %v10509_v15, %v7695_v14  ;;  %v7567_v14 = vld [vmem:[#allocation8 + $0x2c8] sm:$0xf] }
  0xd0   :  { %v10477_v15 = vld [vmem:[#allocation8 + $0x2e4] sm:$0xf0] }
  0xdd   :  { %v611_v28 = vpop.f32.mrf.mxu0 }
  0xde   :  { %v625_v31 = vpop.f32.mrf.mxu1 }
  0xdf   :  { %v626_v8 = vadd.f32 %v625_v31, %v611_v28  ;;  %v7407_v28 = vld [vmem:[#allocation8 + $0x188] sm:$0xf] }
  0xe0   :  { %v7408_v39 = vor.u32 %v10437_v29, %v7407_v28  ;;  %v10469_v28 = vld [vmem:[#allocation8 + $0x2a4] sm:$0xf0] }
  0xe5   :  { %v639_v44 = vpop.f32.mrf.mxu2  ;;  %v613_v47 = vpop.f32.mrf.mxu0 }
  0xe6   :  { %v653_v46 = vpop.f32.mrf.mxu3  ;;  %v627_v48 = vpop.f32.mrf.mxu1 }
  0xe7   :  { %v654_v25 = vadd.f32 %v653_v46, %v639_v44  ;;  %v628_v18 = vadd.f32 %v627_v48, %v613_v47  ;;  %v7664_v44 = vor.u32 %v10501_v35, %v7663_v34  ;;  %v7375_v46 = vld [vmem:[#allocation8 + $0x148] sm:$0xf] }
  0xe8   :  { %v10429_v47 = vld [vmem:[#allocation8 + $0x164] sm:$0xf0] }
  0xed   :  { %v641_v54 = vpop.f32.mrf.mxu2  ;;  %v716_v50 = vpop.f32.mrf.mxu0 }
  0xee   :  { %v655_v49 = vpop.f32.mrf.mxu3  ;;  %v730_v51 = vpop.f32.mrf.mxu1  ;;  %v717_v60 = vadd.f32 %v716_v50, %v570_v56  ;;  %v10493_v50 = vld [vmem:[#allocation8 + $0x364] sm:$0xf0]  ;;  %v7952_v56 = vor.u32 %v10573_v41, %v7951_v40 }
  0xef   :  { %v731_v62 = vadd.f32 %v730_v51, %v598_v58  ;;  %v656_v23 = vadd.f32 %v655_v49, %v641_v54  ;;  %v7631_v49 = vld [vmem:[#allocation8 + $0x348] sm:$0xf] }
  0xf0   :  { %v773_v5 = vadd.f32 %v765_v61, %v717_v60  ;;  %v8208_v60 = vor.u32 %v10637_v45, %v8207_v42  ;;  %v7503_v40 = vld [vmem:[#allocation8 + $0x248] sm:$0xf] }
  0xf1   :  { %v774_v9 = vadd.f32 %v766_v63, %v731_v62  ;;  %v7919_v62 = vld [vmem:[#allocation8 + $0x588] sm:$0xf] }
  0xf2   :  { %v781_v55 = vmax.f32 %v773_v5, 0.0  ;;  %v10421_v5 = vld [vmem:[#allocation8 + $0x124] sm:$0xf0] }
  0xf3   :  { %v782_v19 = vmax.f32 %v774_v9, 0.0  ;;  %v10461_v41 = vld [vmem:[#allocation8 + $0x264] sm:$0xf0] }
  0xf4   :  { %v10533_v45 = vld [vmem:[#allocation8 + $0x4a4] sm:$0xf0] }
  0xf5   :  { %v744_v1 = vpop.f32.mrf.mxu2  ;;  %v718_v4 = vpop.f32.mrf.mxu0 }
  0xf6   :  { %v758_v3 = vpop.f32.mrf.mxu3  ;;  %v719_v6 = vadd.f32 %v718_v4, %v572_v0  ;;  %v732_v7 = vpop.f32.mrf.mxu1  ;;  %v745_v11 = vadd.f32 %v744_v1, %v626_v8  ;;  %v8175_v0 = vld [vmem:[#allocation8 + $0x788] sm:$0xf] }
  0xf7   :  { %v733_v22 = vadd.f32 %v732_v7, %v600_v2  ;;  %v759_v59 = vadd.f32 %v758_v3, %v654_v25  ;;  %v7632_v2 = vor.u32 %v10493_v50, %v7631_v49  ;;  %v10629_v3 = vld [vmem:[#allocation8 + $0x7a4] sm:$0xf0] }
  0xf8   :  { %v777_v10 = vadd.f32 %v765_v61, %v719_v6  ;;  %v775_v30 = vadd.f32 %v767_v12, %v745_v11  ;;  %v7376_v61 = vor.u32 %v10429_v47, %v7375_v46  ;;  %v7343_v4 = vld [vmem:[#allocation8 + $0x108] sm:$0xf]  ;;  %v8176_v9 = vor.u32 %v10629_v3, %v8175_v0 }
  0xf9   :  { %v778_v13 = vadd.f32 %v766_v63, %v733_v22  ;;  %v776_v36 = vadd.f32 %v768_v16, %v759_v59  ;;  %v10565_v63 = vld [vmem:[#allocation8 + $0x5a4] sm:$0xf0]  ;;  %v7344_v22 = vor.u32 %v10421_v5, %v7343_v4 }
  0xfa   :  { %v785_v17 = vmax.f32 %v777_v10, 0.0  ;;  %v783_v48 = vmax.f32 %v775_v30, 0.0  ;;  %v7599_v6 = vld [vmem:[#allocation8 + $0x308] sm:$0xf]  ;;  %v7920_v8 = vor.u32 %v10565_v63, %v7919_v62  ;;  %v10505_v62 = vld [vmem:[#allocation8 + $0x3cc] sm:$0xf] }
  0xfb   :  { %v786_v20 = vmax.f32 %v778_v13, 0.0  ;;  %v784_v51 = vmax.f32 %v776_v36, 0.0  ;;  %v10485_v7 = vld [vmem:[#allocation8 + $0x324] sm:$0xf0]  ;;  %v7697_v63 = vld [vmem:[#allocation8 + $0x3e8] sm:$0xf0] }
  0xfc   :  { %v11509_v24 = vpack.c.bf16 %v785_v17, %v781_v55  ;;  %v7887_v25 = vld [vmem:[#allocation8 + $0x548] sm:$0xf]  ;;  %v7600_v57 = vor.u32 %v10485_v7, %v7599_v6 }
  0xfd   :  { %v746_v26 = vpop.f32.mrf.mxu2  ;;  %v11511_v31 = vpack.c.bf16 %v786_v20, %v782_v19  ;;  %v10557_v10 = vld [vmem:[#allocation8 + $0x564] sm:$0xf0]  ;;  %v7568_v19 = vor.u32 %v10477_v15, %v7567_v14 }
  0xfe   :  { %v747_v32 = vadd.f32 %v746_v26, %v628_v18  ;;  %v760_v33 = vpop.f32.mrf.mxu3  ;;  %2355 = vmatmul.bf16.vlgmr.msrb.gmra.mxu0 %v11509_v24  ;;  %v10621_v11 = vld [vmem:[#allocation8 + $0x764] sm:$0xf0]  ;;  %v7888_v55 = vor.u32 %v10557_v10, %v7887_v25  ;;  %v7409_v10 = vld [vmem:[#allocation8 + $0x1a8] sm:$0xf0] }
  0xff   :  { %v761_v37 = vadd.f32 %v760_v33, %v656_v23  ;;  %2369 = vmatmul.bf16.vlgmr.msrb.gmra.mxu1 %v11511_v31  ;;  %2459 = vmatpush.bf16.msrb.mxu0 %v7440_v21  ;;  %v10413_v13 = vld [vmem:[#allocation8 + $0xe4] sm:$0xf0]  ;;  %v8144_v59 = vor.u32 %v10621_v11, %v8143_v53  ;;  %v7665_v53 = vld [vmem:[#allocation8 + $0x3a8] sm:$0xf0] }
 0x100   :  { %v779_v38 = vadd.f32 %v767_v12, %v747_v32  ;;  %2473 = vmatpush.bf16.msrb.mxu1 %v7696_v27  ;;  %v7311_v12 = vld [vmem:[#allocation8 + $0xc8] sm:$0xf] }
 0x101   :  { %v780_v43 = vadd.f32 %v768_v16, %v761_v37  ;;  %v7855_v16 = vld [vmem:[#allocation8 + $0x508] sm:$0xf]  ;;  %v7312_v18 = vor.u32 %v10413_v13, %v7311_v12 }
 0x102   :  { %v787_v54 = vmax.f32 %v779_v38, 0.0  ;;  %v10549_v17 = vld [vmem:[#allocation8 + $0x524] sm:$0xf0] }
 0x103   :  { %v788_v52 = vmax.f32 %v780_v43, 0.0  ;;  %2460 = vmatpush.bf16.msrb.mxu0 %v7408_v39  ;;  %v8111_v20 = vld [vmem:[#allocation8 + $0x708] sm:$0xf]  ;;  %v7856_v29 = vor.u32 %v10549_v17, %v7855_v16 }
 0x104   :  { %v11515_v58 = vpack.c.bf16 %v787_v54, %v783_v48  ;;  %2474 = vmatpush.bf16.msrb.mxu1 %v7664_v44  ;;  %v10613_v21 = vld [vmem:[#allocation8 + $0x724] sm:$0xf0]  ;;  %v7504_v48 = vor.u32 %v10461_v41, %v7503_v40  ;;  %v10481_v40 = vld [vmem:[#allocation8 + $0x30c] sm:$0xf] }
 0x105   :  { %v11517_v1 = vpack.c.bf16 %v788_v52, %v784_v51  ;;  %v7279_v23 = vld [vmem:[#allocation8 + $0x88] sm:$0xf]  ;;  %v8112_v30 = vor.u32 %v10613_v21, %v8111_v20  ;;  %v10425_v20 = vld [vmem:[#allocation8 + $0x14c] sm:$0xf] }
 0x106   :  { %2383 = vmatmul.bf16.vlgmr.msrb.gmra.mxu2 %v11515_v58  ;;  %v10405_v26 = vld [vmem:[#allocation8 + $0xa4] sm:$0xf0]  ;;  %v7601_v41 = vld [vmem:[#allocation8 + $0x328] sm:$0xf0] }
 0x107   :  { %2397 = vmatmul.bf16.vlgmr.msrb.gmra.mxu3 %v11517_v1  ;;  %2487 = vmatpush.bf16.msrb.mxu2 %v7952_v56  ;;  %v7535_v27 = vld [vmem:[#allocation8 + $0x288] sm:$0xf]  ;;  %v7280_v34 = vor.u32 %v10405_v26, %v7279_v23  ;;  %v10441_v56 = vld [vmem:[#allocation8 + $0x1cc] sm:$0xf] }
 0x108   :  { %2501 = vmatpush.bf16.msrb.mxu3 %v8208_v60  ;;  %2461 = vmatpush.bf16.msrb.mxu0 %v7376_v61  ;;  %v7823_v32 = vld [vmem:[#allocation8 + $0x4c8] sm:$0xf]  ;;  %v7536_v35 = vor.u32 %v10469_v28, %v7535_v27  ;;  %v7441_v61 = vld [vmem:[#allocation8 + $0x1e8] sm:$0xf0] }
 0x109   :  { %2475 = vmatpush.bf16.msrb.mxu1 %v7632_v2  ;;  %v10541_v33 = vld [vmem:[#allocation8 + $0x4e4] sm:$0xf0]  ;;  %v7377_v23 = vld [vmem:[#allocation8 + $0x168] sm:$0xf0] }
 0x10a   :  { %v8079_v36 = vld [vmem:[#allocation8 + $0x6c8] sm:$0xf]  ;;  %v7824_v42 = vor.u32 %v10541_v33, %v7823_v32  ;;  %v10489_v26 = vld [vmem:[#allocation8 + $0x34c] sm:$0xf] }
 0x10b   :  { %2488 = vmatpush.bf16.msrb.mxu2 %v7920_v8  ;;  %v10605_v37 = vld [vmem:[#allocation8 + $0x6e4] sm:$0xf0]  ;;  %v7444_v8 = vor.u32 %v10441_v56, %v7441_v61  ;;  %v7633_v27 = vld [vmem:[#allocation8 + $0x368] sm:$0xf0] }
 0x10c   :  { %2502 = vmatpush.bf16.msrb.mxu3 %v8176_v9  ;;  %2462 = vmatpush.bf16.msrb.mxu0 %v7344_v22  ;;  %v7247_v38 = vld [vmem:[#allocation8 + $0x48] sm:$0xf]  ;;  %v8080_v43 = vor.u32 %v10605_v37, %v8079_v36  ;;  %v7700_v9 = vor.u32 %v10505_v62, %v7697_v63  ;;  %v10433_v22 = vld [vmem:[#allocation8 + $0x18c] sm:$0xf] }
 0x10d   :  { %2476 = vmatpush.bf16.msrb.mxu1 %v7600_v57  ;;  %v10397_v39 = vld [vmem:[#allocation8 + $0x64] sm:$0xf0]  ;;  %v10497_v57 = vld [vmem:[#allocation8 + $0x38c] sm:$0xf]  ;;  %v7412_v16 = vor.u32 %v10433_v22, %v7409_v10 }
 0x10e   :  { %2411 = vmatmul.bf16.vlgmr.msra.gmra.mxu0 %v11509_v24  ;;  %v7791_v44 = vld [vmem:[#allocation8 + $0x488] sm:$0xf]  ;;  %v7248_v47 = vor.u32 %v10397_v39, %v7247_v38  ;;  %v7668_v17 = vor.u32 %v10497_v57, %v7665_v53  ;;  %v10561_v32 = vld [vmem:[#allocation8 + $0x58c] sm:$0xf] }
 0x10f   :  { %2489 = vmatpush.bf16.msrb.mxu2 %v7888_v55  ;;  %2425 = vmatmul.bf16.vlgmr.msra.gmra.mxu1 %v11511_v31  ;;  %v8047_v46 = vld [vmem:[#allocation8 + $0x688] sm:$0xf]  ;;  %v7792_v60 = vor.u32 %v10533_v45, %v7791_v44  ;;  %v10569_v55 = vld [vmem:[#allocation8 + $0x5cc] sm:$0xf] }
 0x110   :  { %2503 = vmatpush.bf16.msrb.mxu3 %v8144_v59  ;;  %2463 = vmatpush.bf16.msrb.mxu0 %v7312_v18  ;;  %v10597_v54 = vld [vmem:[#allocation8 + $0x6a4] sm:$0xf0]  ;;  %v7953_v59 = vld [vmem:[#allocation8 + $0x5e8] sm:$0xf0] }
 0x111   :  { %2477 = vmatpush.bf16.msrb.mxu1 %v7568_v19  ;;  %v7215_v49 = vld [vmem:[#allocation8 + $0x8] sm:$0xf]  ;;  %v8048_v0 = vor.u32 %v10597_v54, %v8047_v46  ;;  %v10633_v18 = vld [vmem:[#allocation8 + $0x7cc] sm:$0xf] }
 0x112   :  { %v10389_v50 = vld [vmem:[#allocation8 + $0x24] sm:$0xf0]  ;;  %v8209_v19 = vld [vmem:[#allocation8 + $0x7e8] sm:$0xf0] }
 0x113   :  { %2490 = vmatpush.bf16.msrb.mxu2 %v7856_v29  ;;  %v7471_v51 = vld [vmem:[#allocation8 + $0x208] sm:$0xf]  ;;  %v7216_v4 = vor.u32 %v10389_v50, %v7215_v49  ;;  %v7956_v29 = vor.u32 %v10569_v55, %v7953_v59  ;;  %v7921_v33 = vld [vmem:[#allocation8 + $0x5a8] sm:$0xf0] }
 0x114   :  { %2504 = vmatpush.bf16.msrb.mxu3 %v8112_v30  ;;  %2464 = vmatpush.bf16.msrb.mxu0 %v7280_v34  ;;  %v10453_v52 = vld [vmem:[#allocation8 + $0x224] sm:$0xf0]  ;;  %v8212_v30 = vor.u32 %v10633_v18, %v8209_v19  ;;  %v7380_v34 = vor.u32 %v10425_v20, %v7377_v23  ;;  %v10625_v36 = vld [vmem:[#allocation8 + $0x78c] sm:$0xf] }
 0x115   :  { %2478 = vmatpush.bf16.msrb.mxu1 %v7536_v35  ;;  %v7759_v2 = vld [vmem:[#allocation8 + $0x448] sm:$0xf]  ;;  %v7472_v5 = vor.u32 %v10453_v52, %v7471_v51  ;;  %v7636_v35 = vor.u32 %v10489_v26, %v7633_v27  ;;  %v8177_v37 = vld [vmem:[#allocation8 + $0x7a8] sm:$0xf0] }
 0x116   :  { %2439 = vmatmul.bf16.vlgmr.msra.gmra.mxu2 %v11515_v58  ;;  %v10525_v3 = vld [vmem:[#allocation8 + $0x464] sm:$0xf0]  ;;  %v10417_v38 = vld [vmem:[#allocation8 + $0x10c] sm:$0xf] }
 0x117   :  { %2453 = vmatmul.bf16.vlgmr.msra.gmra.mxu3 %v11517_v1  ;;  %2491 = vmatpush.bf16.msrb.mxu2 %v7824_v42  ;;  %v8015_v6 = vld [vmem:[#allocation8 + $0x648] sm:$0xf]  ;;  %v7760_v25 = vor.u32 %v10525_v3, %v7759_v2  ;;  %v7345_v39 = vld [vmem:[#allocation8 + $0x128] sm:$0xf0]  ;;  %v7924_v42 = vor.u32 %v10561_v32, %v7921_v33  ;;  %v10446_v32 = vld [vmem:[#allocation8 + $0x1ec] sm:$0xf0] }
 0x118   :  { %2505 = vmatpush.bf16.msrb.mxu3 %v8080_v43  ;;  %2465 = vmatpush.bf16.msrb.mxu0 %v7248_v47  ;;  %v10589_v7 = vld [vmem:[#allocation8 + $0x664] sm:$0xf0]  ;;  %v8180_v43 = vor.u32 %v10625_v36, %v8177_v37  ;;  %v10553_v44 = vld [vmem:[#allocation8 + $0x54c] sm:$0xf]  ;;  %v7348_v46 = vor.u32 %v10417_v38, %v7345_v39  ;;  %v7604_v47 = vor.u32 %v10481_v40, %v7601_v41  ;;  %v7703_v33 = vld [vmem:[#allocation8 + $0x3d0] sm:$0xf] }
 0x119   :  { %2479 = vmatpush.bf16.msrb.mxu1 %v7504_v48  ;;  %v8016_v11 = vor.u32 %v10589_v7, %v8015_v6  ;;  %v7727_v12 = vld [vmem:[#allocation8 + $0x408] sm:$0xf]  ;;  %v7889_v45 = vld [vmem:[#allocation8 + $0x568] sm:$0xf0] }
 0x11a   :  { %v10517_v13 = vld [vmem:[#allocation8 + $0x424] sm:$0xf0]  ;;  %v10617_v48 = vld [vmem:[#allocation8 + $0x74c] sm:$0xf]  ;;  %v7892_v56 = vor.u32 %v10553_v44, %v7889_v45  ;;  %v7415_v44 = vld [vmem:[#allocation8 + $0x190] sm:$0xf] }
 0x11b   :  { %2492 = vmatpush.bf16.msrb.mxu2 %v7792_v60  ;;  %v7983_v14 = vld [vmem:[#allocation8 + $0x608] sm:$0xf]  ;;  %v7728_v21 = vor.u32 %v10517_v13, %v7727_v12  ;;  %v8145_v54 = vld [vmem:[#allocation8 + $0x768] sm:$0xf0] }
 0x11c   :  { %2506 = vmatpush.bf16.msrb.mxu3 %v8048_v0  ;;  %2466 = vmatpush.bf16.msrb.mxu0 %v7216_v4  ;;  %v10581_v15 = vld [vmem:[#allocation8 + $0x624] sm:$0xf0]  ;;  %v10409_v49 = vld [vmem:[#allocation8 + $0xcc] sm:$0xf]  ;;  %v8148_v60 = vor.u32 %v10617_v48, %v8145_v54  ;;  %v10502_v48 = vld [vmem:[#allocation8 + $0x3ac] sm:$0xf0] }
 0x11d   :  { %2480 = vmatpush.bf16.msrb.mxu1 %v7472_v5  ;;  %v7984_v28 = vor.u32 %v10581_v15, %v7983_v14  ;;  %v7313_v50 = vld [vmem:[#allocation8 + $0xe8] sm:$0xf0] }
 0x11e   :  { %v10473_v51 = vld [vmem:[#allocation8 + $0x2cc] sm:$0xf]  ;;  %v7316_v63 = vor.u32 %v10409_v49, %v7313_v50 }
 0x11f   :  { %2493 = vmatpush.bf16.msrb.mxu2 %v7760_v25  ;;  %2467 = vmatmul.bf16.vlgmr.msrb.gmra.mxu0 %v11509_v24  ;;  %v7569_v52 = vld [vmem:[#allocation8 + $0x2e8] sm:$0xf0] }
 0x120   :  { %2515 = vmatpush.bf16.msra.mxu0 %v7444_v8  ;;  %2507 = vmatpush.bf16.msrb.mxu3 %v8016_v11  ;;  %v10545_v61 = vld [vmem:[#allocation8 + $0x50c] sm:$0xf]  ;;  %v7572_v0 = vor.u32 %v10473_v51, %v7569_v52 }
 0x121   :  { %2529 = vmatpush.bf16.msra.mxu1 %v7700_v9  ;;  %v7857_v62 = vld [vmem:[#allocation8 + $0x528] sm:$0xf0] }
 0x122   :  { %2481 = vmatmul.bf16.vlgmr.msrb.gmra.mxu1 %v11511_v31  ;;  %v10609_v2 = vld [vmem:[#allocation8 + $0x70c] sm:$0xf]  ;;  %v7860_v8 = vor.u32 %v10545_v61, %v7857_v62 }
 0x123   :  { %2494 = vmatpush.bf16.msrb.mxu2 %v7728_v21  ;;  %v8113_v3 = vld [vmem:[#allocation8 + $0x728] sm:$0xf0] }
 0x124   :  { %2516 = vmatpush.bf16.msra.mxu0 %v7412_v16  ;;  %2508 = vmatpush.bf16.msrb.mxu3 %v7984_v28  ;;  %v10401_v4 = vld [vmem:[#allocation8 + $0x8c] sm:$0xf]  ;;  %v8116_v9 = vor.u32 %v10609_v2, %v8113_v3  ;;  %v7383_v3 = vld [vmem:[#allocation8 + $0x150] sm:$0xf] }
 0x125   :  { %2530 = vmatpush.bf16.msra.mxu1 %v7668_v17  ;;  %v7281_v5 = vld [vmem:[#allocation8 + $0xa8] sm:$0xf0] }
 0x126   :  { %2495 = vmatmul.bf16.vlgmr.msrb.gmra.mxu2 %v11515_v58  ;;  %v10465_v6 = vld [vmem:[#allocation8 + $0x28c] sm:$0xf]  ;;  %v7284_v10 = vor.u32 %v10401_v4, %v7281_v5  ;;  %v10430_v4 = vld [vmem:[#allocation8 + $0x16c] sm:$0xf0] }
 0x127   :  { %2543 = vmatpush.bf16.msra.mxu2 %v7956_v29  ;;  %2509 = vmatmul.bf16.vlgmr.msrb.gmra.mxu3 %v11517_v1  ;;  %v7537_v7 = vld [vmem:[#allocation8 + $0x2a8] sm:$0xf0]  ;;  %v7447_v29 = vld [vmem:[#allocation8 + $0x1d0] sm:$0xf] }
 0x128   :  { %2557 = vmatpush.bf16.msra.mxu3 %v8212_v30  ;;  %2517 = vmatpush.bf16.msra.mxu0 %v7380_v34  ;;  %v10537_v22 = vld [vmem:[#allocation8 + $0x4cc] sm:$0xf]  ;;  %v7540_v57 = vor.u32 %v10465_v6, %v7537_v7  ;;  %v10510_v34 = vld [vmem:[#allocation8 + $0x3ec] sm:$0xf0] }
 0x129   :  { %2531 = vmatpush.bf16.msra.mxu1 %v7636_v35  ;;  %v7825_v25 = vld [vmem:[#allocation8 + $0x4e8] sm:$0xf0]  ;;  %v7639_v7 = vld [vmem:[#allocation8 + $0x350] sm:$0xf] }
 0x12a   :  { %v10601_v53 = vld [vmem:[#allocation8 + $0x6cc] sm:$0xf]  ;;  %v7828_v55 = vor.u32 %v10537_v22, %v7825_v25  ;;  %v7927_v22 = vld [vmem:[#allocation8 + $0x590] sm:$0xf] }
 0x12b   :  { %2544 = vmatpush.bf16.msra.mxu2 %v7924_v42  ;;  %v8081_v11 = vld [vmem:[#allocation8 + $0x6e8] sm:$0xf0]  ;;  %v7448_v42 = vor.u32 %v10446_v32, %v7447_v29  ;;  %v10566_v25 = vld [vmem:[#allocation8 + $0x5ac] sm:$0xf0] }
 0x12c   :  { %2558 = vmatpush.bf16.msra.mxu3 %v8180_v43  ;;  %2518 = vmatpush.bf16.msra.mxu0 %v7348_v46  ;;  %v10393_v12 = vld [vmem:[#allocation8 + $0x4c] sm:$0xf]  ;;  %v8084_v59 = vor.u32 %v10601_v53, %v8081_v11  ;;  %v7704_v43 = vor.u32 %v10510_v34, %v7703_v33  ;;  %v10438_v46 = vld [vmem:[#allocation8 + $0x1ac] sm:$0xf0] }
 0x12d   :  { %2532 = vmatpush.bf16.msra.mxu1 %v7604_v47  ;;  %v7249_v13 = vld [vmem:[#allocation8 + $0x68] sm:$0xf0]  ;;  %v7671_v47 = vld [vmem:[#allocation8 + $0x390] sm:$0xf]  ;;  %v7416_v61 = vor.u32 %v10438_v46, %v7415_v44 }
 0x12e   :  { %v10457_v14 = vld [vmem:[#allocation8 + $0x24c] sm:$0xf]  ;;  %v7252_v19 = vor.u32 %v10393_v12, %v7249_v13  ;;  %v7672_v62 = vor.u32 %v10502_v48, %v7671_v47  ;;  %v10630_v53 = vld [vmem:[#allocation8 + $0x7ac] sm:$0xf0] }
 0x12f   :  { %2545 = vmatpush.bf16.msra.mxu2 %v7892_v56  ;;  %v7505_v15 = vld [vmem:[#allocation8 + $0x268] sm:$0xf0]  ;;  %v7959_v56 = vld [vmem:[#allocation8 + $0x5d0] sm:$0xf] }
 0x130   :  { %2559 = vmatpush.bf16.msra.mxu3 %v8148_v60  ;;  %2519 = vmatpush.bf16.msra.mxu0 %v7316_v63  ;;  %v10529_v16 = vld [vmem:[#allocation8 + $0x48c] sm:$0xf]  ;;  %v7508_v20 = vor.u32 %v10457_v14, %v7505_v15  ;;  %v10574_v60 = vld [vmem:[#allocation8 + $0x5ec] sm:$0xf0]  ;;  %v7928_v14 = vor.u32 %v10566_v25, %v7927_v22  ;;  %v7449_v22 = vld [vmem:[#allocation8 + $0x1f0] sm:$0xf0] }
 0x131   :  { %2533 = vmatpush.bf16.msra.mxu1 %v7572_v0  ;;  %v7793_v17 = vld [vmem:[#allocation8 + $0x4a8] sm:$0xf0]  ;;  %v8215_v63 = vld [vmem:[#allocation8 + $0x7d0] sm:$0xf]  ;;  %v7960_v6 = vor.u32 %v10574_v60, %v7959_v56  ;;  %v10506_v25 = vld [vmem:[#allocation8 + $0x3d4] sm:$0xf] }
 0x132   :  { %v10593_v18 = vld [vmem:[#allocation8 + $0x68c] sm:$0xf]  ;;  %v7796_v30 = vor.u32 %v10529_v16, %v7793_v17  ;;  %v10638_v0 = vld [vmem:[#allocation8 + $0x7ec] sm:$0xf0] }
 0x133   :  { %2546 = vmatpush.bf16.msra.mxu2 %v7860_v8  ;;  %v8049_v21 = vld [vmem:[#allocation8 + $0x6a8] sm:$0xf0]  ;;  %v10494_v8 = vld [vmem:[#allocation8 + $0x36c] sm:$0xf0] }
 0x134   :  { %2560 = vmatpush.bf16.msra.mxu3 %v8116_v9  ;;  %2520 = vmatpush.bf16.msra.mxu0 %v7284_v10  ;;  %v10385_v23 = vld [vmem:[#allocation8 + $0xc] sm:$0xf]  ;;  %v8052_v35 = vor.u32 %v10593_v18, %v8049_v21  ;;  %v8216_v9 = vor.u32 %v10638_v0, %v8215_v63  ;;  %v7384_v10 = vor.u32 %v10430_v4, %v7383_v3  ;;  %v7351_v12 = vld [vmem:[#allocation8 + $0x110] sm:$0xf] }
 0x135   :  { %2534 = vmatpush.bf16.msra.mxu1 %v7540_v57  ;;  %v7217_v26 = vld [vmem:[#allocation8 + $0x28] sm:$0xf0]  ;;  %v8183_v57 = vld [vmem:[#allocation8 + $0x790] sm:$0xf]  ;;  %v7640_v11 = vor.u32 %v10494_v8, %v7639_v7 }
 0x136   :  { %v10449_v27 = vld [vmem:[#allocation8 + $0x20c] sm:$0xf]  ;;  %v7220_v38 = vor.u32 %v10385_v23, %v7217_v26  ;;  %v10422_v13 = vld [vmem:[#allocation8 + $0x12c] sm:$0xf0] }
 0x137   :  { %v7473_v28 = vld [vmem:[#allocation8 + $0x228] sm:$0xf0]  ;;  %2547 = vmatpush.bf16.msra.mxu2 %v7828_v55  ;;  %v7607_v15 = vld [vmem:[#allocation8 + $0x310] sm:$0xf]  ;;  %v7352_v18 = vor.u32 %v10422_v13, %v7351_v12 }
 0x138   :  { %2561 = vmatpush.bf16.msra.mxu3 %v8084_v59  ;;  %v10521_v36 = vld [vmem:[#allocation8 + $0x44c] sm:$0xf]  ;;  %2521 = vmatpush.bf16.msra.mxu0 %v7252_v19  ;;  %v7476_v39 = vor.u32 %v10449_v27, %v7473_v28  ;;  %v10486_v55 = vld [vmem:[#allocation8 + $0x32c] sm:$0xf0]  ;;  %v8184_v59 = vor.u32 %v10630_v53, %v8183_v57  ;;  %v7705_v57 = vld [vmem:[#allocation8 + $0x3f0] sm:$0xf0] }
 0x139   :  { %v7761_v37 = vld [vmem:[#allocation8 + $0x468] sm:$0xf0]  ;;  %2535 = vmatpush.bf16.msra.mxu1 %v7508_v20  ;;  %v7895_v16 = vld [vmem:[#allocation8 + $0x550] sm:$0xf]  ;;  %v7608_v21 = vor.u32 %v10486_v55, %v7607_v15 }
 0x13a   :  { %v10585_v40 = vld [vmem:[#allocation8 + $0x64c] sm:$0xf]  ;;  %v7764_v45 = vor.u32 %v10521_v36, %v7761_v37  ;;  %v10558_v17 = vld [vmem:[#allocation8 + $0x56c] sm:$0xf0] }
 0x13b   :  { %v8017_v41 = vld [vmem:[#allocation8 + $0x668] sm:$0xf0]  ;;  %2548 = vmatpush.bf16.msra.mxu2 %v7796_v30  ;;  %v8151_v19 = vld [vmem:[#allocation8 + $0x750] sm:$0xf]  ;;  %v7896_v27 = vor.u32 %v10558_v17, %v7895_v16  ;;  %v7708_v16 = vor.u32 %v10506_v25, %v7705_v57  ;;  %v7865_v25 = vld [vmem:[#allocation8 + $0x530] sm:$0xf0] }
 0x13c   :  { %2562 = vmatpush.bf16.msra.mxu3 %v8052_v35  ;;  %v8020_v54 = vor.u32 %v10585_v40, %v8017_v41  ;;  %v10513_v49 = vld [vmem:[#allocation8 + $0x40c] sm:$0xf]  ;;  %2522 = vmatpush.bf16.msra.mxu0 %v7220_v38  ;;  %v10622_v20 = vld [vmem:[#allocation8 + $0x76c] sm:$0xf0]  ;;  %v10610_v57 = vld [vmem:[#allocation8 + $0x714] sm:$0xf] }
 0x13d   :  { %v7729_v50 = vld [vmem:[#allocation8 + $0x428] sm:$0xf0]  ;;  %2536 = vmatpush.bf16.msra.mxu1 %v7476_v39  ;;  %v7319_v23 = vld [vmem:[#allocation8 + $0xd0] sm:$0xf]  ;;  %v8152_v30 = vor.u32 %v10622_v20, %v8151_v19  ;;  %v10498_v19 = vld [vmem:[#allocation8 + $0x394] sm:$0xf] }
 0x13e   :  { %v10577_v51 = vld [vmem:[#allocation8 + $0x60c] sm:$0xf]  ;;  %v7732_v2 = vor.u32 %v10513_v49, %v7729_v50  ;;  %v10414_v26 = vld [vmem:[#allocation8 + $0xec] sm:$0xf0]  ;;  %v7673_v20 = vld [vmem:[#allocation8 + $0x3b0] sm:$0xf0] }
 0x13f   :  { %v7985_v52 = vld [vmem:[#allocation8 + $0x628] sm:$0xf0]  ;;  %2549 = vmatpush.bf16.msra.mxu2 %v7764_v45  ;;  %2523 = vmatmul.bf16.vlgmr.msra.gmra.mxu0 %v11509_v24  ;;  %v7575_v28 = vld [vmem:[#allocation8 + $0x2d0] sm:$0xf]  ;;  %v7320_v34 = vor.u32 %v10414_v26, %v7319_v23 }
 0x140   :  { %2571 = vmatpush.bf16.msrb.mxu0 %v7448_v42  ;;  %2563 = vmatpush.bf16.msra.mxu3 %v8020_v54  ;;  %v7988_v5 = vor.u32 %v10577_v51, %v7985_v52  ;;  %v10478_v29 = vld [vmem:[#allocation8 + $0x2ec] sm:$0xf0] }
 0x141   :  { %2585 = vmatpush.bf16.msrb.mxu1 %v7704_v43  ;;  %v7863_v32 = vld [vmem:[#allocation8 + $0x510] sm:$0xf]  ;;  %v7576_v37 = vor.u32 %v10478_v29, %v7575_v28  ;;  %v10570_v29 = vld [vmem:[#allocation8 + $0x5d4] sm:$0xf] }
 0x142   :  { %2537 = vmatmul.bf16.vlgmr.msra.gmra.mxu1 %v11511_v31  ;;  %v10550_v33 = vld [vmem:[#allocation8 + $0x52c] sm:$0xf0] }
 0x143   :  { %2550 = vmatpush.bf16.msra.mxu2 %v7732_v2  ;;  %v8119_v35 = vld [vmem:[#allocation8 + $0x710] sm:$0xf]  ;;  %v7864_v40 = vor.u32 %v10550_v33, %v7863_v32  ;;  %v10634_v33 = vld [vmem:[#allocation8 + $0x7d4] sm:$0xf] }
 0x144   :  { %2572 = vmatpush.bf16.msrb.mxu0 %v7416_v61  ;;  %2564 = vmatpush.bf16.msra.mxu3 %v7988_v5  ;;  %v10614_v36 = vld [vmem:[#allocation8 + $0x72c] sm:$0xf0] }
 0x145   :  { %2586 = vmatpush.bf16.msrb.mxu1 %v7672_v62  ;;  %v7287_v38 = vld [vmem:[#allocation8 + $0x90] sm:$0xf]  ;;  %v8120_v43 = vor.u32 %v10614_v36, %v8119_v35  ;;  %v7676_v35 = vor.u32 %v10498_v19, %v7673_v20  ;;  %v10602_v19 = vld [vmem:[#allocation8 + $0x6d4] sm:$0xf] }
 0x146   :  { %2551 = vmatmul.bf16.vlgmr.msra.gmra.mxu2 %v11515_v58  ;;  %v10406_v39 = vld [vmem:[#allocation8 + $0xac] sm:$0xf0]  ;;  %v8089_v20 = vld [vmem:[#allocation8 + $0x6f0] sm:$0xf0] }
 0x147   :  { %2599 = vmatpush.bf16.msrb.mxu2 %v7960_v6  ;;  %2565 = vmatmul.bf16.vlgmr.msra.gmra.mxu3 %v11517_v1  ;;  %v7543_v41 = vld [vmem:[#allocation8 + $0x290] sm:$0xf]  ;;  %v7288_v46 = vor.u32 %v10406_v39, %v7287_v38  ;;  %v7385_v38 = vld [vmem:[#allocation8 + $0x170] sm:$0xf0] }
 0x148   :  { %2613 = vmatpush.bf16.msrb.mxu3 %v8216_v9  ;;  %2573 = vmatpush.bf16.msrb.mxu0 %v7384_v10  ;;  %v10470_v42 = vld [vmem:[#allocation8 + $0x2ac] sm:$0xf0]  ;;  %v10442_v9 = vld [vmem:[#allocation8 + $0x1d4] sm:$0xf] }
 0x149   :  { %2587 = vmatpush.bf16.msrb.mxu1 %v7640_v11  ;;  %v7831_v44 = vld [vmem:[#allocation8 + $0x4d0] sm:$0xf]  ;;  %v7544_v54 = vor.u32 %v10470_v42, %v7543_v41  ;;  %v7452_v55 = vor.u32 %v10442_v9, %v7449_v22  ;;  %v10490_v41 = vld [vmem:[#allocation8 + $0x354] sm:$0xf] }
 0x14a   :  { %v10542_v45 = vld [vmem:[#allocation8 + $0x4ec] sm:$0xf0]  ;;  %v7641_v42 = vld [vmem:[#allocation8 + $0x370] sm:$0xf0] }
 0x14b   :  { %2600 = vmatpush.bf16.msrb.mxu2 %v7928_v14  ;;  %v8087_v47 = vld [vmem:[#allocation8 + $0x6d0] sm:$0xf]  ;;  %v7832_v51 = vor.u32 %v10542_v45, %v7831_v44  ;;  %v10562_v44 = vld [vmem:[#allocation8 + $0x594] sm:$0xf] }
 0x14c   :  { %2614 = vmatpush.bf16.msrb.mxu3 %v8184_v59  ;;  %2574 = vmatpush.bf16.msrb.mxu0 %v7352_v18  ;;  %v10606_v48 = vld [vmem:[#allocation8 + $0x6ec] sm:$0xf0]  ;;  %v10434_v59 = vld [vmem:[#allocation8 + $0x194] sm:$0xf] }
 0x14d   :  { %2588 = vmatpush.bf16.msrb.mxu1 %v7608_v21  ;;  %v7255_v49 = vld [vmem:[#allocation8 + $0x50] sm:$0xf]  ;;  %v8088_v60 = vor.u32 %v10606_v48, %v8087_v47  ;;  %v7417_v18 = vld [vmem:[#allocation8 + $0x1b0] sm:$0xf0] }
 0x14e   :  { %v10398_v50 = vld [vmem:[#allocation8 + $0x6c] sm:$0xf0]  ;;  %v7420_v32 = vor.u32 %v10434_v59, %v7417_v18  ;;  %v7929_v45 = vld [vmem:[#allocation8 + $0x5b0] sm:$0xf0] }
 0x14f   :  { %2601 = vmatpush.bf16.msrb.mxu2 %v7896_v27  ;;  %v7511_v52 = vld [vmem:[#allocation8 + $0x250] sm:$0xf]  ;;  %v7256_v63 = vor.u32 %v10398_v50, %v7255_v49  ;;  %v10626_v47 = vld [vmem:[#allocation8 + $0x794] sm:$0xf] }
 0x150   :  { %2615 = vmatpush.bf16.msrb.mxu3 %v8152_v30  ;;  %2575 = vmatpush.bf16.msrb.mxu0 %v7320_v34  ;;  %v10462_v56 = vld [vmem:[#allocation8 + $0x26c] sm:$0xf0]  ;;  %v7961_v30 = vld [vmem:[#allocation8 + $0x5f0] sm:$0xf0] }
 0x151   :  { %2589 = vmatpush.bf16.msrb.mxu1 %v7576_v37  ;;  %v7799_v61 = vld [vmem:[#allocation8 + $0x490] sm:$0xf]  ;;  %v7512_v4 = vor.u32 %v10462_v56, %v7511_v52  ;;  %v8217_v34 = vld [vmem:[#allocation8 + $0x7f0] sm:$0xf0] }
 0x152   :  { %v10534_v62 = vld [vmem:[#allocation8 + $0x4ac] sm:$0xf0]  ;;  %v10426_v37 = vld [vmem:[#allocation8 + $0x154] sm:$0xf] }
 0x153   :  { %2602 = vmatpush.bf16.msrb.mxu2 %v7864_v40  ;;  %v8055_v0 = vld [vmem:[#allocation8 + $0x690] sm:$0xf]  ;;  %v7800_v8 = vor.u32 %v10534_v62, %v7799_v61  ;;  %v7964_v40 = vor.u32 %v10570_v29, %v7961_v30  ;;  %v8185_v48 = vld [vmem:[#allocation8 + $0x7b0] sm:$0xf0]  ;;  %v8092_v30 = vor.u32 %v10602_v19, %v8089_v20  ;;  %v8191_v19 = vld [vmem:[#allocation8 + $0x798] sm:$0xf] }
 0x154   :  { %2616 = vmatpush.bf16.msrb.mxu3 %v8120_v43  ;;  %2576 = vmatpush.bf16.msrb.mxu0 %v7288_v46  ;;  %v10598_v2 = vld [vmem:[#allocation8 + $0x6ac] sm:$0xf0]  ;;  %v8220_v43 = vor.u32 %v10634_v33, %v8217_v34  ;;  %v7388_v46 = vor.u32 %v10426_v37, %v7385_v38  ;;  %v10418_v49 = vld [vmem:[#allocation8 + $0x114] sm:$0xf]  ;;  %v10631_v20 = vld [vmem:[#allocation8 + $0x7b4] sm:$0xf0] }
 0x155   :  { %v7223_v3 = vld [vmem:[#allocation8 + $0x10] sm:$0xf]  ;;  %2590 = vmatpush.bf16.msrb.mxu1 %v7544_v54  ;;  %v8056_v10 = vor.u32 %v10598_v2, %v8055_v0  ;;  %v7644_v54 = vor.u32 %v10490_v41, %v7641_v42  ;;  %v7353_v50 = vld [vmem:[#allocation8 + $0x130] sm:$0xf0] }
 0x156   :  { %v10390_v5 = vld [vmem:[#allocation8 + $0x2c] sm:$0xf0]  ;;  %v10482_v52 = vld [vmem:[#allocation8 + $0x314] sm:$0xf] }
 0x157   :  { %v7479_v6 = vld [vmem:[#allocation8 + $0x210] sm:$0xf]  ;;  %2603 = vmatpush.bf16.msrb.mxu2 %v7832_v51  ;;  %v7224_v12 = vor.u32 %v10390_v5, %v7223_v3  ;;  %v7932_v51 = vor.u32 %v10562_v44, %v7929_v45  ;;  %v7609_v56 = vld [vmem:[#allocation8 + $0x330] sm:$0xf0]  ;;  %v10447_v44 = vld [vmem:[#allocation8 + $0x1f4] sm:$0xf0] }
 0x158   :  { %v10454_v7 = vld [vmem:[#allocation8 + $0x22c] sm:$0xf0]  ;;  %2617 = vmatpush.bf16.msrb.mxu3 %v8088_v60  ;;  %2577 = vmatpush.bf16.msrb.mxu0 %v7256_v63  ;;  %v8188_v60 = vor.u32 %v10626_v47, %v8185_v48  ;;  %v10554_v61 = vld [vmem:[#allocation8 + $0x554] sm:$0xf]  ;;  %v7356_v63 = vor.u32 %v10418_v49, %v7353_v50  ;;  %v7612_v3 = vor.u32 %v10482_v52, %v7609_v56  ;;  %v7711_v45 = vld [vmem:[#allocation8 + $0x3d8] sm:$0xf] }
 0x159   :  { %v7767_v53 = vld [vmem:[#allocation8 + $0x450] sm:$0xf]  ;;  %2591 = vmatpush.bf16.msrb.mxu1 %v7512_v4  ;;  %v7480_v15 = vor.u32 %v10454_v7, %v7479_v6  ;;  %v7897_v62 = vld [vmem:[#allocation8 + $0x570] sm:$0xf0]  ;;  %v10511_v47 = vld [vmem:[#allocation8 + $0x3f4] sm:$0xf0] }
 0x15a   :  { %v10526_v11 = vld [vmem:[#allocation8 + $0x46c] sm:$0xf0]  ;;  %v10618_v0 = vld [vmem:[#allocation8 + $0x754] sm:$0xf]  ;;  %v7900_v6 = vor.u32 %v10554_v61, %v7897_v62  ;;  %v7712_v61 = vor.u32 %v10511_v47, %v7711_v45  ;;  %v7871_v45 = vld [vmem:[#allocation8 + $0x518] sm:$0xf] }
 0x15b   :  { %v8023_v13 = vld [vmem:[#allocation8 + $0x650] sm:$0xf]  ;;  %2604 = vmatpush.bf16.msrb.mxu2 %v7800_v8  ;;  %v7768_v17 = vor.u32 %v10526_v11, %v7767_v53  ;;  %v8153_v2 = vld [vmem:[#allocation8 + $0x770] sm:$0xf0] }
 0x15c   :  { %v10590_v14 = vld [vmem:[#allocation8 + $0x66c] sm:$0xf0]  ;;  %2618 = vmatpush.bf16.msrb.mxu3 %v8056_v10  ;;  %2578 = vmatpush.bf16.msrb.mxu0 %v7224_v12  ;;  %v10410_v4 = vld [vmem:[#allocation8 + $0xd4] sm:$0xf]  ;;  %v8156_v9 = vor.u32 %v10618_v0, %v8153_v2  ;;  %v7679_v0 = vld [vmem:[#allocation8 + $0x398] sm:$0xf] }
 0x15d   :  { %v8024_v21 = vor.u32 %v10590_v14, %v8023_v13  ;;  %v7735_v23 = vld [vmem:[#allocation8 + $0x410] sm:$0xf]  ;;  %2592 = vmatpush.bf16.msrb.mxu1 %v7480_v15  ;;  %v7321_v5 = vld [vmem:[#allocation8 + $0xf0] sm:$0xf0]  ;;  %v10503_v2 = vld [vmem:[#allocation8 + $0x3b4] sm:$0xf0] }
 0x15e   :  { %v10518_v26 = vld [vmem:[#allocation8 + $0x42c] sm:$0xf0]  ;;  %v10474_v7 = vld [vmem:[#allocation8 + $0x2d4] sm:$0xf]  ;;  %v7324_v10 = vor.u32 %v10410_v4, %v7321_v5 }
 0x15f   :  { %v7991_v27 = vld [vmem:[#allocation8 + $0x610] sm:$0xf]  ;;  %2605 = vmatpush.bf16.msrb.mxu2 %v7768_v17  ;;  %v7736_v36 = vor.u32 %v10518_v26, %v7735_v23  ;;  %2579 = vmatmul.bf16.vlgmr.msrb.gmra.mxu0 %v11509_v24  ;;  %v7577_v8 = vld [vmem:[#allocation8 + $0x2f0] sm:$0xf0] }
 0x160   :  { %v10582_v28 = vld [vmem:[#allocation8 + $0x62c] sm:$0xf0]  ;;  %2627 = vmatpush.bf16.msra.mxu0 %v7452_v55  ;;  %2619 = vmatpush.bf16.msrb.mxu3 %v8024_v21  ;;  %v10546_v22 = vld [vmem:[#allocation8 + $0x514] sm:$0xf]  ;;  %v7580_v11 = vor.u32 %v10474_v7, %v7577_v8  ;;  %v7967_v8 = vld [vmem:[#allocation8 + $0x5d8] sm:$0xf] }
 0x161   :  { %2641 = vmatpush.bf16.msra.mxu1 %v7708_v16  ;;  %v7992_v39 = vor.u32 %v10582_v28, %v7991_v27  ;;  %v8121_v53 = vld [vmem:[#allocation8 + $0x730] sm:$0xf0]  ;;  %v7868_v14 = vor.u32 %v10546_v22, %v7865_v25  ;;  %v8223_v25 = vld [vmem:[#allocation8 + $0x7d8] sm:$0xf] }
 0x162   :  { %2593 = vmatmul.bf16.vlgmr.msrb.gmra.mxu1 %v11511_v31  ;;  %v10402_v12 = vld [vmem:[#allocation8 + $0x94] sm:$0xf]  ;;  %v8124_v59 = vor.u32 %v10610_v57, %v8121_v53  ;;  %v7680_v57 = vor.u32 %v10503_v2, %v7679_v0  ;;  %v10543_v0 = vld [vmem:[#allocation8 + $0x4f4] sm:$0xf0]  ;;  %v11545_v2 = vld [vmem:[#allocation10] sm:$0xff] }
 0x163   :  { %2606 = vmatpush.bf16.msrb.mxu2 %v7736_v36  ;;  %v7289_v13 = vld [vmem:[#allocation8 + $0xb0] sm:$0xf0] }
 0x164   :  { %2628 = vmatpush.bf16.msra.mxu0 %v7420_v32  ;;  %2620 = vmatpush.bf16.msrb.mxu3 %v7992_v39  ;;  %v10466_v15 = vld [vmem:[#allocation8 + $0x294] sm:$0xf]  ;;  %v7292_v18 = vor.u32 %v10402_v12, %v7289_v13  ;;  %v10431_v12 = vld [vmem:[#allocation8 + $0x174] sm:$0xf0] }
 0x165   :  { %2642 = vmatpush.bf16.msra.mxu1 %v7676_v35  ;;  %v7545_v55 = vld [vmem:[#allocation8 + $0x2b0] sm:$0xf0] }
 0x166   :  { %2607 = vmatmul.bf16.vlgmr.msrb.gmra.mxu2 %v11515_v58  ;;  %v10538_v16 = vld [vmem:[#allocation8 + $0x4d4] sm:$0xf]  ;;  %v7548_v21 = vor.u32 %v10466_v15, %v7545_v55  ;;  %v7647_v15 = vld [vmem:[#allocation8 + $0x358] sm:$0xf] }
 0x167   :  { %2655 = vmatpush.bf16.msra.mxu2 %v7964_v40  ;;  %2621 = vmatmul.bf16.vlgmr.msrb.gmra.mxu3 %v11517_v1  ;;  %v7833_v17 = vld [vmem:[#allocation8 + $0x4f0] sm:$0xf0]  ;;  %v10495_v55 = vld [vmem:[#allocation8 + $0x374] sm:$0xf0] }
 0x168   :  { %2669 = vmatpush.bf16.msra.mxu3 %v8220_v43  ;;  %2629 = vmatpush.bf16.msra.mxu0 %v7388_v46  ;;  %v10394_v23 = vld [vmem:[#allocation8 + $0x54] sm:$0xf]  ;;  %v7836_v27 = vor.u32 %v10538_v16, %v7833_v17  ;;  %v7455_v43 = vld [vmem:[#allocation8 + $0x1d8] sm:$0xf] }
 0x169   :  { %2643 = vmatpush.bf16.msra.mxu1 %v7644_v54  ;;  %v7257_v26 = vld [vmem:[#allocation8 + $0x70] sm:$0xf0]  ;;  %v7456_v56 = vor.u32 %v10447_v44, %v7455_v43  ;;  %v7935_v16 = vld [vmem:[#allocation8 + $0x598] sm:$0xf] }
 0x16a   :  { %v10458_v28 = vld [vmem:[#allocation8 + $0x254] sm:$0xf]  ;;  %v7260_v34 = vor.u32 %v10394_v23, %v7257_v26  ;;  %v10567_v17 = vld [vmem:[#allocation8 + $0x5b4] sm:$0xf0] }
 0x16b   :  { %2656 = vmatpush.bf16.msra.mxu2 %v7932_v51  ;;  %v7513_v29 = vld [vmem:[#allocation8 + $0x270] sm:$0xf0]  ;;  %v7359_v23 = vld [vmem:[#allocation8 + $0x118] sm:$0xf] }
 0x16c   :  { %2670 = vmatpush.bf16.msra.mxu3 %v8188_v60  ;;  %2630 = vmatpush.bf16.msra.mxu0 %v7356_v63  ;;  %v10530_v32 = vld [vmem:[#allocation8 + $0x494] sm:$0xf]  ;;  %v7516_v38 = vor.u32 %v10458_v28, %v7513_v29  ;;  %v7423_v60 = vld [vmem:[#allocation8 + $0x198] sm:$0xf] }
 0x16d   :  { %2644 = vmatpush.bf16.msra.mxu1 %v7612_v3  ;;  %v7801_v33 = vld [vmem:[#allocation8 + $0x4b0] sm:$0xf0]  ;;  %v10439_v63 = vld [vmem:[#allocation8 + $0x1b4] sm:$0xf0] }
 0x16e   :  { %v10594_v35 = vld [vmem:[#allocation8 + $0x694] sm:$0xf]  ;;  %v7804_v42 = vor.u32 %v10530_v32, %v7801_v33  ;;  %v7424_v22 = vor.u32 %v10439_v63, %v7423_v60  ;;  %v10423_v26 = vld [vmem:[#allocation8 + $0x134] sm:$0xf0]  ;;  %v8192_v32 = vor.u32 %v10631_v20, %v8191_v19 }
 0x16f   :  { %2657 = vmatpush.bf16.msra.mxu2 %v7900_v6  ;;  %v8057_v36 = vld [vmem:[#allocation8 + $0x6b0] sm:$0xf0]  ;;  %v7615_v28 = vld [vmem:[#allocation8 + $0x318] sm:$0xf] }
 0x170   :  { %2671 = vmatpush.bf16.msra.mxu3 %v8156_v9  ;;  %2631 = vmatpush.bf16.msra.mxu0 %v7324_v10  ;;  %v10386_v37 = vld [vmem:[#allocation8 + $0x14] sm:$0xf]  ;;  %v8060_v46 = vor.u32 %v10594_v35, %v8057_v36  ;;  %v10575_v9 = vld [vmem:[#allocation8 + $0x5f4] sm:$0xf0]  ;;  %v7360_v35 = vor.u32 %v10423_v26, %v7359_v23  ;;  %v10443_v26 = vld [vmem:[#allocation8 + $0x1dc] sm:$0xf] }
 0x171   :  { %2645 = vmatpush.bf16.msra.mxu1 %v7580_v11  ;;  %v7225_v39 = vld [vmem:[#allocation8 + $0x30] sm:$0xf0]  ;;  %v10639_v10 = vld [vmem:[#allocation8 + $0x7f4] sm:$0xf0] }
 0x172   :  { %v10450_v40 = vld [vmem:[#allocation8 + $0x214] sm:$0xf]  ;;  %v7228_v49 = vor.u32 %v10386_v37, %v7225_v39  ;;  %v7391_v11 = vld [vmem:[#allocation8 + $0x158] sm:$0xf] }
 0x173   :  { %2658 = vmatpush.bf16.msra.mxu2 %v7868_v14  ;;  %v7481_v41 = vld [vmem:[#allocation8 + $0x230] sm:$0xf0]  ;;  %v7968_v14 = vor.u32 %v10575_v9, %v7967_v8  ;;  %v10487_v29 = vld [vmem:[#allocation8 + $0x334] sm:$0xf0] }
 0x174   :  { %2672 = vmatpush.bf16.msra.mxu3 %v8124_v59  ;;  %2632 = vmatpush.bf16.msra.mxu0 %v7292_v18  ;;  %v10522_v48 = vld [vmem:[#allocation8 + $0x454] sm:$0xf]  ;;  %v7484_v52 = vor.u32 %v10450_v40, %v7481_v41  ;;  %v8224_v59 = vor.u32 %v10639_v10, %v8223_v25  ;;  %v7392_v18 = vor.u32 %v10431_v12, %v7391_v11  ;;  %v7903_v33 = vld [vmem:[#allocation8 + $0x558] sm:$0xf] }
 0x175   :  { %2646 = vmatpush.bf16.msra.mxu1 %v7548_v21  ;;  %v7769_v54 = vld [vmem:[#allocation8 + $0x470] sm:$0xf0]  ;;  %v7648_v21 = vor.u32 %v10495_v55, %v7647_v15  ;;  %v8159_v36 = vld [vmem:[#allocation8 + $0x758] sm:$0xf] }
 0x176   :  { %v10586_v50 = vld [vmem:[#allocation8 + $0x654] sm:$0xf]  ;;  %v7772_v62 = vor.u32 %v10522_v48, %v7769_v54  ;;  %v10623_v37 = vld [vmem:[#allocation8 + $0x774] sm:$0xf0] }
 0x177   :  { %2659 = vmatpush.bf16.msra.mxu2 %v7836_v27  ;;  %v8025_v51 = vld [vmem:[#allocation8 + $0x670] sm:$0xf0]  ;;  %v7936_v27 = vor.u32 %v10567_v17, %v7935_v16  ;;  %v7327_v39 = vld [vmem:[#allocation8 + $0xd8] sm:$0xf]  ;;  %v8160_v44 = vor.u32 %v10623_v37, %v8159_v36 }
 0x178   :  { %2673 = vmatpush.bf16.msra.mxu3 %v8092_v30  ;;  %2633 = vmatpush.bf16.msra.mxu0 %v7260_v34  ;;  %v8028_v3 = vor.u32 %v10586_v50, %v8025_v51  ;;  %v10514_v4 = vld [vmem:[#allocation8 + $0x414] sm:$0xf]  ;;  %v10559_v34 = vld [vmem:[#allocation8 + $0x574] sm:$0xf0] }
 0x179   :  { %2647 = vmatpush.bf16.msra.mxu1 %v7516_v38  ;;  %v7737_v5 = vld [vmem:[#allocation8 + $0x430] sm:$0xf0]  ;;  %v7616_v38 = vor.u32 %v10487_v29, %v7615_v28  ;;  %v10415_v40 = vld [vmem:[#allocation8 + $0xf4] sm:$0xf0]  ;;  %v7904_v41 = vor.u32 %v10559_v34, %v7903_v33  ;;  %v10507_v28 = vld [vmem:[#allocation8 + $0x3dc] sm:$0xf] }
 0x17a   :  { %v10578_v6 = vld [vmem:[#allocation8 + $0x614] sm:$0xf]  ;;  %v7740_v53 = vor.u32 %v10514_v4, %v7737_v5  ;;  %v10479_v43 = vld [vmem:[#allocation8 + $0x2f4] sm:$0xf0]  ;;  %v7328_v48 = vor.u32 %v10415_v40, %v7327_v39 }
 0x17b   :  { %2660 = vmatpush.bf16.msra.mxu2 %v7804_v42  ;;  %v7993_v7 = vld [vmem:[#allocation8 + $0x630] sm:$0xf0]  ;;  %v11539_v30 = vpop.f32.mrf.mxu0  ;;  %v7583_v42 = vld [vmem:[#allocation8 + $0x2d8] sm:$0xf] }
 0x17c   :  { %2674 = vmatpush.bf16.msra.mxu3 %v8060_v46  ;;  %2634 = vmatpush.bf16.msra.mxu0 %v7228_v49  ;;  %v7996_v13 = vor.u32 %v10578_v6, %v7993_v7  ;;  %v10551_v46 = vld [vmem:[#allocation8 + $0x534] sm:$0xf0]  ;;  %v11543_v47 = vpop.f32.mrf.mxu1  ;;  %v7584_v50 = vor.u32 %v10479_v43, %v7583_v42  ;;  %v7425_v42 = vld [vmem:[#allocation8 + $0x1b8] sm:$0xf0] }
 0x17d   :  { %2648 = vmatpush.bf16.msra.mxu1 %v7484_v52  ;;  %v8127_v54 = vld [vmem:[#allocation8 + $0x718] sm:$0xf] }
 0x17e   :  { %v10615_v49 = vld [vmem:[#allocation8 + $0x734] sm:$0xf0] }
 0x17f   :  { %2661 = vmatpush.bf16.msra.mxu2 %v7772_v62  ;;  %2635 = vmatmul.bf16.vlgmr.msra.gmra.mxu0 %v11509_v24  ;;  %v7295_v51 = vld [vmem:[#allocation8 + $0x98] sm:$0xf]  ;;  %v8128_v62 = vor.u32 %v10615_v49, %v8127_v54 }
 0x180   :  { %2683 = vmatpush.bf16.msrb.mxu0 %v7456_v56  ;;  %2675 = vmatpush.bf16.msra.mxu3 %v8028_v3  ;;  %v10407_v52 = vld [vmem:[#allocation8 + $0xb4] sm:$0xf0]  ;;  %v7872_v56 = vor.u32 %v10551_v46, %v7871_v45  ;;  %v10499_v46 = vld [vmem:[#allocation8 + $0x39c] sm:$0xf] }
 0x181   :  { %2697 = vmatpush.bf16.msrb.mxu1 %v7712_v61  ;;  %v7551_v60 = vld [vmem:[#allocation8 + $0x298] sm:$0xf]  ;;  %v7296_v4 = vor.u32 %v10407_v52, %v7295_v51 }
 0x182   :  { %2649 = vmatmul.bf16.vlgmr.msra.gmra.mxu1 %v11511_v31  ;;  %v10471_v61 = vld [vmem:[#allocation8 + $0x2b4] sm:$0xf0] }
 0x183   :  { %2662 = vmatpush.bf16.msra.mxu2 %v7740_v53  ;;  %v7839_v63 = vld [vmem:[#allocation8 + $0x4d8] sm:$0xf]  ;;  %v11547_v3 = vpop.f32.mrf.mxu0  ;;  %v7552_v7 = vor.u32 %v10471_v61, %v7551_v60  ;;  %v10571_v61 = vld [vmem:[#allocation8 + $0x5dc] sm:$0xf] }
 0x184   :  { %2684 = vmatpush.bf16.msrb.mxu0 %v7424_v22  ;;  %2676 = vmatpush.bf16.msra.mxu3 %v7996_v13  ;;  %v8095_v5 = vld [vmem:[#allocation8 + $0x6d8] sm:$0xf]  ;;  %v7840_v22 = vor.u32 %v10543_v0, %v7839_v63 }
 0x185   :  { %2698 = vmatpush.bf16.msrb.mxu1 %v7680_v57  ;;  %v10607_v6 = vld [vmem:[#allocation8 + $0x6f4] sm:$0xf0]  ;;  %v1051_v57 = vperm.slane %v11545_v2, 0 }
 0x186   :  { %2663 = vmatmul.bf16.vlgmr.msra.gmra.mxu2 %v11515_v58  ;;  %v7263_v8 = vld [vmem:[#allocation8 + $0x58] sm:$0xf]  ;;  %v8096_v53 = vor.u32 %v10607_v6, %v8095_v5  ;;  %v8225_v5 = vld [vmem:[#allocation8 + $0x7f8] sm:$0xf0] }
 0x187   :  { %2711 = vmatpush.bf16.msrb.mxu2 %v7968_v14  ;;  %2677 = vmatmul.bf16.vlgmr.msra.gmra.mxu3 %v11517_v1  ;;  %v10399_v9 = vld [vmem:[#allocation8 + $0x74] sm:$0xf0]  ;;  %v2357_v49 = vadd.f32 %v11539_v30, %v1051_v57 }
 0x188   :  { %2725 = vmatpush.bf16.msrb.mxu3 %v8224_v59  ;;  %2685 = vmatpush.bf16.msrb.mxu0 %v7392_v18  ;;  %v7519_v25 = vld [vmem:[#allocation8 + $0x258] sm:$0xf]  ;;  %v7264_v14 = vor.u32 %v10399_v9, %v7263_v8  ;;  %v10427_v8 = vld [vmem:[#allocation8 + $0x15c] sm:$0xf] }
 0x189   :  { %2699 = vmatpush.bf16.msrb.mxu1 %v7648_v21  ;;  %v10463_v10 = vld [vmem:[#allocation8 + $0x274] sm:$0xf0]  ;;  %v11550_v13 = vpop.f32.mrf.mxu2  ;;  %v11554_v21 = vpop.f32.mrf.mxu1  ;;  %v7393_v9 = vld [vmem:[#allocation8 + $0x178] sm:$0xf0] }
 0x18a   :  { %v7807_v11 = vld [vmem:[#allocation8 + $0x498] sm:$0xf]  ;;  %v11552_v16 = vpop.f32.mrf.mxu3  ;;  %v7520_v17 = vor.u32 %v10463_v10, %v7519_v25 }
 0x18b   :  { %2712 = vmatpush.bf16.msrb.mxu2 %v7936_v27  ;;  %v10535_v12 = vld [vmem:[#allocation8 + $0x4b4] sm:$0xf0]  ;;  %v7457_v27 = vld [vmem:[#allocation8 + $0x1f8] sm:$0xf0]  ;;  %v2412_v43 = vpop.f32.mrf.mxu0 }
 0x18c   :  { %2726 = vmatpush.bf16.msrb.mxu3 %v8192_v32  ;;  %2686 = vmatpush.bf16.msrb.mxu0 %v7360_v35  ;;  %v8063_v15 = vld [vmem:[#allocation8 + $0x698] sm:$0xf]  ;;  %v7808_v23 = vor.u32 %v10535_v12, %v7807_v11  ;;  %v7713_v32 = vld [vmem:[#allocation8 + $0x3f8] sm:$0xf0]  ;;  %v7460_v40 = vor.u32 %v10443_v26, %v7457_v27  ;;  %v2359_v26 = vadd.f32 %v11547_v3, %v1051_v57 }
 0x18d   :  { %2700 = vmatpush.bf16.msrb.mxu1 %v7616_v38  ;;  %v10599_v55 = vld [vmem:[#allocation8 + $0x6b4] sm:$0xf0]  ;;  %v1052_v38 = vperm.slane %v11545_v2, 1  ;;  %v7649_v11 = vld [vmem:[#allocation8 + $0x378] sm:$0xf0] }
 0x18e   :  { %v7231_v59 = vld [vmem:[#allocation8 + $0x18] sm:$0xf]  ;;  %v8064_v29 = vor.u32 %v10599_v55, %v8063_v15  ;;  %v10563_v15 = vld [vmem:[#allocation8 + $0x59c] sm:$0xf] }
 0x18f   :  { %2713 = vmatpush.bf16.msrb.mxu2 %v7904_v41  ;;  %v10391_v18 = vld [vmem:[#allocation8 + $0x34] sm:$0xf0]  ;;  %v10435_v41 = vld [vmem:[#allocation8 + $0x19c] sm:$0xf]  ;;  %v2413_v25 = vadd.f32 %v2412_v43, %v1052_v38 }
 0x190   :  { %2727 = vmatpush.bf16.msrb.mxu3 %v8160_v44  ;;  %2687 = vmatpush.bf16.msrb.mxu0 %v7328_v48  ;;  %v7487_v19 = vld [vmem:[#allocation8 + $0x218] sm:$0xf]  ;;  %v7232_v35 = vor.u32 %v10391_v18, %v7231_v59  ;;  %v7716_v44 = vor.u32 %v10507_v28, %v7713_v32  ;;  %v7681_v48 = vld [vmem:[#allocation8 + $0x3b8] sm:$0xf0]  ;;  %v7428_v0 = vor.u32 %v10435_v41, %v7425_v42 }
 0x191   :  { %2701 = vmatpush.bf16.msrb.mxu1 %v7584_v50  ;;  %v10455_v20 = vld [vmem:[#allocation8 + $0x234] sm:$0xf0]  ;;  %v11560_v60 = vpop.f32.mrf.mxu2  ;;  %v7684_v30 = vor.u32 %v10499_v46, %v7681_v48  ;;  %v2426_v12 = vpop.f32.mrf.mxu1  ;;  %v7937_v55 = vld [vmem:[#allocation8 + $0x5b8] sm:$0xf0] }
 0x192   :  { %v7775_v33 = vld [vmem:[#allocation8 + $0x458] sm:$0xf]  ;;  %v7488_v39 = vor.u32 %v10455_v20, %v7487_v19  ;;  %v11562_v63 = vpop.f32.mrf.mxu3  ;;  %v8193_v18 = vld [vmem:[#allocation8 + $0x7b8] sm:$0xf0]  ;;  %v2427_v27 = vadd.f32 %v2426_v12, %v2413_v25  ;;  %v7940_v28 = vor.u32 %v10563_v15, %v7937_v55 }
 0x193   :  { %2714 = vmatpush.bf16.msrb.mxu2 %v7872_v56  ;;  %v10527_v34 = vld [vmem:[#allocation8 + $0x474] sm:$0xf0]  ;;  %v10419_v20 = vld [vmem:[#allocation8 + $0x11c] sm:$0xf] }
 0x194   :  { %2728 = vmatpush.bf16.msrb.mxu3 %v8128_v62  ;;  %2688 = vmatpush.bf16.msrb.mxu0 %v7296_v4  ;;  %v8031_v36 = vld [vmem:[#allocation8 + $0x658] sm:$0xf]  ;;  %v7776_v45 = vor.u32 %v10527_v34, %v7775_v33  ;;  %v7969_v62 = vld [vmem:[#allocation8 + $0x5f8] sm:$0xf0] }
 0x195   :  { %2702 = vmatpush.bf16.msrb.mxu1 %v7552_v7  ;;  %v10591_v37 = vld [vmem:[#allocation8 + $0x674] sm:$0xf0]  ;;  %v10635_v4 = vld [vmem:[#allocation8 + $0x7dc] sm:$0xf]  ;;  %v7972_v10 = vor.u32 %v10571_v61, %v7969_v62 }
 0x196   :  { %v7743_v54 = vld [vmem:[#allocation8 + $0x418] sm:$0xf]  ;;  %v8032_v50 = vor.u32 %v10591_v37, %v8031_v36  ;;  %v7617_v32 = vld [vmem:[#allocation8 + $0x338] sm:$0xf0] }
 0x197   :  { %2715 = vmatpush.bf16.msrb.mxu2 %v7840_v22  ;;  %v10519_v51 = vld [vmem:[#allocation8 + $0x434] sm:$0xf0]  ;;  %v2371_v22 = vadd.f32 %v11543_v47, %v2357_v49  ;;  %v10627_v47 = vld [vmem:[#allocation8 + $0x79c] sm:$0xf] }
 0x198   :  { %2729 = vmatpush.bf16.msrb.mxu3 %v8096_v53  ;;  %2689 = vmatpush.bf16.msrb.mxu0 %v7264_v14  ;;  %v7999_v52 = vld [vmem:[#allocation8 + $0x618] sm:$0xf]  ;;  %v7744_v6 = vor.u32 %v10519_v51, %v7743_v54  ;;  %v10491_v53 = vld [vmem:[#allocation8 + $0x35c] sm:$0xf]  ;;  %v8228_v14 = vor.u32 %v10635_v4, %v8225_v5  ;;  %v8196_v34 = vor.u32 %v10627_v47, %v8193_v18 }
 0x199   :  { %2703 = vmatpush.bf16.msrb.mxu1 %v7520_v17  ;;  %v10583_v56 = vld [vmem:[#allocation8 + $0x634] sm:$0xf0]  ;;  %v2385_v59 = vadd.f32 %v11550_v13, %v2371_v22  ;;  %v7396_v17 = vor.u32 %v10427_v8, %v7393_v9  ;;  %v7652_v19 = vor.u32 %v10491_v53, %v7649_v11  ;;  %v2414_v13 = vpop.f32.mrf.mxu0  ;;  %v2440_v33 = vpop.f32.mrf.mxu2  ;;  %v7905_v36 = vld [vmem:[#allocation8 + $0x578] sm:$0xf0] }
 0x19a   :  { %v8000_v7 = vor.u32 %v10583_v56, %v7999_v52  ;;  %v10619_v57 = vld [vmem:[#allocation8 + $0x75c] sm:$0xf]  ;;  %v2415_v46 = vadd.f32 %v2414_v13, %v1052_v38  ;;  %v2428_v5 = vpop.f32.mrf.mxu1 }
 0x19b   :  { %2716 = vmatpush.bf16.msrb.mxu2 %v7808_v23  ;;  %v7361_v23 = vld [vmem:[#allocation8 + $0x138] sm:$0xf0]  ;;  %v2399_v37 = vadd.f32 %v11552_v16, %v2385_v59 }
 0x19c   :  { %2730 = vmatpush.bf16.msrb.mxu3 %v8064_v29  ;;  %2690 = vmatpush.bf16.msrb.mxu0 %v7232_v35  ;;  %v10483_v29 = vld [vmem:[#allocation8 + $0x31c] sm:$0xf]  ;;  %v7364_v3 = vor.u32 %v10419_v20, %v7361_v23 }
 0x19d   :  { %2704 = vmatpush.bf16.msrb.mxu1 %v7488_v39  ;;  %v10555_v35 = vld [vmem:[#allocation8 + $0x55c] sm:$0xf]  ;;  %v2441_v39 = vadd.f32 %v2440_v33, %v2427_v27  ;;  %v7620_v42 = vor.u32 %v10483_v29, %v7617_v32  ;;  %v2795_v56 = vmax.f32 %v2399_v37, 0.0 }
 0x19e   :  { %v8161_v41 = vld [vmem:[#allocation8 + $0x778] sm:$0xf0]  ;;  %v7908_v48 = vor.u32 %v10555_v35, %v7905_v36 }
 0x19f   :  { %2717 = vmatpush.bf16.msrb.mxu2 %v7776_v45  ;;  %2691 = vmatmul.bf16.vlgmr.msrb.gmra.mxu0 %v11509_v24  ;;  %v10411_v43 = vld [vmem:[#allocation8 + $0xdc] sm:$0xf]  ;;  %v2373_v45 = vadd.f32 %v11554_v21, %v2359_v26 }
 0x1a0   :  { %2739 = vmatpush.bf16.msra.mxu0 %v7460_v40  ;;  %2731 = vmatpush.bf16.msrb.mxu3 %v8032_v50  ;;  %v2454_v40 = vpop.f32.mrf.mxu3  ;;  %v10475_v54 = vld [vmem:[#allocation8 + $0x2dc] sm:$0xf]  ;;  %v8164_v50 = vor.u32 %v10619_v57, %v8161_v41 }
 0x1a1   :  { %2753 = vmatpush.bf16.msra.mxu1 %v7716_v44  ;;  %v7329_v44 = vld [vmem:[#allocation8 + $0xf8] sm:$0xf0]  ;;  %v2455_v16 = vadd.f32 %v2454_v40, %v2441_v39  ;;  %v2387_v61 = vadd.f32 %v11560_v60, %v2373_v45 }
 0x1a2   :  { %2705 = vmatmul.bf16.vlgmr.msrb.gmra.mxu1 %v11511_v31  ;;  %v7585_v49 = vld [vmem:[#allocation8 + $0x2f8] sm:$0xf0] }
 0x1a3   :  { %2718 = vmatpush.bf16.msrb.mxu2 %v7744_v6  ;;  %v10547_v51 = vld [vmem:[#allocation8 + $0x51c] sm:$0xf]  ;;  %v2796_v62 = vmax.f32 %v2455_v16, 0.0  ;;  %v7588_v38 = vor.u32 %v10475_v54, %v7585_v49  ;;  %v2401_v12 = vadd.f32 %v11562_v63, %v2387_v61  ;;  %v11581_v54 = vpop.f32.mrf.mxu0  ;;  %v8455_v61 = vld [vmem:[#allocation11 + $0x180] sm:$0xf] }
 0x1a4   :  { %2740 = vmatpush.bf16.msra.mxu0 %v7428_v0  ;;  %2732 = vmatpush.bf16.msrb.mxu3 %v8000_v7  ;;  %v7873_v52 = vld [vmem:[#allocation8 + $0x538] sm:$0xf0]  ;;  %v7332_v0 = vor.u32 %v10411_v43, %v7329_v44  ;;  %v2429_v7 = vadd.f32 %v2428_v5, %v2415_v46  ;;  %v10708_v43 = vld [vmem:[#allocation11 + $0x1dc] sm:$0xf0] }
 0x1a5   :  { %2754 = vmatpush.bf16.msra.mxu1 %v7684_v30  ;;  %v10611_v4 = vld [vmem:[#allocation8 + $0x71c] sm:$0xf]  ;;  %v2811_v8 = vpack.c.bf16 %v2796_v62, %v2795_v56  ;;  %v7876_v9 = vor.u32 %v10547_v51, %v7873_v52  ;;  %v2803_v13 = vmax.f32 %v2401_v12, 0.0  ;;  %v8743_v44 = vld [vmem:[#allocation11 + $0x3c0] sm:$0xf] }
 0x1a6   :  { %2719 = vmatmul.bf16.vlgmr.msrb.gmra.mxu2 %v11515_v58  ;;  %v8129_v21 = vld [vmem:[#allocation8 + $0x738] sm:$0xf0]  ;;  %v10772_v46 = vld [vmem:[#allocation11 + $0x3dc] sm:$0xf0] }
 0x1a7   :  { %2767 = vmatpush.bf16.msra.mxu2 %v7972_v10  ;;  %2733 = vmatmul.bf16.vlgmr.msrb.gmra.mxu3 %v11517_v1  ;;  %v10403_v30 = vld [vmem:[#allocation8 + $0x9c] sm:$0xf]  ;;  %v2442_v10 = vpop.f32.mrf.mxu2  ;;  %v8132_v53 = vor.u32 %v10611_v4, %v8129_v21  ;;  %2819 = vst [vmem:[#allocation2] sm:$0xff] %v2811_v8  ;;  %v8744_v62 = vor.u32 %v10772_v46, %v8743_v44  ;;  %v10700_v4 = vld [vmem:[#allocation11 + $0x19c] sm:$0xf0] }
 0x1a8   :  { %2781 = vmatpush.bf16.msra.mxu3 %v8228_v14  ;;  %2741 = vmatpush.bf16.msra.mxu0 %v7396_v17  ;;  %v7297_v6 = vld [vmem:[#allocation8 + $0xb8] sm:$0xf0]  ;;  %v2443_v14 = vadd.f32 %v2442_v10, %v2429_v7  ;;  %v2456_v17 = vpop.f32.mrf.mxu3  ;;  %v8711_v21 = vld [vmem:[#allocation11 + $0x380] sm:$0xf] }
 0x1a9   :  { %2755 = vmatpush.bf16.msra.mxu1 %v7652_v19  ;;  %v10467_v22 = vld [vmem:[#allocation8 + $0x29c] sm:$0xf]  ;;  %v7300_v15 = vor.u32 %v10403_v30, %v7297_v6  ;;  %v10764_v5 = vld [vmem:[#allocation11 + $0x39c] sm:$0xf0] }
 0x1aa   :  { %v7553_v25 = vld [vmem:[#allocation8 + $0x2b8] sm:$0xf0]  ;;  %v2457_v20 = vadd.f32 %v2456_v17, %v2443_v14  ;;  %v9255_v10 = vld [vmem:[#allocation11 + $0x7c0] sm:$0xf] }
 0x1ab   :  { %2768 = vmatpush.bf16.msra.mxu2 %v7940_v28  ;;  %v10539_v60 = vld [vmem:[#allocation8 + $0x4dc] sm:$0xf]  ;;  %v7556_v47 = vor.u32 %v10467_v22, %v7553_v25  ;;  %v10836_v22 = vld [vmem:[#allocation11 + $0x5dc] sm:$0xf0]  ;;  %v8456_v25 = vor.u32 %v10700_v4, %v8455_v61  ;;  %v1054_v4 = vperm.slane %v11545_v2, 3 }
 0x1ac   :  { %2782 = vmatpush.bf16.msra.mxu3 %v8196_v34  ;;  %2742 = vmatpush.bf16.msra.mxu0 %v7364_v3  ;;  %v7841_v11 = vld [vmem:[#allocation8 + $0x4f8] sm:$0xf0]  ;;  %v2804_v33 = vmax.f32 %v2457_v20, 0.0  ;;  %v8423_v14 = vld [vmem:[#allocation11 + $0x140] sm:$0xf] }
 0x1ad   :  { %2756 = vmatpush.bf16.msra.mxu1 %v7620_v42  ;;  %v10603_v55 = vld [vmem:[#allocation8 + $0x6dc] sm:$0xf]  ;;  %v7844_v23 = vor.u32 %v10539_v60, %v7841_v11  ;;  %v8487_v42 = vld [vmem:[#allocation11 + $0x1c0] sm:$0xf]  ;;  %v11583_v60 = vpop.f32.mrf.mxu1  ;;  %v8712_v11 = vor.u32 %v10764_v5, %v8711_v21 }
 0x1ae   :  { %v8097_v59 = vld [vmem:[#allocation8 + $0x6f8] sm:$0xf0]  ;;  %v2815_v57 = vpack.c.bf16 %v2804_v33, %v2803_v13  ;;  %v8488_v56 = vor.u32 %v10708_v43, %v8487_v42  ;;  %v10756_v17 = vld [vmem:[#allocation11 + $0x35c] sm:$0xf0]  ;;  %v1053_v43 = vperm.slane %v11545_v2, 2 }
 0x1af   :  { %2769 = vmatpush.bf16.msra.mxu2 %v7908_v48  ;;  %v10395_v18 = vld [vmem:[#allocation8 + $0x5c] sm:$0xf]  ;;  %v8100_v28 = vor.u32 %v10603_v55, %v8097_v59  ;;  %v8679_v59 = vld [vmem:[#allocation11 + $0x340] sm:$0xf] }
 0x1b0   :  { %2783 = vmatpush.bf16.msra.mxu3 %v8164_v50  ;;  %2743 = vmatpush.bf16.msra.mxu0 %v7332_v0  ;;  %v7265_v19 = vld [vmem:[#allocation8 + $0x78] sm:$0xf0]  ;;  %2823 = vst [vmem:[#allocation2 + $0x20] sm:$0xff] %v2815_v57  ;;  %v10828_v20 = vld [vmem:[#allocation11 + $0x59c] sm:$0xf0]  ;;  %v11591_v13 = vpop.f32.mrf.mxu3 }
 0x1b1   :  { %2757 = vmatpush.bf16.msra.mxu1 %v7588_v38  ;;  %v10459_v26 = vld [vmem:[#allocation8 + $0x25c] sm:$0xf]  ;;  %v7268_v34 = vor.u32 %v10395_v18, %v7265_v19  ;;  %v8967_v19 = vld [vmem:[#allocation11 + $0x580] sm:$0xf] }
 0x1b2   :  { %v7521_v27 = vld [vmem:[#allocation8 + $0x278] sm:$0xf0]  ;;  %v10748_v33 = vld [vmem:[#allocation11 + $0x31c] sm:$0xf0] }
 0x1b3   :  { %2770 = vmatpush.bf16.msra.mxu2 %v7876_v9  ;;  %v10531_v29 = vld [vmem:[#allocation8 + $0x49c] sm:$0xf]  ;;  %v7524_v37 = vor.u32 %v10459_v26, %v7521_v27  ;;  %v8999_v9 = vld [vmem:[#allocation11 + $0x5c0] sm:$0xf] }
 0x1b4   :  { %2784 = vmatpush.bf16.msra.mxu3 %v8132_v53  ;;  %v7809_v63 = vld [vmem:[#allocation8 + $0x4b8] sm:$0xf0]  ;;  %2744 = vmatpush.bf16.msra.mxu0 %v7300_v15  ;;  %v10900_v53 = vld [vmem:[#allocation11 + $0x7dc] sm:$0xf0] }
 0x1b5   :  { %v10595_v32 = vld [vmem:[#allocation8 + $0x69c] sm:$0xf]  ;;  %2758 = vmatpush.bf16.msra.mxu1 %v7556_v47  ;;  %v7812_v41 = vor.u32 %v10531_v29, %v7809_v63  ;;  %v10692_v15 = vld [vmem:[#allocation11 + $0x15c] sm:$0xf0]  ;;  %v9000_v47 = vor.u32 %v10836_v22, %v8999_v9  ;;  %v9256_v18 = vor.u32 %v10900_v53, %v9255_v10  ;;  %v11589_v29 = vpop.f32.mrf.mxu2 }
 0x1b6   :  { %v8065_v35 = vld [vmem:[#allocation8 + $0x6b8] sm:$0xf0]  ;;  %v9223_v26 = vld [vmem:[#allocation11 + $0x780] sm:$0xf] }
 0x1b7   :  { %v10387_v36 = vld [vmem:[#allocation8 + $0x1c] sm:$0xf]  ;;  %2771 = vmatpush.bf16.msra.mxu2 %v7844_v23  ;;  %v8068_v45 = vor.u32 %v10595_v32, %v8065_v35  ;;  %v8424_v23 = vor.u32 %v10692_v15, %v8423_v14  ;;  %v10892_v27 = vld [vmem:[#allocation11 + $0x79c] sm:$0xf0] }
 0x1b8   :  { %v7233_v39 = vld [vmem:[#allocation8 + $0x38] sm:$0xf0]  ;;  %2785 = vmatpush.bf16.msra.mxu3 %v8100_v28  ;;  %2745 = vmatpush.bf16.msra.mxu0 %v7268_v34  ;;  %v11587_v28 = vpop.f32.mrf.mxu0  ;;  %v8391_v63 = vld [vmem:[#allocation11 + $0x100] sm:$0xf]  ;;  %v8968_v34 = vor.u32 %v10828_v20, %v8967_v19  ;;  %v9224_v35 = vor.u32 %v10892_v27, %v9223_v26  ;;  %v11602_v9 = vpop.f32.mrf.mxu3 }
 0x1b9   :  { %v10451_v40 = vld [vmem:[#allocation8 + $0x21c] sm:$0xf]  ;;  %v7236_v49 = vor.u32 %v10387_v36, %v7233_v39  ;;  %2759 = vmatpush.bf16.msra.mxu1 %v7524_v37  ;;  %v10684_v32 = vld [vmem:[#allocation11 + $0x11c] sm:$0xf0] }
 0x1ba   :  { %v7489_v3 = vld [vmem:[#allocation8 + $0x238] sm:$0xf0]  ;;  %v8935_v36 = vld [vmem:[#allocation11 + $0x540] sm:$0xf]  ;;  %v8392_v39 = vor.u32 %v10684_v32, %v8391_v63 }
 0x1bb   :  { %v10523_v16 = vld [vmem:[#allocation8 + $0x45c] sm:$0xf]  ;;  %v7492_v52 = vor.u32 %v10451_v40, %v7489_v3  ;;  %2772 = vmatpush.bf16.msra.mxu2 %v7812_v41  ;;  %v10820_v37 = vld [vmem:[#allocation11 + $0x55c] sm:$0xf0] }
 0x1bc   :  { %v7777_v48 = vld [vmem:[#allocation8 + $0x478] sm:$0xf0]  ;;  %2786 = vmatpush.bf16.msra.mxu3 %v8068_v45  ;;  %2746 = vmatpush.bf16.msra.mxu0 %v7236_v49  ;;  %v9191_v40 = vld [vmem:[#allocation11 + $0x740] sm:$0xf]  ;;  %v8936_v46 = vor.u32 %v10820_v37, %v8935_v36 }
 0x1bd   :  { %v10587_v50 = vld [vmem:[#allocation8 + $0x65c] sm:$0xf]  ;;  %v7780_v0 = vor.u32 %v10523_v16, %v7777_v48  ;;  %2760 = vmatpush.bf16.msra.mxu1 %v7492_v52  ;;  %v10884_v3 = vld [vmem:[#allocation11 + $0x75c] sm:$0xf0]  ;;  %v11596_v16 = vpop.f32.mrf.mxu1 }
 0x1be   :  { %v8033_v51 = vld [vmem:[#allocation8 + $0x678] sm:$0xf0]  ;;  %v8359_v41 = vld [vmem:[#allocation11 + $0xc0] sm:$0xf] }
 0x1bf   :  { %v8036_v38 = vor.u32 %v10587_v50, %v8033_v51  ;;  %v10515_v30 = vld [vmem:[#allocation8 + $0x41c] sm:$0xf]  ;;  %2773 = vmatpush.bf16.msra.mxu2 %v7780_v0  ;;  %2747 = vmatmul.bf16.vlgmr.msra.gmra.mxu0 %v11509_v24  ;;  %v8680_v24 = vor.u32 %v10756_v17, %v8679_v59  ;;  %v10676_v42 = vld [vmem:[#allocation11 + $0xdc] sm:$0xf0]  ;;  %v2469_v0 = vadd.f32 %v11581_v54, %v1053_v43 }
 0x1c0   :  { %v7745_v6 = vld [vmem:[#allocation8 + $0x438] sm:$0xf0]  ;;  %5965 = vmatpush.bf16.msrb.mxu0 %v8488_v56  ;;  %2761 = vmatmul.bf16.vlgmr.msra.gmra.mxu1 %v11511_v31  ;;  %v8647_v31 = vld [vmem:[#allocation11 + $0x300] sm:$0xf]  ;;  %v8360_v50 = vor.u32 %v10676_v42, %v8359_v41  ;;  %v2524_v52 = vpop.f32.mrf.mxu0 }
 0x1c1   :  { %v10579_v7 = vld [vmem:[#allocation8 + $0x61c] sm:$0xf]  ;;  %5979 = vmatpush.bf16.msrb.mxu1 %v8744_v62  ;;  %v7748_v12 = vor.u32 %v10515_v30, %v7745_v6  ;;  %2787 = vmatpush.bf16.msra.mxu3 %v8036_v38  ;;  %v8648_v57 = vor.u32 %v10748_v33, %v8647_v31  ;;  %v8615_v44 = vld [vmem:[#allocation11 + $0x2c0] sm:$0xf]  ;;  %v11600_v30 = vpop.f32.mrf.mxu2  ;;  %v2525_v14 = vadd.f32 %v2524_v52, %v1054_v4 }
 0x1c2   :  { %v8001_v8 = vld [vmem:[#allocation8 + $0x638] sm:$0xf0]  ;;  %v10740_v45 = vld [vmem:[#allocation11 + $0x2dc] sm:$0xf0] }
 0x1c3   :  { %v8004_v55 = vor.u32 %v10579_v7, %v8001_v8  ;;  %2774 = vmatpush.bf16.msra.mxu2 %v7748_v12  ;;  %v8903_v48 = vld [vmem:[#allocation11 + $0x500] sm:$0xf]  ;;  %v8616_v56 = vor.u32 %v10740_v45, %v8615_v44  ;;  %v2483_v12 = vadd.f32 %v11583_v60, %v2469_v0  ;;  %v2471_v60 = vadd.f32 %v11587_v28, %v1053_v43 }
 0x1c4   :  { %5966 = vmatpush.bf16.msrb.mxu0 %v8456_v25  ;;  %v10812_v49 = vld [vmem:[#allocation11 + $0x51c] sm:$0xf0] }
 0x1c5   :  { %5980 = vmatpush.bf16.msrb.mxu1 %v8712_v11  ;;  %2788 = vmatpush.bf16.msra.mxu3 %v8004_v55  ;;  %v9159_v51 = vld [vmem:[#allocation11 + $0x700] sm:$0xf]  ;;  %v8904_v38 = vor.u32 %v10812_v49, %v8903_v48  ;;  %v2538_v17 = vpop.f32.mrf.mxu1  ;;  %v2497_v20 = vadd.f32 %v11589_v29, %v2483_v12  ;;  %v2485_v48 = vadd.f32 %v11596_v16, %v2471_v60 }
 0x1c6   :  { %2775 = vmatmul.bf16.vlgmr.msra.gmra.mxu2 %v11515_v58  ;;  %v9192_v58 = vor.u32 %v10884_v3, %v9191_v40  ;;  %v8327_v61 = vld [vmem:[#allocation11 + $0x80] sm:$0xf] }
 0x1c7   :  { %5993 = vmatpush.bf16.msrb.mxu2 %v9000_v47  ;;  %v10668_v62 = vld [vmem:[#allocation11 + $0x9c] sm:$0xf0]  ;;  %v2511_v28 = vadd.f32 %v11591_v13, %v2497_v20 }
 0x1c8   :  { %5967 = vmatpush.bf16.msrb.mxu0 %v8424_v23  ;;  %2789 = vmatmul.bf16.vlgmr.msra.gmra.mxu3 %v11517_v1  ;;  %v10876_v1 = vld [vmem:[#allocation11 + $0x71c] sm:$0xf0]  ;;  %v8328_v22 = vor.u32 %v10668_v62, %v8327_v61  ;;  %v2526_v40 = vpop.f32.mrf.mxu0 }
 0x1c9   :  { %6007 = vmatpush.bf16.msrb.mxu3 %v9256_v18  ;;  %5981 = vmatpush.bf16.msrb.mxu1 %v8680_v24  ;;  %v8583_v21 = vld [vmem:[#allocation11 + $0x280] sm:$0xf]  ;;  %v9160_v6 = vor.u32 %v10876_v1, %v9159_v51  ;;  %v2552_v29 = vpop.f32.mrf.mxu2  ;;  %v10644_v51 = vld [vmem:[#allocation2 + $0x1c] sm:$0xf0]  ;;  %v8233_v1 = vld [vmem:[#allocation2 + $0x20] sm:$0xf0]  ;;  %v2527_v61 = vadd.f32 %v2526_v40, %v1054_v4 }
 0x1ca   :  { %v10732_v5 = vld [vmem:[#allocation11 + $0x29c] sm:$0xf0]  ;;  %v2566_v44 = vpop.f32.mrf.mxu3 }
 0x1cb   :  { %5994 = vmatpush.bf16.msrb.mxu2 %v8968_v34  ;;  %v8871_v7 = vld [vmem:[#allocation11 + $0x4c0] sm:$0xf]  ;;  %v8584_v54 = vor.u32 %v10732_v5, %v8583_v21  ;;  %v2539_v34 = vadd.f32 %v2538_v17, %v2525_v14 }
 0x1cc   :  { %5968 = vmatpush.bf16.msrb.mxu0 %v8392_v39  ;;  %v10804_v8 = vld [vmem:[#allocation11 + $0x4dc] sm:$0xf0] }
 0x1cd   :  { %6008 = vmatpush.bf16.msrb.mxu3 %v9224_v35  ;;  %5982 = vmatpush.bf16.msrb.mxu1 %v8648_v57  ;;  %v9127_v25 = vld [vmem:[#allocation11 + $0x6c0] sm:$0xf]  ;;  %v8872_v59 = vor.u32 %v10804_v8, %v8871_v7  ;;  %v2553_v43 = vadd.f32 %v2552_v29, %v2539_v34 }
 0x1ce   :  { %v10868_v10 = vld [vmem:[#allocation11 + $0x6dc] sm:$0xf0] }
 0x1cf   :  { %5995 = vmatpush.bf16.msrb.mxu2 %v8936_v46  ;;  %v8295_v53 = vld [vmem:[#allocation11 + $0x40] sm:$0xf]  ;;  %v9128_v47 = vor.u32 %v10868_v10, %v9127_v25  ;;  %v2567_v62 = vadd.f32 %v2566_v44, %v2553_v43  ;;  %v2499_v25 = vadd.f32 %v11600_v30, %v2485_v48 }
 0x1d0   :  { %5969 = vmatpush.bf16.msrb.mxu0 %v8360_v50  ;;  %v10660_v11 = vld [vmem:[#allocation11 + $0x5c] sm:$0xf0]  ;;  %v8231_v50 = vld [vmem:[#allocation2] sm:$0xf] }
 0x1d1   :  { %6009 = vmatpush.bf16.msrb.mxu3 %v9192_v58  ;;  %5983 = vmatpush.bf16.msrb.mxu1 %v8616_v56  ;;  %v8551_v15 = vld [vmem:[#allocation11 + $0x240] sm:$0xf]  ;;  %v8296_v23 = vor.u32 %v10660_v11, %v8295_v53  ;;  %v2798_v10 = vmax.f32 %v2567_v62, 0.0  ;;  %v2540_v53 = vpop.f32.mrf.mxu1 }
 0x1d2   :  { %v10724_v55 = vld [vmem:[#allocation11 + $0x25c] sm:$0xf0] }
 0x1d3   :  { %5996 = vmatpush.bf16.msrb.mxu2 %v8904_v38  ;;  %v8839_v18 = vld [vmem:[#allocation11 + $0x480] sm:$0xf]  ;;  %v8552_v63 = vor.u32 %v10724_v55, %v8551_v15  ;;  %v2541_v15 = vadd.f32 %v2540_v53, %v2527_v61 }
 0x1d4   :  { %v10796_v19 = vld [vmem:[#allocation11 + $0x49c] sm:$0xf0]  ;;  %5970 = vmatpush.bf16.msrb.mxu0 %v8328_v22  ;;  %v2797_v22 = vmax.f32 %v2511_v28, 0.0 }
 0x1d5   :  { %6010 = vmatpush.bf16.msrb.mxu3 %v9160_v6  ;;  %v8263_v26 = vld [vmem:[#allocation11] sm:$0xf]  ;;  %5984 = vmatpush.bf16.msrb.mxu1 %v8584_v54  ;;  %v8840_v35 = vor.u32 %v10796_v19, %v8839_v18  ;;  %v10640_v6 = vld [vmem:[#allocation2 + $0x4] sm:$0xf]  ;;  %v11614_v54 = vor.u32 %v10644_v51, %v8231_v50 }
 0x1d6   :  { %v9095_v27 = vld [vmem:[#allocation11 + $0x680] sm:$0xf]  ;;  %v11616_v11 = vor.u32 %v10640_v6, %v8233_v1  ;;  %v2812_v55 = vpack.c.bf16 %v2798_v10, %v2797_v22  ;;  %v10704_v6 = vld [vmem:[#allocation11 + $0x1c4] sm:$0xf] }
 0x1d7   :  { %v10860_v24 = vld [vmem:[#allocation11 + $0x69c] sm:$0xf0]  ;;  %5997 = vmatpush.bf16.msrb.mxu2 %v8872_v59  ;;  %v10768_v10 = vld [vmem:[#allocation11 + $0x3c4] sm:$0xf] }
 0x1d8   :  { %v10652_v32 = vld [vmem:[#allocation11 + $0x1c] sm:$0xf0]  ;;  %v9096_v3 = vor.u32 %v10860_v24, %v9095_v27  ;;  %5971 = vmatpush.bf16.msrb.mxu0 %v8296_v23  ;;  %v2513_v23 = vadd.f32 %v11602_v9, %v2499_v25  ;;  %2820 = vst [vmem:[#allocation2 + $0x8] sm:$0xff] %v2812_v55  ;;  %v2568_v27 = vpop.f32.mrf.mxu3  ;;  %v10760_v55 = vld [vmem:[#allocation11 + $0x384] sm:$0xf] }
 0x1d9   :  { %v8519_v31 = vld [vmem:[#allocation11 + $0x200] sm:$0xf]  ;;  %6011 = vmatpush.bf16.msrb.mxu3 %v9128_v47  ;;  %v8264_v45 = vor.u32 %v10652_v32, %v8263_v26  ;;  %5985 = vmatpush.bf16.msrb.mxu1 %v8552_v63  ;;  %v2554_v47 = vpop.f32.mrf.mxu2 }
 0x1da   :  { %v10716_v33 = vld [vmem:[#allocation11 + $0x21c] sm:$0xf0]  ;;  %v2555_v26 = vadd.f32 %v2554_v47, %v2541_v15  ;;  %v10688_v47 = vld [vmem:[#allocation11 + $0x144] sm:$0xf] }
 0x1db   :  { %v8807_v36 = vld [vmem:[#allocation11 + $0x440] sm:$0xf]  ;;  %v8520_v49 = vor.u32 %v10716_v33, %v8519_v31  ;;  %5998 = vmatpush.bf16.msrb.mxu2 %v8840_v35  ;;  %v2805_v35 = vmax.f32 %v2513_v23, 0.0  ;;  %v8681_v23 = vld [vmem:[#allocation11 + $0x360] sm:$0xf0] }
 0x1dc   :  { %v9511_v37 = vld [vmem:[#allocation11 + $0x9c0] sm:$0xf]  ;;  %5972 = vmatpush.bf16.msrb.mxu0 %v8264_v45  ;;  %v2569_v60 = vadd.f32 %v2568_v27, %v2555_v26  ;;  %v2580_v22 = vpop.f32.mrf.mxu0 }
 0x1dd   :  { %v10964_v39 = vld [vmem:[#allocation11 + $0x9dc] sm:$0xf0]  ;;  %6012 = vmatpush.bf16.msrb.mxu3 %v9096_v3  ;;  %5986 = vmatpush.bf16.msrb.mxu1 %v8520_v49 }
 0x1de   :  { %v10788_v57 = vld [vmem:[#allocation11 + $0x45c] sm:$0xf0]  ;;  %v9512_v56 = vor.u32 %v10964_v39, %v9511_v37 }
 0x1df   :  { %v9767_v41 = vld [vmem:[#allocation11 + $0xbc0] sm:$0xf]  ;;  %v8808_v13 = vor.u32 %v10788_v57, %v8807_v36  ;;  %5973 = vmatmul.bf16.vlgmr.msrb.gmra.mxu0 %v11614_v54  ;;  %v2806_v36 = vmax.f32 %v2569_v60, 0.0  ;;  %v10680_v60 = vld [vmem:[#allocation11 + $0x104] sm:$0xf] }
 0x1e0   :  { %v11028_v42 = vld [vmem:[#allocation11 + $0xbdc] sm:$0xf0]  ;;  %6021 = vmatpush.bf16.msra.mxu0 %v9512_v56  ;;  %5987 = vmatmul.bf16.vlgmr.msrb.gmra.mxu1 %v11616_v11 }
 0x1e1   :  { %v9063_v46 = vld [vmem:[#allocation11 + $0x640] sm:$0xf]  ;;  %v9768_v21 = vor.u32 %v11028_v42, %v9767_v41  ;;  %5999 = vmatpush.bf16.msrb.mxu2 %v8808_v13  ;;  %v2816_v37 = vpack.c.bf16 %v2806_v36, %v2805_v35  ;;  %v10672_v36 = vld [vmem:[#allocation11 + $0xc4] sm:$0xf] }
 0x1e2   :  { %v10852_v58 = vld [vmem:[#allocation11 + $0x65c] sm:$0xf0] }
 0x1e3   :  { %v8775_v52 = vld [vmem:[#allocation11 + $0x400] sm:$0xf]  ;;  %v9064_v16 = vor.u32 %v10852_v58, %v9063_v46  ;;  %6035 = vmatpush.bf16.msra.mxu1 %v9768_v21  ;;  %2824 = vst [vmem:[#allocation2 + $0x28] sm:$0xff] %v2816_v37  ;;  %v8239_v58 = vld [vmem:[#allocation2 + $0x8] sm:$0xf] }
 0x1e4   :  { %v10780_v0 = vld [vmem:[#allocation11 + $0x41c] sm:$0xf0]  ;;  %v2582_v27 = vpop.f32.mrf.mxu0  ;;  %v11629_v37 = vld [vmem:[#allocation10] sm:$0xff] }
 0x1e5   :  { %v9479_v5 = vld [vmem:[#allocation11 + $0x980] sm:$0xf]  ;;  %v8776_v12 = vor.u32 %v10780_v0, %v8775_v52  ;;  %6013 = vmatpush.bf16.msrb.mxu3 %v9064_v16  ;;  %v8489_v16 = vld [vmem:[#allocation11 + $0x1e0] sm:$0xf0] }
 0x1e6   :  { %v10956_v38 = vld [vmem:[#allocation11 + $0x99c] sm:$0xf0] }
 0x1e7   :  { %v9735_v7 = vld [vmem:[#allocation11 + $0xb80] sm:$0xf]  ;;  %v9480_v14 = vor.u32 %v10956_v38, %v9479_v5  ;;  %6000 = vmatpush.bf16.msrb.mxu2 %v8776_v12  ;;  %v10696_v12 = vld [vmem:[#allocation11 + $0x184] sm:$0xf] }
 0x1e8   :  { %v11020_v8 = vld [vmem:[#allocation11 + $0xb9c] sm:$0xf0] }
 0x1e9   :  { %v9031_v2 = vld [vmem:[#allocation11 + $0x600] sm:$0xf]  ;;  %v9736_v59 = vor.u32 %v11020_v8, %v9735_v7  ;;  %6022 = vmatpush.bf16.msra.mxu0 %v9480_v14  ;;  %v8457_v14 = vld [vmem:[#allocation11 + $0x1a0] sm:$0xf0] }
 0x1ea   :  { %v10844_v4 = vld [vmem:[#allocation11 + $0x61c] sm:$0xf0]  ;;  %v10645_v50 = vld [vmem:[#allocation2 + $0x24] sm:$0xf0] }
 0x1eb   :  { %v9447_v17 = vld [vmem:[#allocation11 + $0x940] sm:$0xf]  ;;  %v9032_v18 = vor.u32 %v10844_v4, %v9031_v2  ;;  %6036 = vmatpush.bf16.msra.mxu1 %v9736_v59  ;;  %v11621_v56 = vor.u32 %v10645_v50, %v8239_v58  ;;  %v8745_v2 = vld [vmem:[#allocation11 + $0x3e0] sm:$0xf0]  ;;  %v8492_v4 = vor.u32 %v10704_v6, %v8489_v16 }
 0x1ec   :  { %v10948_v30 = vld [vmem:[#allocation11 + $0x95c] sm:$0xf0]  ;;  %v8748_v15 = vor.u32 %v10768_v10, %v8745_v2  ;;  %v8713_v59 = vld [vmem:[#allocation11 + $0x3a0] sm:$0xf0] }
 0x1ed   :  { %v9703_v19 = vld [vmem:[#allocation11 + $0xb40] sm:$0xf]  ;;  %v9448_v24 = vor.u32 %v10948_v30, %v9447_v17  ;;  %6014 = vmatpush.bf16.msrb.mxu3 %v9032_v18  ;;  %6001 = vmatmul.bf16.vlgmr.msrb.gmra.mxu2 %v11621_v56  ;;  %v8460_v17 = vor.u32 %v10696_v12, %v8457_v14  ;;  %v2594_v30 = vpop.f32.mrf.mxu1  ;;  %v8425_v18 = vld [vmem:[#allocation11 + $0x160] sm:$0xf0] }
 0x1ee   :  { %v11012_v20 = vld [vmem:[#allocation11 + $0xb5c] sm:$0xf0]  ;;  %v8428_v26 = vor.u32 %v10688_v47, %v8425_v18 }
 0x1ef   :  { %v9704_v63 = vor.u32 %v11012_v20, %v9703_v19  ;;  %v9415_v32 = vld [vmem:[#allocation11 + $0x900] sm:$0xf]  ;;  %6023 = vmatpush.bf16.msra.mxu0 %v9448_v24  ;;  %v8716_v19 = vor.u32 %v10760_v55, %v8713_v59  ;;  %v10752_v20 = vld [vmem:[#allocation11 + $0x344] sm:$0xf]  ;;  %v2608_v24 = vpop.f32.mrf.mxu2 }
 0x1f0   :  { %v10940_v31 = vld [vmem:[#allocation11 + $0x91c] sm:$0xf0]  ;;  %v8265_v55 = vld [vmem:[#allocation11 + $0x20] sm:$0xf0] }
 0x1f1   :  { %v9671_v33 = vld [vmem:[#allocation11 + $0xb00] sm:$0xf]  ;;  %v9416_v9 = vor.u32 %v10940_v31, %v9415_v32  ;;  %6037 = vmatpush.bf16.msra.mxu1 %v9704_v63  ;;  %v8393_v63 = vld [vmem:[#allocation11 + $0x120] sm:$0xf0]  ;;  %v11627_v32 = vpop.f32.mrf.mxu3  ;;  %v8684_v31 = vor.u32 %v10752_v20, %v8681_v23 }
 0x1f2   :  { %v11004_v34 = vld [vmem:[#allocation11 + $0xb1c] sm:$0xf0]  ;;  %v8396_v35 = vor.u32 %v10680_v60, %v8393_v63  ;;  %v10712_v23 = vld [vmem:[#allocation11 + $0x204] sm:$0xf] }
 0x1f3   :  { %v9672_v39 = vor.u32 %v11004_v34, %v9671_v33  ;;  %v9383_v40 = vld [vmem:[#allocation11 + $0x8c0] sm:$0xf]  ;;  %6024 = vmatpush.bf16.msra.mxu0 %v9416_v9  ;;  %v10744_v33 = vld [vmem:[#allocation11 + $0x304] sm:$0xf] }
 0x1f4   :  { %v10932_v29 = vld [vmem:[#allocation11 + $0x8dc] sm:$0xf0]  ;;  %v8649_v34 = vld [vmem:[#allocation11 + $0x320] sm:$0xf0] }
 0x1f5   :  { %v9639_v3 = vld [vmem:[#allocation11 + $0xac0] sm:$0xf]  ;;  %v9384_v41 = vor.u32 %v10932_v29, %v9383_v40  ;;  %6038 = vmatpush.bf16.msra.mxu1 %v9672_v39  ;;  %v8361_v9 = vld [vmem:[#allocation11 + $0xe0] sm:$0xf0]  ;;  %v1055_v39 = vperm.slane %v11629_v37, 4  ;;  %v8652_v40 = vor.u32 %v10744_v33, %v8649_v34  ;;  %v11632_v29 = vpop.f32.mrf.mxu1 }
 0x1f6   :  { %v10996_v57 = vld [vmem:[#allocation11 + $0xadc] sm:$0xf0] }
 0x1f7   :  { %v9640_v42 = vor.u32 %v10996_v57, %v9639_v3  ;;  %v9351_v28 = vld [vmem:[#allocation11 + $0x880] sm:$0xf]  ;;  %6025 = vmatpush.bf16.msra.mxu0 %v9384_v41  ;;  %v10736_v3 = vld [vmem:[#allocation11 + $0x2c4] sm:$0xf]  ;;  %v8364_v41 = vor.u32 %v10672_v36, %v8361_v9  ;;  %v2610_v58 = vpop.f32.mrf.mxu2  ;;  %v2583_v14 = vadd.f32 %v2582_v27, %v1055_v39 }
 0x1f8   :  { %v10924_v43 = vld [vmem:[#allocation11 + $0x89c] sm:$0xf0]  ;;  %v8617_v57 = vld [vmem:[#allocation11 + $0x2e0] sm:$0xf0] }
 0x1f9   :  { %v9607_v44 = vld [vmem:[#allocation11 + $0xa80] sm:$0xf]  ;;  %v9352_v46 = vor.u32 %v10924_v43, %v9351_v28  ;;  %6039 = vmatpush.bf16.msra.mxu1 %v9640_v42  ;;  %v10664_v28 = vld [vmem:[#allocation11 + $0x84] sm:$0xf]  ;;  %v11635_v50 = vpop.f32.mrf.mxu3 }
 0x1fa   :  { %v10988_v45 = vld [vmem:[#allocation11 + $0xa9c] sm:$0xf0]  ;;  %v8329_v43 = vld [vmem:[#allocation11 + $0xa0] sm:$0xf0] }
 0x1fb   :  { %v9319_v48 = vld [vmem:[#allocation11 + $0x840] sm:$0xf]  ;;  %v9608_v52 = vor.u32 %v10988_v45, %v9607_v44  ;;  %6026 = vmatpush.bf16.msra.mxu0 %v9352_v46  ;;  %v2581_v44 = vadd.f32 %v2580_v22, %v1055_v39  ;;  %v1056_v45 = vperm.slane %v11629_v37, 5  ;;  %v8620_v46 = vor.u32 %v10736_v3, %v8617_v57  ;;  %v10720_v22 = vld [vmem:[#allocation11 + $0x244] sm:$0xf] }
 0x1fc   :  { %v10916_v49 = vld [vmem:[#allocation11 + $0x85c] sm:$0xf0]  ;;  %v2636_v42 = vpop.f32.mrf.mxu0 }
 0x1fd   :  { %v10641_v51 = vld [vmem:[#allocation2 + $0xc] sm:$0xf]  ;;  %v9320_v0 = vor.u32 %v10916_v49, %v9319_v48  ;;  %6040 = vmatpush.bf16.msra.mxu1 %v9608_v52  ;;  %v10728_v48 = vld [vmem:[#allocation11 + $0x284] sm:$0xf]  ;;  %v2637_v6 = vadd.f32 %v2636_v42, %v1056_v45 }
 0x1fe   :  { %v8241_v1 = vld [vmem:[#allocation2 + $0x28] sm:$0xf0]  ;;  %v8585_v49 = vld [vmem:[#allocation11 + $0x2a0] sm:$0xf0] }
 0x1ff   :  { %v11623_v61 = vor.u32 %v10641_v51, %v8241_v1  ;;  %v9575_v62 = vld [vmem:[#allocation11 + $0xa40] sm:$0xf]  ;;  %6027 = vmatpush.bf16.msra.mxu0 %v9320_v0  ;;  %v8332_v51 = vor.u32 %v10664_v28, %v8329_v43  ;;  %v10656_v1 = vld [vmem:[#allocation11 + $0x44] sm:$0xf]  ;;  %v8588_v16 = vor.u32 %v10728_v48, %v8585_v49 }
 0x200   :  { %v10980_v13 = vld [vmem:[#allocation11 + $0xa5c] sm:$0xf0] }
 0x201   :  { %6015 = vmatmul.bf16.vlgmr.msrb.gmra.mxu3 %v11623_v61  ;;  %v9287_v21 = vld [vmem:[#allocation11 + $0x800] sm:$0xf]  ;;  %v9576_v38 = vor.u32 %v10980_v13, %v9575_v62  ;;  %v8297_v13 = vld [vmem:[#allocation11 + $0x60] sm:$0xf0] }
 0x202   :  { %v10908_v5 = vld [vmem:[#allocation11 + $0x81c] sm:$0xf0]  ;;  %v8300_v2 = vor.u32 %v10656_v1, %v8297_v13 }
 0x203   :  { %v9543_v7 = vld [vmem:[#allocation11 + $0xa00] sm:$0xf]  ;;  %v9288_v25 = vor.u32 %v10908_v5, %v9287_v21  ;;  %6041 = vmatpush.bf16.msra.mxu1 %v9576_v38  ;;  %v2595_v38 = vadd.f32 %v2594_v30, %v2581_v44 }
 0x204   :  { %v10972_v8 = vld [vmem:[#allocation11 + $0xa1c] sm:$0xf0] }
 0x205   :  { %v9544_v53 = vor.u32 %v10972_v8, %v9543_v7  ;;  %6028 = vmatpush.bf16.msra.mxu0 %v9288_v25  ;;  %v10023_v52 = vld [vmem:[#allocation11 + $0xdc0] sm:$0xf]  ;;  %v2650_v8 = vpop.f32.mrf.mxu1  ;;  %v8553_v25 = vld [vmem:[#allocation11 + $0x260] sm:$0xf0]  ;;  %v2609_v10 = vadd.f32 %v2608_v24, %v2595_v38 }
 0x206   :  { %v11092_v62 = vld [vmem:[#allocation11 + $0xddc] sm:$0xf0]  ;;  %v2651_v30 = vadd.f32 %v2650_v8, %v2637_v6  ;;  %v8556_v47 = vor.u32 %v10720_v22, %v8553_v25 }
 0x207   :  { %6042 = vmatpush.bf16.msra.mxu1 %v9544_v53  ;;  %v10024_v0 = vor.u32 %v11092_v62, %v10023_v52  ;;  %v10279_v21 = vld [vmem:[#allocation11 + $0xfc0] sm:$0xf]  ;;  %v2623_v24 = vadd.f32 %v11627_v32, %v2609_v10 }
 0x208   :  { %v11156_v5 = vld [vmem:[#allocation11 + $0xfdc] sm:$0xf0] }
 0x209   :  { %6077 = vmatpush.bf16.msrb.mxu0 %v8492_v4  ;;  %v10280_v7 = vor.u32 %v11156_v5, %v10279_v21  ;;  %6049 = vmatpush.bf16.msra.mxu2 %v10024_v0  ;;  %v9991_v4 = vld [vmem:[#allocation11 + $0xd80] sm:$0xf]  ;;  %v2664_v20 = vpop.f32.mrf.mxu2 }
 0x20a   :  { %v11084_v53 = vld [vmem:[#allocation11 + $0xd9c] sm:$0xf0]  ;;  %v2665_v60 = vadd.f32 %v2664_v20, %v2651_v30  ;;  %v2678_v63 = vpop.f32.mrf.mxu3 }
 0x20b   :  { %6091 = vmatpush.bf16.msrb.mxu1 %v8748_v15  ;;  %6063 = vmatpush.bf16.msra.mxu3 %v10280_v7  ;;  %v10247_v12 = vld [vmem:[#allocation11 + $0xf80] sm:$0xf]  ;;  %v10648_v15 = vld [vmem:[#allocation11 + $0x4] sm:$0xf]  ;;  %v9992_v59 = vor.u32 %v11084_v53, %v9991_v4 }
 0x20c   :  { %v9959_v27 = vld [vmem:[#allocation11 + $0xd40] sm:$0xf] }
 0x20d   :  { %6078 = vmatpush.bf16.msrb.mxu0 %v8460_v17  ;;  %v11148_v17 = vld [vmem:[#allocation11 + $0xf9c] sm:$0xf0]  ;;  %6050 = vmatpush.bf16.msra.mxu2 %v9992_v59  ;;  %v2652_v44 = vpop.f32.mrf.mxu1 }
 0x20e   :  { %v10248_v18 = vor.u32 %v11148_v17, %v10247_v12  ;;  %v11076_v33 = vld [vmem:[#allocation11 + $0xd5c] sm:$0xf0]  ;;  %v10960_v17 = vld [vmem:[#allocation11 + $0x9c4] sm:$0xf] }
 0x20f   :  { %6092 = vmatpush.bf16.msrb.mxu1 %v8716_v19  ;;  %v2638_v19 = vpop.f32.mrf.mxu0  ;;  %v10215_v34 = vld [vmem:[#allocation11 + $0xf40] sm:$0xf]  ;;  %v9960_v36 = vor.u32 %v11076_v33, %v9959_v27  ;;  %v10952_v27 = vld [vmem:[#allocation11 + $0x984] sm:$0xf] }
 0x210   :  { %6064 = vmatpush.bf16.msra.mxu3 %v10248_v18  ;;  %v11140_v9 = vld [vmem:[#allocation11 + $0xf5c] sm:$0xf0]  ;;  %v2639_v39 = vadd.f32 %v2638_v19, %v1056_v45  ;;  %v11024_v18 = vld [vmem:[#allocation11 + $0xbc4] sm:$0xf] }
 0x211   :  { %6079 = vmatpush.bf16.msrb.mxu0 %v8428_v26  ;;  %v8521_v26 = vld [vmem:[#allocation11 + $0x220] sm:$0xf0]  ;;  %v10216_v57 = vor.u32 %v11140_v9, %v10215_v34  ;;  %6051 = vmatpush.bf16.msra.mxu2 %v9960_v36  ;;  %v9927_v28 = vld [vmem:[#allocation11 + $0xd00] sm:$0xf]  ;;  %v2666_v1 = vpop.f32.mrf.mxu2 }
 0x212   :  { %v8524_v3 = vor.u32 %v10712_v23, %v8521_v26  ;;  %v11068_v43 = vld [vmem:[#allocation11 + $0xd1c] sm:$0xf0]  ;;  %v2680_v0 = vpop.f32.mrf.mxu3  ;;  %v9769_v19 = vld [vmem:[#allocation11 + $0xbe0] sm:$0xf0] }
 0x213   :  { %6093 = vmatpush.bf16.msrb.mxu1 %v8684_v31  ;;  %v8268_v31 = vor.u32 %v10648_v15, %v8265_v55  ;;  %v10183_v48 = vld [vmem:[#allocation11 + $0xf00] sm:$0xf]  ;;  %v9481_v33 = vld [vmem:[#allocation11 + $0x9a0] sm:$0xf0] }
 0x214   :  { %6065 = vmatpush.bf16.msra.mxu3 %v10216_v57  ;;  %v11132_v49 = vld [vmem:[#allocation11 + $0xf1c] sm:$0xf0]  ;;  %v11016_v34 = vld [vmem:[#allocation11 + $0xb84] sm:$0xf] }
 0x215   :  { %6080 = vmatpush.bf16.msrb.mxu0 %v8396_v35  ;;  %v2597_v35 = vadd.f32 %v11632_v29, %v2583_v14  ;;  %v2653_v29 = vadd.f32 %v2652_v44, %v2639_v39  ;;  %v10184_v45 = vor.u32 %v11132_v49, %v10183_v48  ;;  %v11060_v13 = vld [vmem:[#allocation11 + $0xcdc] sm:$0xf0]  ;;  %v10832_v36 = vld [vmem:[#allocation11 + $0x5c4] sm:$0xf] }
 0x216   :  { %v10151_v5 = vld [vmem:[#allocation11 + $0xec0] sm:$0xf]  ;;  %v9001_v57 = vld [vmem:[#allocation11 + $0x5e0] sm:$0xf0] }
 0x217   :  { %6094 = vmatpush.bf16.msrb.mxu1 %v8652_v40  ;;  %v2679_v40 = vadd.f32 %v2678_v63, %v2665_v60  ;;  %v2611_v32 = vadd.f32 %v2610_v58, %v2597_v35  ;;  %v2667_v62 = vadd.f32 %v2666_v1, %v2653_v29  ;;  %v9895_v58 = vld [vmem:[#allocation11 + $0xcc0] sm:$0xf]  ;;  %v9257_v44 = vld [vmem:[#allocation11 + $0x7e0] sm:$0xf0] }
 0x218   :  { %6066 = vmatpush.bf16.msra.mxu3 %v10184_v45  ;;  %v9896_v21 = vor.u32 %v11060_v13, %v9895_v58  ;;  %v11124_v38 = vld [vmem:[#allocation11 + $0xedc] sm:$0xf0]  ;;  %v10824_v48 = vld [vmem:[#allocation11 + $0x584] sm:$0xf] }
 0x219   :  { %6081 = vmatpush.bf16.msrb.mxu0 %v8364_v41  ;;  %v2799_v41 = vmax.f32 %v2623_v24, 0.0  ;;  %v2800_v42 = vmax.f32 %v2679_v40, 0.0  ;;  %v2625_v52 = vadd.f32 %v11635_v50, %v2611_v32  ;;  %v2681_v6 = vadd.f32 %v2680_v0, %v2667_v62  ;;  %v9863_v22 = vld [vmem:[#allocation11 + $0xc80] sm:$0xf]  ;;  %v8969_v49 = vld [vmem:[#allocation11 + $0x5a0] sm:$0xf0] }
 0x21a   :  { %v11052_v25 = vld [vmem:[#allocation11 + $0xc9c] sm:$0xf0]  ;;  %v10888_v29 = vld [vmem:[#allocation11 + $0x784] sm:$0xf]  ;;  %v8972_v0 = vor.u32 %v10824_v48, %v8969_v49  ;;  %v1057_v48 = vperm.slane %v11629_v37, 6 }
 0x21b   :  { %6095 = vmatpush.bf16.msrb.mxu1 %v8620_v46  ;;  %v9928_v46 = vor.u32 %v11068_v43, %v9927_v28  ;;  %v2807_v7 = vmax.f32 %v2625_v52, 0.0  ;;  %v2808_v8 = vmax.f32 %v2681_v6, 0.0  ;;  %v9864_v10 = vor.u32 %v11052_v25, %v9863_v22  ;;  %v11116_v50 = vld [vmem:[#allocation11 + $0xe9c] sm:$0xf0]  ;;  %v10896_v43 = vld [vmem:[#allocation11 + $0x7c4] sm:$0xf] }
 0x21c   :  { %v9831_v12 = vld [vmem:[#allocation11 + $0xc40] sm:$0xf]  ;;  %v9004_v28 = vor.u32 %v10832_v36, %v9001_v57  ;;  %v10944_v1 = vld [vmem:[#allocation11 + $0x944] sm:$0xf] }
 0x21d   :  { %6082 = vmatpush.bf16.msrb.mxu0 %v8332_v51  ;;  %v2813_v51 = vpack.c.bf16 %v2800_v42, %v2799_v41  ;;  %6052 = vmatpush.bf16.msra.mxu2 %v9928_v46  ;;  %v2817_v4 = vpack.c.bf16 %v2808_v8, %v2807_v7  ;;  %v11044_v14 = vld [vmem:[#allocation11 + $0xc5c] sm:$0xf0]  ;;  %v9737_v42 = vld [vmem:[#allocation11 + $0xba0] sm:$0xf0]  ;;  %v9260_v46 = vor.u32 %v10896_v43, %v9257_v44 }
 0x21e   :  { %v9832_v15 = vor.u32 %v11044_v14, %v9831_v12  ;;  %v10087_v55 = vld [vmem:[#allocation11 + $0xe40] sm:$0xf]  ;;  %v9740_v45 = vor.u32 %v11016_v34, %v9737_v42  ;;  %v9225_v52 = vld [vmem:[#allocation11 + $0x7a0] sm:$0xf0] }
 0x21f   :  { %6096 = vmatpush.bf16.msrb.mxu1 %v8588_v16  ;;  %2821 = vst [vmem:[#allocation2 + $0x10] sm:$0xff] %v2813_v51  ;;  %v10152_v16 = vor.u32 %v11124_v38, %v10151_v5  ;;  %v11108_v59 = vld [vmem:[#allocation11 + $0xe5c] sm:$0xf0]  ;;  %v9484_v51 = vor.u32 %v10952_v27, %v9481_v33  ;;  %v9449_v62 = vld [vmem:[#allocation11 + $0x960] sm:$0xf0]  ;;  %v11646_v5 = vpop.f32.mrf.mxu0 }
 0x220   :  { %2825 = vst [vmem:[#allocation2 + $0x30] sm:$0xff] %v2817_v4  ;;  %v10088_v30 = vor.u32 %v11108_v59, %v10087_v55  ;;  %v9799_v20 = vld [vmem:[#allocation11 + $0xc00] sm:$0xf]  ;;  %v11008_v58 = vld [vmem:[#allocation11 + $0xb44] sm:$0xf]  ;;  %v9452_v8 = vor.u32 %v10944_v1, %v9449_v62  ;;  %v11648_v59 = vpop.f32.mrf.mxu1 }
 0x221   :  { %6083 = vmatpush.bf16.msrb.mxu0 %v8300_v2  ;;  %6053 = vmatpush.bf16.msra.mxu2 %v9896_v21  ;;  %v10119_v2 = vld [vmem:[#allocation11 + $0xe80] sm:$0xf]  ;;  %v9705_v13 = vld [vmem:[#allocation11 + $0xb60] sm:$0xf0]  ;;  %v9228_v21 = vor.u32 %v10888_v29, %v9225_v52 }
 0x222   :  { %6067 = vmatpush.bf16.msra.mxu3 %v10152_v16  ;;  %v10120_v53 = vor.u32 %v11116_v50, %v10119_v2  ;;  %v11036_v23 = vld [vmem:[#allocation11 + $0xc1c] sm:$0xf0]  ;;  %v10816_v38 = vld [vmem:[#allocation11 + $0x544] sm:$0xf]  ;;  %v9708_v22 = vor.u32 %v11008_v58, %v9705_v13 }
 0x223   :  { %6097 = vmatpush.bf16.msrb.mxu1 %v8556_v47  ;;  %v9513_v47 = vld [vmem:[#allocation11 + $0x9e0] sm:$0xf0]  ;;  %v10055_v26 = vld [vmem:[#allocation11 + $0xe00] sm:$0xf]  ;;  %v9800_v24 = vor.u32 %v11036_v23, %v9799_v20 }
 0x224   :  { %v11100_v60 = vld [vmem:[#allocation11 + $0xe1c] sm:$0xf0]  ;;  %v9516_v40 = vor.u32 %v10960_v17, %v9513_v47  ;;  %v8937_v6 = vld [vmem:[#allocation11 + $0x560] sm:$0xf0] }
 0x225   :  { %6084 = vmatpush.bf16.msrb.mxu0 %v8268_v31  ;;  %6054 = vmatpush.bf16.msra.mxu2 %v9864_v10  ;;  %v10056_v35 = vor.u32 %v11100_v60, %v10055_v26  ;;  %v10880_v16 = vld [vmem:[#allocation11 + $0x744] sm:$0xf]  ;;  %v8940_v4 = vor.u32 %v10816_v38, %v8937_v6  ;;  %v1058_v6 = vperm.slane %v11629_v37, 7  ;;  %v8367_v37 = vld [vmem:[#allocation11 + $0xc8] sm:$0xf] }
 0x226   :  { %6068 = vmatpush.bf16.msra.mxu3 %v10120_v53  ;;  %v8247_v63 = vld [vmem:[#allocation2 + $0x10] sm:$0xf]  ;;  %v10642_v31 = vld [vmem:[#allocation2 + $0x14] sm:$0xf] }
 0x227   :  { %6098 = vmatpush.bf16.msrb.mxu1 %v8524_v3  ;;  %v10646_v9 = vld [vmem:[#allocation2 + $0x2c] sm:$0xf0]  ;;  %v8249_v39 = vld [vmem:[#allocation2 + $0x30] sm:$0xf0]  ;;  %v9772_v3 = vor.u32 %v11024_v18, %v9769_v19  ;;  %v11650_v27 = vpop.f32.mrf.mxu0 }
 0x228   :  { %v11640_v41 = vor.u32 %v10646_v9, %v8247_v63  ;;  %v11642_v32 = vor.u32 %v10642_v31, %v8249_v39  ;;  %v9193_v7 = vld [vmem:[#allocation11 + $0x760] sm:$0xf0]  ;;  %v11659_v13 = vpop.f32.mrf.mxu1 }
 0x229   :  { %6055 = vmatpush.bf16.msra.mxu2 %v9832_v15  ;;  %v10936_v25 = vld [vmem:[#allocation11 + $0x904] sm:$0xf]  ;;  %v9196_v53 = vor.u32 %v10880_v16, %v9193_v7  ;;  %v11652_v33 = vpop.f32.mrf.mxu2  ;;  %v2693_v7 = vadd.f32 %v11646_v5, %v1057_v48 }
 0x22a   :  { %6069 = vmatpush.bf16.msra.mxu3 %v10088_v30  ;;  %6029 = vmatmul.bf16.vlgmr.msra.gmra.mxu0 %v11640_v41  ;;  %v9417_v10 = vld [vmem:[#allocation11 + $0x920] sm:$0xf0]  ;;  %v11654_v9 = vpop.f32.mrf.mxu3 }
 0x22b   :  { %6043 = vmatmul.bf16.vlgmr.msra.gmra.mxu1 %v11642_v32  ;;  %6133 = vmatpush.bf16.msra.mxu0 %v9516_v40  ;;  %v11000_v2 = vld [vmem:[#allocation11 + $0xb04] sm:$0xf]  ;;  %v9420_v17 = vor.u32 %v10936_v25, %v9417_v10 }
 0x22c   :  { %6147 = vmatpush.bf16.msra.mxu1 %v9772_v3  ;;  %v9673_v50 = vld [vmem:[#allocation11 + $0xb20] sm:$0xf0] }
 0x22d   :  { %6056 = vmatpush.bf16.msra.mxu2 %v9800_v24  ;;  %v10808_v12 = vld [vmem:[#allocation11 + $0x504] sm:$0xf]  ;;  %v9676_v30 = vor.u32 %v11000_v2, %v9673_v50 }
 0x22e   :  { %6070 = vmatpush.bf16.msra.mxu3 %v10056_v35  ;;  %v8905_v14 = vld [vmem:[#allocation11 + $0x520] sm:$0xf0] }
 0x22f   :  { %6134 = vmatpush.bf16.msra.mxu0 %v9484_v51  ;;  %v10872_v15 = vld [vmem:[#allocation11 + $0x704] sm:$0xf]  ;;  %v8908_v23 = vor.u32 %v10808_v12, %v8905_v14  ;;  %v10709_v12 = vld [vmem:[#allocation11 + $0x1e4] sm:$0xf0] }
 0x230   :  { %6148 = vmatpush.bf16.msra.mxu1 %v9740_v45  ;;  %v9161_v55 = vld [vmem:[#allocation11 + $0x720] sm:$0xf0] }
 0x231   :  { %6105 = vmatpush.bf16.msrb.mxu2 %v9004_v28  ;;  %v10928_v47 = vld [vmem:[#allocation11 + $0x8c4] sm:$0xf]  ;;  %v9164_v26 = vor.u32 %v10872_v15, %v9161_v55  ;;  %v2722_v55 = vpop.f32.mrf.mxu2 }
 0x232   :  { %6119 = vmatpush.bf16.msrb.mxu3 %v9260_v46  ;;  %v9385_v18 = vld [vmem:[#allocation11 + $0x8e0] sm:$0xf0]  ;;  %v11663_v5 = vpop.f32.mrf.mxu3 }
 0x233   :  { %6135 = vmatpush.bf16.msra.mxu0 %v9452_v8  ;;  %v10992_v19 = vld [vmem:[#allocation11 + $0xac4] sm:$0xf]  ;;  %v9388_v34 = vor.u32 %v10928_v47, %v9385_v18 }
 0x234   :  { %6149 = vmatpush.bf16.msra.mxu1 %v9708_v22  ;;  %v9641_v20 = vld [vmem:[#allocation11 + $0xae0] sm:$0xf0] }
 0x235   :  { %6106 = vmatpush.bf16.msrb.mxu2 %v8972_v0  ;;  %v10800_v24 = vld [vmem:[#allocation11 + $0x4c4] sm:$0xf]  ;;  %v9644_v35 = vor.u32 %v10992_v19, %v9641_v20 }
 0x236   :  { %6120 = vmatpush.bf16.msrb.mxu3 %v9228_v21  ;;  %v8873_v60 = vld [vmem:[#allocation11 + $0x4e0] sm:$0xf0] }
 0x237   :  { %v10864_v63 = vld [vmem:[#allocation11 + $0x6c4] sm:$0xf]  ;;  %6136 = vmatpush.bf16.msra.mxu0 %v9420_v17  ;;  %v8876_v57 = vor.u32 %v10800_v24, %v8873_v60  ;;  %v8751_v17 = vld [vmem:[#allocation11 + $0x3c8] sm:$0xf] }
 0x238   :  { %v9129_v31 = vld [vmem:[#allocation11 + $0x6e0] sm:$0xf0]  ;;  %6150 = vmatpush.bf16.msra.mxu1 %v9676_v30  ;;  %v10773_v30 = vld [vmem:[#allocation11 + $0x3e4] sm:$0xf0] }
 0x239   :  { %6107 = vmatpush.bf16.msrb.mxu2 %v8940_v4  ;;  %v10920_v36 = vld [vmem:[#allocation11 + $0x884] sm:$0xf]  ;;  %v9132_v42 = vor.u32 %v10864_v63, %v9129_v31  ;;  %v8752_v31 = vor.u32 %v10773_v30, %v8751_v17 }
 0x23a   :  { %6121 = vmatpush.bf16.msrb.mxu3 %v9196_v53  ;;  %v9353_v39 = vld [vmem:[#allocation11 + $0x8a0] sm:$0xf0]  ;;  %6085 = vmatmul.bf16.vlgmr.msrb.gmra.mxu0 %v11614_v54  ;;  %v8495_v53 = vld [vmem:[#allocation11 + $0x1c8] sm:$0xf] }
 0x23b   :  { %v10984_v40 = vld [vmem:[#allocation11 + $0xa84] sm:$0xf]  ;;  %6099 = vmatmul.bf16.vlgmr.msrb.gmra.mxu1 %v11616_v11  ;;  %6137 = vmatpush.bf16.msra.mxu0 %v9388_v34  ;;  %v9356_v49 = vor.u32 %v10920_v36, %v9353_v39  ;;  %v8496_v63 = vor.u32 %v10709_v12, %v8495_v53  ;;  %v8463_v34 = vld [vmem:[#allocation11 + $0x188] sm:$0xf] }
 0x23c   :  { %v9609_v3 = vld [vmem:[#allocation11 + $0xaa0] sm:$0xf0]  ;;  %6151 = vmatpush.bf16.msra.mxu1 %v9644_v35  ;;  %v2748_v8 = vpop.f32.mrf.mxu0  ;;  %v10701_v36 = vld [vmem:[#allocation11 + $0x1a4] sm:$0xf0] }
 0x23d   :  { %6108 = vmatpush.bf16.msrb.mxu2 %v8908_v23  ;;  %v10792_v28 = vld [vmem:[#allocation11 + $0x484] sm:$0xf]  ;;  %v9612_v29 = vor.u32 %v10984_v40, %v9609_v3  ;;  %v2707_v23 = vadd.f32 %v11648_v59, %v2693_v7  ;;  %v2749_v60 = vadd.f32 %v2748_v8, %v1058_v6  ;;  %v2762_v35 = vpop.f32.mrf.mxu1  ;;  %v8719_v39 = vld [vmem:[#allocation11 + $0x388] sm:$0xf] }
 0x23e   :  { %6122 = vmatpush.bf16.msrb.mxu3 %v9164_v26  ;;  %v8841_v43 = vld [vmem:[#allocation11 + $0x4a0] sm:$0xf0]  ;;  %v10765_v40 = vld [vmem:[#allocation11 + $0x3a4] sm:$0xf0] }
 0x23f   :  { %v10856_v44 = vld [vmem:[#allocation11 + $0x684] sm:$0xf]  ;;  %v8844_v62 = vor.u32 %v10792_v28, %v8841_v43  ;;  %6138 = vmatpush.bf16.msra.mxu0 %v9356_v49  ;;  %v2721_v59 = vadd.f32 %v11652_v33, %v2707_v23  ;;  %v2763_v28 = vadd.f32 %v2762_v35, %v2749_v60  ;;  %v8464_v43 = vor.u32 %v10701_v36, %v8463_v34  ;;  %v10693_v49 = vld [vmem:[#allocation11 + $0x164] sm:$0xf0] }
 0x240   :  { %v9097_v46 = vld [vmem:[#allocation11 + $0x6a0] sm:$0xf0]  ;;  %6152 = vmatpush.bf16.msra.mxu1 %v9612_v29  ;;  %v8655_v7 = vld [vmem:[#allocation11 + $0x308] sm:$0xf] }
 0x241   :  { %v10912_v51 = vld [vmem:[#allocation11 + $0x844] sm:$0xf]  ;;  %6109 = vmatpush.bf16.msrb.mxu2 %v8876_v57  ;;  %v9100_v58 = vor.u32 %v10856_v44, %v9097_v46  ;;  %v8720_v44 = vor.u32 %v10765_v40, %v8719_v39  ;;  %v8431_v46 = vld [vmem:[#allocation11 + $0x148] sm:$0xf] }
 0x242   :  { %v9321_v45 = vld [vmem:[#allocation11 + $0x860] sm:$0xf0]  ;;  %6123 = vmatpush.bf16.msrb.mxu3 %v9132_v42  ;;  %v2695_v42 = vadd.f32 %v11650_v27, %v1057_v48  ;;  %v8432_v48 = vor.u32 %v10693_v49, %v8431_v46  ;;  %v10677_v53 = vld [vmem:[#allocation11 + $0xe4] sm:$0xf0] }
 0x243   :  { %v10976_v1 = vld [vmem:[#allocation11 + $0xa44] sm:$0xf]  ;;  %v9324_v22 = vor.u32 %v10912_v51, %v9321_v45  ;;  %v8687_v45 = vld [vmem:[#allocation11 + $0x348] sm:$0xf] }
 0x244   :  { %v9577_v52 = vld [vmem:[#allocation11 + $0xa60] sm:$0xf0]  ;;  %v2750_v29 = vpop.f32.mrf.mxu0  ;;  %v2709_v27 = vadd.f32 %v11659_v13, %v2695_v42  ;;  %v8623_v12 = vld [vmem:[#allocation11 + $0x2c8] sm:$0xf] }
 0x245   :  { %v10784_v0 = vld [vmem:[#allocation11 + $0x444] sm:$0xf]  ;;  %v9580_v25 = vor.u32 %v10976_v1, %v9577_v52  ;;  %6110 = vmatpush.bf16.msrb.mxu2 %v8844_v62  ;;  %6139 = vmatpush.bf16.msra.mxu0 %v9324_v22  ;;  %v10757_v1 = vld [vmem:[#allocation11 + $0x364] sm:$0xf0]  ;;  %v2735_v52 = vadd.f32 %v11654_v9, %v2721_v59 }
 0x246   :  { %v8809_v21 = vld [vmem:[#allocation11 + $0x460] sm:$0xf0]  ;;  %6124 = vmatpush.bf16.msrb.mxu3 %v9100_v58  ;;  %v2751_v58 = vadd.f32 %v2750_v29, %v1058_v6  ;;  %v10749_v9 = vld [vmem:[#allocation11 + $0x324] sm:$0xf0]  ;;  %v2723_v22 = vadd.f32 %v2722_v55, %v2709_v27  ;;  %v8368_v55 = vor.u32 %v10677_v53, %v8367_v37 }
 0x247   :  { %v10848_v38 = vld [vmem:[#allocation11 + $0x644] sm:$0xf]  ;;  %v8812_v14 = vor.u32 %v10784_v0, %v8809_v21  ;;  %6153 = vmatpush.bf16.msra.mxu1 %v9580_v25  ;;  %v8688_v21 = vor.u32 %v10757_v1, %v8687_v45  ;;  %v2801_v8 = vmax.f32 %v2735_v52, 0.0  ;;  %v8656_v13 = vor.u32 %v10749_v9, %v8655_v7  ;;  %v8591_v23 = vld [vmem:[#allocation11 + $0x288] sm:$0xf] }
 0x248   :  { %v9065_v16 = vld [vmem:[#allocation11 + $0x660] sm:$0xf0]  ;;  %v10661_v35 = vld [vmem:[#allocation11 + $0x64] sm:$0xf0] }
 0x249   :  { %v10904_v10 = vld [vmem:[#allocation11 + $0x804] sm:$0xf]  ;;  %v9068_v15 = vor.u32 %v10848_v38, %v9065_v16  ;;  %6111 = vmatpush.bf16.msrb.mxu2 %v8812_v14  ;;  %v2776_v51 = vpop.f32.mrf.mxu2  ;;  %v8399_v38 = vld [vmem:[#allocation11 + $0x108] sm:$0xf] }
 0x24a   :  { %v9289_v2 = vld [vmem:[#allocation11 + $0x820] sm:$0xf0]  ;;  %v2777_v33 = vadd.f32 %v2776_v51, %v2763_v28  ;;  %v10685_v16 = vld [vmem:[#allocation11 + $0x124] sm:$0xf0] }
 0x24b   :  { %v10968_v50 = vld [vmem:[#allocation11 + $0xa04] sm:$0xf]  ;;  %v9292_v26 = vor.u32 %v10904_v10, %v9289_v2  ;;  %6125 = vmatpush.bf16.msrb.mxu3 %v9068_v15  ;;  %v2790_v62 = vpop.f32.mrf.mxu3  ;;  %v2764_v10 = vpop.f32.mrf.mxu1  ;;  %v8400_v2 = vor.u32 %v10685_v16, %v8399_v38  ;;  %v10741_v14 = vld [vmem:[#allocation11 + $0x2e4] sm:$0xf0]  ;;  %v2737_v15 = vadd.f32 %v11663_v5, %v2723_v22 }
 0x24c   :  { %v9545_v4 = vld [vmem:[#allocation11 + $0xa20] sm:$0xf0]  ;;  %v2791_v0 = vadd.f32 %v2790_v62, %v2777_v33  ;;  %v8303_v5 = vld [vmem:[#allocation11 + $0x48] sm:$0xf] }
 0x24d   :  { %v10776_v47 = vld [vmem:[#allocation11 + $0x404] sm:$0xf]  ;;  %v9548_v24 = vor.u32 %v10968_v50, %v9545_v4  ;;  %6140 = vmatpush.bf16.msra.mxu0 %v9292_v26  ;;  %v2765_v50 = vadd.f32 %v2764_v10, %v2751_v58  ;;  %v10733_v26 = vld [vmem:[#allocation11 + $0x2a4] sm:$0xf0]  ;;  %v8304_v40 = vor.u32 %v10661_v35, %v8303_v5 }
 0x24e   :  { %v8777_v18 = vld [vmem:[#allocation11 + $0x420] sm:$0xf0]  ;;  %v2802_v25 = vmax.f32 %v2791_v0, 0.0  ;;  %v8592_v34 = vor.u32 %v10733_v26, %v8591_v23  ;;  %v8559_v36 = vld [vmem:[#allocation11 + $0x248] sm:$0xf] }
 0x24f   :  { %v10840_v19 = vld [vmem:[#allocation11 + $0x604] sm:$0xf]  ;;  %v8780_v3 = vor.u32 %v10776_v47, %v8777_v18  ;;  %6154 = vmatpush.bf16.msra.mxu1 %v9548_v24  ;;  %v8624_v18 = vor.u32 %v10741_v14, %v8623_v12  ;;  %v2809_v24 = vmax.f32 %v2737_v15, 0.0  ;;  %v10725_v39 = vld [vmem:[#allocation11 + $0x264] sm:$0xf0] }
 0x250   :  { %v9033_v20 = vld [vmem:[#allocation11 + $0x620] sm:$0xf0]  ;;  %6141 = vmatmul.bf16.vlgmr.msra.gmra.mxu0 %v11640_v41  ;;  %v2814_v4 = vpack.c.bf16 %v2802_v25, %v2801_v8  ;;  %v10653_v59 = vld [vmem:[#allocation11 + $0x24] sm:$0xf0] }
 0x251   :  { %v9036_v57 = vor.u32 %v10840_v19, %v9033_v20  ;;  %6189 = vmatpush.bf16.msrb.mxu0 %v8496_v63  ;;  %6112 = vmatpush.bf16.msrb.mxu2 %v8780_v3  ;;  %v2778_v6 = vpop.f32.mrf.mxu2  ;;  %v8335_v19 = vld [vmem:[#allocation11 + $0x88] sm:$0xf]  ;;  %v8560_v3 = vor.u32 %v10725_v39, %v8559_v36  ;;  %v11152_v46 = vld [vmem:[#allocation11 + $0xfc4] sm:$0xf] }
 0x252   :  { %6155 = vmatmul.bf16.vlgmr.msra.gmra.mxu1 %v11642_v32  ;;  %2822 = vst [vmem:[#allocation2 + $0x18] sm:$0xff] %v2814_v4  ;;  %v2779_v17 = vadd.f32 %v2778_v6, %v2765_v50  ;;  %v10669_v20 = vld [vmem:[#allocation11 + $0xa4] sm:$0xf0]  ;;  %v10281_v49 = vld [vmem:[#allocation11 + $0xfe0] sm:$0xf0] }
 0x253   :  { %6203 = vmatpush.bf16.msrb.mxu1 %v8752_v31  ;;  %6126 = vmatpush.bf16.msrb.mxu3 %v9036_v57  ;;  %v2792_v30 = vpop.f32.mrf.mxu3  ;;  %v8336_v31 = vor.u32 %v10669_v20, %v8335_v19  ;;  %v8271_v57 = vld [vmem:[#allocation11 + $0x8] sm:$0xf]  ;;  %v10284_v16 = vor.u32 %v11152_v46, %v10281_v49  ;;  %v11080_v7 = vld [vmem:[#allocation11 + $0xd84] sm:$0xf] }
 0x254   :  { %v2793_v47 = vadd.f32 %v2792_v30, %v2779_v17  ;;  %v8527_v42 = vld [vmem:[#allocation11 + $0x208] sm:$0xf]  ;;  %v8272_v45 = vor.u32 %v10653_v59, %v8271_v57  ;;  %v9993_v9 = vld [vmem:[#allocation11 + $0xda0] sm:$0xf0] }
 0x255   :  { %6190 = vmatpush.bf16.msrb.mxu0 %v8464_v43  ;;  %v10717_v28 = vld [vmem:[#allocation11 + $0x224] sm:$0xf0]  ;;  %v11088_v43 = vld [vmem:[#allocation11 + $0xdc4] sm:$0xf]  ;;  %v9996_v37 = vor.u32 %v11080_v7, %v9993_v9 }
 0x256   :  { %v2810_v60 = vmax.f32 %v2793_v47, 0.0  ;;  %v9519_v29 = vld [vmem:[#allocation11 + $0x9c8] sm:$0xf]  ;;  %v8528_v1 = vor.u32 %v10717_v28, %v8527_v42  ;;  %v11144_v25 = vld [vmem:[#allocation11 + $0xf84] sm:$0xf] }
 0x257   :  { %6204 = vmatpush.bf16.msrb.mxu1 %v8720_v44  ;;  %v10025_v44 = vld [vmem:[#allocation11 + $0xde0] sm:$0xf0]  ;;  %v10965_v51 = vld [vmem:[#allocation11 + $0x9e4] sm:$0xf0] }
 0x258   :  { %v2818_v63 = vpack.c.bf16 %v2810_v60, %v2809_v24  ;;  %v9775_v33 = vld [vmem:[#allocation11 + $0xbc8] sm:$0xf]  ;;  %v10028_v38 = vor.u32 %v11088_v43, %v10025_v44  ;;  %v9520_v8 = vor.u32 %v10965_v51, %v9519_v29  ;;  %v10249_v10 = vld [vmem:[#allocation11 + $0xfa0] sm:$0xf0] }
 0x259   :  { %6191 = vmatpush.bf16.msrb.mxu0 %v8432_v48  ;;  %v8255_v52 = vld [vmem:[#allocation2 + $0x18] sm:$0xf]  ;;  %v11029_v62 = vld [vmem:[#allocation11 + $0xbe4] sm:$0xf0]  ;;  %v10643_v48 = vld [vmem:[#allocation2 + $0x1c] sm:$0xf]  ;;  %v10252_v6 = vor.u32 %v11144_v25, %v10249_v10 }
 0x25a   :  { %2826 = vst [vmem:[#allocation2 + $0x38] sm:$0xff] %v2818_v63  ;;  %v9776_v22 = vor.u32 %v11029_v62, %v9775_v33  ;;  %v10957_v50 = vld [vmem:[#allocation11 + $0x9a4] sm:$0xf0]  ;;  %v11072_v53 = vld [vmem:[#allocation11 + $0xd44] sm:$0xf] }
 0x25b   :  { %6205 = vmatpush.bf16.msrb.mxu1 %v8688_v21  ;;  %v9743_v4 = vld [vmem:[#allocation11 + $0xb88] sm:$0xf]  ;;  %v9961_v12 = vld [vmem:[#allocation11 + $0xd60] sm:$0xf0] }
 0x25c   :  { %v11136_v17 = vld [vmem:[#allocation11 + $0xf44] sm:$0xf]  ;;  %v9455_v47 = vld [vmem:[#allocation11 + $0x948] sm:$0xf]  ;;  %v9964_v20 = vor.u32 %v11072_v53, %v9961_v12 }
 0x25d   :  { %6192 = vmatpush.bf16.msrb.mxu0 %v8400_v2  ;;  %v9487_v2 = vld [vmem:[#allocation11 + $0x988] sm:$0xf]  ;;  %v10217_v30 = vld [vmem:[#allocation11 + $0xf60] sm:$0xf0] }
 0x25e   :  { %v9488_v14 = vor.u32 %v10957_v50, %v9487_v2  ;;  %v11013_v19 = vld [vmem:[#allocation11 + $0xb64] sm:$0xf0]  ;;  %v10220_v23 = vor.u32 %v11136_v17, %v10217_v30  ;;  %v11064_v26 = vld [vmem:[#allocation11 + $0xd04] sm:$0xf] }
 0x25f   :  { %6206 = vmatpush.bf16.msrb.mxu1 %v8656_v13  ;;  %v11021_v13 = vld [vmem:[#allocation11 + $0xba4] sm:$0xf0]  ;;  %v9929_v24 = vld [vmem:[#allocation11 + $0xd20] sm:$0xf0] }
 0x260   :  { %v9744_v15 = vor.u32 %v11021_v13, %v9743_v4  ;;  %v9423_v5 = vld [vmem:[#allocation11 + $0x908] sm:$0xf]  ;;  %v11056_v57 = vld [vmem:[#allocation11 + $0xcc4] sm:$0xf] }
 0x261   :  { %6193 = vmatpush.bf16.msrb.mxu0 %v8368_v55  ;;  %v10647_v27 = vld [vmem:[#allocation2 + $0x34] sm:$0xf0]  ;;  %v8257_v58 = vld [vmem:[#allocation2 + $0x38] sm:$0xf0]  ;;  %v10949_v55 = vld [vmem:[#allocation11 + $0x964] sm:$0xf0] }
 0x262   :  { %v11677_v0 = vor.u32 %v10647_v27, %v8255_v52  ;;  %v11679_v21 = vor.u32 %v10643_v48, %v8257_v58  ;;  %v9456_v60 = vor.u32 %v10949_v55, %v9455_v47  ;;  %v10941_v35 = vld [vmem:[#allocation11 + $0x924] sm:$0xf0]  ;;  %v9897_v59 = vld [vmem:[#allocation11 + $0xce0] sm:$0xf0] }
 0x263   :  { %6207 = vmatpush.bf16.msrb.mxu1 %v8624_v18  ;;  %v9711_v18 = vld [vmem:[#allocation11 + $0xb48] sm:$0xf]  ;;  %v9424_v42 = vor.u32 %v10941_v35, %v9423_v5  ;;  %v11120_v43 = vld [vmem:[#allocation11 + $0xec4] sm:$0xf]  ;;  %v10705_v5 = vld [vmem:[#allocation11 + $0x1cc] sm:$0xf] }
 0x264   :  { %6057 = vmatmul.bf16.vlgmr.msra.gmra.mxu2 %v11677_v0  ;;  %6071 = vmatmul.bf16.vlgmr.msra.gmra.mxu3 %v11679_v21  ;;  %v9712_v63 = vor.u32 %v11013_v19, %v9711_v18  ;;  %v9679_v36 = vld [vmem:[#allocation11 + $0xb08] sm:$0xf]  ;;  %v10153_v44 = vld [vmem:[#allocation11 + $0xee0] sm:$0xf0] }
 0x265   :  { %6194 = vmatpush.bf16.msrb.mxu0 %v8336_v31  ;;  %6161 = vmatpush.bf16.msra.mxu2 %v10028_v38  ;;  %v11128_v31 = vld [vmem:[#allocation11 + $0xf04] sm:$0xf]  ;;  %v11005_v39 = vld [vmem:[#allocation11 + $0xb24] sm:$0xf0] }
 0x266   :  { %6175 = vmatpush.bf16.msra.mxu3 %v10284_v16  ;;  %v9680_v28 = vor.u32 %v11005_v39, %v9679_v36  ;;  %v9391_v46 = vld [vmem:[#allocation11 + $0x8c8] sm:$0xf]  ;;  %v11048_v52 = vld [vmem:[#allocation11 + $0xc84] sm:$0xf]  ;;  %v8497_v39 = vld [vmem:[#allocation11 + $0x1e8] sm:$0xf0] }
 0x267   :  { %6208 = vmatpush.bf16.msrb.mxu1 %v8592_v34  ;;  %v10185_v34 = vld [vmem:[#allocation11 + $0xf20] sm:$0xf0]  ;;  %v10933_v49 = vld [vmem:[#allocation11 + $0x8e4] sm:$0xf0] }
 0x268   :  { %v9647_v29 = vld [vmem:[#allocation11 + $0xac8] sm:$0xf]  ;;  %v9865_v33 = vld [vmem:[#allocation11 + $0xca0] sm:$0xf0]  ;;  %v9392_v62 = vor.u32 %v10933_v49, %v9391_v46  ;;  %v8500_v46 = vor.u32 %v10705_v5, %v8497_v39 }
 0x269   :  { %6195 = vmatpush.bf16.msrb.mxu0 %v8304_v40  ;;  %6162 = vmatpush.bf16.msra.mxu2 %v9996_v37  ;;  %v9932_v40 = vor.u32 %v11064_v26, %v9929_v24  ;;  %v10997_v51 = vld [vmem:[#allocation11 + $0xae4] sm:$0xf0]  ;;  %v11112_v48 = vld [vmem:[#allocation11 + $0xe84] sm:$0xf] }
 0x26a   :  { %6176 = vmatpush.bf16.msra.mxu3 %v10252_v6  ;;  %v9648_v27 = vor.u32 %v10997_v51, %v9647_v29  ;;  %v10121_v58 = vld [vmem:[#allocation11 + $0xea0] sm:$0xf0]  ;;  %v9359_v38 = vld [vmem:[#allocation11 + $0x888] sm:$0xf] }
 0x26b   :  { %6209 = vmatpush.bf16.msrb.mxu1 %v8560_v3  ;;  %v10188_v3 = vor.u32 %v11128_v31, %v10185_v34  ;;  %v10925_v16 = vld [vmem:[#allocation11 + $0x8a4] sm:$0xf0]  ;;  %v11040_v25 = vld [vmem:[#allocation11 + $0xc44] sm:$0xf] }
 0x26c   :  { %v9615_v7 = vld [vmem:[#allocation11 + $0xa88] sm:$0xf]  ;;  %v9833_v10 = vld [vmem:[#allocation11 + $0xc60] sm:$0xf0]  ;;  %v9360_v2 = vor.u32 %v10925_v16, %v9359_v38 }
 0x26d   :  { %6196 = vmatpush.bf16.msrb.mxu0 %v8272_v45  ;;  %6163 = vmatpush.bf16.msra.mxu2 %v9964_v20  ;;  %v9900_v45 = vor.u32 %v11056_v57, %v9897_v59  ;;  %v10989_v9 = vld [vmem:[#allocation11 + $0xaa4] sm:$0xf0]  ;;  %v11104_v4 = vld [vmem:[#allocation11 + $0xe44] sm:$0xf] }
 0x26e   :  { %6177 = vmatpush.bf16.msra.mxu3 %v10220_v23  ;;  %v9616_v50 = vor.u32 %v10989_v9, %v9615_v7  ;;  %v10089_v13 = vld [vmem:[#allocation11 + $0xe60] sm:$0xf0]  ;;  %v9327_v37 = vld [vmem:[#allocation11 + $0x848] sm:$0xf] }
 0x26f   :  { %6210 = vmatpush.bf16.msrb.mxu1 %v8528_v1  ;;  %v10156_v1 = vor.u32 %v11120_v43, %v10153_v44  ;;  %v10917_v6 = vld [vmem:[#allocation11 + $0x864] sm:$0xf0]  ;;  %v10092_v17 = vor.u32 %v11104_v4, %v10089_v13  ;;  %v9801_v30 = vld [vmem:[#allocation11 + $0xc20] sm:$0xf0] }
 0x270   :  { %6197 = vmatmul.bf16.vlgmr.msrb.gmra.mxu0 %v11614_v54  ;;  %v9583_v53 = vld [vmem:[#allocation11 + $0xa48] sm:$0xf]  ;;  %v11096_v47 = vld [vmem:[#allocation11 + $0xe04] sm:$0xf]  ;;  %v9328_v18 = vor.u32 %v10917_v6, %v9327_v37 }
 0x271   :  { %6245 = vmatpush.bf16.msra.mxu0 %v9520_v8  ;;  %6164 = vmatpush.bf16.msra.mxu2 %v9932_v40  ;;  %v9868_v8 = vor.u32 %v11048_v52, %v9865_v33  ;;  %v10981_v12 = vld [vmem:[#allocation11 + $0xa64] sm:$0xf0]  ;;  %v10057_v55 = vld [vmem:[#allocation11 + $0xe20] sm:$0xf0]  ;;  %v10769_v40 = vld [vmem:[#allocation11 + $0x3cc] sm:$0xf] }
 0x272   :  { %6211 = vmatmul.bf16.vlgmr.msrb.gmra.mxu1 %v11616_v11  ;;  %6178 = vmatpush.bf16.msra.mxu3 %v10188_v3  ;;  %v9584_v19 = vor.u32 %v10981_v12, %v9583_v53  ;;  %v9295_v20 = vld [vmem:[#allocation11 + $0x808] sm:$0xf]  ;;  %v10060_v36 = vor.u32 %v11096_v47, %v10057_v55  ;;  %v8753_v3 = vld [vmem:[#allocation11 + $0x3e8] sm:$0xf0] }
 0x273   :  { %6259 = vmatpush.bf16.msra.mxu1 %v9776_v22  ;;  %v10124_v22 = vor.u32 %v11112_v48, %v10121_v58  ;;  %v10909_v23 = vld [vmem:[#allocation11 + $0x824] sm:$0xf0]  ;;  %v8756_v49 = vor.u32 %v10769_v40, %v8753_v3  ;;  %v10761_v52 = vld [vmem:[#allocation11 + $0x38c] sm:$0xf] }
 0x274   :  { %6113 = vmatmul.bf16.vlgmr.msrb.gmra.mxu2 %v11621_v56  ;;  %6127 = vmatmul.bf16.vlgmr.msrb.gmra.mxu3 %v11623_v61  ;;  %v9551_v26 = vld [vmem:[#allocation11 + $0xa08] sm:$0xf]  ;;  %v9296_v57 = vor.u32 %v10909_v23, %v9295_v20  ;;  %v8721_v33 = vld [vmem:[#allocation11 + $0x3a8] sm:$0xf0] }
 0x275   :  { %6246 = vmatpush.bf16.msra.mxu0 %v9488_v14  ;;  %6165 = vmatpush.bf16.msra.mxu2 %v9900_v45  ;;  %v11032_v14 = vld [vmem:[#allocation11 + $0xc04] sm:$0xf]  ;;  %v10973_v24 = vld [vmem:[#allocation11 + $0xa24] sm:$0xf0]  ;;  %v10697_v45 = vld [vmem:[#allocation11 + $0x18c] sm:$0xf]  ;;  %v8724_v16 = vor.u32 %v10761_v52, %v8721_v33 }
 0x276   :  { %6179 = vmatpush.bf16.msra.mxu3 %v10156_v1  ;;  %v9263_v31 = vld [vmem:[#allocation11 + $0x7c8] sm:$0xf]  ;;  %v9804_v35 = vor.u32 %v11032_v14, %v9801_v30  ;;  %v9552_v59 = vor.u32 %v10973_v24, %v9551_v26  ;;  %v8465_v1 = vld [vmem:[#allocation11 + $0x1a8] sm:$0xf0] }
 0x277   :  { %6260 = vmatpush.bf16.msra.mxu1 %v9744_v15  ;;  %v9836_v15 = vor.u32 %v11040_v25, %v9833_v10  ;;  %v10901_v34 = vld [vmem:[#allocation11 + $0x7e4] sm:$0xf0]  ;;  %v8468_v38 = vor.u32 %v10697_v45, %v8465_v1  ;;  %v10753_v25 = vld [vmem:[#allocation11 + $0x34c] sm:$0xf] }
 0x278   :  { %v8975_v43 = vld [vmem:[#allocation11 + $0x588] sm:$0xf]  ;;  %v8689_v10 = vld [vmem:[#allocation11 + $0x368] sm:$0xf0] }
 0x279   :  { %6247 = vmatpush.bf16.msra.mxu0 %v9456_v60  ;;  %6166 = vmatpush.bf16.msra.mxu2 %v9868_v8  ;;  %v9007_v60 = vld [vmem:[#allocation11 + $0x5c8] sm:$0xf]  ;;  %v10689_v8 = vld [vmem:[#allocation11 + $0x14c] sm:$0xf]  ;;  %v8692_v6 = vor.u32 %v10753_v25, %v8689_v10 }
 0x27a   :  { %6180 = vmatpush.bf16.msra.mxu3 %v10124_v22  ;;  %v10829_v44 = vld [vmem:[#allocation11 + $0x5a4] sm:$0xf0]  ;;  %v8433_v22 = vld [vmem:[#allocation11 + $0x168] sm:$0xf0] }
 0x27b   :  { %6261 = vmatpush.bf16.msra.mxu1 %v9712_v63  ;;  %v10837_v63 = vld [vmem:[#allocation11 + $0x5e4] sm:$0xf0]  ;;  %v8436_v37 = vor.u32 %v10689_v8, %v8433_v22  ;;  %v10681_v14 = vld [vmem:[#allocation11 + $0x10c] sm:$0xf] }
 0x27c   :  { %v9231_v29 = vld [vmem:[#allocation11 + $0x788] sm:$0xf]  ;;  %v8657_v30 = vld [vmem:[#allocation11 + $0x328] sm:$0xf0] }
 0x27d   :  { %6248 = vmatpush.bf16.msra.mxu0 %v9424_v42  ;;  %6167 = vmatpush.bf16.msra.mxu2 %v9836_v15  ;;  %v9008_v42 = vor.u32 %v10837_v63, %v9007_v60  ;;  %v10893_v51 = vld [vmem:[#allocation11 + $0x7a4] sm:$0xf0]  ;;  %v8401_v15 = vld [vmem:[#allocation11 + $0x128] sm:$0xf0] }
 0x27e   :  { %6181 = vmatpush.bf16.msra.mxu3 %v10092_v17  ;;  %v8943_v48 = vld [vmem:[#allocation11 + $0x548] sm:$0xf]  ;;  %v10745_v17 = vld [vmem:[#allocation11 + $0x30c] sm:$0xf]  ;;  %v8404_v20 = vor.u32 %v10681_v14, %v8401_v15 }
 0x27f   :  { %6262 = vmatpush.bf16.msra.mxu1 %v9680_v28  ;;  %v9264_v28 = vor.u32 %v10901_v34, %v9263_v31  ;;  %v10821_v58 = vld [vmem:[#allocation11 + $0x564] sm:$0xf0]  ;;  %v8660_v23 = vor.u32 %v10745_v17, %v8657_v30  ;;  %v10673_v60 = vld [vmem:[#allocation11 + $0xcc] sm:$0xf] }
 0x280   :  { %v9199_v7 = vld [vmem:[#allocation11 + $0x748] sm:$0xf]  ;;  %v8369_v63 = vld [vmem:[#allocation11 + $0xe8] sm:$0xf0] }
 0x281   :  { %6249 = vmatpush.bf16.msra.mxu0 %v9392_v62  ;;  %6168 = vmatpush.bf16.msra.mxu2 %v9804_v35  ;;  %v8976_v62 = vor.u32 %v10829_v44, %v8975_v43  ;;  %v10885_v9 = vld [vmem:[#allocation11 + $0x764] sm:$0xf0]  ;;  %v10737_v31 = vld [vmem:[#allocation11 + $0x2cc] sm:$0xf]  ;;  %v8372_v40 = vor.u32 %v10673_v60, %v8369_v63 }
 0x282   :  { %6182 = vmatpush.bf16.msra.mxu3 %v10060_v36  ;;  %v8911_v4 = vld [vmem:[#allocation11 + $0x508] sm:$0xf]  ;;  %v8625_v34 = vld [vmem:[#allocation11 + $0x2e8] sm:$0xf0] }
 0x283   :  { %6263 = vmatpush.bf16.msra.mxu1 %v9648_v27  ;;  %v9232_v27 = vor.u32 %v10893_v51, %v9231_v29  ;;  %v10813_v13 = vld [vmem:[#allocation11 + $0x524] sm:$0xf0]  ;;  %v8628_v3 = vor.u32 %v10737_v31, %v8625_v34  ;;  %v10729_v43 = vld [vmem:[#allocation11 + $0x28c] sm:$0xf] }
 0x284   :  { %6169 = vmatmul.bf16.vlgmr.msra.gmra.mxu2 %v11677_v0  ;;  %v9167_v53 = vld [vmem:[#allocation11 + $0x708] sm:$0xf]  ;;  %v8912_v47 = vor.u32 %v10813_v13, %v8911_v4  ;;  %v8593_v44 = vld [vmem:[#allocation11 + $0x2a8] sm:$0xf0] }
 0x285   :  { %6250 = vmatpush.bf16.msra.mxu0 %v9360_v2  ;;  %6217 = vmatpush.bf16.msrb.mxu2 %v9008_v42  ;;  %v8944_v2 = vor.u32 %v10821_v58, %v8943_v48  ;;  %v10877_v12 = vld [vmem:[#allocation11 + $0x724] sm:$0xf0]  ;;  %v10665_v42 = vld [vmem:[#allocation11 + $0x8c] sm:$0xf]  ;;  %v8596_v1 = vor.u32 %v10729_v43, %v8593_v44 }
 0x286   :  { %6231 = vmatpush.bf16.msrb.mxu3 %v9264_v28  ;;  %v9168_v55 = vor.u32 %v10877_v12, %v9167_v53  ;;  %v9135_v26 = vld [vmem:[#allocation11 + $0x6c8] sm:$0xf]  ;;  %v8337_v28 = vld [vmem:[#allocation11 + $0xa8] sm:$0xf0] }
 0x287   :  { %6264 = vmatpush.bf16.msra.mxu1 %v9616_v50  ;;  %6183 = vmatmul.bf16.vlgmr.msra.gmra.mxu3 %v11679_v21  ;;  %v9200_v50 = vor.u32 %v10885_v9, %v9199_v7  ;;  %v10869_v24 = vld [vmem:[#allocation11 + $0x6e4] sm:$0xf0]  ;;  %v8340_v45 = vor.u32 %v10665_v42, %v8337_v28  ;;  %v10721_v48 = vld [vmem:[#allocation11 + $0x24c] sm:$0xf] }
 0x288   :  { %v9136_v35 = vor.u32 %v10869_v24, %v9135_v26  ;;  %v8847_v36 = vld [vmem:[#allocation11 + $0x488] sm:$0xf]  ;;  %v8561_v58 = vld [vmem:[#allocation11 + $0x268] sm:$0xf0] }
 0x289   :  { %6251 = vmatpush.bf16.msra.mxu0 %v9328_v18  ;;  %6218 = vmatpush.bf16.msrb.mxu2 %v8976_v62  ;;  %v8879_v18 = vld [vmem:[#allocation11 + $0x4c8] sm:$0xf]  ;;  %v10657_v62 = vld [vmem:[#allocation11 + $0x4c] sm:$0xf]  ;;  %v8564_v10 = vor.u32 %v10721_v48, %v8561_v58 }
 0x28a   :  { %6232 = vmatpush.bf16.msrb.mxu3 %v9232_v27  ;;  %v10797_v39 = vld [vmem:[#allocation11 + $0x4a4] sm:$0xf0]  ;;  %v8305_v27 = vld [vmem:[#allocation11 + $0x68] sm:$0xf0] }
 0x28b   :  { %6265 = vmatpush.bf16.msra.mxu1 %v9584_v19  ;;  %v10805_v19 = vld [vmem:[#allocation11 + $0x4e4] sm:$0xf0]  ;;  %v8308_v25 = vor.u32 %v10657_v62, %v8305_v27  ;;  %v10713_v4 = vld [vmem:[#allocation11 + $0x20c] sm:$0xf] }
 0x28c   :  { %v8880_v5 = vor.u32 %v10805_v19, %v8879_v18  ;;  %v8815_v29 = vld [vmem:[#allocation11 + $0x448] sm:$0xf]  ;;  %v8529_v13 = vld [vmem:[#allocation11 + $0x228] sm:$0xf0] }
 0x28d   :  { %6252 = vmatpush.bf16.msra.mxu0 %v9296_v57  ;;  %6219 = vmatpush.bf16.msrb.mxu2 %v8944_v2  ;;  %v9103_v57 = vld [vmem:[#allocation11 + $0x688] sm:$0xf]  ;;  %v10649_v2 = vld [vmem:[#allocation11 + $0xc] sm:$0xf]  ;;  %v8532_v19 = vor.u32 %v10713_v4, %v8529_v13 }
 0x28e   :  { %6233 = vmatpush.bf16.msrb.mxu3 %v9200_v50  ;;  %v10789_v51 = vld [vmem:[#allocation11 + $0x464] sm:$0xf0]  ;;  %v8273_v50 = vld [vmem:[#allocation11 + $0x28] sm:$0xf0] }
 0x28f   :  { %6266 = vmatpush.bf16.msra.mxu1 %v9552_v59  ;;  %v10861_v59 = vld [vmem:[#allocation11 + $0x6a4] sm:$0xf0]  ;;  %v10961_v14 = vld [vmem:[#allocation11 + $0x9cc] sm:$0xf]  ;;  %v8276_v18 = vor.u32 %v10649_v2, %v8273_v50 }
 0x290   :  { %6253 = vmatmul.bf16.vlgmr.msra.gmra.mxu0 %v11640_v41  ;;  %v9071_v52 = vld [vmem:[#allocation11 + $0x648] sm:$0xf]  ;;  %v9521_v30 = vld [vmem:[#allocation11 + $0x9e8] sm:$0xf0] }
 0x291   :  { %6301 = vmatpush.bf16.msrb.mxu0 %v8500_v46  ;;  %6220 = vmatpush.bf16.msrb.mxu2 %v8912_v47  ;;  %v8848_v46 = vor.u32 %v10797_v39, %v8847_v36  ;;  %v10853_v33 = vld [vmem:[#allocation11 + $0x664] sm:$0xf0]  ;;  %v11025_v47 = vld [vmem:[#allocation11 + $0xbcc] sm:$0xf]  ;;  %v9524_v60 = vor.u32 %v10961_v14, %v9521_v30 }
 0x292   :  { %6267 = vmatmul.bf16.vlgmr.msra.gmra.mxu1 %v11642_v32  ;;  %6234 = vmatpush.bf16.msrb.mxu3 %v9168_v55  ;;  %v9072_v7 = vor.u32 %v10853_v33, %v9071_v52  ;;  %v10781_v9 = vld [vmem:[#allocation11 + $0x424] sm:$0xf0]  ;;  %v9777_v55 = vld [vmem:[#allocation11 + $0xbe8] sm:$0xf0] }
 0x293   :  { %6315 = vmatpush.bf16.msrb.mxu1 %v8756_v49  ;;  %v9104_v49 = vor.u32 %v10861_v59, %v9103_v57  ;;  %v9039_v8 = vld [vmem:[#allocation11 + $0x608] sm:$0xf]  ;;  %v9780_v63 = vor.u32 %v11025_v47, %v9777_v55  ;;  %v11017_v36 = vld [vmem:[#allocation11 + $0xb8c] sm:$0xf] }
 0x294   :  { %v10845_v22 = vld [vmem:[#allocation11 + $0x624] sm:$0xf0]  ;;  %v9745_v39 = vld [vmem:[#allocation11 + $0xba8] sm:$0xf0] }
 0x295   :  { %6302 = vmatpush.bf16.msrb.mxu0 %v8468_v38  ;;  %6221 = vmatpush.bf16.msrb.mxu2 %v8880_v5  ;;  %v8783_v38 = vld [vmem:[#allocation11 + $0x408] sm:$0xf]  ;;  %v9040_v17 = vor.u32 %v10845_v22, %v9039_v8  ;;  %v10953_v5 = vld [vmem:[#allocation11 + $0x98c] sm:$0xf]  ;;  %v9748_v28 = vor.u32 %v11017_v36, %v9745_v39 }
 0x296   :  { %6235 = vmatpush.bf16.msrb.mxu3 %v9136_v35  ;;  %v10287_v53 = vld [vmem:[#allocation11 + $0xfc8] sm:$0xf]  ;;  %v8784_v15 = vor.u32 %v10781_v9, %v8783_v38  ;;  %v9489_v35 = vld [vmem:[#allocation11 + $0x9a8] sm:$0xf0] }
 0x297   :  { %6316 = vmatpush.bf16.msrb.mxu1 %v8724_v16  ;;  %v8816_v16 = vor.u32 %v10789_v51, %v8815_v29  ;;  %v11157_v12 = vld [vmem:[#allocation11 + $0xfe4] sm:$0xf0]  ;;  %v9492_v42 = vor.u32 %v10953_v5, %v9489_v35  ;;  %v11009_v29 = vld [vmem:[#allocation11 + $0xb4c] sm:$0xf] }
 0x298   :  { %v9999_v26 = vld [vmem:[#allocation11 + $0xd88] sm:$0xf]  ;;  %v9713_v51 = vld [vmem:[#allocation11 + $0xb68] sm:$0xf0] }
 0x299   :  { %6303 = vmatpush.bf16.msrb.mxu0 %v8436_v37  ;;  %6222 = vmatpush.bf16.msrb.mxu2 %v8848_v46  ;;  %v10031_v37 = vld [vmem:[#allocation11 + $0xdc8] sm:$0xf]  ;;  %v10945_v46 = vld [vmem:[#allocation11 + $0x94c] sm:$0xf]  ;;  %v9716_v27 = vor.u32 %v11009_v29, %v9713_v51 }
 0x29a   :  { %6236 = vmatpush.bf16.msrb.mxu3 %v9104_v49  ;;  %v11085_v24 = vld [vmem:[#allocation11 + $0xda4] sm:$0xf0]  ;;  %v9457_v49 = vld [vmem:[#allocation11 + $0x968] sm:$0xf0] }
 0x29b   :  { %6317 = vmatpush.bf16.msrb.mxu1 %v8692_v6  ;;  %v11093_v6 = vld [vmem:[#allocation11 + $0xde4] sm:$0xf0]  ;;  %v9460_v62 = vor.u32 %v10945_v46, %v9457_v49  ;;  %v10937_v38 = vld [vmem:[#allocation11 + $0x90c] sm:$0xf] }
 0x29c   :  { %v10255_v31 = vld [vmem:[#allocation11 + $0xf88] sm:$0xf]  ;;  %v9681_v9 = vld [vmem:[#allocation11 + $0xb28] sm:$0xf0] }
 0x29d   :  { %6304 = vmatpush.bf16.msrb.mxu0 %v8404_v20  ;;  %6223 = vmatpush.bf16.msrb.mxu2 %v8816_v16  ;;  %v10032_v20 = vor.u32 %v11093_v6, %v10031_v37  ;;  %v11149_v34 = vld [vmem:[#allocation11 + $0xfa4] sm:$0xf0]  ;;  %v9425_v16 = vld [vmem:[#allocation11 + $0x928] sm:$0xf0] }
 0x29e   :  { %6237 = vmatpush.bf16.msrb.mxu3 %v9072_v7  ;;  %v9967_v57 = vld [vmem:[#allocation11 + $0xd48] sm:$0xf]  ;;  %v11001_v7 = vld [vmem:[#allocation11 + $0xb0c] sm:$0xf]  ;;  %v9428_v2 = vor.u32 %v10937_v38, %v9425_v16  ;;  %v8503_v38 = vld [vmem:[#allocation11 + $0x1d0] sm:$0xf] }
 0x29f   :  { %6318 = vmatpush.bf16.msrb.mxu1 %v8660_v23  ;;  %v10288_v23 = vor.u32 %v11157_v12, %v10287_v53  ;;  %v11077_v59 = vld [vmem:[#allocation11 + $0xd64] sm:$0xf0]  ;;  %v9684_v50 = vor.u32 %v11001_v7, %v9681_v9  ;;  %v10929_v37 = vld [vmem:[#allocation11 + $0x8cc] sm:$0xf]  ;;  %v10710_v9 = vld [vmem:[#allocation11 + $0x1ec] sm:$0xf0] }
 0x2a0   :  { %v10223_v43 = vld [vmem:[#allocation11 + $0xf48] sm:$0xf]  ;;  %v9393_v6 = vld [vmem:[#allocation11 + $0x8e8] sm:$0xf0] }
 0x2a1   :  { %6305 = vmatpush.bf16.msrb.mxu0 %v8372_v40  ;;  %6224 = vmatpush.bf16.msrb.mxu2 %v8784_v15  ;;  %v10000_v40 = vor.u32 %v11085_v24, %v9999_v26  ;;  %v11141_v44 = vld [vmem:[#allocation11 + $0xf64] sm:$0xf0]  ;;  %v10993_v53 = vld [vmem:[#allocation11 + $0xacc] sm:$0xf]  ;;  %v9396_v47 = vor.u32 %v10929_v37, %v9393_v6  ;;  %v8504_v37 = vor.u32 %v10710_v9, %v8503_v38  ;;  %v10742_v38 = vld [vmem:[#allocation11 + $0x2ec] sm:$0xf0] }
 0x2a2   :  { %6238 = vmatpush.bf16.msrb.mxu3 %v9040_v17  ;;  %v9935_v52 = vld [vmem:[#allocation11 + $0xd08] sm:$0xf]  ;;  %v9649_v12 = vld [vmem:[#allocation11 + $0xae8] sm:$0xf0] }
 0x2a3   :  { %6319 = vmatpush.bf16.msrb.mxu1 %v8628_v3  ;;  %v10256_v3 = vor.u32 %v11149_v34, %v10255_v31  ;;  %v11069_v33 = vld [vmem:[#allocation11 + $0xd24] sm:$0xf0]  ;;  %v9652_v55 = vor.u32 %v10993_v53, %v9649_v12  ;;  %v10985_v26 = vld [vmem:[#allocation11 + $0xa8c] sm:$0xf] }
 0x2a4   :  { %6225 = vmatmul.bf16.vlgmr.msrb.gmra.mxu2 %v11621_v56  ;;  %v10191_v48 = vld [vmem:[#allocation11 + $0xf08] sm:$0xf]  ;;  %v9936_v8 = vor.u32 %v11069_v33, %v9935_v52  ;;  %v9617_v24 = vld [vmem:[#allocation11 + $0xaa8] sm:$0xf0] }
 0x2a5   :  { %6306 = vmatpush.bf16.msrb.mxu0 %v8340_v45  ;;  %6273 = vmatpush.bf16.msra.mxu2 %v10032_v20  ;;  %v9968_v45 = vor.u32 %v11077_v59, %v9967_v57  ;;  %v11133_v58 = vld [vmem:[#allocation11 + $0xf24] sm:$0xf0]  ;;  %v10921_v20 = vld [vmem:[#allocation11 + $0x88c] sm:$0xf]  ;;  %v9620_v35 = vor.u32 %v10985_v26, %v9617_v24 }
 0x2a6   :  { %6287 = vmatpush.bf16.msra.mxu3 %v10288_v23  ;;  %v10192_v22 = vor.u32 %v11133_v58, %v10191_v48  ;;  %v10159_v4 = vld [vmem:[#allocation11 + $0xec8] sm:$0xf]  ;;  %v9361_v23 = vld [vmem:[#allocation11 + $0x8a8] sm:$0xf0] }
 0x2a7   :  { %6320 = vmatpush.bf16.msrb.mxu1 %v8596_v1  ;;  %6239 = vmatmul.bf16.vlgmr.msrb.gmra.mxu3 %v11623_v61  ;;  %v10224_v1 = vor.u32 %v11141_v44, %v10223_v43  ;;  %v11125_v13 = vld [vmem:[#allocation11 + $0xee4] sm:$0xf0]  ;;  %v9364_v5 = vor.u32 %v10921_v20, %v9361_v23  ;;  %v10977_v57 = vld [vmem:[#allocation11 + $0xa4c] sm:$0xf] }
 0x2a8   :  { %v10160_v15 = vor.u32 %v11125_v13, %v10159_v4  ;;  %v9871_v17 = vld [vmem:[#allocation11 + $0xc88] sm:$0xf]  ;;  %v9585_v59 = vld [vmem:[#allocation11 + $0xa68] sm:$0xf0] }
 0x2a9   :  { %6307 = vmatpush.bf16.msrb.mxu0 %v8308_v25  ;;  %6274 = vmatpush.bf16.msra.mxu2 %v10000_v40  ;;  %v9903_v25 = vld [vmem:[#allocation11 + $0xcc8] sm:$0xf]  ;;  %v10913_v40 = vld [vmem:[#allocation11 + $0x84c] sm:$0xf]  ;;  %v9588_v51 = vor.u32 %v10977_v57, %v9585_v59 }
 0x2aa   :  { %6288 = vmatpush.bf16.msra.mxu3 %v10256_v3  ;;  %v11053_v30 = vld [vmem:[#allocation11 + $0xca4] sm:$0xf0]  ;;  %v9329_v3 = vld [vmem:[#allocation11 + $0x868] sm:$0xf0] }
 0x2ab   :  { %6321 = vmatpush.bf16.msrb.mxu1 %v8564_v10  ;;  %v11061_v10 = vld [vmem:[#allocation11 + $0xce4] sm:$0xf0]  ;;  %v9332_v29 = vor.u32 %v10913_v40, %v9329_v3  ;;  %v10969_v52 = vld [vmem:[#allocation11 + $0xa0c] sm:$0xf] }
 0x2ac   :  { %v9904_v14 = vor.u32 %v11061_v10, %v9903_v25  ;;  %v9839_v31 = vld [vmem:[#allocation11 + $0xc48] sm:$0xf]  ;;  %v9553_v33 = vld [vmem:[#allocation11 + $0xa28] sm:$0xf0] }
 0x2ad   :  { %6308 = vmatpush.bf16.msrb.mxu0 %v8276_v18  ;;  %6275 = vmatpush.bf16.msra.mxu2 %v9968_v45  ;;  %v10127_v18 = vld [vmem:[#allocation11 + $0xe88] sm:$0xf]  ;;  %v10905_v45 = vld [vmem:[#allocation11 + $0x80c] sm:$0xf]  ;;  %v9556_v10 = vor.u32 %v10969_v52, %v9553_v33 }
 0x2ae   :  { %6289 = vmatpush.bf16.msra.mxu3 %v10224_v1  ;;  %v11045_v34 = vld [vmem:[#allocation11 + $0xc64] sm:$0xf0]  ;;  %v9297_v1 = vld [vmem:[#allocation11 + $0x828] sm:$0xf0] }
 0x2af   :  { %6322 = vmatpush.bf16.msrb.mxu1 %v8532_v19  ;;  %v11117_v19 = vld [vmem:[#allocation11 + $0xea4] sm:$0xf0]  ;;  %v10897_v48 = vld [vmem:[#allocation11 + $0x7cc] sm:$0xf]  ;;  %v9300_v25 = vor.u32 %v10905_v45, %v9297_v1 }
 0x2b0   :  { %6309 = vmatmul.bf16.vlgmr.msrb.gmra.mxu0 %v11614_v54  ;;  %v10095_v36 = vld [vmem:[#allocation11 + $0xe48] sm:$0xf]  ;;  %v9265_v58 = vld [vmem:[#allocation11 + $0x7e8] sm:$0xf0] }
 0x2b1   :  { %6357 = vmatpush.bf16.msra.mxu0 %v9524_v60  ;;  %6276 = vmatpush.bf16.msra.mxu2 %v9936_v8  ;;  %v9872_v60 = vor.u32 %v11053_v30, %v9871_v17  ;;  %v11109_v39 = vld [vmem:[#allocation11 + $0xe64] sm:$0xf0]  ;;  %v8759_v8 = vld [vmem:[#allocation11 + $0x3d0] sm:$0xf]  ;;  %v10825_v4 = vld [vmem:[#allocation11 + $0x58c] sm:$0xf] }
 0x2b2   :  { %6323 = vmatmul.bf16.vlgmr.msrb.gmra.mxu1 %v11616_v11  ;;  %6290 = vmatpush.bf16.msra.mxu3 %v10192_v22  ;;  %v10096_v43 = vor.u32 %v11109_v39, %v10095_v36  ;;  %v11037_v44 = vld [vmem:[#allocation11 + $0xc24] sm:$0xf0]  ;;  %v10774_v22 = vld [vmem:[#allocation11 + $0x3ec] sm:$0xf0]  ;;  %v8977_v13 = vld [vmem:[#allocation11 + $0x5a8] sm:$0xf0] }
 0x2b3   :  { %6371 = vmatpush.bf16.msra.mxu1 %v9780_v63  ;;  %v10128_v63 = vor.u32 %v11117_v19, %v10127_v18  ;;  %v10063_v46 = vld [vmem:[#allocation11 + $0xe08] sm:$0xf]  ;;  %v8760_v6 = vor.u32 %v10774_v22, %v8759_v8  ;;  %v10889_v53 = vld [vmem:[#allocation11 + $0x78c] sm:$0xf]  ;;  %v8727_v17 = vld [vmem:[#allocation11 + $0x390] sm:$0xf] }
 0x2b4   :  { %v11101_v49 = vld [vmem:[#allocation11 + $0xe24] sm:$0xf0]  ;;  %v9233_v12 = vld [vmem:[#allocation11 + $0x7a8] sm:$0xf0]  ;;  %v10766_v30 = vld [vmem:[#allocation11 + $0x3ac] sm:$0xf0] }
 0x2b5   :  { %6358 = vmatpush.bf16.msra.mxu0 %v9492_v42  ;;  %6277 = vmatpush.bf16.msra.mxu2 %v9904_v14  ;;  %v9807_v42 = vld [vmem:[#allocation11 + $0xc08] sm:$0xf]  ;;  %v10064_v7 = vor.u32 %v11101_v49, %v10063_v46  ;;  %v8471_v14 = vld [vmem:[#allocation11 + $0x190] sm:$0xf]  ;;  %v10817_v18 = vld [vmem:[#allocation11 + $0x54c] sm:$0xf]  ;;  %v8728_v23 = vor.u32 %v10766_v30, %v8727_v17  ;;  %v11699_v46 = vpop.f32.mrf.mxu0 }
 0x2b6   :  { %6291 = vmatpush.bf16.msra.mxu3 %v10160_v15  ;;  %v9808_v16 = vor.u32 %v11037_v44, %v9807_v42  ;;  %v10702_v15 = vld [vmem:[#allocation11 + $0x1ac] sm:$0xf0]  ;;  %v8945_v19 = vld [vmem:[#allocation11 + $0x568] sm:$0xf0] }
 0x2b7   :  { %6372 = vmatpush.bf16.msra.mxu1 %v9748_v28  ;;  %v9840_v28 = vor.u32 %v11045_v34, %v9839_v31  ;;  %v8472_v20 = vor.u32 %v10702_v15, %v8471_v14  ;;  %v10881_v26 = vld [vmem:[#allocation11 + $0x74c] sm:$0xf]  ;;  %v8695_v31 = vld [vmem:[#allocation11 + $0x350] sm:$0xf] }
 0x2b8   :  { %v9201_v24 = vld [vmem:[#allocation11 + $0x768] sm:$0xf0]  ;;  %v10758_v34 = vld [vmem:[#allocation11 + $0x36c] sm:$0xf0] }
 0x2b9   :  { %6359 = vmatpush.bf16.msra.mxu0 %v9460_v62  ;;  %6278 = vmatpush.bf16.msra.mxu2 %v9872_v60  ;;  %v10833_v62 = vld [vmem:[#allocation11 + $0x5cc] sm:$0xf]  ;;  %v8439_v60 = vld [vmem:[#allocation11 + $0x150] sm:$0xf]  ;;  %v8696_v3 = vor.u32 %v10758_v34, %v8695_v31 }
 0x2ba   :  { %6292 = vmatpush.bf16.msra.mxu3 %v10128_v63  ;;  %v10694_v63 = vld [vmem:[#allocation11 + $0x16c] sm:$0xf0]  ;;  %v10809_v36 = vld [vmem:[#allocation11 + $0x50c] sm:$0xf] }
 0x2bb   :  { %6373 = vmatpush.bf16.msra.mxu1 %v9716_v27  ;;  %v9009_v27 = vld [vmem:[#allocation11 + $0x5e8] sm:$0xf0]  ;;  %v8440_v40 = vor.u32 %v10694_v63, %v8439_v60  ;;  %v8407_v42 = vld [vmem:[#allocation11 + $0x110] sm:$0xf] }
 0x2bc   :  { %v8913_v39 = vld [vmem:[#allocation11 + $0x528] sm:$0xf0]  ;;  %v10750_v44 = vld [vmem:[#allocation11 + $0x32c] sm:$0xf0] }
 0x2bd   :  { %6360 = vmatpush.bf16.msra.mxu0 %v9428_v2  ;;  %6279 = vmatpush.bf16.msra.mxu2 %v9840_v28  ;;  %v9012_v2 = vor.u32 %v10833_v62, %v9009_v27  ;;  %v10873_v57 = vld [vmem:[#allocation11 + $0x70c] sm:$0xf]  ;;  %v10686_v28 = vld [vmem:[#allocation11 + $0x12c] sm:$0xf0]  ;;  %v8916_v49 = vor.u32 %v10809_v36, %v8913_v39  ;;  %v11705_v30 = vpop.f32.mrf.mxu0 }
 0x2be   :  { %6293 = vmatpush.bf16.msra.mxu3 %v10096_v43  ;;  %v9169_v59 = vld [vmem:[#allocation11 + $0x728] sm:$0xf0]  ;;  %v8663_v43 = vld [vmem:[#allocation11 + $0x310] sm:$0xf]  ;;  %v8408_v1 = vor.u32 %v10686_v28, %v8407_v42  ;;  %v6002_v28 = vpop.f32.mrf.mxu2 }
 0x2bf   :  { %6374 = vmatpush.bf16.msra.mxu1 %v9684_v50  ;;  %v9268_v50 = vor.u32 %v10897_v48, %v9265_v58  ;;  %v8881_v45 = vld [vmem:[#allocation11 + $0x4e8] sm:$0xf0]  ;;  %v8664_v52 = vor.u32 %v10750_v44, %v8663_v43  ;;  %v8375_v27 = vld [vmem:[#allocation11 + $0xd0] sm:$0xf]  ;;  %v6016_v43 = vpop.f32.mrf.mxu3 }
 0x2c0   :  { %v10865_v33 = vld [vmem:[#allocation11 + $0x6cc] sm:$0xf]  ;;  %v10678_v48 = vld [vmem:[#allocation11 + $0xec] sm:$0xf0] }
 0x2c1   :  { %6361 = vmatpush.bf16.msra.mxu0 %v9396_v47  ;;  %6280 = vmatpush.bf16.msra.mxu2 %v9808_v16  ;;  %v8980_v47 = vor.u32 %v10825_v4, %v8977_v13  ;;  %v9137_v62 = vld [vmem:[#allocation11 + $0x6e8] sm:$0xf0]  ;;  %v8631_v58 = vld [vmem:[#allocation11 + $0x2d0] sm:$0xf]  ;;  %v11701_v16 = vpop.f32.mrf.mxu1 }
 0x2c2   :  { %6294 = vmatpush.bf16.msra.mxu3 %v10064_v7  ;;  %v9140_v9 = vor.u32 %v10865_v33, %v9137_v62  ;;  %v10793_v8 = vld [vmem:[#allocation11 + $0x48c] sm:$0xf]  ;;  %v8343_v4 = vld [vmem:[#allocation11 + $0x90] sm:$0xf] }
 0x2c3   :  { %6375 = vmatpush.bf16.msra.mxu1 %v9652_v55  ;;  %v9236_v55 = vor.u32 %v10889_v53, %v9233_v12  ;;  %v8849_v22 = vld [vmem:[#allocation11 + $0x4a8] sm:$0xf0]  ;;  %v10670_v13 = vld [vmem:[#allocation11 + $0xac] sm:$0xf0]  ;;  %v11703_v53 = vld [vmem:[#allocation13] sm:$0xff] }
 0x2c4   :  { %6281 = vmatmul.bf16.vlgmr.msra.gmra.mxu2 %v11677_v0  ;;  %v8852_v12 = vor.u32 %v10793_v8, %v8849_v22  ;;  %v10785_v15 = vld [vmem:[#allocation11 + $0x44c] sm:$0xf]  ;;  %v3349_v60 = vperm.slane %v11703_v53, 0  ;;  %v8535_v42 = vld [vmem:[#allocation11 + $0x210] sm:$0xf] }
 0x2c5   :  { %6362 = vmatpush.bf16.msra.mxu0 %v9364_v5  ;;  %6329 = vmatpush.bf16.msrb.mxu2 %v9012_v2  ;;  %v8948_v5 = vor.u32 %v10817_v18, %v8945_v19  ;;  %v10857_v2 = vld [vmem:[#allocation11 + $0x68c] sm:$0xf]  ;;  %v10718_v44 = vld [vmem:[#allocation11 + $0x22c] sm:$0xf0] }
 0x2c6   :  { %6343 = vmatpush.bf16.msrb.mxu3 %v9268_v50  ;;  %v9105_v50 = vld [vmem:[#allocation11 + $0x6a8] sm:$0xf0] }
 0x2c7   :  { %6376 = vmatpush.bf16.msra.mxu1 %v9620_v35  ;;  %6295 = vmatmul.bf16.vlgmr.msra.gmra.mxu3 %v11679_v21  ;;  %v9204_v35 = vor.u32 %v10881_v26, %v9201_v24  ;;  %v9108_v14 = vor.u32 %v10857_v2, %v9105_v50  ;;  %v8817_v17 = vld [vmem:[#allocation11 + $0x468] sm:$0xf0]  ;;  %v8567_v26 = vld [vmem:[#allocation11 + $0x250] sm:$0xf] }
 0x2c8   :  { %v10849_v18 = vld [vmem:[#allocation11 + $0x64c] sm:$0xf]  ;;  %v10726_v24 = vld [vmem:[#allocation11 + $0x26c] sm:$0xf0]  ;;  %v8820_v31 = vor.u32 %v10785_v15, %v8817_v17 }
 0x2c9   :  { %6363 = vmatpush.bf16.msra.mxu0 %v9332_v29  ;;  %6330 = vmatpush.bf16.msrb.mxu2 %v8980_v47  ;;  %v9172_v29 = vor.u32 %v10873_v57, %v9169_v59  ;;  %v8344_v47 = vor.u32 %v10670_v13, %v8343_v4  ;;  %v9073_v19 = vld [vmem:[#allocation11 + $0x668] sm:$0xf0]  ;;  %v11708_v39 = vpop.f32.mrf.mxu1  ;;  %v8279_v57 = vld [vmem:[#allocation11 + $0x10] sm:$0xf] }
 0x2ca   :  { %6344 = vmatpush.bf16.msrb.mxu3 %v9236_v55  ;;  %v10777_v63 = vld [vmem:[#allocation11 + $0x40c] sm:$0xf]  ;;  %v9076_v34 = vor.u32 %v10849_v18, %v9073_v19  ;;  %v10654_v59 = vld [vmem:[#allocation11 + $0x2c] sm:$0xf0] }
 0x2cb   :  { %6377 = vmatpush.bf16.msra.mxu1 %v9588_v51  ;;  %v10801_v51 = vld [vmem:[#allocation11 + $0x4cc] sm:$0xf] }
 0x2cc   :  { %v8884_v7 = vor.u32 %v10801_v51, %v8881_v45  ;;  %v9041_v36 = vld [vmem:[#allocation11 + $0x628] sm:$0xf0]  ;;  %v5975_v51 = vadd.f32 %v11699_v46, %v3349_v60 }
 0x2cd   :  { %6364 = vmatpush.bf16.msra.mxu0 %v9300_v25  ;;  %6331 = vmatpush.bf16.msrb.mxu2 %v8948_v5  ;;  %v8376_v25 = vor.u32 %v10678_v48, %v8375_v27  ;;  %v8785_v5 = vld [vmem:[#allocation11 + $0x428] sm:$0xf0]  ;;  %v10966_v27 = vld [vmem:[#allocation11 + $0x9ec] sm:$0xf0] }
 0x2ce   :  { %6345 = vmatpush.bf16.msrb.mxu3 %v9204_v35  ;;  %v10841_v35 = vld [vmem:[#allocation11 + $0x60c] sm:$0xf]  ;;  %v8788_v33 = vor.u32 %v10777_v63, %v8785_v5  ;;  %v9783_v48 = vld [vmem:[#allocation11 + $0xbd0] sm:$0xf]  ;;  %v5989_v46 = vadd.f32 %v11701_v16, %v5975_v51 }
 0x2cf   :  { %6378 = vmatpush.bf16.msra.mxu1 %v9556_v10  ;;  %v8632_v10 = vor.u32 %v10742_v38, %v8631_v58  ;;  %v11153_v45 = vld [vmem:[#allocation11 + $0xfcc] sm:$0xf]  ;;  %v9044_v62 = vor.u32 %v10841_v35, %v9041_v36  ;;  %v11030_v58 = vld [vmem:[#allocation11 + $0xbec] sm:$0xf0]  ;;  %v6030_v38 = vpop.f32.mrf.mxu0 }
 0x2d0   :  { %6365 = vmatmul.bf16.vlgmr.msra.gmra.mxu0 %v11640_v41  ;;  %v9784_v50 = vor.u32 %v11030_v58, %v9783_v48  ;;  %v11145_v4 = vld [vmem:[#allocation11 + $0xf8c] sm:$0xf]  ;;  %v6003_v15 = vadd.f32 %v6002_v28, %v5989_v46  ;;  %v9463_v63 = vld [vmem:[#allocation11 + $0x950] sm:$0xf] }
 0x2d1   :  { %6413 = vmatpush.bf16.msrb.mxu0 %v8504_v37  ;;  %6332 = vmatpush.bf16.msrb.mxu2 %v8916_v49  ;;  %v8599_v37 = vld [vmem:[#allocation11 + $0x290] sm:$0xf]  ;;  %v11089_v49 = vld [vmem:[#allocation11 + $0xdcc] sm:$0xf]  ;;  %v6044_v17 = vpop.f32.mrf.mxu1 }
 0x2d2   :  { %6379 = vmatmul.bf16.vlgmr.msra.gmra.mxu1 %v11642_v32  ;;  %6346 = vmatpush.bf16.msrb.mxu3 %v9172_v29  ;;  %v10033_v29 = vld [vmem:[#allocation11 + $0xde8] sm:$0xf0]  ;;  %v11014_v5 = vld [vmem:[#allocation11 + $0xb6c] sm:$0xf0]  ;;  %v6017_v35 = vadd.f32 %v6016_v43, %v6003_v15 }
 0x2d3   :  { %6427 = vmatpush.bf16.msrb.mxu1 %v8760_v6  ;;  %v10734_v6 = vld [vmem:[#allocation11 + $0x2ac] sm:$0xf0]  ;;  %v10036_v8 = vor.u32 %v11089_v49, %v10033_v29  ;;  %v10257_v13 = vld [vmem:[#allocation11 + $0xfa8] sm:$0xf0] }
 0x2d4   :  { %v8600_v55 = vor.u32 %v10734_v6, %v8599_v37  ;;  %v9495_v37 = vld [vmem:[#allocation11 + $0x990] sm:$0xf]  ;;  %v10260_v16 = vor.u32 %v11145_v4, %v10257_v13  ;;  %v11073_v18 = vld [vmem:[#allocation11 + $0xd4c] sm:$0xf] }
 0x2d5   :  { %6414 = vmatpush.bf16.msrb.mxu0 %v8472_v20  ;;  %6333 = vmatpush.bf16.msrb.mxu2 %v8884_v7  ;;  %v8311_v20 = vld [vmem:[#allocation11 + $0x50] sm:$0xf]  ;;  %v8280_v7 = vor.u32 %v10654_v59, %v8279_v57  ;;  %v9969_v19 = vld [vmem:[#allocation11 + $0xd68] sm:$0xf0] }
 0x2d6   :  { %6347 = vmatpush.bf16.msrb.mxu3 %v9140_v9  ;;  %v8536_v9 = vor.u32 %v10718_v44, %v8535_v42  ;;  %v10958_v6 = vld [vmem:[#allocation11 + $0x9ac] sm:$0xf0]  ;;  %v11065_v57 = vld [vmem:[#allocation11 + $0xd0c] sm:$0xf]  ;;  %v6031_v42 = vadd.f32 %v6030_v38, %v6017_v35 }
 0x2d7   :  { %6428 = vmatpush.bf16.msrb.mxu1 %v8728_v23  ;;  %v10662_v23 = vld [vmem:[#allocation11 + $0x6c] sm:$0xf0]  ;;  %v9937_v59 = vld [vmem:[#allocation11 + $0xd28] sm:$0xf0]  ;;  %v6032_v28 = vpop.f32.mrf.mxu0 }
 0x2d8   :  { %v11129_v29 = vld [vmem:[#allocation11 + $0xf0c] sm:$0xf]  ;;  %v9431_v51 = vld [vmem:[#allocation11 + $0x910] sm:$0xf]  ;;  %v6045_v58 = vadd.f32 %v6044_v17, %v6031_v42 }
 0x2d9   :  { %6415 = vmatpush.bf16.msrb.mxu0 %v8440_v40  ;;  %6334 = vmatpush.bf16.msrb.mxu2 %v8852_v12  ;;  %v8312_v40 = vor.u32 %v10662_v23, %v8311_v20  ;;  %v9751_v12 = vld [vmem:[#allocation11 + $0xb90] sm:$0xf]  ;;  %v9496_v20 = vor.u32 %v10958_v6, %v9495_v37  ;;  %v10193_v43 = vld [vmem:[#allocation11 + $0xf28] sm:$0xf0]  ;;  %v6046_v38 = vpop.f32.mrf.mxu1 }
 0x2da   :  { %6348 = vmatpush.bf16.msrb.mxu3 %v9108_v14  ;;  %v11022_v14 = vld [vmem:[#allocation11 + $0xbac] sm:$0xf0]  ;;  %v9905_v48 = vld [vmem:[#allocation11 + $0xce8] sm:$0xf0] }
 0x2db   :  { %6429 = vmatpush.bf16.msrb.mxu1 %v8696_v3  ;;  %v8568_v3 = vor.u32 %v10726_v24, %v8567_v26  ;;  %v9752_v23 = vor.u32 %v11022_v14, %v9751_v12  ;;  %v11137_v26 = vld [vmem:[#allocation11 + $0xf4c] sm:$0xf]  ;;  %v9655_v4 = vld [vmem:[#allocation11 + $0xad0] sm:$0xf] }
 0x2dc   :  { %v10225_v24 = vld [vmem:[#allocation11 + $0xf68] sm:$0xf0]  ;;  %v10998_v13 = vld [vmem:[#allocation11 + $0xaec] sm:$0xf0] }
 0x2dd   :  { %6416 = vmatpush.bf16.msrb.mxu0 %v8408_v1  ;;  %v10289_v1 = vld [vmem:[#allocation11 + $0xfe8] sm:$0xf0]  ;;  %6335 = vmatpush.bf16.msrb.mxu2 %v8820_v31  ;;  %v6004_v31 = vpop.f32.mrf.mxu2 }
 0x2de   :  { %6349 = vmatpush.bf16.msrb.mxu3 %v9076_v34  ;;  %v10292_v22 = vor.u32 %v11153_v45, %v10289_v1  ;;  %v6018_v34 = vpop.f32.mrf.mxu3  ;;  %v10942_v1 = vld [vmem:[#allocation11 + $0x92c] sm:$0xf0]  ;;  %v11049_v15 = vld [vmem:[#allocation11 + $0xc8c] sm:$0xf] }
 0x2df   :  { %6430 = vmatpush.bf16.msrb.mxu1 %v8664_v52  ;;  %v9527_v52 = vld [vmem:[#allocation11 + $0x9d0] sm:$0xf]  ;;  %v9873_v17 = vld [vmem:[#allocation11 + $0xca8] sm:$0xf0] }
 0x2e0   :  { %v9528_v2 = vor.u32 %v10966_v27, %v9527_v52  ;;  %v9687_v52 = vld [vmem:[#allocation11 + $0xb10] sm:$0xf]  ;;  %v11057_v27 = vld [vmem:[#allocation11 + $0xccc] sm:$0xf] }
 0x2e1   :  { %6417 = vmatpush.bf16.msrb.mxu0 %v8376_v25  ;;  %v11081_v25 = vld [vmem:[#allocation11 + $0xd8c] sm:$0xf]  ;;  %6336 = vmatpush.bf16.msrb.mxu2 %v8788_v33  ;;  %v11006_v33 = vld [vmem:[#allocation11 + $0xb2c] sm:$0xf0]  ;;  %v9908_v12 = vor.u32 %v11057_v27, %v9905_v48 }
 0x2e2   :  { %6350 = vmatpush.bf16.msrb.mxu3 %v9044_v62  ;;  %v10196_v62 = vor.u32 %v11129_v29, %v10193_v43  ;;  %v3350_v29 = vperm.slane %v11703_v53, 1 }
 0x2e3   :  { %6431 = vmatpush.bf16.msrb.mxu1 %v8632_v10  ;;  %v10001_v10 = vld [vmem:[#allocation11 + $0xda8] sm:$0xf0] }
 0x2e4   :  { %6337 = vmatmul.bf16.vlgmr.msrb.gmra.mxu2 %v11621_v56 }
 0x2e5   :  { %6418 = vmatpush.bf16.msrb.mxu0 %v8344_v47  ;;  %v5977_v47 = vadd.f32 %v11705_v30, %v3349_v60  ;;  %6385 = vmatpush.bf16.msra.mxu2 %v10036_v8  ;;  %v10950_v30 = vld [vmem:[#allocation11 + $0x96c] sm:$0xf0]  ;;  %v11121_v8 = vld [vmem:[#allocation11 + $0xecc] sm:$0xf] }
 0x2e6   :  { %6399 = vmatpush.bf16.msra.mxu3 %v10292_v22  ;;  %v9719_v60 = vld [vmem:[#allocation11 + $0xb50] sm:$0xf]  ;;  %v9464_v44 = vor.u32 %v10950_v30, %v9463_v63  ;;  %v10161_v22 = vld [vmem:[#allocation11 + $0xee8] sm:$0xf0]  ;;  %v6086_v63 = vpop.f32.mrf.mxu0 }
 0x2e7   :  { %6432 = vmatpush.bf16.msrb.mxu1 %v8600_v55  ;;  %v10004_v55 = vor.u32 %v11081_v25, %v10001_v10  ;;  %6351 = vmatmul.bf16.vlgmr.msrb.gmra.mxu3 %v11623_v61  ;;  %v5991_v36 = vadd.f32 %v11708_v39, %v5977_v47  ;;  %v9720_v49 = vor.u32 %v11014_v5, %v9719_v60  ;;  %v9399_v25 = vld [vmem:[#allocation11 + $0x8d0] sm:$0xf]  ;;  %v6058_v46 = vpop.f32.mrf.mxu2  ;;  %v11041_v30 = vld [vmem:[#allocation11 + $0xc4c] sm:$0xf] }
 0x2e8   :  { %v9940_v39 = vor.u32 %v11065_v57, %v9937_v59  ;;  %v6059_v37 = vadd.f32 %v6058_v46, %v6045_v58  ;;  %v10164_v14 = vor.u32 %v11121_v8, %v10161_v22  ;;  %v9841_v60 = vld [vmem:[#allocation11 + $0xc68] sm:$0xf0]  ;;  %v9335_v57 = vld [vmem:[#allocation11 + $0x850] sm:$0xf] }
 0x2e9   :  { %6419 = vmatpush.bf16.msrb.mxu0 %v8312_v40  ;;  %6386 = vmatpush.bf16.msra.mxu2 %v10004_v55  ;;  %v9972_v40 = vor.u32 %v11073_v18, %v9969_v19  ;;  %v6005_v45 = vadd.f32 %v6004_v31, %v5991_v36  ;;  %v11113_v18 = vld [vmem:[#allocation11 + $0xe8c] sm:$0xf]  ;;  %v9876_v31 = vor.u32 %v11049_v15, %v9873_v17  ;;  %v9559_v8 = vld [vmem:[#allocation11 + $0xa10] sm:$0xf] }
 0x2ea   :  { %6400 = vmatpush.bf16.msra.mxu3 %v10260_v16  ;;  %v9656_v16 = vor.u32 %v10998_v13, %v9655_v4  ;;  %v10129_v19 = vld [vmem:[#allocation11 + $0xea8] sm:$0xf0]  ;;  %v10974_v22 = vld [vmem:[#allocation11 + $0xa2c] sm:$0xf0] }
 0x2eb   :  { %6433 = vmatpush.bf16.msrb.mxu1 %v8568_v3  ;;  %v10228_v3 = vor.u32 %v11137_v26, %v10225_v24  ;;  %v6019_v10 = vadd.f32 %v6018_v34, %v6005_v45  ;;  %v9623_v26 = vld [vmem:[#allocation11 + $0xa90] sm:$0xf]  ;;  %v10132_v34 = vor.u32 %v11113_v18, %v10129_v19  ;;  %v6100_v45 = vpop.f32.mrf.mxu1 }
 0x2ec   :  { %v10990_v24 = vld [vmem:[#allocation11 + $0xaac] sm:$0xf0] }
 0x2ed   :  { %6420 = vmatpush.bf16.msrb.mxu0 %v8280_v7  ;;  %6387 = vmatpush.bf16.msra.mxu2 %v9972_v40  ;;  %v9432_v7 = vor.u32 %v10942_v1, %v9431_v51  ;;  %v6033_v6 = vadd.f32 %v6032_v28, %v6019_v10  ;;  %v9624_v36 = vor.u32 %v10990_v24, %v9623_v26  ;;  %v11105_v40 = vld [vmem:[#allocation11 + $0xe4c] sm:$0xf]  ;;  %v10918_v28 = vld [vmem:[#allocation11 + $0x86c] sm:$0xf0] }
 0x2ee   :  { %6401 = vmatpush.bf16.msra.mxu3 %v10228_v3  ;;  %v10097_v3 = vld [vmem:[#allocation11 + $0xe68] sm:$0xf0]  ;;  %v9844_v1 = vor.u32 %v11041_v30, %v9841_v60  ;;  %v9336_v58 = vor.u32 %v10918_v28, %v9335_v57  ;;  %v10838_v10 = vld [vmem:[#allocation11 + $0x5ec] sm:$0xf0]  ;;  %v6088_v15 = vpop.f32.mrf.mxu0  ;;  %v10698_v30 = vld [vmem:[#allocation11 + $0x194] sm:$0xf] }
 0x2ef   :  { %6434 = vmatpush.bf16.msrb.mxu1 %v8536_v9  ;;  %v9688_v9 = vor.u32 %v11006_v33, %v9687_v52  ;;  %v6047_v5 = vadd.f32 %v6046_v38, %v6033_v6  ;;  %v6060_v59 = vpop.f32.mrf.mxu2  ;;  %v11033_v51 = vld [vmem:[#allocation11 + $0xc0c] sm:$0xf]  ;;  %v10100_v52 = vor.u32 %v11105_v40, %v10097_v3  ;;  %v9271_v46 = vld [vmem:[#allocation11 + $0x7d0] sm:$0xf]  ;;  %v10770_v6 = vld [vmem:[#allocation11 + $0x3d4] sm:$0xf] }
 0x2f0   :  { %6421 = vmatmul.bf16.vlgmr.msrb.gmra.mxu0 %v11614_v54  ;;  %v9809_v33 = vld [vmem:[#allocation11 + $0xc28] sm:$0xf0]  ;;  %v8473_v60 = vld [vmem:[#allocation11 + $0x1b0] sm:$0xf0] }
 0x2f1   :  { %6469 = vmatpush.bf16.msra.mxu0 %v9528_v2  ;;  %v6072_v2 = vpop.f32.mrf.mxu3  ;;  %6388 = vmatpush.bf16.msra.mxu2 %v9940_v39  ;;  %v6061_v43 = vadd.f32 %v6060_v59, %v6047_v5  ;;  %v11097_v39 = vld [vmem:[#allocation11 + $0xe0c] sm:$0xf]  ;;  %v9812_v4 = vor.u32 %v11033_v51, %v9809_v33  ;;  %v8729_v5 = vld [vmem:[#allocation11 + $0x3b0] sm:$0xf0]  ;;  %v8951_v59 = vld [vmem:[#allocation11 + $0x550] sm:$0xf] }
 0x2f2   :  { %6435 = vmatmul.bf16.vlgmr.msrb.gmra.mxu1 %v11616_v11  ;;  %6402 = vmatpush.bf16.msra.mxu3 %v10196_v62  ;;  %v6073_v47 = vadd.f32 %v6072_v2, %v6059_v37  ;;  %v10065_v62 = vld [vmem:[#allocation11 + $0xe28] sm:$0xf0]  ;;  %v10902_v2 = vld [vmem:[#allocation11 + $0x7ec] sm:$0xf0]  ;;  %v8505_v37 = vld [vmem:[#allocation11 + $0x1f0] sm:$0xf0] }
 0x2f3   :  { %6483 = vmatpush.bf16.msra.mxu1 %v9784_v50  ;;  %v10934_v50 = vld [vmem:[#allocation11 + $0x8ec] sm:$0xf0]  ;;  %v10068_v13 = vor.u32 %v11097_v39, %v10065_v62  ;;  %v6102_v40 = vpop.f32.mrf.mxu1  ;;  %v8697_v33 = vld [vmem:[#allocation11 + $0x370] sm:$0xf0]  ;;  %v6089_v39 = vadd.f32 %v6088_v15, %v3350_v29 }
 0x2f4   :  { %v9400_v55 = vor.u32 %v10934_v50, %v9399_v25  ;;  %11171 = vtanh.f32 %v6073_v47  ;;  %v9015_v25 = vld [vmem:[#allocation11 + $0x5d0] sm:$0xf]  ;;  %v10706_v50 = vld [vmem:[#allocation11 + $0x1d4] sm:$0xf]  ;;  %v9560_v47 = vor.u32 %v10974_v22, %v9559_v8 }
 0x2f5   :  { %6470 = vmatpush.bf16.msra.mxu0 %v9496_v20  ;;  %v9367_v20 = vld [vmem:[#allocation11 + $0x890] sm:$0xf]  ;;  %6389 = vmatpush.bf16.msra.mxu2 %v9908_v12  ;;  %v8761_v12 = vld [vmem:[#allocation11 + $0x3f0] sm:$0xf0]  ;;  %v8508_v26 = vor.u32 %v10706_v50, %v8505_v37 }
 0x2f6   :  { %6403 = vmatpush.bf16.msra.mxu3 %v10164_v14  ;;  %v6087_v14 = vadd.f32 %v6086_v63, %v3350_v29  ;;  %v8764_v24 = vor.u32 %v10770_v6, %v8761_v12  ;;  %v10762_v63 = vld [vmem:[#allocation11 + $0x394] sm:$0xf]  ;;  %v10886_v51 = vld [vmem:[#allocation11 + $0x76c] sm:$0xf0] }
 0x2f7   :  { %6484 = vmatpush.bf16.msra.mxu1 %v9752_v23  ;;  %v10926_v23 = vld [vmem:[#allocation11 + $0x8ac] sm:$0xf0]  ;;  %v6114_v18 = vpop.f32.mrf.mxu2  ;;  %v10682_v29 = vld [vmem:[#allocation11 + $0x114] sm:$0xf] }
 0x2f8   :  { %v9368_v35 = vor.u32 %v10926_v23, %v9367_v20  ;;  %v8983_v20 = vld [vmem:[#allocation11 + $0x590] sm:$0xf]  ;;  %v10746_v50 = vld [vmem:[#allocation11 + $0x314] sm:$0xf] }
 0x2f9   :  { %6471 = vmatpush.bf16.msra.mxu0 %v9464_v44  ;;  %v6074_v42 = vpop.f32.mrf.mxu3  ;;  %v9591_v44 = vld [vmem:[#allocation11 + $0xa50] sm:$0xf]  ;;  %6390 = vmatpush.bf16.msra.mxu2 %v9876_v31 }
 0x2fa   :  { %6404 = vmatpush.bf16.msra.mxu3 %v10132_v34  ;;  %v11172_v27 = vpop.eup %11171  ;;  %v6075_v48 = vadd.f32 %v6074_v42, %v6061_v43  ;;  %v10830_v23 = vld [vmem:[#allocation11 + $0x5ac] sm:$0xf0] }
 0x2fb   :  { %6485 = vmatpush.bf16.msra.mxu1 %v9720_v49  ;;  %v10982_v49 = vld [vmem:[#allocation11 + $0xa6c] sm:$0xf0]  ;;  %6877 = vst [vmem:[%s11826_s9] sm:$0xff] %v11172_v27  ;;  %v8984_v3 = vor.u32 %v10830_v23, %v8983_v20  ;;  %v8377_v20 = vld [vmem:[#allocation11 + $0xf0] sm:$0xf0]  ;;  %v6156_v23 = vpop.f32.mrf.mxu1 }
 0x2fc   :  { %v9592_v38 = vor.u32 %v10982_v49, %v9591_v44  ;;  %11173 = vtanh.f32 %v6075_v48  ;;  %v9239_v31 = vld [vmem:[#allocation11 + $0x790] sm:$0xf]  ;;  %v8476_v44 = vor.u32 %v10698_v30, %v8473_v60  ;;  %v8732_v49 = vor.u32 %v10762_v63, %v8729_v5 }
 0x2fd   :  { %6472 = vmatpush.bf16.msra.mxu0 %v9432_v7  ;;  %v9303_v7 = vld [vmem:[#allocation11 + $0x810] sm:$0xf]  ;;  %6391 = vmatpush.bf16.msra.mxu2 %v9844_v1  ;;  %v8441_v1 = vld [vmem:[#allocation11 + $0x170] sm:$0xf0] }
 0x2fe   :  { %6405 = vmatpush.bf16.msra.mxu3 %v10100_v52  ;;  %v10894_v34 = vld [vmem:[#allocation11 + $0x7ac] sm:$0xf0]  ;;  %v10754_v52 = vld [vmem:[#allocation11 + $0x354] sm:$0xf] }
 0x2ff   :  { %6486 = vmatpush.bf16.msra.mxu1 %v9688_v9  ;;  %v10910_v9 = vld [vmem:[#allocation11 + $0x82c] sm:$0xf0]  ;;  %v9240_v57 = vor.u32 %v10894_v34, %v9239_v31  ;;  %v6116_v48 = vpop.f32.mrf.mxu2 }
 0x300   :  { %v9304_v17 = vor.u32 %v10910_v9, %v9303_v7  ;;  %v10822_v42 = vld [vmem:[#allocation11 + $0x56c] sm:$0xf0] }
 0x301   :  { %6473 = vmatpush.bf16.msra.mxu0 %v9400_v55  ;;  %v9016_v55 = vor.u32 %v10838_v10, %v9015_v25  ;;  %v6128_v19 = vpop.f32.mrf.mxu3  ;;  %6392 = vmatpush.bf16.msra.mxu2 %v9812_v4  ;;  %v9207_v43 = vld [vmem:[#allocation11 + $0x750] sm:$0xf]  ;;  %v8952_v62 = vor.u32 %v10822_v42, %v8951_v59  ;;  %v8700_v25 = vor.u32 %v10754_v52, %v8697_v33  ;;  %v8665_v4 = vld [vmem:[#allocation11 + $0x330] sm:$0xf0] }
 0x302   :  { %6406 = vmatpush.bf16.msra.mxu3 %v10068_v13  ;;  %v9208_v27 = vor.u32 %v10886_v51, %v9207_v43  ;;  %v10814_v7 = vld [vmem:[#allocation11 + $0x52c] sm:$0xf0]  ;;  %v6103_v13 = vadd.f32 %v6102_v40, %v6089_v39  ;;  %v8345_v59 = vld [vmem:[#allocation11 + $0xb0] sm:$0xf0] }
 0x303   :  { %6487 = vmatpush.bf16.msra.mxu1 %v9656_v16  ;;  %v9272_v16 = vor.u32 %v10902_v2, %v9271_v46  ;;  %v9175_v9 = vld [vmem:[#allocation11 + $0x710] sm:$0xf]  ;;  %v8409_v46 = vld [vmem:[#allocation11 + $0x130] sm:$0xf0]  ;;  %v6142_v2 = vpop.f32.mrf.mxu0 }
 0x304   :  { %6393 = vmatmul.bf16.vlgmr.msra.gmra.mxu2 %v11677_v0  ;;  %v10878_v10 = vld [vmem:[#allocation11 + $0x72c] sm:$0xf0]  ;;  %v8412_v12 = vor.u32 %v10682_v29, %v8409_v46 }
 0x305   :  { %6474 = vmatpush.bf16.msra.mxu0 %v9368_v35  ;;  %v11174_v35 = vpop.eup %11173  ;;  %6441 = vmatpush.bf16.msrb.mxu2 %v9016_v55  ;;  %v9176_v6 = vor.u32 %v10878_v10, %v9175_v9  ;;  %v10806_v15 = vld [vmem:[#allocation11 + $0x4ec] sm:$0xf0]  ;;  %v6117_v55 = vadd.f32 %v6116_v48, %v6103_v13  ;;  %v8313_v9 = vld [vmem:[#allocation11 + $0x70] sm:$0xf0]  ;;  %v6158_v10 = vpop.f32.mrf.mxu1 }
 0x306   :  { %6885 = vst [vmem:[%s11826_s9 + $0x40] sm:$0xff] %v11174_v35  ;;  %6455 = vmatpush.bf16.msrb.mxu3 %v9272_v16  ;;  %v8668_v16 = vor.u32 %v10746_v50, %v8665_v4  ;;  %v8855_v60 = vld [vmem:[#allocation11 + $0x490] sm:$0xf] }
 0x307   :  { %6488 = vmatpush.bf16.msra.mxu1 %v9624_v36  ;;  %v6101_v36 = vadd.f32 %v6100_v45, %v6087_v14  ;;  %v10690_v45 = vld [vmem:[#allocation11 + $0x154] sm:$0xf]  ;;  %6407 = vmatmul.bf16.vlgmr.msra.gmra.mxu3 %v11679_v21  ;;  %v8887_v14 = vld [vmem:[#allocation11 + $0x4d0] sm:$0xf]  ;;  %v6170_v42 = vpop.f32.mrf.mxu2 }
 0x308   :  { %v8444_v22 = vor.u32 %v10690_v45, %v8441_v1  ;;  %v8888_v31 = vor.u32 %v10806_v15, %v8887_v14  ;;  %v10798_v63 = vld [vmem:[#allocation11 + $0x4ac] sm:$0xf0]  ;;  %v8281_v14 = vld [vmem:[#allocation11 + $0x30] sm:$0xf0] }
 0x309   :  { %6475 = vmatpush.bf16.msra.mxu0 %v9336_v58  ;;  %v6115_v28 = vadd.f32 %v6114_v18, %v6101_v36  ;;  %6442 = vmatpush.bf16.msrb.mxu2 %v8984_v3  ;;  %v6130_v58 = vpop.f32.mrf.mxu3  ;;  %v10870_v18 = vld [vmem:[#allocation11 + $0x6ec] sm:$0xf0]  ;;  %v8856_v45 = vor.u32 %v10798_v63, %v8855_v60  ;;  %v10714_v15 = vld [vmem:[#allocation11 + $0x214] sm:$0xf] }
 0x30a   :  { %6456 = vmatpush.bf16.msrb.mxu3 %v9240_v57  ;;  %v9111_v5 = vld [vmem:[#allocation11 + $0x690] sm:$0xf]  ;;  %v6131_v35 = vadd.f32 %v6130_v58, %v6117_v55  ;;  %v10666_v57 = vld [vmem:[#allocation11 + $0x94] sm:$0xf] }
 0x30b   :  { %6489 = vmatpush.bf16.msra.mxu1 %v9592_v38  ;;  %v8919_v38 = vld [vmem:[#allocation11 + $0x510] sm:$0xf]  ;;  %v6129_v8 = vadd.f32 %v6128_v19, %v6115_v28  ;;  %v10674_v19 = vld [vmem:[#allocation11 + $0xd4] sm:$0xf]  ;;  %v6144_v51 = vpop.f32.mrf.mxu0  ;;  %v8348_v52 = vor.u32 %v10666_v57, %v8345_v59 }
 0x30c   :  { %v8920_v37 = vor.u32 %v10814_v7, %v8919_v38  ;;  %v8380_v30 = vor.u32 %v10674_v19, %v8377_v20  ;;  %v10862_v3 = vld [vmem:[#allocation11 + $0x6ac] sm:$0xf0]  ;;  %v10658_v7 = vld [vmem:[#allocation11 + $0x54] sm:$0xf] }
 0x30d   :  { %6476 = vmatpush.bf16.msra.mxu0 %v9304_v17  ;;  %6443 = vmatpush.bf16.msrb.mxu2 %v8952_v62  ;;  %v9143_v17 = vld [vmem:[#allocation11 + $0x6d0] sm:$0xf]  ;;  %v9112_v1 = vor.u32 %v10862_v3, %v9111_v5  ;;  %v6145_v62 = vadd.f32 %v6144_v51, %v6131_v35  ;;  %v8316_v13 = vor.u32 %v10658_v7, %v8313_v9  ;;  %v9785_v60 = vld [vmem:[#allocation11 + $0xbf0] sm:$0xf0] }
 0x30e   :  { %6457 = vmatpush.bf16.msrb.mxu3 %v9208_v27  ;;  %v9144_v34 = vor.u32 %v10870_v18, %v9143_v17  ;;  %v8823_v33 = vld [vmem:[#allocation11 + $0x450] sm:$0xf]  ;;  %v9497_v51 = vld [vmem:[#allocation11 + $0x9b0] sm:$0xf0] }
 0x30f   :  { %6490 = vmatpush.bf16.msra.mxu1 %v9560_v47  ;;  %v6143_v47 = vadd.f32 %v6142_v2, %v6129_v8  ;;  %v10790_v39 = vld [vmem:[#allocation11 + $0x46c] sm:$0xf0]  ;;  %v10722_v8 = vld [vmem:[#allocation11 + $0x254] sm:$0xf]  ;;  %v6172_v17 = vpop.f32.mrf.mxu2 }
 0x310   :  { %6477 = vmatmul.bf16.vlgmr.msra.gmra.mxu0 %v11640_v41  ;;  %v9079_v58 = vld [vmem:[#allocation11 + $0x650] sm:$0xf]  ;;  %v8824_v29 = vor.u32 %v10790_v39, %v8823_v33  ;;  %v10946_v7 = vld [vmem:[#allocation11 + $0x954] sm:$0xf] }
 0x311   :  { %6525 = vmatpush.bf16.msrb.mxu0 %v8508_v26  ;;  %v10738_v26 = vld [vmem:[#allocation11 + $0x2d4] sm:$0xf]  ;;  %6444 = vmatpush.bf16.msrb.mxu2 %v8920_v37  ;;  %v6157_v40 = vadd.f32 %v6156_v23, %v6143_v47  ;;  %v6184_v28 = vpop.f32.mrf.mxu3  ;;  %v10854_v38 = vld [vmem:[#allocation11 + $0x66c] sm:$0xf0] }
 0x312   :  { %6491 = vmatmul.bf16.vlgmr.msra.gmra.mxu1 %v11642_v32  ;;  %6458 = vmatpush.bf16.msrb.mxu3 %v9176_v6  ;;  %v9080_v46 = vor.u32 %v10854_v38, %v9079_v58  ;;  %v10782_v2 = vld [vmem:[#allocation11 + $0x42c] sm:$0xf0]  ;;  %v6159_v6 = vadd.f32 %v6158_v10, %v6145_v62  ;;  %v8537_v47 = vld [vmem:[#allocation11 + $0x230] sm:$0xf0] }
 0x313   :  { %6539 = vmatpush.bf16.msrb.mxu1 %v8764_v24  ;;  %v8633_v24 = vld [vmem:[#allocation11 + $0x2f0] sm:$0xf0]  ;;  %v6171_v43 = vadd.f32 %v6170_v42, %v6157_v40  ;;  %v9047_v50 = vld [vmem:[#allocation11 + $0x610] sm:$0xf] }
 0x314   :  { %v8636_v36 = vor.u32 %v10738_v26, %v8633_v24  ;;  %v10846_v4 = vld [vmem:[#allocation11 + $0x62c] sm:$0xf0]  ;;  %v6173_v18 = vadd.f32 %v6172_v17, %v6159_v6  ;;  %v10962_v23 = vld [vmem:[#allocation11 + $0x9d4] sm:$0xf] }
 0x315   :  { %6526 = vmatpush.bf16.msrb.mxu0 %v8476_v44  ;;  %v10730_v44 = vld [vmem:[#allocation11 + $0x294] sm:$0xf]  ;;  %6445 = vmatpush.bf16.msrb.mxu2 %v8888_v31  ;;  %v6185_v27 = vadd.f32 %v6184_v28, %v6171_v43  ;;  %v10039_v55 = vld [vmem:[#allocation11 + $0xdd0] sm:$0xf]  ;;  %v9048_v31 = vor.u32 %v10846_v4, %v9047_v50 }
 0x316   :  { %6459 = vmatpush.bf16.msrb.mxu3 %v9144_v34  ;;  %v10295_v19 = vld [vmem:[#allocation11 + $0xfd0] sm:$0xf]  ;;  %v9529_v34 = vld [vmem:[#allocation11 + $0x9f0] sm:$0xf0] }
 0x317   :  { %6540 = vmatpush.bf16.msrb.mxu1 %v8732_v49  ;;  %v8601_v49 = vld [vmem:[#allocation11 + $0x2b0] sm:$0xf0]  ;;  %11175 = vtanh.f32 %v6185_v27  ;;  %v11158_v20 = vld [vmem:[#allocation11 + $0xfec] sm:$0xf0]  ;;  %v9532_v42 = vor.u32 %v10962_v23, %v9529_v34 }
 0x318   :  { %v8604_v48 = vor.u32 %v10730_v44, %v8601_v49  ;;  %v10296_v3 = vor.u32 %v11158_v20, %v10295_v19  ;;  %v10007_v57 = vld [vmem:[#allocation11 + $0xd90] sm:$0xf]  ;;  %v10954_v43 = vld [vmem:[#allocation11 + $0x994] sm:$0xf] }
 0x319   :  { %6527 = vmatpush.bf16.msrb.mxu0 %v8444_v22  ;;  %v8569_v22 = vld [vmem:[#allocation11 + $0x270] sm:$0xf0]  ;;  %6446 = vmatpush.bf16.msrb.mxu2 %v8856_v45  ;;  %v6186_v26 = vpop.f32.mrf.mxu3  ;;  %v11086_v59 = vld [vmem:[#allocation11 + $0xdac] sm:$0xf0]  ;;  %v9500_v27 = vor.u32 %v10954_v43, %v9497_v51 }
 0x31a   :  { %6460 = vmatpush.bf16.msrb.mxu3 %v9112_v1  ;;  %v8572_v37 = vor.u32 %v10722_v8, %v8569_v22  ;;  %v6187_v5 = vadd.f32 %v6186_v26, %v6173_v18  ;;  %v10263_v44 = vld [vmem:[#allocation11 + $0xf90] sm:$0xf]  ;;  %v11018_v45 = vld [vmem:[#allocation11 + $0xb94] sm:$0xf] }
 0x31b   :  { %6541 = vmatpush.bf16.msrb.mxu1 %v8700_v25  ;;  %v8791_v25 = vld [vmem:[#allocation11 + $0x410] sm:$0xf]  ;;  %v9753_v1 = vld [vmem:[#allocation11 + $0xbb0] sm:$0xf0] }
 0x31c   :  { %v8792_v24 = vor.u32 %v10782_v2, %v8791_v25  ;;  %11177 = vtanh.f32 %v6187_v5  ;;  %v11150_v49 = vld [vmem:[#allocation11 + $0xfac] sm:$0xf0]  ;;  %v9465_v9 = vld [vmem:[#allocation11 + $0x970] sm:$0xf0] }
 0x31d   :  { %6528 = vmatpush.bf16.msrb.mxu0 %v8412_v12  ;;  %v10650_v12 = vld [vmem:[#allocation11 + $0x14] sm:$0xf]  ;;  %6447 = vmatpush.bf16.msrb.mxu2 %v8824_v29  ;;  %v11176_v63 = vpop.eup %11175  ;;  %v10264_v33 = vor.u32 %v11150_v49, %v10263_v44  ;;  %v9975_v39 = vld [vmem:[#allocation11 + $0xd50] sm:$0xf]  ;;  %v9468_v50 = vor.u32 %v10946_v7, %v9465_v9  ;;  %v6198_v44 = vpop.f32.mrf.mxu0 }
 0x31e   :  { %6461 = vmatpush.bf16.msrb.mxu3 %v9080_v46  ;;  %v8284_v35 = vor.u32 %v10650_v12, %v8281_v14  ;;  %6878 = vst [vmem:[%s11826_s9 + $0x8] sm:$0xff] %v11176_v63  ;;  %v11078_v62 = vld [vmem:[#allocation11 + $0xd6c] sm:$0xf0]  ;;  %v11010_v8 = vld [vmem:[#allocation11 + $0xb54] sm:$0xf] }
 0x31f   :  { %6542 = vmatpush.bf16.msrb.mxu1 %v8668_v16  ;;  %v11094_v16 = vld [vmem:[#allocation11 + $0xdec] sm:$0xf0]  ;;  %v9721_v22 = vld [vmem:[#allocation11 + $0xb70] sm:$0xf0]  ;;  %v9976_v10 = vor.u32 %v11078_v62, %v9975_v39 }
 0x320   :  { %v10040_v40 = vor.u32 %v11094_v16, %v10039_v55  ;;  %v10231_v58 = vld [vmem:[#allocation11 + $0xf50] sm:$0xf]  ;;  %v9724_v4 = vor.u32 %v11010_v8, %v9721_v22  ;;  %v10938_v6 = vld [vmem:[#allocation11 + $0x914] sm:$0xf] }
 0x321   :  { %6529 = vmatpush.bf16.msrb.mxu0 %v8380_v30  ;;  %v11026_v30 = vld [vmem:[#allocation11 + $0xbd4] sm:$0xf]  ;;  %6448 = vmatpush.bf16.msrb.mxu2 %v8792_v24  ;;  %v11142_v38 = vld [vmem:[#allocation11 + $0xf6c] sm:$0xf0] }
 0x322   :  { %v9788_v28 = vor.u32 %v11026_v30, %v9785_v60  ;;  %6462 = vmatpush.bf16.msrb.mxu3 %v9048_v31  ;;  %v11178_v25 = vpop.eup %11177  ;;  %v10232_v29 = vor.u32 %v11142_v38, %v10231_v58  ;;  %v9943_v46 = vld [vmem:[#allocation11 + $0xd10] sm:$0xf]  ;;  %v9433_v12 = vld [vmem:[#allocation11 + $0x930] sm:$0xf0]  ;;  %v3351_v38 = vperm.slane %v11703_v53, 2 }
 0x323   :  { %6543 = vmatpush.bf16.msrb.mxu1 %v8636_v36  ;;  %v8540_v36 = vor.u32 %v10714_v15, %v8537_v47  ;;  %6886 = vst [vmem:[%s11826_s9 + $0x48] sm:$0xff] %v11178_v25  ;;  %v11070_v2 = vld [vmem:[#allocation11 + $0xd2c] sm:$0xf0]  ;;  %v11002_v14 = vld [vmem:[#allocation11 + $0xb14] sm:$0xf]  ;;  %v9436_v18 = vor.u32 %v10938_v6, %v9433_v12 }
 0x324   :  { %6449 = vmatmul.bf16.vlgmr.msrb.gmra.mxu2 %v11621_v56  ;;  %v9689_v15 = vld [vmem:[#allocation11 + $0xb30] sm:$0xf0]  ;;  %v9944_v17 = vor.u32 %v11070_v2, %v9943_v46  ;;  %v9911_v55 = vld [vmem:[#allocation11 + $0xcd0] sm:$0xf] }
 0x325   :  { %6530 = vmatpush.bf16.msrb.mxu0 %v8348_v52  ;;  %6497 = vmatpush.bf16.msra.mxu2 %v10040_v40  ;;  %v10008_v52 = vor.u32 %v11086_v59, %v10007_v57  ;;  %v11062_v16 = vld [vmem:[#allocation11 + $0xcec] sm:$0xf0]  ;;  %v9692_v19 = vor.u32 %v11002_v14, %v9689_v15  ;;  %v10930_v26 = vld [vmem:[#allocation11 + $0x8d4] sm:$0xf] }
 0x326   :  { %6511 = vmatpush.bf16.msra.mxu3 %v10296_v3  ;;  %v10167_v20 = vld [vmem:[#allocation11 + $0xed0] sm:$0xf]  ;;  %v9401_v24 = vld [vmem:[#allocation11 + $0x8f0] sm:$0xf0]  ;;  %v9912_v30 = vor.u32 %v11062_v16, %v9911_v55 }
 0x327   :  { %6544 = vmatpush.bf16.msrb.mxu1 %v8604_v48  ;;  %v9756_v48 = vor.u32 %v11018_v45, %v9753_v1  ;;  %6463 = vmatmul.bf16.vlgmr.msrb.gmra.mxu3 %v11623_v61  ;;  %v11126_v23 = vld [vmem:[#allocation11 + $0xeec] sm:$0xf0]  ;;  %v10994_v31 = vld [vmem:[#allocation11 + $0xad4] sm:$0xf] }
 0x328   :  { %v9657_v34 = vld [vmem:[#allocation11 + $0xaf0] sm:$0xf0]  ;;  %v10168_v60 = vor.u32 %v11126_v23, %v10167_v20  ;;  %v9879_v63 = vld [vmem:[#allocation11 + $0xc90] sm:$0xf]  ;;  %v10775_v20 = vld [vmem:[#allocation11 + $0x3f4] sm:$0xf0]  ;;  %v6226_v23 = vpop.f32.mrf.mxu2 }
 0x329   :  { %6531 = vmatpush.bf16.msrb.mxu0 %v8316_v13  ;;  %6498 = vmatpush.bf16.msra.mxu2 %v10008_v52  ;;  %v10199_v13 = vld [vmem:[#allocation11 + $0xf10] sm:$0xf]  ;;  %v10922_v57 = vld [vmem:[#allocation11 + $0x894] sm:$0xf] }
 0x32a   :  { %6512 = vmatpush.bf16.msra.mxu3 %v10264_v33  ;;  %v11054_v5 = vld [vmem:[#allocation11 + $0xcac] sm:$0xf0]  ;;  %v9369_v59 = vld [vmem:[#allocation11 + $0x8b0] sm:$0xf0] }
 0x32b   :  { %6545 = vmatpush.bf16.msrb.mxu1 %v8572_v37  ;;  %v11134_v37 = vld [vmem:[#allocation11 + $0xf2c] sm:$0xf0]  ;;  %v9880_v49 = vor.u32 %v11054_v5, %v9879_v63  ;;  %v9372_v1 = vor.u32 %v10922_v57, %v9369_v59  ;;  %v10914_v62 = vld [vmem:[#allocation11 + $0x854] sm:$0xf]  ;;  %v8479_v57 = vld [vmem:[#allocation11 + $0x198] sm:$0xf] }
 0x32c   :  { %v10200_v47 = vor.u32 %v11134_v37, %v10199_v13  ;;  %v10135_v40 = vld [vmem:[#allocation11 + $0xe90] sm:$0xf]  ;;  %v9593_v58 = vld [vmem:[#allocation11 + $0xa70] sm:$0xf0] }
 0x32d   :  { %6532 = vmatpush.bf16.msrb.mxu0 %v8284_v35  ;;  %6499 = vmatpush.bf16.msra.mxu2 %v9976_v10  ;;  %v9404_v35 = vor.u32 %v10930_v26, %v9401_v24  ;;  %v11118_v3 = vld [vmem:[#allocation11 + $0xeac] sm:$0xf0]  ;;  %v10970_v13 = vld [vmem:[#allocation11 + $0xa14] sm:$0xf]  ;;  %v6240_v26 = vpop.f32.mrf.mxu3 }
 0x32e   :  { %6513 = vmatpush.bf16.msra.mxu3 %v10232_v29  ;;  %v10136_v43 = vor.u32 %v11118_v3, %v10135_v40  ;;  %v9847_v51 = vld [vmem:[#allocation11 + $0xc50] sm:$0xf]  ;;  %v6212_v29 = vpop.f32.mrf.mxu1  ;;  %v9561_v37 = vld [vmem:[#allocation11 + $0xa30] sm:$0xf0] }
 0x32f   :  { %6546 = vmatpush.bf16.msrb.mxu1 %v8540_v36  ;;  %v9660_v36 = vor.u32 %v10994_v31, %v9657_v34  ;;  %v11046_v45 = vld [vmem:[#allocation11 + $0xc6c] sm:$0xf0]  ;;  %v10834_v6 = vld [vmem:[#allocation11 + $0x5d4] sm:$0xf]  ;;  %v9564_v31 = vor.u32 %v10970_v13, %v9561_v37  ;;  %v6200_v34 = vpop.f32.mrf.mxu0 }
 0x330   :  { %6533 = vmatmul.bf16.vlgmr.msrb.gmra.mxu0 %v11614_v54  ;;  %v10103_v33 = vld [vmem:[#allocation11 + $0xe50] sm:$0xf]  ;;  %v9848_v9 = vor.u32 %v11046_v45, %v9847_v51  ;;  %v9017_v12 = vld [vmem:[#allocation11 + $0x5f0] sm:$0xf0] }
 0x331   :  { %6581 = vmatpush.bf16.msra.mxu0 %v9532_v42  ;;  %6500 = vmatpush.bf16.msra.mxu2 %v9944_v17  ;;  %v10986_v42 = vld [vmem:[#allocation11 + $0xa94] sm:$0xf]  ;;  %v11110_v39 = vld [vmem:[#allocation11 + $0xe6c] sm:$0xf0]  ;;  %v8511_v17 = vld [vmem:[#allocation11 + $0x1d8] sm:$0xf] }
 0x332   :  { %6547 = vmatmul.bf16.vlgmr.msrb.gmra.mxu1 %v11616_v11  ;;  %6514 = vmatpush.bf16.msra.mxu3 %v10200_v47  ;;  %v9815_v7 = vld [vmem:[#allocation11 + $0xc10] sm:$0xf]  ;;  %v10104_v8 = vor.u32 %v11110_v39, %v10103_v33  ;;  %v10898_v14 = vld [vmem:[#allocation11 + $0x7d4] sm:$0xf]  ;;  %v6199_v47 = vadd.f32 %v6198_v44, %v3351_v38  ;;  %v10767_v44 = vld [vmem:[#allocation11 + $0x3b4] sm:$0xf0] }
 0x333   :  { %6595 = vmatpush.bf16.msra.mxu1 %v9788_v28  ;;  %v9625_v28 = vld [vmem:[#allocation11 + $0xab0] sm:$0xf0]  ;;  %v11038_v22 = vld [vmem:[#allocation11 + $0xc2c] sm:$0xf0] }
 0x334   :  { %v9628_v52 = vor.u32 %v10986_v42, %v9625_v28  ;;  %v10071_v25 = vld [vmem:[#allocation11 + $0xe10] sm:$0xf]  ;;  %v9273_v15 = vld [vmem:[#allocation11 + $0x7f0] sm:$0xf0]  ;;  %v9816_v55 = vor.u32 %v11038_v22, %v9815_v7  ;;  %v6213_v59 = vadd.f32 %v6212_v29, %v6199_v47  ;;  %v10703_v42 = vld [vmem:[#allocation11 + $0x1b4] sm:$0xf0] }
 0x335   :  { %6582 = vmatpush.bf16.msra.mxu0 %v9500_v27  ;;  %6501 = vmatpush.bf16.msra.mxu2 %v9912_v30  ;;  %v9337_v27 = vld [vmem:[#allocation11 + $0x870] sm:$0xf0]  ;;  %v11102_v10 = vld [vmem:[#allocation11 + $0xe2c] sm:$0xf0]  ;;  %v9020_v30 = vor.u32 %v10834_v6, %v9017_v12  ;;  %v8735_v28 = vld [vmem:[#allocation11 + $0x398] sm:$0xf]  ;;  %v8480_v33 = vor.u32 %v10703_v42, %v8479_v57 }
 0x336   :  { %6515 = vmatpush.bf16.msra.mxu3 %v10168_v60  ;;  %v9340_v46 = vor.u32 %v10914_v62, %v9337_v27  ;;  %v10072_v16 = vor.u32 %v11102_v10, %v10071_v25  ;;  %v9276_v60 = vor.u32 %v10898_v14, %v9273_v15  ;;  %v10826_v63 = vld [vmem:[#allocation11 + $0x594] sm:$0xf]  ;;  %v8736_v39 = vor.u32 %v10767_v44, %v8735_v28  ;;  %v10695_v7 = vld [vmem:[#allocation11 + $0x174] sm:$0xf0] }
 0x337   :  { %6596 = vmatpush.bf16.msra.mxu1 %v9756_v48  ;;  %v10978_v48 = vld [vmem:[#allocation11 + $0xa54] sm:$0xf]  ;;  %v6254_v22 = vpop.f32.mrf.mxu0  ;;  %v8415_v6 = vld [vmem:[#allocation11 + $0x118] sm:$0xf] }
 0x338   :  { %v9596_v2 = vor.u32 %v10978_v48, %v9593_v58  ;;  %v8985_v5 = vld [vmem:[#allocation11 + $0x5b0] sm:$0xf0]  ;;  %v8447_v48 = vld [vmem:[#allocation11 + $0x158] sm:$0xf]  ;;  %v6201_v58 = vadd.f32 %v6200_v34, %v3351_v38  ;;  %v6228_v38 = vpop.f32.mrf.mxu2 }
 0x339   :  { %6583 = vmatpush.bf16.msra.mxu0 %v9468_v50  ;;  %6502 = vmatpush.bf16.msra.mxu2 %v9880_v49  ;;  %v10906_v50 = vld [vmem:[#allocation11 + $0x814] sm:$0xf]  ;;  %v6227_v49 = vadd.f32 %v6226_v23, %v6213_v59  ;;  %v10687_v14 = vld [vmem:[#allocation11 + $0x134] sm:$0xf0] }
 0x33a   :  { %6516 = vmatpush.bf16.msra.mxu3 %v10136_v43  ;;  %v10890_v40 = vld [vmem:[#allocation11 + $0x794] sm:$0xf]  ;;  %v8988_v43 = vor.u32 %v10826_v63, %v8985_v5  ;;  %v8671_v15 = vld [vmem:[#allocation11 + $0x318] sm:$0xf] }
 0x33b   :  { %6597 = vmatpush.bf16.msra.mxu1 %v9724_v4  ;;  %v9305_v4 = vld [vmem:[#allocation11 + $0x830] sm:$0xf0]  ;;  %v6241_v25 = vadd.f32 %v6240_v26, %v6227_v49  ;;  %v8416_v26 = vor.u32 %v10687_v14, %v8415_v6  ;;  %v8639_v63 = vld [vmem:[#allocation11 + $0x2d8] sm:$0xf] }
 0x33c   :  { %v9308_v24 = vor.u32 %v10906_v50, %v9305_v4  ;;  %v9241_v3 = vld [vmem:[#allocation11 + $0x7b0] sm:$0xf0]  ;;  %v8448_v50 = vor.u32 %v10695_v7, %v8447_v48  ;;  %v10743_v5 = vld [vmem:[#allocation11 + $0x2f4] sm:$0xf0] }
 0x33d   :  { %6584 = vmatpush.bf16.msra.mxu0 %v9436_v18  ;;  %6503 = vmatpush.bf16.msra.mxu2 %v9848_v9  ;;  %v10711_v18 = vld [vmem:[#allocation11 + $0x1f4] sm:$0xf0]  ;;  %v9244_v51 = vor.u32 %v10890_v40, %v9241_v3  ;;  %v10818_v45 = vld [vmem:[#allocation11 + $0x554] sm:$0xf]  ;;  %v8640_v28 = vor.u32 %v10743_v5, %v8639_v63 }
 0x33e   :  { %6517 = vmatpush.bf16.msra.mxu3 %v10104_v8  ;;  %v10882_v62 = vld [vmem:[#allocation11 + $0x754] sm:$0xf]  ;;  %v8703_v9 = vld [vmem:[#allocation11 + $0x358] sm:$0xf] }
 0x33f   :  { %6598 = vmatpush.bf16.msra.mxu1 %v9692_v19  ;;  %v8767_v19 = vld [vmem:[#allocation11 + $0x3d8] sm:$0xf]  ;;  %v9209_v27 = vld [vmem:[#allocation11 + $0x770] sm:$0xf0] }
 0x340   :  { %v10759_v8 = vld [vmem:[#allocation11 + $0x374] sm:$0xf0]  ;;  %v9212_v29 = vor.u32 %v10882_v62, %v9209_v27  ;;  %v8921_v53 = vld [vmem:[#allocation11 + $0x530] sm:$0xf0]  ;;  %v6256_v62 = vpop.f32.mrf.mxu0 }
 0x341   :  { %6585 = vmatpush.bf16.msra.mxu0 %v9404_v35  ;;  %v8512_v35 = vor.u32 %v10711_v18, %v8511_v17  ;;  %6504 = vmatpush.bf16.msra.mxu2 %v9816_v55  ;;  %v8704_v4 = vor.u32 %v10759_v8, %v8703_v9  ;;  %v10874_v13 = vld [vmem:[#allocation11 + $0x714] sm:$0xf]  ;;  %v10751_v17 = vld [vmem:[#allocation11 + $0x334] sm:$0xf0]  ;;  %v6255_v55 = vadd.f32 %v6254_v22, %v6241_v25 }
 0x342   :  { %6518 = vmatpush.bf16.msra.mxu3 %v10072_v16  ;;  %v9177_v37 = vld [vmem:[#allocation11 + $0x730] sm:$0xf0] }
 0x343   :  { %6599 = vmatpush.bf16.msra.mxu1 %v9660_v36  ;;  %v8768_v36 = vor.u32 %v10775_v20, %v8767_v19  ;;  %v9180_v18 = vor.u32 %v10874_v13, %v9177_v37  ;;  %v10802_v19 = vld [vmem:[#allocation11 + $0x4d4] sm:$0xf] }
 0x344   :  { %6505 = vmatmul.bf16.vlgmr.msra.gmra.mxu2 %v11677_v0  ;;  %v8889_v20 = vld [vmem:[#allocation11 + $0x4f0] sm:$0xf0] }
 0x345   :  { %6586 = vmatpush.bf16.msra.mxu0 %v9372_v1  ;;  %6553 = vmatpush.bf16.msrb.mxu2 %v9020_v30  ;;  %v8953_v1 = vld [vmem:[#allocation11 + $0x570] sm:$0xf0]  ;;  %v8383_v30 = vld [vmem:[#allocation11 + $0xd8] sm:$0xf] }
 0x346   :  { %6567 = vmatpush.bf16.msrb.mxu3 %v9276_v60  ;;  %v8956_v10 = vor.u32 %v10818_v45, %v8953_v1  ;;  %v9145_v34 = vld [vmem:[#allocation11 + $0x6f0] sm:$0xf0]  ;;  %v10679_v60 = vld [vmem:[#allocation11 + $0xf4] sm:$0xf0] }
 0x347   :  { %6600 = vmatpush.bf16.msra.mxu1 %v9628_v52  ;;  %v6214_v52 = vpop.f32.mrf.mxu1  ;;  %6519 = vmatmul.bf16.vlgmr.msra.gmra.mxu3 %v11679_v21  ;;  %v10794_v57 = vld [vmem:[#allocation11 + $0x494] sm:$0xf]  ;;  %v8384_v42 = vor.u32 %v10679_v60, %v8383_v30  ;;  %v6282_v44 = vpop.f32.mrf.mxu2  ;;  %v8351_v45 = vld [vmem:[#allocation11 + $0x98] sm:$0xf] }
 0x348   :  { %v6215_v12 = vadd.f32 %v6214_v52, %v6201_v58  ;;  %v8857_v59 = vld [vmem:[#allocation11 + $0x4b0] sm:$0xf0]  ;;  %v10671_v52 = vld [vmem:[#allocation11 + $0xb4] sm:$0xf0] }
 0x349   :  { %6587 = vmatpush.bf16.msra.mxu0 %v9340_v46  ;;  %6554 = vmatpush.bf16.msrb.mxu2 %v8988_v43  ;;  %v10810_v46 = vld [vmem:[#allocation11 + $0x514] sm:$0xf]  ;;  %v8860_v27 = vor.u32 %v10794_v57, %v8857_v59  ;;  %v8352_v22 = vor.u32 %v10671_v52, %v8351_v45  ;;  %v9535_v60 = vld [vmem:[#allocation11 + $0x9d8] sm:$0xf] }
 0x34a   :  { %6568 = vmatpush.bf16.msrb.mxu3 %v9244_v51  ;;  %v8924_v47 = vor.u32 %v10810_v46, %v8921_v53  ;;  %v6229_v16 = vadd.f32 %v6228_v38, %v6215_v12  ;;  %v10858_v43 = vld [vmem:[#allocation11 + $0x694] sm:$0xf]  ;;  %v8319_v46 = vld [vmem:[#allocation11 + $0x58] sm:$0xf] }
 0x34b   :  { %6601 = vmatpush.bf16.msra.mxu1 %v9596_v2  ;;  %v6242_v2 = vpop.f32.mrf.mxu3  ;;  %v9113_v51 = vld [vmem:[#allocation11 + $0x6b0] sm:$0xf0]  ;;  %v10663_v53 = vld [vmem:[#allocation11 + $0x74] sm:$0xf0] }
 0x34c   :  { %v9116_v7 = vor.u32 %v10858_v43, %v9113_v51  ;;  %v10786_v9 = vld [vmem:[#allocation11 + $0x454] sm:$0xf]  ;;  %v8575_v38 = vld [vmem:[#allocation11 + $0x258] sm:$0xf] }
 0x34d   :  { %6588 = vmatpush.bf16.msra.mxu0 %v9308_v24  ;;  %6555 = vmatpush.bf16.msrb.mxu2 %v8956_v10  ;;  %v8672_v24 = vor.u32 %v10751_v17, %v8671_v15  ;;  %v8825_v8 = vld [vmem:[#allocation11 + $0x470] sm:$0xf0]  ;;  %v8320_v17 = vor.u32 %v10663_v53, %v8319_v46  ;;  %v11031_v57 = vld [vmem:[#allocation11 + $0xbf4] sm:$0xf0] }
 0x34e   :  { %6569 = vmatpush.bf16.msrb.mxu3 %v9212_v29  ;;  %v10850_v10 = vld [vmem:[#allocation11 + $0x654] sm:$0xf]  ;;  %v8828_v13 = vor.u32 %v10786_v9, %v8825_v8  ;;  %v10951_v53 = vld [vmem:[#allocation11 + $0x974] sm:$0xf0] }
 0x34f   :  { %6602 = vmatpush.bf16.msra.mxu1 %v9564_v31  ;;  %v6268_v23 = vpop.f32.mrf.mxu1  ;;  %v10866_v31 = vld [vmem:[#allocation11 + $0x6d4] sm:$0xf] }
 0x350   :  { %6589 = vmatmul.bf16.vlgmr.msra.gmra.mxu0 %v11640_v41  ;;  %v9148_v40 = vor.u32 %v10866_v31, %v9145_v34  ;;  %v6269_v3 = vadd.f32 %v6268_v23, %v6255_v55  ;;  %v9081_v29 = vld [vmem:[#allocation11 + $0x670] sm:$0xf0]  ;;  %v6284_v55 = vpop.f32.mrf.mxu2  ;;  %v10719_v23 = vld [vmem:[#allocation11 + $0x234] sm:$0xf0] }
 0x351   :  { %6637 = vmatpush.bf16.msrb.mxu0 %v8512_v35  ;;  %v8892_v35 = vor.u32 %v10802_v19, %v8889_v20  ;;  %6556 = vmatpush.bf16.msrb.mxu2 %v8924_v47  ;;  %v9084_v37 = vor.u32 %v10850_v10, %v9081_v29  ;;  %v8793_v12 = vld [vmem:[#allocation11 + $0x430] sm:$0xf0]  ;;  %v8543_v19 = vld [vmem:[#allocation11 + $0x218] sm:$0xf] }
 0x352   :  { %6603 = vmatmul.bf16.vlgmr.msra.gmra.mxu1 %v11642_v32  ;;  %6570 = vmatpush.bf16.msrb.mxu3 %v9180_v18  ;;  %v6283_v1 = vadd.f32 %v6282_v44, %v6269_v3  ;;  %v10842_v14 = vld [vmem:[#allocation11 + $0x614] sm:$0xf]  ;;  %v10655_v18 = vld [vmem:[#allocation11 + $0x34] sm:$0xf0] }
 0x353   :  { %6651 = vmatpush.bf16.msrb.mxu1 %v8768_v36  ;;  %v6243_v36 = vadd.f32 %v6242_v2, %v6229_v16  ;;  %v6296_v49 = vpop.f32.mrf.mxu3  ;;  %v10727_v2 = vld [vmem:[#allocation11 + $0x274] sm:$0xf0]  ;;  %v9049_v15 = vld [vmem:[#allocation11 + $0x630] sm:$0xf0] }
 0x354   :  { %v6297_v58 = vadd.f32 %v6296_v49, %v6283_v1  ;;  %v8576_v47 = vor.u32 %v10727_v2, %v8575_v38  ;;  %v8287_v16 = vld [vmem:[#allocation11 + $0x18] sm:$0xf]  ;;  %v11154_v34 = vld [vmem:[#allocation11 + $0xfd4] sm:$0xf] }
 0x355   :  { %6638 = vmatpush.bf16.msrb.mxu0 %v8480_v33  ;;  %v8607_v33 = vld [vmem:[#allocation11 + $0x298] sm:$0xf]  ;;  %v6257_v48 = vadd.f32 %v6256_v62, %v6243_v36  ;;  %6557 = vmatpush.bf16.msrb.mxu2 %v8892_v35  ;;  %v10297_v30 = vld [vmem:[#allocation11 + $0xff0] sm:$0xf0]  ;;  %v9052_v36 = vor.u32 %v10842_v14, %v9049_v15  ;;  %v8288_v59 = vor.u32 %v10655_v18, %v8287_v16 }
 0x356   :  { %6571 = vmatpush.bf16.msrb.mxu3 %v9148_v40  ;;  %11179 = vtanh.f32 %v6297_v58  ;;  %v10967_v40 = vld [vmem:[#allocation11 + $0x9f4] sm:$0xf0]  ;;  %v10300_v44 = vor.u32 %v11154_v34, %v10297_v30  ;;  %v11082_v49 = vld [vmem:[#allocation11 + $0xd94] sm:$0xf] }
 0x357   :  { %6652 = vmatpush.bf16.msrb.mxu1 %v8736_v39  ;;  %v10735_v39 = vld [vmem:[#allocation11 + $0x2b4] sm:$0xf0]  ;;  %v10009_v43 = vld [vmem:[#allocation11 + $0xdb0] sm:$0xf0]  ;;  %v9536_v51 = vor.u32 %v10967_v40, %v9535_v60 }
 0x358   :  { %v8608_v25 = vor.u32 %v10735_v39, %v8607_v33  ;;  %v9791_v3 = vld [vmem:[#allocation11 + $0xbd8] sm:$0xf]  ;;  %v11146_v1 = vld [vmem:[#allocation11 + $0xf94] sm:$0xf] }
 0x359   :  { %6639 = vmatpush.bf16.msrb.mxu0 %v8448_v50  ;;  %v6270_v50 = vpop.f32.mrf.mxu1  ;;  %6558 = vmatpush.bf16.msrb.mxu2 %v8860_v27  ;;  %v9792_v45 = vor.u32 %v11031_v57, %v9791_v3  ;;  %v10265_v52 = vld [vmem:[#allocation11 + $0xfb0] sm:$0xf0]  ;;  %v9503_v33 = vld [vmem:[#allocation11 + $0x998] sm:$0xf] }
 0x35a   :  { %6572 = vmatpush.bf16.msrb.mxu3 %v9116_v7  ;;  %v6271_v6 = vadd.f32 %v6270_v50, %v6257_v48  ;;  %v10959_v39 = vld [vmem:[#allocation11 + $0x9b4] sm:$0xf0]  ;;  %v10012_v48 = vor.u32 %v11082_v49, %v10009_v43  ;;  %v10268_v58 = vor.u32 %v11146_v1, %v10265_v52  ;;  %v11074_v7 = vld [vmem:[#allocation11 + $0xd54] sm:$0xf] }
 0x35b   :  { %6653 = vmatpush.bf16.msrb.mxu1 %v8704_v4  ;;  %v10778_v4 = vld [vmem:[#allocation11 + $0x414] sm:$0xf]  ;;  %v6298_v31 = vpop.f32.mrf.mxu3  ;;  %v9759_v62 = vld [vmem:[#allocation11 + $0xb98] sm:$0xf]  ;;  %v9504_v8 = vor.u32 %v10959_v39, %v9503_v33 }
 0x35c   :  { %v6285_v20 = vadd.f32 %v6284_v55, %v6271_v6  ;;  %v11180_v63 = vpop.eup %11179  ;;  %v8796_v35 = vor.u32 %v10778_v4, %v8793_v12  ;;  %v11023_v27 = vld [vmem:[#allocation11 + $0xbb4] sm:$0xf0]  ;;  %v9977_v9 = vld [vmem:[#allocation11 + $0xd70] sm:$0xf0] }
 0x35d   :  { %6640 = vmatpush.bf16.msrb.mxu0 %v8416_v26  ;;  %v11090_v26 = vld [vmem:[#allocation11 + $0xdd4] sm:$0xf]  ;;  %6559 = vmatpush.bf16.msrb.mxu2 %v8828_v13  ;;  %6879 = vst [vmem:[%s11826_s9 + $0x10] sm:$0xff] %v11180_v63  ;;  %v9471_v29 = vld [vmem:[#allocation11 + $0x958] sm:$0xf]  ;;  %v9980_v50 = vor.u32 %v11074_v7, %v9977_v9 }
 0x35e   :  { %6573 = vmatpush.bf16.msrb.mxu3 %v9084_v37  ;;  %v6299_v5 = vadd.f32 %v6298_v31, %v6285_v20  ;;  %v10233_v10 = vld [vmem:[#allocation11 + $0xf70] sm:$0xf0]  ;;  %v9727_v38 = vld [vmem:[#allocation11 + $0xb58] sm:$0xf]  ;;  %v9472_v6 = vor.u32 %v10951_v53, %v9471_v29 }
 0x35f   :  { %6654 = vmatpush.bf16.msrb.mxu1 %v8672_v24  ;;  %v10041_v24 = vld [vmem:[#allocation11 + $0xdf0] sm:$0xf0]  ;;  %v11015_v2 = vld [vmem:[#allocation11 + $0xb74] sm:$0xf0] }
 0x360   :  { %11181 = vtanh.f32 %v6299_v5  ;;  %v11066_v13 = vld [vmem:[#allocation11 + $0xd14] sm:$0xf]  ;;  %v9728_v12 = vor.u32 %v11015_v2, %v9727_v38  ;;  %v9695_v55 = vld [vmem:[#allocation11 + $0xb18] sm:$0xf] }
 0x361   :  { %6641 = vmatpush.bf16.msrb.mxu0 %v8384_v42  ;;  %v8544_v42 = vor.u32 %v10719_v23, %v8543_v19  ;;  %6560 = vmatpush.bf16.msrb.mxu2 %v8796_v35  ;;  %v9945_v37 = vld [vmem:[#allocation11 + $0xd30] sm:$0xf0]  ;;  %v11007_v16 = vld [vmem:[#allocation11 + $0xb34] sm:$0xf0] }
 0x362   :  { %6574 = vmatpush.bf16.msrb.mxu3 %v9052_v36  ;;  %v11130_v14 = vld [vmem:[#allocation11 + $0xf14] sm:$0xf]  ;;  %v9948_v18 = vor.u32 %v11066_v13, %v9945_v37  ;;  %v9407_v30 = vld [vmem:[#allocation11 + $0x8d8] sm:$0xf] }
 0x363   :  { %6655 = vmatpush.bf16.msrb.mxu1 %v8640_v28  ;;  %v10044_v28 = vor.u32 %v11090_v26, %v10041_v24  ;;  %v10201_v15 = vld [vmem:[#allocation11 + $0xf30] sm:$0xf0]  ;;  %v9696_v24 = vor.u32 %v11007_v16, %v9695_v55  ;;  %v10935_v60 = vld [vmem:[#allocation11 + $0x8f4] sm:$0xf0] }
 0x364   :  { %6561 = vmatmul.bf16.vlgmr.msrb.gmra.mxu2 %v11621_v56  ;;  %v10204_v19 = vor.u32 %v11130_v14, %v10201_v15  ;;  %v11058_v20 = vld [vmem:[#allocation11 + $0xcd4] sm:$0xf]  ;;  %v9663_v63 = vld [vmem:[#allocation11 + $0xad8] sm:$0xf]  ;;  %v9408_v57 = vor.u32 %v10935_v60, %v9407_v30 }
 0x365   :  { %6642 = vmatpush.bf16.msrb.mxu0 %v8352_v22  ;;  %6609 = vmatpush.bf16.msra.mxu2 %v10044_v28  ;;  %v9760_v22 = vor.u32 %v11023_v27, %v9759_v62  ;;  %v9913_v23 = vld [vmem:[#allocation11 + $0xcf0] sm:$0xf0]  ;;  %v10999_v5 = vld [vmem:[#allocation11 + $0xaf4] sm:$0xf0] }
 0x366   :  { %6623 = vmatpush.bf16.msra.mxu3 %v10300_v44  ;;  %v11182_v46 = vpop.eup %11181  ;;  %v11122_v31 = vld [vmem:[#allocation11 + $0xed4] sm:$0xf]  ;;  %v9916_v35 = vor.u32 %v11058_v20, %v9913_v23  ;;  %v9375_v44 = vld [vmem:[#allocation11 + $0x898] sm:$0xf] }
 0x367   :  { %6656 = vmatpush.bf16.msrb.mxu1 %v8608_v25  ;;  %v11138_v25 = vld [vmem:[#allocation11 + $0xf54] sm:$0xf]  ;;  %6575 = vmatmul.bf16.vlgmr.msrb.gmra.mxu3 %v11623_v61  ;;  %6887 = vst [vmem:[%s11826_s9 + $0x50] sm:$0xff] %v11182_v46  ;;  %v10927_v49 = vld [vmem:[#allocation11 + $0x8b4] sm:$0xf0] }
 0x368   :  { %v10236_v4 = vor.u32 %v11138_v25, %v10233_v10  ;;  %v10169_v34 = vld [vmem:[#allocation11 + $0xef0] sm:$0xf0]  ;;  %v9631_v43 = vld [vmem:[#allocation11 + $0xa98] sm:$0xf]  ;;  %v9376_v62 = vor.u32 %v10927_v49, %v9375_v44  ;;  %v11762_v25 = vld [vmem:[#allocation13] sm:$0xff] }
 0x369   :  { %6643 = vmatpush.bf16.msrb.mxu0 %v8320_v17  ;;  %6610 = vmatpush.bf16.msra.mxu2 %v10012_v48  ;;  %v9439_v17 = vld [vmem:[#allocation11 + $0x918] sm:$0xf]  ;;  %v10172_v36 = vor.u32 %v11122_v31, %v10169_v34  ;;  %v11050_v40 = vld [vmem:[#allocation11 + $0xc94] sm:$0xf]  ;;  %v3352_v10 = vperm.slane %v11762_v25, 3  ;;  %v6338_v34 = vpop.f32.mrf.mxu2 }
 0x36a   :  { %6624 = vmatpush.bf16.msra.mxu3 %v10268_v58  ;;  %v9881_v3 = vld [vmem:[#allocation11 + $0xcb0] sm:$0xf0]  ;;  %v9343_v7 = vld [vmem:[#allocation11 + $0x858] sm:$0xf]  ;;  %v8769_v31 = vld [vmem:[#allocation11 + $0x3f8] sm:$0xf0]  ;;  %v6352_v30 = vpop.f32.mrf.mxu3 }
 0x36b   :  { %6657 = vmatpush.bf16.msrb.mxu1 %v8576_v47  ;;  %v10943_v47 = vld [vmem:[#allocation11 + $0x934] sm:$0xf0]  ;;  %v10137_v28 = vld [vmem:[#allocation11 + $0xeb0] sm:$0xf0]  ;;  %v9884_v1 = vor.u32 %v11050_v40, %v9881_v3  ;;  %v10699_v44 = vld [vmem:[#allocation11 + $0x19c] sm:$0xf] }
 0x36c   :  { %v9440_v26 = vor.u32 %v10943_v47, %v9439_v17  ;;  %v11042_v33 = vld [vmem:[#allocation11 + $0xc54] sm:$0xf]  ;;  %v10919_v9 = vld [vmem:[#allocation11 + $0x874] sm:$0xf0] }
 0x36d   :  { %6644 = vmatpush.bf16.msrb.mxu0 %v8288_v59  ;;  %6611 = vmatpush.bf16.msra.mxu2 %v9980_v50  ;;  %v9664_v59 = vor.u32 %v10999_v5, %v9663_v63  ;;  %v9849_v39 = vld [vmem:[#allocation11 + $0xc70] sm:$0xf0]  ;;  %v9344_v13 = vor.u32 %v10919_v9, %v9343_v7  ;;  %v9567_v14 = vld [vmem:[#allocation11 + $0xa18] sm:$0xf] }
 0x36e   :  { %6625 = vmatpush.bf16.msra.mxu3 %v10236_v4  ;;  %v11106_v48 = vld [vmem:[#allocation11 + $0xe54] sm:$0xf]  ;;  %v9852_v46 = vor.u32 %v11042_v33, %v9849_v39  ;;  %v6324_v4 = vpop.f32.mrf.mxu1  ;;  %v10975_v15 = vld [vmem:[#allocation11 + $0xa34] sm:$0xf0] }
 0x36f   :  { %6658 = vmatpush.bf16.msrb.mxu1 %v8544_v42  ;;  %v11114_v42 = vld [vmem:[#allocation11 + $0xe94] sm:$0xf]  ;;  %v9023_v17 = vld [vmem:[#allocation11 + $0x5d8] sm:$0xf]  ;;  %v9568_v63 = vor.u32 %v10975_v15, %v9567_v14 }
 0x370   :  { %6645 = vmatmul.bf16.vlgmr.msrb.gmra.mxu0 %v11614_v54  ;;  %v10140_v52 = vor.u32 %v11114_v42, %v10137_v28  ;;  %v10105_v58 = vld [vmem:[#allocation11 + $0xe70] sm:$0xf0]  ;;  %v10839_v47 = vld [vmem:[#allocation11 + $0x5f4] sm:$0xf0] }
 0x371   :  { %6693 = vmatpush.bf16.msra.mxu0 %v9536_v51  ;;  %6612 = vmatpush.bf16.msra.mxu2 %v9948_v18  ;;  %v10991_v51 = vld [vmem:[#allocation11 + $0xab4] sm:$0xf0]  ;;  %v11034_v29 = vld [vmem:[#allocation11 + $0xc14] sm:$0xf]  ;;  %v10108_v53 = vor.u32 %v11106_v48, %v10105_v58  ;;  %v10707_v18 = vld [vmem:[#allocation11 + $0x1dc] sm:$0xf] }
 0x372   :  { %6659 = vmatmul.bf16.vlgmr.msrb.gmra.mxu1 %v11616_v11  ;;  %6626 = vmatpush.bf16.msra.mxu3 %v10204_v19  ;;  %v9632_v27 = vor.u32 %v10991_v51, %v9631_v43  ;;  %v9817_v38 = vld [vmem:[#allocation11 + $0xc30] sm:$0xf0]  ;;  %v9279_v55 = vld [vmem:[#allocation11 + $0x7d8] sm:$0xf]  ;;  %v8481_v43 = vld [vmem:[#allocation11 + $0x1b8] sm:$0xf0] }
 0x373   :  { %6707 = vmatpush.bf16.msra.mxu1 %v9792_v45  ;;  %v6310_v45 = vpop.f32.mrf.mxu0  ;;  %v11098_v2 = vld [vmem:[#allocation11 + $0xe14] sm:$0xf]  ;;  %v10903_v16 = vld [vmem:[#allocation11 + $0x7f4] sm:$0xf0]  ;;  %v9820_v20 = vor.u32 %v11034_v29, %v9817_v38  ;;  %v10763_v51 = vld [vmem:[#allocation11 + $0x39c] sm:$0xf]  ;;  %v8484_v48 = vor.u32 %v10699_v44, %v8481_v43 }
 0x374   :  { %v10073_v50 = vld [vmem:[#allocation11 + $0xe30] sm:$0xf0]  ;;  %v6311_v19 = vadd.f32 %v6310_v45, %v3352_v10  ;;  %v8991_v40 = vld [vmem:[#allocation11 + $0x598] sm:$0xf]  ;;  %v8737_v45 = vld [vmem:[#allocation11 + $0x3b8] sm:$0xf0] }
 0x375   :  { %6694 = vmatpush.bf16.msra.mxu0 %v9504_v8  ;;  %6613 = vmatpush.bf16.msra.mxu2 %v9916_v35  ;;  %v9599_v8 = vld [vmem:[#allocation11 + $0xa58] sm:$0xf]  ;;  %v10076_v23 = vor.u32 %v11098_v2, %v10073_v50  ;;  %v9024_v35 = vor.u32 %v10839_v47, %v9023_v17  ;;  %v8740_v58 = vor.u32 %v10763_v51, %v8737_v45  ;;  %v8449_v29 = vld [vmem:[#allocation11 + $0x178] sm:$0xf0] }
 0x376   :  { %6627 = vmatpush.bf16.msra.mxu3 %v10172_v36  ;;  %v9280_v36 = vor.u32 %v10903_v16, %v9279_v55  ;;  %v10831_v3 = vld [vmem:[#allocation11 + $0x5b4] sm:$0xf0]  ;;  %v6325_v49 = vadd.f32 %v6324_v4, %v6311_v19  ;;  %v10683_v47 = vld [vmem:[#allocation11 + $0x11c] sm:$0xf] }
 0x377   :  { %6708 = vmatpush.bf16.msra.mxu1 %v9760_v22  ;;  %v10983_v22 = vld [vmem:[#allocation11 + $0xa74] sm:$0xf0]  ;;  %v8417_v16 = vld [vmem:[#allocation11 + $0x138] sm:$0xf0] }
 0x378   :  { %v9600_v37 = vor.u32 %v10983_v22, %v9599_v8  ;;  %v9247_v42 = vld [vmem:[#allocation11 + $0x798] sm:$0xf]  ;;  %v10691_v8 = vld [vmem:[#allocation11 + $0x15c] sm:$0xf] }
 0x379   :  { %6695 = vmatpush.bf16.msra.mxu0 %v9472_v6  ;;  %6614 = vmatpush.bf16.msra.mxu2 %v9884_v1  ;;  %v9311_v6 = vld [vmem:[#allocation11 + $0x818] sm:$0xf]  ;;  %v6339_v1 = vadd.f32 %v6338_v34, %v6325_v49  ;;  %v8673_v19 = vld [vmem:[#allocation11 + $0x338] sm:$0xf0] }
 0x37a   :  { %6628 = vmatpush.bf16.msra.mxu3 %v10140_v52  ;;  %v10895_v28 = vld [vmem:[#allocation11 + $0x7b4] sm:$0xf0]  ;;  %v8992_v52 = vor.u32 %v10831_v3, %v8991_v40  ;;  %v8385_v40 = vld [vmem:[#allocation11 + $0xf8] sm:$0xf0] }
 0x37b   :  { %6709 = vmatpush.bf16.msra.mxu1 %v9728_v12  ;;  %v10911_v12 = vld [vmem:[#allocation11 + $0x834] sm:$0xf0]  ;;  %v6312_v5 = vpop.f32.mrf.mxu0  ;;  %v9248_v33 = vor.u32 %v10895_v28, %v9247_v42  ;;  %v6353_v2 = vadd.f32 %v6352_v30, %v6339_v1  ;;  %v10739_v3 = vld [vmem:[#allocation11 + $0x2dc] sm:$0xf] }
 0x37c   :  { %v9312_v60 = vor.u32 %v10911_v12, %v9311_v6  ;;  %v8959_v39 = vld [vmem:[#allocation11 + $0x558] sm:$0xf]  ;;  %v6313_v22 = vadd.f32 %v6312_v5, %v3352_v10  ;;  %v6340_v10 = vpop.f32.mrf.mxu2  ;;  %v6354_v6 = vpop.f32.mrf.mxu3  ;;  %v8452_v12 = vor.u32 %v10691_v8, %v8449_v29 }
 0x37d   :  { %6696 = vmatpush.bf16.msra.mxu0 %v9440_v26  ;;  %6615 = vmatpush.bf16.msra.mxu2 %v9852_v46  ;;  %v8513_v26 = vld [vmem:[#allocation11 + $0x1f8] sm:$0xf0]  ;;  %v9215_v7 = vld [vmem:[#allocation11 + $0x758] sm:$0xf] }
 0x37e   :  { %6629 = vmatpush.bf16.msra.mxu3 %v10108_v53  ;;  %v10887_v9 = vld [vmem:[#allocation11 + $0x774] sm:$0xf0]  ;;  %v10755_v46 = vld [vmem:[#allocation11 + $0x35c] sm:$0xf] }
 0x37f   :  { %6710 = vmatpush.bf16.msra.mxu1 %v9696_v24  ;;  %v10771_v24 = vld [vmem:[#allocation11 + $0x3dc] sm:$0xf]  ;;  %v9216_v4 = vor.u32 %v10887_v9, %v9215_v7  ;;  %v9183_v15 = vld [vmem:[#allocation11 + $0x718] sm:$0xf] }
 0x380   :  { %v8705_v53 = vld [vmem:[#allocation11 + $0x378] sm:$0xf0]  ;;  %v10879_v17 = vld [vmem:[#allocation11 + $0x734] sm:$0xf0] }
 0x381   :  { %6697 = vmatpush.bf16.msra.mxu0 %v9408_v57  ;;  %v8516_v57 = vor.u32 %v10707_v18, %v8513_v26  ;;  %6616 = vmatpush.bf16.msra.mxu2 %v9820_v20  ;;  %v8708_v14 = vor.u32 %v10755_v46, %v8705_v53  ;;  %v10747_v18 = vld [vmem:[#allocation11 + $0x31c] sm:$0xf]  ;;  %v10807_v34 = vld [vmem:[#allocation11 + $0x4f4] sm:$0xf0] }
 0x382   :  { %6630 = vmatpush.bf16.msra.mxu3 %v10076_v23  ;;  %v9151_v5 = vld [vmem:[#allocation11 + $0x6d8] sm:$0xf]  ;;  %v8609_v7 = vld [vmem:[#allocation11 + $0x2b8] sm:$0xf0] }
 0x383   :  { %6711 = vmatpush.bf16.msra.mxu1 %v9664_v59  ;;  %v8772_v59 = vor.u32 %v10771_v24, %v8769_v31  ;;  %v6366_v38 = vpop.f32.mrf.mxu0  ;;  %v9184_v24 = vor.u32 %v10879_v17, %v9183_v15  ;;  %v8895_v31 = vld [vmem:[#allocation11 + $0x4d8] sm:$0xf] }
 0x384   :  { %6617 = vmatmul.bf16.vlgmr.msra.gmra.mxu2 %v11677_v0  ;;  %v6367_v23 = vadd.f32 %v6366_v38, %v6353_v2  ;;  %v8863_v49 = vld [vmem:[#allocation11 + $0x498] sm:$0xf] }
 0x385   :  { %6698 = vmatpush.bf16.msra.mxu0 %v9376_v62  ;;  %6665 = vmatpush.bf16.msrb.mxu2 %v9024_v35  ;;  %v10823_v62 = vld [vmem:[#allocation11 + $0x574] sm:$0xf0] }
 0x386   :  { %6679 = vmatpush.bf16.msrb.mxu3 %v9280_v36  ;;  %v8960_v50 = vor.u32 %v10823_v62, %v8959_v39  ;;  %v10871_v35 = vld [vmem:[#allocation11 + $0x6f4] sm:$0xf0]  ;;  %v10675_v36 = vld [vmem:[#allocation11 + $0xdc] sm:$0xf] }
 0x387   :  { %6712 = vmatpush.bf16.msra.mxu1 %v9632_v27  ;;  %v6326_v27 = vpop.f32.mrf.mxu1  ;;  %6631 = vmatmul.bf16.vlgmr.msra.gmra.mxu3 %v11679_v21  ;;  %v9152_v28 = vor.u32 %v10871_v35, %v9151_v5  ;;  %v10799_v43 = vld [vmem:[#allocation11 + $0x4b4] sm:$0xf0]  ;;  %v8388_v51 = vor.u32 %v10675_v36, %v8385_v40  ;;  %v6394_v1 = vpop.f32.mrf.mxu2  ;;  %v10667_v62 = vld [vmem:[#allocation11 + $0x9c] sm:$0xf] }
 0x388   :  { %v6327_v55 = vadd.f32 %v6326_v27, %v6313_v22  ;;  %v10863_v39 = vld [vmem:[#allocation11 + $0x6b4] sm:$0xf0]  ;;  %v8864_v8 = vor.u32 %v10799_v43, %v8863_v49  ;;  %v11027_v49 = vld [vmem:[#allocation11 + $0xbdc] sm:$0xf] }
 0x389   :  { %6699 = vmatpush.bf16.msra.mxu0 %v9344_v13  ;;  %6666 = vmatpush.bf16.msrb.mxu2 %v8992_v52  ;;  %v8927_v13 = vld [vmem:[#allocation11 + $0x518] sm:$0xf]  ;;  %v9793_v43 = vld [vmem:[#allocation11 + $0xbf8] sm:$0xf0] }
 0x38a   :  { %6680 = vmatpush.bf16.msrb.mxu3 %v9248_v33  ;;  %v6341_v26 = vadd.f32 %v6340_v10, %v6327_v55  ;;  %v6408_v52 = vpop.f32.mrf.mxu3  ;;  %v9119_v33 = vld [vmem:[#allocation11 + $0x698] sm:$0xf]  ;;  %v8321_v10 = vld [vmem:[#allocation11 + $0x78] sm:$0xf0] }
 0x38b   :  { %6713 = vmatpush.bf16.msra.mxu1 %v9600_v37  ;;  %v10815_v37 = vld [vmem:[#allocation11 + $0x534] sm:$0xf0]  ;;  %v6368_v9 = vpop.f32.mrf.mxu0  ;;  %v9120_v46 = vor.u32 %v10863_v39, %v9119_v33 }
 0x38c   :  { %v8928_v20 = vor.u32 %v10815_v37, %v8927_v13  ;;  %v6355_v42 = vadd.f32 %v6354_v6, %v6341_v26  ;;  %v8831_v53 = vld [vmem:[#allocation11 + $0x458] sm:$0xf]  ;;  %v10659_v37 = vld [vmem:[#allocation11 + $0x5c] sm:$0xf] }
 0x38d   :  { %6700 = vmatpush.bf16.msra.mxu0 %v9312_v60  ;;  %6667 = vmatpush.bf16.msrb.mxu2 %v8960_v50  ;;  %v8420_v60 = vor.u32 %v10683_v47, %v8417_v16  ;;  %v10791_v38 = vld [vmem:[#allocation11 + $0x474] sm:$0xf0]  ;;  %v10723_v6 = vld [vmem:[#allocation11 + $0x25c] sm:$0xf] }
 0x38e   :  { %6681 = vmatpush.bf16.msrb.mxu3 %v9216_v4  ;;  %v6369_v22 = vadd.f32 %v6368_v9, %v6355_v42  ;;  %v9087_v4 = vld [vmem:[#allocation11 + $0x658] sm:$0xf]  ;;  %v8832_v17 = vor.u32 %v10791_v38, %v8831_v53  ;;  %v9505_v9 = vld [vmem:[#allocation11 + $0x9b8] sm:$0xf0] }
 0x38f   :  { %6714 = vmatpush.bf16.msra.mxu1 %v9568_v63  ;;  %v6380_v30 = vpop.f32.mrf.mxu1  ;;  %v8676_v63 = vor.u32 %v10747_v18, %v8673_v19  ;;  %v10855_v13 = vld [vmem:[#allocation11 + $0x674] sm:$0xf0]  ;;  %v6396_v26 = vpop.f32.mrf.mxu2 }
 0x390   :  { %6701 = vmatmul.bf16.vlgmr.msra.gmra.mxu0 %v11640_v41  ;;  %v6381_v44 = vadd.f32 %v6380_v30, %v6367_v23  ;;  %v8799_v15 = vld [vmem:[#allocation11 + $0x418] sm:$0xf]  ;;  %v9088_v47 = vor.u32 %v10855_v13, %v9087_v4 }
 0x391   :  { %6749 = vmatpush.bf16.msrb.mxu0 %v8516_v57  ;;  %v8641_v57 = vld [vmem:[#allocation11 + $0x2f8] sm:$0xf0]  ;;  %6668 = vmatpush.bf16.msrb.mxu2 %v8928_v20  ;;  %v10783_v16 = vld [vmem:[#allocation11 + $0x434] sm:$0xf0]  ;;  %v8324_v20 = vor.u32 %v10659_v37, %v8321_v10 }
 0x392   :  { %6715 = vmatmul.bf16.vlgmr.msra.gmra.mxu1 %v11642_v32  ;;  %6682 = vmatpush.bf16.msrb.mxu3 %v9184_v24  ;;  %v8644_v45 = vor.u32 %v10739_v3, %v8641_v57  ;;  %v6395_v27 = vadd.f32 %v6394_v1, %v6381_v44  ;;  %v9055_v18 = vld [vmem:[#allocation11 + $0x618] sm:$0xf]  ;;  %v10651_v24 = vld [vmem:[#allocation11 + $0x1c] sm:$0xf]  ;;  %v6410_v35 = vpop.f32.mrf.mxu3  ;;  %v8800_v42 = vor.u32 %v10783_v16, %v8799_v15 }
 0x393   :  { %6763 = vmatpush.bf16.msrb.mxu1 %v8772_v59  ;;  %v8896_v59 = vor.u32 %v10807_v34, %v8895_v31  ;;  %v10847_v19 = vld [vmem:[#allocation11 + $0x634] sm:$0xf0]  ;;  %v8289_v31 = vld [vmem:[#allocation11 + $0x38] sm:$0xf0] }
 0x394   :  { %v6409_v29 = vadd.f32 %v6408_v52, %v6395_v27  ;;  %v10715_v34 = vld [vmem:[#allocation11 + $0x21c] sm:$0xf]  ;;  %v11095_v5 = vld [vmem:[#allocation11 + $0xdf4] sm:$0xf0]  ;;  %v9796_v27 = vor.u32 %v11027_v49, %v9793_v43 }
 0x395   :  { %6750 = vmatpush.bf16.msrb.mxu0 %v8484_v48  ;;  %v8353_v48 = vld [vmem:[#allocation11 + $0xb8] sm:$0xf0]  ;;  %6669 = vmatpush.bf16.msrb.mxu2 %v8896_v59  ;;  %v10303_v36 = vld [vmem:[#allocation11 + $0xfd8] sm:$0xf] }
 0x396   :  { %6683 = vmatpush.bf16.msrb.mxu3 %v9152_v28  ;;  %v8356_v2 = vor.u32 %v10667_v62, %v8353_v48  ;;  %11183 = vtanh.f32 %v6409_v29  ;;  %v11159_v40 = vld [vmem:[#allocation11 + $0xff4] sm:$0xf0]  ;;  %v10963_v3 = vld [vmem:[#allocation11 + $0x9dc] sm:$0xf]  ;;  %v9056_v28 = vor.u32 %v10847_v19, %v9055_v18 }
 0x397   :  { %6764 = vmatpush.bf16.msrb.mxu1 %v8740_v58  ;;  %v10731_v58 = vld [vmem:[#allocation11 + $0x29c] sm:$0xf]  ;;  %v10304_v52 = vor.u32 %v11159_v40, %v10303_v36  ;;  %v10015_v33 = vld [vmem:[#allocation11 + $0xd98] sm:$0xf] }
 0x398   :  { %v8612_v50 = vor.u32 %v10731_v58, %v8609_v7  ;;  %v9537_v44 = vld [vmem:[#allocation11 + $0x9f8] sm:$0xf0]  ;;  %v11087_v39 = vld [vmem:[#allocation11 + $0xdb4] sm:$0xf0] }
 0x399   :  { %6751 = vmatpush.bf16.msrb.mxu0 %v8452_v12  ;;  %v8577_v12 = vld [vmem:[#allocation11 + $0x278] sm:$0xf0]  ;;  %6670 = vmatpush.bf16.msrb.mxu2 %v8864_v8  ;;  %v9540_v62 = vor.u32 %v10963_v3, %v9537_v44  ;;  %v10271_v48 = vld [vmem:[#allocation11 + $0xf98] sm:$0xf]  ;;  %v10016_v29 = vor.u32 %v11087_v39, %v10015_v33 }
 0x39a   :  { %6684 = vmatpush.bf16.msrb.mxu3 %v9120_v46  ;;  %v8580_v23 = vor.u32 %v10723_v6, %v8577_v12  ;;  %v11151_v58 = vld [vmem:[#allocation11 + $0xfb4] sm:$0xf0]  ;;  %v10955_v7 = vld [vmem:[#allocation11 + $0x99c] sm:$0xf] }
 0x39b   :  { %6765 = vmatpush.bf16.msrb.mxu1 %v8708_v14  ;;  %v6382_v14 = vpop.f32.mrf.mxu1  ;;  %v11019_v8 = vld [vmem:[#allocation11 + $0xb9c] sm:$0xf]  ;;  %v10272_v46 = vor.u32 %v11151_v58, %v10271_v48  ;;  %v9983_v53 = vld [vmem:[#allocation11 + $0xd58] sm:$0xf] }
 0x39c   :  { %v6383_v55 = vadd.f32 %v6382_v14, %v6369_v22  ;;  %v11184_v57 = vpop.eup %11183  ;;  %v9761_v22 = vld [vmem:[#allocation11 + $0xbb8] sm:$0xf0]  ;;  %v11079_v38 = vld [vmem:[#allocation11 + $0xd74] sm:$0xf0] }
 0x39d   :  { %6752 = vmatpush.bf16.msrb.mxu0 %v8420_v60  ;;  %v8545_v60 = vld [vmem:[#allocation11 + $0x238] sm:$0xf0]  ;;  %6671 = vmatpush.bf16.msrb.mxu2 %v8832_v17  ;;  %6880 = vst [vmem:[%s11826_s9 + $0x18] sm:$0xff] %v11184_v57  ;;  %v10239_v4 = vld [vmem:[#allocation11 + $0xf58] sm:$0xf]  ;;  %v9984_v15 = vor.u32 %v11079_v38, %v9983_v53 }
 0x39e   :  { %v6397_v30 = vadd.f32 %v6396_v26, %v6383_v55  ;;  %6685 = vmatpush.bf16.msrb.mxu3 %v9088_v47  ;;  %v11143_v13 = vld [vmem:[#allocation11 + $0xf74] sm:$0xf0]  ;;  %v10947_v37 = vld [vmem:[#allocation11 + $0x95c] sm:$0xf] }
 0x39f   :  { %6766 = vmatpush.bf16.msrb.mxu1 %v8676_v63  ;;  %v10047_v63 = vld [vmem:[#allocation11 + $0xdd8] sm:$0xf]  ;;  %v9473_v6 = vld [vmem:[#allocation11 + $0x978] sm:$0xf0]  ;;  %v10240_v17 = vor.u32 %v11143_v13, %v10239_v4 }
 0x3a0   :  { %v6411_v59 = vadd.f32 %v6410_v35, %v6397_v30  ;;  %v10048_v1 = vor.u32 %v11095_v5, %v10047_v63  ;;  %v11011_v12 = vld [vmem:[#allocation11 + $0xb5c] sm:$0xf]  ;;  %v9951_v47 = vld [vmem:[#allocation11 + $0xd18] sm:$0xf]  ;;  %v9476_v16 = vor.u32 %v10947_v37, %v9473_v6 }
 0x3a1   :  { %6753 = vmatpush.bf16.msrb.mxu0 %v8388_v51  ;;  %v8292_v51 = vor.u32 %v10651_v24, %v8289_v31  ;;  %6672 = vmatpush.bf16.msrb.mxu2 %v8800_v42  ;;  %v9729_v14 = vld [vmem:[#allocation11 + $0xb78] sm:$0xf0]  ;;  %v11071_v55 = vld [vmem:[#allocation11 + $0xd34] sm:$0xf0] }
 0x3a2   :  { %11185 = vtanh.f32 %v6411_v59  ;;  %6686 = vmatpush.bf16.msrb.mxu3 %v9056_v28  ;;  %v9732_v18 = vor.u32 %v11011_v12, %v9729_v14  ;;  %v10207_v19 = vld [vmem:[#allocation11 + $0xf18] sm:$0xf]  ;;  %v9441_v26 = vld [vmem:[#allocation11 + $0x938] sm:$0xf0] }
 0x3a3   :  { %6767 = vmatpush.bf16.msrb.mxu1 %v8644_v45  ;;  %v8548_v45 = vor.u32 %v10715_v34, %v8545_v60  ;;  %v11003_v24 = vld [vmem:[#allocation11 + $0xb1c] sm:$0xf]  ;;  %v9919_v34 = vld [vmem:[#allocation11 + $0xcd8] sm:$0xf]  ;;  %v6436_v12 = vpop.f32.mrf.mxu1 }
 0x3a4   :  { %6673 = vmatmul.bf16.vlgmr.msrb.gmra.mxu2 %v11621_v56  ;;  %v9697_v31 = vld [vmem:[#allocation11 + $0xb38] sm:$0xf0]  ;;  %v11063_v30 = vld [vmem:[#allocation11 + $0xcf4] sm:$0xf0] }
 0x3a5   :  { %6754 = vmatpush.bf16.msrb.mxu0 %v8356_v2  ;;  %6721 = vmatpush.bf16.msra.mxu2 %v10048_v1  ;;  %v9508_v2 = vor.u32 %v10955_v7, %v9505_v9  ;;  %v9700_v63 = vor.u32 %v11003_v24, %v9697_v31  ;;  %v10175_v5 = vld [vmem:[#allocation11 + $0xed8] sm:$0xf]  ;;  %v10931_v36 = vld [vmem:[#allocation11 + $0x8dc] sm:$0xf]  ;;  %v9920_v59 = vor.u32 %v11063_v30, %v9919_v34 }
 0x3a6   :  { %6735 = vmatpush.bf16.msra.mxu3 %v10304_v52  ;;  %v11127_v35 = vld [vmem:[#allocation11 + $0xef4] sm:$0xf0]  ;;  %v9409_v40 = vld [vmem:[#allocation11 + $0x8f8] sm:$0xf0] }
 0x3a7   :  { %6768 = vmatpush.bf16.msrb.mxu1 %v8612_v50  ;;  %v9764_v50 = vor.u32 %v11019_v8, %v9761_v22  ;;  %6687 = vmatmul.bf16.vlgmr.msrb.gmra.mxu3 %v11623_v61  ;;  %v10995_v3 = vld [vmem:[#allocation11 + $0xadc] sm:$0xf]  ;;  %v10176_v42 = vor.u32 %v11127_v35, %v10175_v5  ;;  %v9887_v28 = vld [vmem:[#allocation11 + $0xc98] sm:$0xf]  ;;  %v9412_v49 = vor.u32 %v10931_v36, %v9409_v40 }
 0x3a8   :  { %v11186_v10 = vpop.eup %11185  ;;  %v9665_v57 = vld [vmem:[#allocation11 + $0xaf8] sm:$0xf0]  ;;  %v11055_v44 = vld [vmem:[#allocation11 + $0xcb4] sm:$0xf0] }
 0x3a9   :  { %6755 = vmatpush.bf16.msrb.mxu0 %v8324_v20  ;;  %6888 = vst [vmem:[%s11826_s9 + $0x58] sm:$0xff] %v11186_v10  ;;  %6722 = vmatpush.bf16.msra.mxu2 %v10016_v29  ;;  %v11135_v20 = vld [vmem:[#allocation11 + $0xf34] sm:$0xf0]  ;;  %v9668_v43 = vor.u32 %v10995_v3, %v9665_v57  ;;  %v10923_v1 = vld [vmem:[#allocation11 + $0x89c] sm:$0xf] }
 0x3aa   :  { %6736 = vmatpush.bf16.msra.mxu3 %v10272_v46  ;;  %v9377_v52 = vld [vmem:[#allocation11 + $0x8b8] sm:$0xf0]  ;;  %v9855_v58 = vld [vmem:[#allocation11 + $0xc58] sm:$0xf]  ;;  %v6464_v34 = vpop.f32.mrf.mxu3 }
 0x3ab   :  { %6769 = vmatpush.bf16.msrb.mxu1 %v8580_v23  ;;  %v10939_v23 = vld [vmem:[#allocation11 + $0x91c] sm:$0xf]  ;;  %v11047_v7 = vld [vmem:[#allocation11 + $0xc74] sm:$0xf0]  ;;  %v9380_v9 = vor.u32 %v10923_v1, %v9377_v52 }
 0x3ac   :  { %v9444_v60 = vor.u32 %v10939_v23, %v9441_v26  ;;  %v10987_v33 = vld [vmem:[#allocation11 + $0xa9c] sm:$0xf]  ;;  %v10111_v22 = vld [vmem:[#allocation11 + $0xe58] sm:$0xf]  ;;  %v9856_v4 = vor.u32 %v11047_v7, %v9855_v58 }
 0x3ad   :  { %6756 = vmatpush.bf16.msrb.mxu0 %v8292_v51  ;;  %6723 = vmatpush.bf16.msra.mxu2 %v9984_v15  ;;  %v10143_v51 = vld [vmem:[#allocation11 + $0xe98] sm:$0xf]  ;;  %v9633_v39 = vld [vmem:[#allocation11 + $0xab8] sm:$0xf0] }
 0x3ae   :  { %6737 = vmatpush.bf16.msra.mxu3 %v10240_v17  ;;  %v9636_v8 = vor.u32 %v10987_v33, %v9633_v39  ;;  %v11111_v29 = vld [vmem:[#allocation11 + $0xe74] sm:$0xf0]  ;;  %v10915_v46 = vld [vmem:[#allocation11 + $0x85c] sm:$0xf] }
 0x3af   :  { %6770 = vmatpush.bf16.msrb.mxu1 %v8548_v45  ;;  %v11119_v45 = vld [vmem:[#allocation11 + $0xeb4] sm:$0xf0]  ;;  %v9345_v53 = vld [vmem:[#allocation11 + $0x878] sm:$0xf0]  ;;  %v10112_v13 = vor.u32 %v11111_v29, %v10111_v22 }
 0x3b0   :  { %6757 = vmatmul.bf16.vlgmr.msrb.gmra.mxu0 %v11614_v54  ;;  %v9952_v54 = vor.u32 %v11071_v55, %v9951_v47  ;;  %v10144_v48 = vor.u32 %v11119_v45, %v10143_v51  ;;  %v10979_v38 = vld [vmem:[#allocation11 + $0xa5c] sm:$0xf]  ;;  %v9823_v37 = vld [vmem:[#allocation11 + $0xc18] sm:$0xf]  ;;  %v9348_v14 = vor.u32 %v10915_v46, %v9345_v53 }
 0x3b1   :  { %6805 = vmatpush.bf16.msra.mxu0 %v9540_v62  ;;  %v6422_v62 = vpop.f32.mrf.mxu0  ;;  %v11039_v10 = vld [vmem:[#allocation11 + $0xc34] sm:$0xf0]  ;;  %v10907_v47 = vld [vmem:[#allocation11 + $0x81c] sm:$0xf] }
 0x3b2   :  { %6771 = vmatmul.bf16.vlgmr.msrb.gmra.mxu1 %v11616_v11  ;;  %v10208_v11 = vor.u32 %v11135_v20, %v10207_v19  ;;  %6724 = vmatpush.bf16.msra.mxu2 %v9952_v54  ;;  %v10079_v6 = vld [vmem:[#allocation11 + $0xe18] sm:$0xf]  ;;  %v9313_v55 = vld [vmem:[#allocation11 + $0x838] sm:$0xf0]  ;;  %v9824_v31 = vor.u32 %v11039_v10, %v9823_v37 }
 0x3b3   :  { %6819 = vmatpush.bf16.msra.mxu1 %v9796_v27  ;;  %v9888_v27 = vor.u32 %v11055_v44, %v9887_v28  ;;  %v11103_v17 = vld [vmem:[#allocation11 + $0xe34] sm:$0xf0]  ;;  %v10835_v19 = vld [vmem:[#allocation11 + $0x5dc] sm:$0xf]  ;;  %v9316_v30 = vor.u32 %v10907_v47, %v9313_v55 }
 0x3b4   :  { %6738 = vmatpush.bf16.msra.mxu3 %v10208_v11  ;;  %v9025_v20 = vld [vmem:[#allocation11 + $0x5f8] sm:$0xf0]  ;;  %v10080_v54 = vor.u32 %v11103_v17, %v10079_v6  ;;  %v6450_v11 = vpop.f32.mrf.mxu2 }
 0x3b5   :  { %6806 = vmatpush.bf16.msra.mxu0 %v9508_v2  ;;  %v9601_v2 = vld [vmem:[#allocation11 + $0xa78] sm:$0xf0]  ;;  %v9028_v5 = vor.u32 %v10835_v19, %v9025_v20 }
 0x3b6   :  { %6725 = vmatpush.bf16.msra.mxu2 %v9920_v59  ;;  %v9604_v15 = vor.u32 %v10979_v38, %v9601_v2  ;;  %v10899_v23 = vld [vmem:[#allocation11 + $0x7dc] sm:$0xf] }
 0x3b7   :  { %6820 = vmatpush.bf16.msra.mxu1 %v9764_v50  ;;  %v3353_v50 = vperm.slane %v11762_v25, 4  ;;  %v9281_v26 = vld [vmem:[#allocation11 + $0x7f8] sm:$0xf0] }
 0x3b8   :  { %6739 = vmatpush.bf16.msra.mxu3 %v10176_v42  ;;  %v9284_v35 = vor.u32 %v10899_v23, %v9281_v26  ;;  %v10827_v36 = vld [vmem:[#allocation11 + $0x59c] sm:$0xf] }
 0x3b9   :  { %6807 = vmatpush.bf16.msra.mxu0 %v9476_v16  ;;  %v10971_v16 = vld [vmem:[#allocation11 + $0xa1c] sm:$0xf]  ;;  %v6423_v24 = vadd.f32 %v6422_v62, %v3353_v50 }
 0x3ba   :  { %6726 = vmatpush.bf16.msra.mxu2 %v9888_v27  ;;  %v8993_v40 = vld [vmem:[#allocation11 + $0x5b8] sm:$0xf0] }
 0x3bb   :  { %6821 = vmatpush.bf16.msra.mxu1 %v9732_v18  ;;  %v9569_v18 = vld [vmem:[#allocation11 + $0xa38] sm:$0xf0]  ;;  %v6437_v59 = vadd.f32 %v6436_v12, %v6423_v24  ;;  %v8996_v28 = vor.u32 %v10827_v36, %v8993_v40 }
 0x3bc   :  { %6740 = vmatpush.bf16.msra.mxu3 %v10144_v48  ;;  %v10891_v3 = vld [vmem:[#allocation11 + $0x79c] sm:$0xf]  ;;  %v6452_v7 = vpop.f32.mrf.mxu2 }
 0x3bd   :  { %6808 = vmatpush.bf16.msra.mxu0 %v9444_v60  ;;  %v9572_v60 = vor.u32 %v10971_v16, %v9569_v18  ;;  %v9249_v57 = vld [vmem:[#allocation11 + $0x7b8] sm:$0xf0]  ;;  %v6451_v42 = vadd.f32 %v6450_v11, %v6437_v59 }
 0x3be   :  { %6727 = vmatpush.bf16.msra.mxu2 %v9856_v4  ;;  %v9252_v44 = vor.u32 %v10891_v3, %v9249_v57  ;;  %v8961_v51 = vld [vmem:[#allocation11 + $0x578] sm:$0xf0] }
 0x3bf   :  { %6822 = vmatpush.bf16.msra.mxu1 %v9700_v63  ;;  %v6424_v63 = vpop.f32.mrf.mxu0  ;;  %v10883_v45 = vld [vmem:[#allocation11 + $0x75c] sm:$0xf]  ;;  %v6465_v39 = vadd.f32 %v6464_v34, %v6451_v42 }
 0x3c0   :  { %6741 = vmatpush.bf16.msra.mxu3 %v10112_v13  ;;  %v9217_v1 = vld [vmem:[#allocation11 + $0x778] sm:$0xf0]  ;;  %v6425_v52 = vadd.f32 %v6424_v63, %v3353_v50 }
 0x3c1   :  { %6809 = vmatpush.bf16.msra.mxu0 %v9412_v49  ;;  %v10819_v49 = vld [vmem:[#allocation11 + $0x55c] sm:$0xf]  ;;  %v9220_v27 = vor.u32 %v10883_v45, %v9217_v1 }
 0x3c2   :  { %6728 = vmatpush.bf16.msra.mxu2 %v9824_v31  ;;  %v8964_v62 = vor.u32 %v10819_v49, %v8961_v51  ;;  %v10811_v48 = vld [vmem:[#allocation11 + $0x51c] sm:$0xf] }
 0x3c3   :  { %6823 = vmatpush.bf16.msra.mxu1 %v9668_v43  ;;  %v6438_v43 = vpop.f32.mrf.mxu1  ;;  %v8929_v58 = vld [vmem:[#allocation11 + $0x538] sm:$0xf0] }
 0x3c4   :  { %6742 = vmatpush.bf16.msra.mxu3 %v10080_v54  ;;  %v9185_v22 = vld [vmem:[#allocation11 + $0x738] sm:$0xf0]  ;;  %v6439_v29 = vadd.f32 %v6438_v43, %v6425_v52  ;;  %v8932_v46 = vor.u32 %v10811_v48, %v8929_v58 }
 0x3c5   :  { %6810 = vmatpush.bf16.msra.mxu0 %v9380_v9  ;;  %6729 = vmatmul.bf16.vlgmr.msra.gmra.mxu2 %v11677_v0  ;;  %v6466_v9 = vpop.f32.mrf.mxu3  ;;  %v8897_v2 = vld [vmem:[#allocation11 + $0x4f8] sm:$0xf0] }
 0x3c6   :  { %6777 = vmatpush.bf16.msrb.mxu2 %v9028_v5  ;;  %v6453_v38 = vadd.f32 %v6452_v7, %v6439_v29  ;;  %v10867_v4 = vld [vmem:[#allocation11 + $0x6dc] sm:$0xf] }
 0x3c7   :  { %6824 = vmatpush.bf16.msra.mxu1 %v9636_v8  ;;  %6743 = vmatmul.bf16.vlgmr.msra.gmra.mxu3 %v11679_v21  ;;  %v6478_v33 = vpop.f32.mrf.mxu0  ;;  %v10875_v8 = vld [vmem:[#allocation11 + $0x71c] sm:$0xf]  ;;  %v6506_v17 = vpop.f32.mrf.mxu2 }
 0x3c8   :  { %6791 = vmatpush.bf16.msrb.mxu3 %v9284_v35  ;;  %v6479_v53 = vadd.f32 %v6478_v33, %v6465_v39  ;;  %v9153_v13 = vld [vmem:[#allocation11 + $0x6f8] sm:$0xf0]  ;;  %v6467_v10 = vadd.f32 %v6466_v9, %v6453_v38 }
 0x3c9   :  { %6811 = vmatpush.bf16.msra.mxu0 %v9348_v14  ;;  %v9156_v6 = vor.u32 %v10867_v4, %v9153_v13  ;;  %v10795_v14 = vld [vmem:[#allocation11 + $0x49c] sm:$0xf] }
 0x3ca   :  { %6778 = vmatpush.bf16.msrb.mxu2 %v8996_v28  ;;  %v10859_v55 = vld [vmem:[#allocation11 + $0x69c] sm:$0xf] }
 0x3cb   :  { %6825 = vmatpush.bf16.msra.mxu1 %v9604_v15  ;;  %v6492_v50 = vpop.f32.mrf.mxu1  ;;  %v8865_v15 = vld [vmem:[#allocation11 + $0x4b8] sm:$0xf0] }
 0x3cc   :  { %6792 = vmatpush.bf16.msrb.mxu3 %v9252_v44  ;;  %v6493_v12 = vadd.f32 %v6492_v50, %v6479_v53  ;;  %v9121_v16 = vld [vmem:[#allocation11 + $0x6b8] sm:$0xf0]  ;;  %v8868_v20 = vor.u32 %v10795_v14, %v8865_v15 }
 0x3cd   :  { %6812 = vmatpush.bf16.msra.mxu0 %v9316_v30  ;;  %v6520_v47 = vpop.f32.mrf.mxu3  ;;  %v9124_v24 = vor.u32 %v10859_v55, %v9121_v16  ;;  %v10787_v31 = vld [vmem:[#allocation11 + $0x45c] sm:$0xf] }
 0x3ce   :  { %6779 = vmatpush.bf16.msrb.mxu2 %v8964_v62  ;;  %v6507_v18 = vadd.f32 %v6506_v17, %v6493_v12  ;;  %v8833_v54 = vld [vmem:[#allocation11 + $0x478] sm:$0xf0] }
 0x3cf   :  { %6826 = vmatpush.bf16.msra.mxu1 %v9572_v60  ;;  %v6480_v19 = vpop.f32.mrf.mxu0  ;;  %v10851_v11 = vld [vmem:[#allocation11 + $0x65c] sm:$0xf]  ;;  %v8836_v60 = vor.u32 %v10787_v31, %v8833_v54  ;;  %v6508_v40 = vpop.f32.mrf.mxu2  ;;  %v3354_v31 = vperm.slane %v11762_v25, 5 }
 0x3d0   :  { %6813 = vmatmul.bf16.vlgmr.msra.gmra.mxu0 %v11640_v41  ;;  %6793 = vmatpush.bf16.msrb.mxu3 %v9220_v27  ;;  %v9188_v41 = vor.u32 %v10875_v8, %v9185_v22  ;;  %v6481_v23 = vadd.f32 %v6480_v19, %v6467_v10  ;;  %v6521_v26 = vadd.f32 %v6520_v47, %v6507_v18  ;;  %v9089_v34 = vld [vmem:[#allocation11 + $0x678] sm:$0xf0] }
 0x3d1   :  { %v9092_v63 = vor.u32 %v10851_v11, %v9089_v34  ;;  %v10779_v35 = vld [vmem:[#allocation11 + $0x41c] sm:$0xf] }
 0x3d2   :  { %6827 = vmatmul.bf16.vlgmr.msra.gmra.mxu1 %v11642_v32  ;;  %v10803_v32 = vld [vmem:[#allocation11 + $0x4dc] sm:$0xf]  ;;  %6780 = vmatpush.bf16.msrb.mxu2 %v8932_v46  ;;  %11187 = vtanh.f32 %v6521_v26 }
 0x3d3   :  { %v8900_v37 = vor.u32 %v10803_v32, %v8897_v2  ;;  %v6494_v30 = vpop.f32.mrf.mxu1  ;;  %v8801_v36 = vld [vmem:[#allocation11 + $0x438] sm:$0xf0] }
 0x3d4   :  { %6794 = vmatpush.bf16.msrb.mxu3 %v9188_v41  ;;  %v6495_v5 = vadd.f32 %v6494_v30, %v6481_v23  ;;  %v10843_v3 = vld [vmem:[#allocation11 + $0x61c] sm:$0xf]  ;;  %v8804_v1 = vor.u32 %v10779_v35, %v8801_v36 }
 0x3d5   :  { %v9057_v57 = vld [vmem:[#allocation11 + $0x638] sm:$0xf0]  ;;  %v6522_v43 = vpop.f32.mrf.mxu3 }
 0x3d6   :  { %6781 = vmatpush.bf16.msrb.mxu2 %v8900_v37  ;;  %v11091_v59 = vld [vmem:[#allocation11 + $0xddc] sm:$0xf]  ;;  %v6509_v42 = vadd.f32 %v6508_v40, %v6495_v5  ;;  %v9060_v52 = vor.u32 %v10843_v3, %v9057_v57 }
 0x3d7   :  { %v10049_v28 = vld [vmem:[#allocation11 + $0xdf8] sm:$0xf0] }
 0x3d8   :  { %6795 = vmatpush.bf16.msrb.mxu3 %v9156_v6  ;;  %v11155_v44 = vld [vmem:[#allocation11 + $0xfdc] sm:$0xf]  ;;  %v11188_v51 = vpop.eup %11187  ;;  %v6523_v45 = vadd.f32 %v6522_v43, %v6509_v42  ;;  %v10052_v33 = vor.u32 %v11091_v59, %v10049_v28 }
 0x3d9   :  { %v10305_v49 = vld [vmem:[#allocation11 + $0xff8] sm:$0xf0]  ;;  %6881 = vst [vmem:[%s11826_s9 + $0x20] sm:$0xff] %v11188_v51 }
 0x3da   :  { %6782 = vmatpush.bf16.msrb.mxu2 %v8868_v20  ;;  %v10308_v39 = vor.u32 %v11155_v44, %v10305_v49  ;;  %v11083_v62 = vld [vmem:[#allocation11 + $0xd9c] sm:$0xf]  ;;  %11189 = vtanh.f32 %v6523_v45  ;;  %v6534_v20 = vpop.f32.mrf.mxu0 }
 0x3db   :  { %v10017_v27 = vld [vmem:[#allocation11 + $0xdb8] sm:$0xf0]  ;;  %v6548_v5 = vpop.f32.mrf.mxu1  ;;  %v6535_v40 = vadd.f32 %v6534_v20, %v3354_v31 }
 0x3dc   :  { %6796 = vmatpush.bf16.msrb.mxu3 %v9124_v24  ;;  %v11147_v48 = vld [vmem:[#allocation11 + $0xf9c] sm:$0xf]  ;;  %v10020_v7 = vor.u32 %v11083_v62, %v10017_v27 }
 0x3dd   :  { %v10273_v58 = vld [vmem:[#allocation11 + $0xfb8] sm:$0xf0]  ;;  %v6549_v25 = vadd.f32 %v6548_v5, %v6535_v40 }
 0x3de   :  { %6783 = vmatpush.bf16.msrb.mxu2 %v8836_v60  ;;  %v10276_v9 = vor.u32 %v11147_v48, %v10273_v58  ;;  %v11075_v8 = vld [vmem:[#allocation11 + $0xd5c] sm:$0xf] }
 0x3df   :  { %v9985_v22 = vld [vmem:[#allocation11 + $0xd78] sm:$0xf0] }
 0x3e0   :  { %6797 = vmatpush.bf16.msrb.mxu3 %v9092_v63  ;;  %v11139_v29 = vld [vmem:[#allocation11 + $0xf5c] sm:$0xf]  ;;  %v11190_v53 = vpop.eup %11189  ;;  %v9988_v38 = vor.u32 %v11075_v8, %v9985_v22 }
 0x3e1   :  { %v10241_v46 = vld [vmem:[#allocation11 + $0xf78] sm:$0xf0]  ;;  %6889 = vst [vmem:[%s11826_s9 + $0x60] sm:$0xff] %v11190_v53 }
 0x3e2   :  { %6784 = vmatpush.bf16.msrb.mxu2 %v8804_v1  ;;  %v10244_v41 = vor.u32 %v11139_v29, %v10241_v46  ;;  %v11067_v32 = vld [vmem:[#allocation11 + $0xd1c] sm:$0xf]  ;;  %v6536_v59 = vpop.f32.mrf.mxu0 }
 0x3e3   :  { %v9953_v2 = vld [vmem:[#allocation11 + $0xd38] sm:$0xf0]  ;;  %v6550_v28 = vpop.f32.mrf.mxu1  ;;  %v6537_v44 = vadd.f32 %v6536_v59, %v3354_v31 }
 0x3e4   :  { %6798 = vmatpush.bf16.msrb.mxu3 %v9060_v52  ;;  %v11131_v50 = vld [vmem:[#allocation11 + $0xf1c] sm:$0xf]  ;;  %v9956_v13 = vor.u32 %v11067_v32, %v9953_v2 }
 0x3e5   :  { %6785 = vmatmul.bf16.vlgmr.msrb.gmra.mxu2 %v11621_v56  ;;  %v10209_v4 = vld [vmem:[#allocation11 + $0xf38] sm:$0xf0]  ;;  %v6551_v1 = vadd.f32 %v6550_v28, %v6537_v44 }
 0x3e6   :  { %6833 = vmatpush.bf16.msra.mxu2 %v10052_v33  ;;  %v10212_v37 = vor.u32 %v11131_v50, %v10209_v4  ;;  %v11059_v56 = vld [vmem:[#allocation11 + $0xcdc] sm:$0xf]  ;;  %v11205_v50 = vld [vmem:[#allocation13] sm:$0xff] }
 0x3e7   :  { %6799 = vmatmul.bf16.vlgmr.msrb.gmra.mxu3 %v11623_v61  ;;  %v9921_v10 = vld [vmem:[#allocation11 + $0xcf8] sm:$0xf0]  ;;  %v6562_v3 = vpop.f32.mrf.mxu2  ;;  %v3355_v4 = vperm.slane %v11205_v50, 6 }
 0x3e8   :  { %6847 = vmatpush.bf16.msra.mxu3 %v10308_v39  ;;  %v11123_v61 = vld [vmem:[#allocation11 + $0xedc] sm:$0xf]  ;;  %v9924_v12 = vor.u32 %v11059_v56, %v9921_v10  ;;  %v6563_v42 = vadd.f32 %v6562_v3, %v6549_v25 }
 0x3e9   :  { %v10177_v6 = vld [vmem:[#allocation11 + $0xef8] sm:$0xf0] }
 0x3ea   :  { %6834 = vmatpush.bf16.msra.mxu2 %v10020_v7  ;;  %v10180_v14 = vor.u32 %v11123_v61, %v10177_v6  ;;  %v11051_v15 = vld [vmem:[#allocation11 + $0xc9c] sm:$0xf]  ;;  %v6576_v57 = vpop.f32.mrf.mxu3  ;;  %v6590_v49 = vpop.f32.mrf.mxu0 }
 0x3eb   :  { %v9889_v17 = vld [vmem:[#allocation11 + $0xcb8] sm:$0xf0]  ;;  %v6577_v43 = vadd.f32 %v6576_v57, %v6563_v42  ;;  %v6604_v39 = vpop.f32.mrf.mxu1  ;;  %v3356_v42 = vperm.slane %v11205_v50, 7 }
 0x3ec   :  { %6848 = vmatpush.bf16.msra.mxu3 %v10276_v9  ;;  %v11115_v47 = vld [vmem:[#allocation11 + $0xe9c] sm:$0xf]  ;;  %v9892_v16 = vor.u32 %v11051_v15, %v9889_v17 }
 0x3ed   :  { %v10145_v55 = vld [vmem:[#allocation11 + $0xeb8] sm:$0xf0]  ;;  %v6591_v52 = vadd.f32 %v6590_v49, %v6577_v43 }
 0x3ee   :  { %6835 = vmatpush.bf16.msra.mxu2 %v9988_v38  ;;  %v10148_v18 = vor.u32 %v11115_v47, %v10145_v55  ;;  %v11043_v19 = vld [vmem:[#allocation11 + $0xc5c] sm:$0xf] }
 0x3ef   :  { %v9857_v23 = vld [vmem:[#allocation11 + $0xc78] sm:$0xf0]  ;;  %v6564_v51 = vpop.f32.mrf.mxu2  ;;  %v6605_v27 = vadd.f32 %v6604_v39, %v6591_v52 }
 0x3f0   :  { %6849 = vmatpush.bf16.msra.mxu3 %v10244_v41  ;;  %v11107_v26 = vld [vmem:[#allocation11 + $0xe5c] sm:$0xf]  ;;  %v9860_v54 = vor.u32 %v11043_v19, %v9857_v23  ;;  %v6565_v33 = vadd.f32 %v6564_v51, %v6551_v1 }
 0x3f1   :  { %v10113_v24 = vld [vmem:[#allocation11 + $0xe78] sm:$0xf0] }
 0x3f2   :  { %6836 = vmatpush.bf16.msra.mxu2 %v9956_v13  ;;  %v10116_v11 = vor.u32 %v11107_v26, %v10113_v24  ;;  %v11035_v34 = vld [vmem:[#allocation11 + $0xc1c] sm:$0xf]  ;;  %v6578_v45 = vpop.f32.mrf.mxu3  ;;  %v6592_v9 = vpop.f32.mrf.mxu0 }
 0x3f3   :  { %v9825_v30 = vld [vmem:[#allocation11 + $0xc38] sm:$0xf0]  ;;  %v6579_v62 = vadd.f32 %v6578_v45, %v6565_v33 }
 0x3f4   :  { %6850 = vmatpush.bf16.msra.mxu3 %v10212_v37  ;;  %v11099_v60 = vld [vmem:[#allocation11 + $0xe1c] sm:$0xf]  ;;  %v9828_v35 = vor.u32 %v11035_v34, %v9825_v30 }
 0x3f5   :  { %v10081_v63 = vld [vmem:[#allocation11 + $0xe38] sm:$0xf0]  ;;  %v6593_v8 = vadd.f32 %v6592_v9, %v6579_v62 }
 0x3f6   :  { %6837 = vmatpush.bf16.msra.mxu2 %v9924_v12  ;;  %v10084_v36 = vor.u32 %v11099_v60, %v10081_v63 }
 0x3f8   :  { %6851 = vmatpush.bf16.msra.mxu3 %v10180_v14 }
 0x3fa   :  { %6838 = vmatpush.bf16.msra.mxu2 %v9892_v16  ;;  %v6646_v2 = vpop.f32.mrf.mxu0 }
 0x3fb   :  { %v6647_v37 = vadd.f32 %v6646_v2, %v3355_v4 }
 0x3fc   :  { %6852 = vmatpush.bf16.msra.mxu3 %v10148_v18 }
 0x3fe   :  { %6839 = vmatpush.bf16.msra.mxu2 %v9860_v54 }
 0x400   :  { %6853 = vmatpush.bf16.msra.mxu3 %v10116_v11 }
 0x402   :  { %6840 = vmatpush.bf16.msra.mxu2 %v9828_v35  ;;  %v6648_v61 = vpop.f32.mrf.mxu0 }
 0x403   :  { %v6649_v15 = vadd.f32 %v6648_v61, %v3355_v4 }
 0x404   :  { %6854 = vmatpush.bf16.msra.mxu3 %v10084_v36 }
 0x405   :  { %6841 = vmatmul.bf16.vlgmr.msra.gmra.mxu2 %v11677_v0 }
 0x407   :  { %6855 = vmatmul.bf16.vlgmr.msra.gmra.mxu3 %v11679_v21  ;;  %v6618_v48 = vpop.f32.mrf.mxu2  ;;  %v6606_v21 = vpop.f32.mrf.mxu1 }
 0x408   :  { %v6619_v7 = vadd.f32 %v6618_v48, %v6605_v27  ;;  %v6607_v22 = vadd.f32 %v6606_v21, %v6593_v8 }
 0x40a   :  { %v6632_v58 = vpop.f32.mrf.mxu3 }
 0x40b   :  { %v6633_v0 = vadd.f32 %v6632_v58, %v6619_v7 }
 0x40d   :  { %11191 = vtanh.f32 %v6633_v0  ;;  %v6702_v17 = vpop.f32.mrf.mxu0 }
 0x40f   :  { %v6620_v29 = vpop.f32.mrf.mxu2  ;;  %v6660_v13 = vpop.f32.mrf.mxu1 }
 0x410   :  { %v6621_v46 = vadd.f32 %v6620_v29, %v6607_v22  ;;  %v6661_v6 = vadd.f32 %v6660_v13, %v6647_v37 }
 0x412   :  { %v6634_v53 = vpop.f32.mrf.mxu3 }
 0x413   :  { %v11192_v38 = vpop.eup %11191  ;;  %v6635_v41 = vadd.f32 %v6634_v53, %v6621_v46 }
 0x414   :  { %6882 = vst [vmem:[%s11826_s9 + $0x28] sm:$0xff] %v11192_v38 }
 0x415   :  { %11193 = vtanh.f32 %v6635_v41  ;;  %v6704_v34 = vpop.f32.mrf.mxu0 }
 0x417   :  { %v6662_v14 = vpop.f32.mrf.mxu1 }
 0x418   :  { %v6663_v18 = vadd.f32 %v6662_v14, %v6649_v15 }
 0x41b   :  { %v11194_v32 = vpop.eup %11193 }
 0x41c   :  { %6890 = vst [vmem:[%s11826_s9 + $0x68] sm:$0xff] %v11194_v32 }
 0x41f   :  { %v6716_v23 = vpop.f32.mrf.mxu1 }
 0x427   :  { %v6674_v56 = vpop.f32.mrf.mxu2  ;;  %v6718_v63 = vpop.f32.mrf.mxu1 }
 0x428   :  { %v6675_v12 = vadd.f32 %v6674_v56, %v6661_v6 }
 0x42a   :  { %v6688_v10 = vpop.f32.mrf.mxu3 }
 0x42b   :  { %v6689_v47 = vadd.f32 %v6688_v10, %v6675_v12 }
 0x42d   :  { %v6703_v19 = vadd.f32 %v6702_v17, %v6689_v47  ;;  %v6758_v25 = vpop.f32.mrf.mxu0 }
 0x42e   :  { %v6759_v44 = vadd.f32 %v6758_v25, %v3356_v42 }
 0x42f   :  { %v6676_v55 = vpop.f32.mrf.mxu2  ;;  %v6717_v24 = vadd.f32 %v6716_v23, %v6703_v19  ;;  %v6772_v28 = vpop.f32.mrf.mxu1 }
 0x430   :  { %v6677_v20 = vadd.f32 %v6676_v55, %v6663_v18  ;;  %v6773_v45 = vadd.f32 %v6772_v28, %v6759_v44 }
 0x432   :  { %v6690_v16 = vpop.f32.mrf.mxu3 }
 0x433   :  { %v6691_v26 = vadd.f32 %v6690_v16, %v6677_v20 }
 0x435   :  { %v6705_v30 = vadd.f32 %v6704_v34, %v6691_v26  ;;  %v6760_v51 = vpop.f32.mrf.mxu0 }
 0x436   :  { %v6761_v33 = vadd.f32 %v6760_v51, %v3356_v42 }
 0x437   :  { %v6719_v5 = vadd.f32 %v6718_v63, %v6705_v30  ;;  %v6774_v52 = vpop.f32.mrf.mxu1 }
 0x438   :  { %v6775_v58 = vadd.f32 %v6774_v52, %v6761_v33 }
 0x448   :  { %v6730_v31 = vpop.f32.mrf.mxu2 }
 0x449   :  { %v6731_v11 = vadd.f32 %v6730_v31, %v6717_v24 }
 0x44a   :  { %v6744_v54 = vpop.f32.mrf.mxu3 }
 0x44b   :  { %v6745_v60 = vadd.f32 %v6744_v54, %v6731_v11 }
 0x44d   :  { %11195 = vtanh.f32 %v6745_v60  ;;  %v6814_v39 = vpop.f32.mrf.mxu0 }
 0x44f   :  { %v6828_v8 = vpop.f32.mrf.mxu1 }
 0x450   :  { %v6732_v35 = vpop.f32.mrf.mxu2 }
 0x451   :  { %v6733_v36 = vadd.f32 %v6732_v35, %v6719_v5 }
 0x452   :  { %v6746_v40 = vpop.f32.mrf.mxu3 }
 0x453   :  { %v11196_v3 = vpop.eup %11195  ;;  %v6747_v57 = vadd.f32 %v6746_v40, %v6733_v36 }
 0x454   :  { %6883 = vst [vmem:[%s11826_s9 + $0x30] sm:$0xff] %v11196_v3 }
 0x455   :  { %11197 = vtanh.f32 %v6747_v57  ;;  %v6816_v53 = vpop.f32.mrf.mxu0 }
 0x457   :  { %v6830_v32 = vpop.f32.mrf.mxu1 }
 0x45b   :  { %v11198_v59 = vpop.eup %11197 }
 0x45c   :  { %6891 = vst [vmem:[%s11826_s9 + $0x70] sm:$0xff] %v11198_v59 }
 0x468   :  { %v6786_v49 = vpop.f32.mrf.mxu2 }
 0x469   :  { %v6787_v1 = vadd.f32 %v6786_v49, %v6773_v45 }
 0x46a   :  { %v6800_v43 = vpop.f32.mrf.mxu3 }
 0x46b   :  { %v6801_v62 = vadd.f32 %v6800_v43, %v6787_v1 }
 0x46d   :  { %v6815_v7 = vadd.f32 %v6814_v39, %v6801_v62 }
 0x46f   :  { %v6829_v21 = vadd.f32 %v6828_v8, %v6815_v7 }
 0x470   :  { %v6788_v27 = vpop.f32.mrf.mxu2 }
 0x471   :  { %v6789_v9 = vadd.f32 %v6788_v27, %v6775_v58 }
 0x472   :  { %v6802_v48 = vpop.f32.mrf.mxu3 }
 0x473   :  { %v6803_v0 = vadd.f32 %v6802_v48, %v6789_v9 }
 0x475   :  { %v6817_v38 = vadd.f32 %v6816_v53, %v6803_v0 }
 0x477   :  { %v6831_v2 = vadd.f32 %v6830_v32, %v6817_v38 }
 0x488   :  { %v6842_v22 = vpop.f32.mrf.mxu2 }
 0x489   :  { %v6843_v46 = vadd.f32 %v6842_v22, %v6829_v21 }
 0x48a   :  { %v6856_v29 = vpop.f32.mrf.mxu3 }
 0x48b   :  { %v6857_v41 = vadd.f32 %v6856_v29, %v6843_v46 }
 0x48d   :  { %11199 = vtanh.f32 %v6857_v41 }
 0x490   :  { %v6844_v50 = vpop.f32.mrf.mxu2 }
 0x491   :  { %v6845_v4 = vadd.f32 %v6844_v50, %v6831_v2 }
 0x492   :  { %v6858_v13 = vpop.f32.mrf.mxu3 }
 0x493   :  { %v11200_v37 = vpop.eup %11199  ;;  %v6859_v56 = vadd.f32 %v6858_v13, %v6845_v4 }
 0x494   :  { %6884 = vst [vmem:[%s11826_s9 + $0x38] sm:$0xff] %v11200_v37 }
 0x495   :  { %11201 = vtanh.f32 %v6859_v56 }
 0x49b   :  { %v11202_v10 = vpop.eup %11201 }
 0x49c   :  { %6892 = vst [vmem:[%s11826_s9 + $0x78] sm:$0xff] %v11202_v10 }
 0x49d   :  { %6897 = vsyncpa [#allocation4], 1 }
 0x49e   :  { %6898 = vsyncpa [#allocation6], 1 }
 0x49f   :  { %6899 = vsyncpa [#allocation9], 1 }
 0x4a0   :  { %6900 = vsyncpa [#allocation12], 1 }

</bundles_post_ra>
